<compile_context>
chip_gen: v7x
topology: tpu7x:2x2x1
jax: 0.10.0
libtpu: 0.0.40
codegen_flags: <defaults>
</compile_context>

<pallas_src>
import numpy as np
import jax
import jax.numpy as jnp
from jax import lax
from jax.experimental import pallas as pl
from jax.experimental.pallas import tpu as pltpu


# --------------------------------------------------------------------------
# Kernel: depthwise KxK conv (padding K//2, no bias) on one (H, W, CT) tile.
# --------------------------------------------------------------------------
def _make_smoothing_kernel(H, W, K, CT, RB):
    P = K // 2
    W2P = W + 2 * P
    n_rb = H // RB

    def kernel(x_ref, w_ref, o_ref, xp_ref):
        # x_ref:  (H, W, CT)        this batch image / channel tile
        # w_ref:  (K*K, CT)         per-channel taps, row index = dy*K + dx
        # o_ref:  (H, W, CT)
        # xp_ref: (H+2P, W+2P, CT)  VMEM scratch holding the zero-padded tile

        # ---- fused zero padding: zero ONLY the halo strips ----------------
        # Top / bottom strips span the full width (covers the corners);
        # left / right strips only need the interior rows.
        xp_ref[pl.ds(0, P), :, :] = jnp.zeros((P, W2P, CT), jnp.float32)
        xp_ref[pl.ds(H + P, P), :, :] = jnp.zeros((P, W2P, CT), jnp.float32)
        xp_ref[pl.ds(P, H), pl.ds(0, P), :] = jnp.zeros((H, P, CT), jnp.float32)
        xp_ref[pl.ds(P, H), pl.ds(W + P, P), :] = jnp.zeros((H, P, CT), jnp.float32)
        # Drop this tile into the centre of the padded scratch.
        xp_ref[pl.ds(P, H), pl.ds(P, W), :] = x_ref[...]

        # ---- hoist all K*K per-channel weight vectors once -----------------
        wv = w_ref[...]                                    # (K*K, CT)

        # ---- 25-tap depthwise conv with register-resident row-block acc ----
        def rb_body(rb, carry):
            r0 = rb * RB
            if not isinstance(r0, (int, np.integer)):
                r0 = pl.multiple_of(r0, RB)
            # Rows needed for this output row block (+ 2P halo rows).
            slab = xp_ref[pl.ds(r0, RB + 2 * P), :, :]     # (RB+2P, W2P, CT)
            acc = jnp.zeros((RB, W, CT), jnp.float32)
            # One sublane-offset slice per kernel column dx; the K row shifts
            # per column are cheap leading-dim slices of a value.
            for dx in range(K):
                col = slab[:, dx:dx + W, :]                # (RB+2P, W, CT)
                for dy in range(K):
                    acc = acc + col[dy:dy + RB] * wv[dy * K + dx]
            o_ref[pl.ds(r0, RB), :, :] = acc.astype(o_ref.dtype)
            return carry

        lax.fori_loop(0, n_rb, rb_body, None, unroll=True)

    return kernel


# --------------------------------------------------------------------------
# NHWC core entry point (no layout transposes -- preferred in an NHWC model).
# --------------------------------------------------------------------------
def smoothing_forward_nhwc(x_nhwc, w_flat):
    """Depthwise KxK smoothing conv.

    x_nhwc: (B, H, W, C) float32
    w_flat: (K*K, C) float32, row index = dy*K + dx
    returns (B, H, W, C) float32
    """
    B, H, W, C = x_nhwc.shape
    KK, Cw = w_flat.shape
    assert Cw == C
    K = int(round(KK ** 0.5))
    assert K * K == KK
    P = K // 2

    # Channel tile: keep channels on the 128-lane axis; tile when C > 128.
    CT = C if C < 128 else 128
    assert C % CT == 0, "C must be a multiple of 128 when C > 128"
    n_ct = C // CT

    # Output row-block size for the register-resident accumulator.
    RB = H
    for cand in (8, 4, 2, 1):
        if H % cand == 0:
            RB = cand
            break

    out = pl.pallas_call(
        _make_smoothing_kernel(H, W, K, CT, RB),
        out_shape=jax.ShapeDtypeStruct((B, H, W, C), jnp.float32),
        grid=(B, n_ct),
        in_specs=[
            pl.BlockSpec((None, H, W, CT), lambda b, ct: (b, 0, 0, ct)),
            pl.BlockSpec((KK, CT), lambda b, ct: (0, ct)),
        ],
        out_specs=pl.BlockSpec((None, H, W, CT), lambda b, ct: (b, 0, 0, ct)),
        scratch_shapes=[pltpu.VMEM((H + 2 * P, W + 2 * P, CT), jnp.float32)],
        compiler_params=pltpu.CompilerParams(
            dimension_semantics=("parallel", "parallel"),
        ),
    )(x_nhwc, w_flat)
    return out


# --------------------------------------------------------------------------
# PyTorch-compatible NCHW wrapper (transposes only at the module boundary).
# --------------------------------------------------------------------------
def smoothing_forward(x, weight):
    """SmoothingLayer forward.

    x:      (B, C, H, W) float32   -- NCHW, as in the PyTorch module
    weight: (C, 1, K, K) float32   -- depthwise Conv2d weight (groups=C)
    returns (B, C, H, W) float32
    """
    B, C, H, W = x.shape
    K = weight.shape[-1]
    assert weight.shape == (C, 1, K, K)

    x_nhwc = jnp.transpose(x, (0, 2, 3, 1)).astype(jnp.float32)           # (B,H,W,C)
    w_flat = jnp.transpose(
        weight[:, 0, :, :].reshape(C, K * K), (1, 0)
    ).astype(jnp.float32)                                                  # (K*K,C)

    out_nhwc = smoothing_forward_nhwc(x_nhwc, w_flat)
    return jnp.transpose(out_nhwc, (0, 3, 1, 2))


# --------------------------------------------------------------------------
# Module-faithful weight init: 5x5 Gaussian, repeated per channel.
# --------------------------------------------------------------------------
def gaussian_depthwise_weight(channels, kernel_size=5, sigma=1.5):
    center = kernel_size // 2
    xg, yg = np.mgrid[0:kernel_size, 0:kernel_size]
    g = np.exp(-((xg - center) ** 2 + (yg - center) ** 2) / (2 * sigma ** 2))
    g = g / g.sum()
    w = np.broadcast_to(g[None, None], (channels, 1, kernel_size, kernel_size))
    return jnp.asarray(np.ascontiguousarray(w), jnp.float32)


# --------------------------------------------------------------------------
# Pure-JAX reference (shift-and-add, f32) for correctness checking.
# --------------------------------------------------------------------------
def smoothing_reference(x, weight):
    B, C, H, W = x.shape
    K = weight.shape[-1]
    P = K // 2
    xp = jnp.pad(x.astype(jnp.float32), ((0, 0), (0, 0), (P, P), (P, P)))
    out = jnp.zeros((B, C, H, W), jnp.float32)
    for dy in range(K):
        for dx in range(K):
            out = out + xp[:, :, dy:dy + H, dx:dx + W] * \
                weight[:, 0, dy, dx][None, :, None, None]
    return out


# --------------------------------------------------------------------------
if __name__ == "__main__":
    # Shapes consistent with how SmoothingLayer is used inside the AE; C=128
    # keeps the channel/lane axis fully dense (C=256/512 tile over the grid).
    B, C, H, W = 2, 128, 16, 16
    key = jax.random.PRNGKey(0)
    x = jax.random.normal(key, (B, C, H, W), dtype=jnp.float32)
    weight = gaussian_depthwise_weight(C, kernel_size=5, sigma=1.5)

    fwd = jax.jit(smoothing_forward)
    y = fwd(x, weight)
    jax.block_until_ready(y)

    assert y.shape == (B, C, H, W), y.shape
    assert not bool(jnp.any(jnp.isnan(y)))

    ref = smoothing_reference(x, weight)
    np.testing.assert_allclose(np.asarray(y), np.asarray(ref), rtol=1e-5, atol=1e-5)

    print("KERNEL_OK")
</pallas_src>

<mosaic_0001>
module attributes {stable_mosaic.version = 11 : i64} {
  func.func @kernel(%arg0: i32, %arg1: i32, %arg2: memref<1x16x16x128xf32, #tpu.memory_space<vmem>>, %arg3: memref<25x128xf32, #tpu.memory_space<vmem>>, %arg4: memref<1x16x16x128xf32, #tpu.memory_space<vmem>>, %arg5: memref<20x20x128xf32, #tpu.memory_space<vmem>>) attributes {dimension_semantics = [#tpu.dimension_semantics<parallel>, #tpu.dimension_semantics<parallel>], iteration_bounds = array<i64: 2, 1>, scalar_prefetch = 0 : i64, scratch_operands = 1 : i64, tpu.core_type = #tpu.core_type<tc>, window_params = [{transform_indices = @transform_0, window_bounds = array<i64: 1, 16, 16, 128>}, {transform_indices = @transform_1, window_bounds = array<i64: 25, 128>}, {transform_indices = @transform_2, window_bounds = array<i64: 1, 16, 16, 128>}]} {
    %cst = arith.constant 0.000000e+00 : f32
    %0 = vector.broadcast %cst : f32 to vector<2x20x128xf32>
    %c0 = arith.constant 0 : index
    %c0_0 = arith.constant 0 : index
    %c0_1 = arith.constant 0 : index
    %1 = vector.load %arg5[%c0, %c0_0, %c0_1] : memref<20x20x128xf32, #tpu.memory_space<vmem>>, vector<2x20x128xf32>
    tpu.vector_store %arg5[%c0, %c0_0, %c0_1], %0 {strides = array<i32>} : memref<20x20x128xf32, #tpu.memory_space<vmem>>, vector<2x20x128xf32>,
    %cst_2 = arith.constant 0.000000e+00 : f32
    %2 = vector.broadcast %cst_2 : f32 to vector<2x20x128xf32>
    %c18 = arith.constant 18 : index
    %c0_3 = arith.constant 0 : index
    %c0_4 = arith.constant 0 : index
    %3 = vector.load %arg5[%c18, %c0_3, %c0_4] : memref<20x20x128xf32, #tpu.memory_space<vmem>>, vector<2x20x128xf32>
    tpu.vector_store %arg5[%c18, %c0_3, %c0_4], %2 {strides = array<i32>} : memref<20x20x128xf32, #tpu.memory_space<vmem>>, vector<2x20x128xf32>,
    %cst_5 = arith.constant 0.000000e+00 : f32
    %4 = vector.broadcast %cst_5 : f32 to vector<16x2x128xf32>
    %c2 = arith.constant 2 : index
    %c0_6 = arith.constant 0 : index
    %c0_7 = arith.constant 0 : index
    %5 = vector.load %arg5[%c2, %c0_6, %c0_7] : memref<20x20x128xf32, #tpu.memory_space<vmem>>, vector<16x2x128xf32>
    tpu.vector_store %arg5[%c2, %c0_6, %c0_7], %4 {strides = array<i32>} : memref<20x20x128xf32, #tpu.memory_space<vmem>>, vector<16x2x128xf32>,
    %cst_8 = arith.constant 0.000000e+00 : f32
    %6 = vector.broadcast %cst_8 : f32 to vector<16x2x128xf32>
    %c2_9 = arith.constant 2 : index
    %c18_10 = arith.constant 18 : index
    %c0_11 = arith.constant 0 : index
    %7 = vector.load %arg5[%c2_9, %c18_10, %c0_11] : memref<20x20x128xf32, #tpu.memory_space<vmem>>, vector<16x2x128xf32>
    tpu.vector_store %arg5[%c2_9, %c18_10, %c0_11], %6 {strides = array<i32>} : memref<20x20x128xf32, #tpu.memory_space<vmem>>, vector<16x2x128xf32>,
    %c0_12 = arith.constant 0 : index
    %c0_13 = arith.constant 0 : index
    %c0_14 = arith.constant 0 : index
    %c0_15 = arith.constant 0 : index
    %8 = vector.load %arg2[%c0_12, %c0_13, %c0_14, %c0_15] : memref<1x16x16x128xf32, #tpu.memory_space<vmem>>, vector<1x16x16x128xf32>
    %9 = vector.shape_cast %8 : vector<1x16x16x128xf32> to vector<16x16x128xf32>
    %c2_16 = arith.constant 2 : index
    %c2_17 = arith.constant 2 : index
    %c0_18 = arith.constant 0 : index
    %10 = vector.load %arg5[%c2_16, %c2_17, %c0_18] : memref<20x20x128xf32, #tpu.memory_space<vmem>>, vector<16x16x128xf32>
    tpu.vector_store %arg5[%c2_16, %c2_17, %c0_18], %9 {strides = array<i32>} : memref<20x20x128xf32, #tpu.memory_space<vmem>>, vector<16x16x128xf32>,
    %c0_19 = arith.constant 0 : index
    %c0_20 = arith.constant 0 : index
    %11 = vector.load %arg3[%c0_19, %c0_20] : memref<25x128xf32, #tpu.memory_space<vmem>>, vector<25x128xf32>
    %c0_i32 = arith.constant 0 : i32
    %c8_i32 = arith.constant 8 : i32
    %12 = arith.muli %c0_i32, %c8_i32 : i32
    %13 = tpu.assume_multiple %12, 8 : i32
    %14 = arith.index_cast %13 : i32 to index
    %c0_21 = arith.constant 0 : index
    %c0_22 = arith.constant 0 : index
    %15 = vector.load %arg5[%14, %c0_21, %c0_22] : memref<20x20x128xf32, #tpu.memory_space<vmem>>, vector<12x20x128xf32>
    %cst_23 = arith.constant 0.000000e+00 : f32
    %16 = vector.broadcast %cst_23 : f32 to vector<8x16x128xf32>
    %17 = vector.extract_strided_slice %15 {offsets = [0, 0, 0], sizes = [12, 16, 128], strides = [1, 1, 1]} : vector<12x20x128xf32> to vector<12x16x128xf32>
    %18 = vector.extract_strided_slice %17 {offsets = [0, 0, 0], sizes = [8, 16, 128], strides = [1, 1, 1]} : vector<12x16x128xf32> to vector<8x16x128xf32>
    %19 = vector.extract_strided_slice %11 {offsets = [0, 0], sizes = [1, 128], strides = [1, 1]} : vector<25x128xf32> to vector<1x128xf32>
    %20 = vector.shape_cast %19 : vector<1x128xf32> to vector<128xf32>
    %21 = vector.shape_cast %20 : vector<128xf32> to vector<1x1x128xf32>
    %22 = vector.broadcast %21 : vector<1x1x128xf32> to vector<8x16x128xf32>
    %23 = arith.mulf %18, %22 : vector<8x16x128xf32>
    %24 = arith.addf %16, %23 : vector<8x16x128xf32>
    %25 = vector.extract_strided_slice %17 {offsets = [1, 0, 0], sizes = [8, 16, 128], strides = [1, 1, 1]} : vector<12x16x128xf32> to vector<8x16x128xf32>
    %26 = vector.extract_strided_slice %11 {offsets = [5, 0], sizes = [1, 128], strides = [1, 1]} : vector<25x128xf32> to vector<1x128xf32>
    %27 = vector.shape_cast %26 : vector<1x128xf32> to vector<128xf32>
    %28 = vector.shape_cast %27 : vector<128xf32> to vector<1x1x128xf32>
    %29 = vector.broadcast %28 : vector<1x1x128xf32> to vector<8x16x128xf32>
    %30 = arith.mulf %25, %29 : vector<8x16x128xf32>
    %31 = arith.addf %24, %30 : vector<8x16x128xf32>
    %32 = vector.extract_strided_slice %17 {offsets = [2, 0, 0], sizes = [8, 16, 128], strides = [1, 1, 1]} : vector<12x16x128xf32> to vector<8x16x128xf32>
    %33 = vector.extract_strided_slice %11 {offsets = [10, 0], sizes = [1, 128], strides = [1, 1]} : vector<25x128xf32> to vector<1x128xf32>
    %34 = vector.shape_cast %33 : vector<1x128xf32> to vector<128xf32>
    %35 = vector.shape_cast %34 : vector<128xf32> to vector<1x1x128xf32>
    %36 = vector.broadcast %35 : vector<1x1x128xf32> to vector<8x16x128xf32>
    %37 = arith.mulf %32, %36 : vector<8x16x128xf32>
    %38 = arith.addf %31, %37 : vector<8x16x128xf32>
    %39 = vector.extract_strided_slice %17 {offsets = [3, 0, 0], sizes = [8, 16, 128], strides = [1, 1, 1]} : vector<12x16x128xf32> to vector<8x16x128xf32>
    %40 = vector.extract_strided_slice %11 {offsets = [15, 0], sizes = [1, 128], strides = [1, 1]} : vector<25x128xf32> to vector<1x128xf32>
    %41 = vector.shape_cast %40 : vector<1x128xf32> to vector<128xf32>
    %42 = vector.shape_cast %41 : vector<128xf32> to vector<1x1x128xf32>
    %43 = vector.broadcast %42 : vector<1x1x128xf32> to vector<8x16x128xf32>
    %44 = arith.mulf %39, %43 : vector<8x16x128xf32>
    %45 = arith.addf %38, %44 : vector<8x16x128xf32>
    %46 = vector.extract_strided_slice %17 {offsets = [4, 0, 0], sizes = [8, 16, 128], strides = [1, 1, 1]} : vector<12x16x128xf32> to vector<8x16x128xf32>
    %47 = vector.extract_strided_slice %11 {offsets = [20, 0], sizes = [1, 128], strides = [1, 1]} : vector<25x128xf32> to vector<1x128xf32>
    %48 = vector.shape_cast %47 : vector<1x128xf32> to vector<128xf32>
    %49 = vector.shape_cast %48 : vector<128xf32> to vector<1x1x128xf32>
    %50 = vector.broadcast %49 : vector<1x1x128xf32> to vector<8x16x128xf32>
    %51 = arith.mulf %46, %50 : vector<8x16x128xf32>
    %52 = arith.addf %45, %51 : vector<8x16x128xf32>
    %53 = vector.extract_strided_slice %15 {offsets = [0, 1, 0], sizes = [12, 16, 128], strides = [1, 1, 1]} : vector<12x20x128xf32> to vector<12x16x128xf32>
    %54 = vector.extract_strided_slice %53 {offsets = [0, 0, 0], sizes = [8, 16, 128], strides = [1, 1, 1]} : vector<12x16x128xf32> to vector<8x16x128xf32>
    %55 = vector.extract_strided_slice %11 {offsets = [1, 0], sizes = [1, 128], strides = [1, 1]} : vector<25x128xf32> to vector<1x128xf32>
    %56 = vector.shape_cast %55 : vector<1x128xf32> to vector<128xf32>
    %57 = vector.shape_cast %56 : vector<128xf32> to vector<1x1x128xf32>
    %58 = vector.broadcast %57 : vector<1x1x128xf32> to vector<8x16x128xf32>
    %59 = arith.mulf %54, %58 : vector<8x16x128xf32>
    %60 = arith.addf %52, %59 : vector<8x16x128xf32>
    %61 = vector.extract_strided_slice %53 {offsets = [1, 0, 0], sizes = [8, 16, 128], strides = [1, 1, 1]} : vector<12x16x128xf32> to vector<8x16x128xf32>
    %62 = vector.extract_strided_slice %11 {offsets = [6, 0], sizes = [1, 128], strides = [1, 1]} : vector<25x128xf32> to vector<1x128xf32>
    %63 = vector.shape_cast %62 : vector<1x128xf32> to vector<128xf32>
    %64 = vector.shape_cast %63 : vector<128xf32> to vector<1x1x128xf32>
    %65 = vector.broadcast %64 : vector<1x1x128xf32> to vector<8x16x128xf32>
    %66 = arith.mulf %61, %65 : vector<8x16x128xf32>
    %67 = arith.addf %60, %66 : vector<8x16x128xf32>
    %68 = vector.extract_strided_slice %53 {offsets = [2, 0, 0], sizes = [8, 16, 128], strides = [1, 1, 1]} : vector<12x16x128xf32> to vector<8x16x128xf32>
    %69 = vector.extract_strided_slice %11 {offsets = [11, 0], sizes = [1, 128], strides = [1, 1]} : vector<25x128xf32> to vector<1x128xf32>
    %70 = vector.shape_cast %69 : vector<1x128xf32> to vector<128xf32>
    %71 = vector.shape_cast %70 : vector<128xf32> to vector<1x1x128xf32>
    %72 = vector.broadcast %71 : vector<1x1x128xf32> to vector<8x16x128xf32>
    %73 = arith.mulf %68, %72 : vector<8x16x128xf32>
    %74 = arith.addf %67, %73 : vector<8x16x128xf32>
    %75 = vector.extract_strided_slice %53 {offsets = [3, 0, 0], sizes = [8, 16, 128], strides = [1, 1, 1]} : vector<12x16x128xf32> to vector<8x16x128xf32>
    %76 = vector.extract_strided_slice %11 {offsets = [16, 0], sizes = [1, 128], strides = [1, 1]} : vector<25x128xf32> to vector<1x128xf32>
    %77 = vector.shape_cast %76 : vector<1x128xf32> to vector<128xf32>
    %78 = vector.shape_cast %77 : vector<128xf32> to vector<1x1x128xf32>
    %79 = vector.broadcast %78 : vector<1x1x128xf32> to vector<8x16x128xf32>
    %80 = arith.mulf %75, %79 : vector<8x16x128xf32>
    %81 = arith.addf %74, %80 : vector<8x16x128xf32>
    %82 = vector.extract_strided_slice %53 {offsets = [4, 0, 0], sizes = [8, 16, 128], strides = [1, 1, 1]} : vector<12x16x128xf32> to vector<8x16x128xf32>
    %83 = vector.extract_strided_slice %11 {offsets = [21, 0], sizes = [1, 128], strides = [1, 1]} : vector<25x128xf32> to vector<1x128xf32>
    %84 = vector.shape_cast %83 : vector<1x128xf32> to vector<128xf32>
    %85 = vector.shape_cast %84 : vector<128xf32> to vector<1x1x128xf32>
    %86 = vector.broadcast %85 : vector<1x1x128xf32> to vector<8x16x128xf32>
    %87 = arith.mulf %82, %86 : vector<8x16x128xf32>
    %88 = arith.addf %81, %87 : vector<8x16x128xf32>
    %89 = vector.extract_strided_slice %15 {offsets = [0, 2, 0], sizes = [12, 16, 128], strides = [1, 1, 1]} : vector<12x20x128xf32> to vector<12x16x128xf32>
    %90 = vector.extract_strided_slice %89 {offsets = [0, 0, 0], sizes = [8, 16, 128], strides = [1, 1, 1]} : vector<12x16x128xf32> to vector<8x16x128xf32>
    %91 = vector.extract_strided_slice %11 {offsets = [2, 0], sizes = [1, 128], strides = [1, 1]} : vector<25x128xf32> to vector<1x128xf32>
    %92 = vector.shape_cast %91 : vector<1x128xf32> to vector<128xf32>
    %93 = vector.shape_cast %92 : vector<128xf32> to vector<1x1x128xf32>
    %94 = vector.broadcast %93 : vector<1x1x128xf32> to vector<8x16x128xf32>
    %95 = arith.mulf %90, %94 : vector<8x16x128xf32>
    %96 = arith.addf %88, %95 : vector<8x16x128xf32>
    %97 = vector.extract_strided_slice %89 {offsets = [1, 0, 0], sizes = [8, 16, 128], strides = [1, 1, 1]} : vector<12x16x128xf32> to vector<8x16x128xf32>
    %98 = vector.extract_strided_slice %11 {offsets = [7, 0], sizes = [1, 128], strides = [1, 1]} : vector<25x128xf32> to vector<1x128xf32>
    %99 = vector.shape_cast %98 : vector<1x128xf32> to vector<128xf32>
    %100 = vector.shape_cast %99 : vector<128xf32> to vector<1x1x128xf32>
    %101 = vector.broadcast %100 : vector<1x1x128xf32> to vector<8x16x128xf32>
    %102 = arith.mulf %97, %101 : vector<8x16x128xf32>
    %103 = arith.addf %96, %102 : vector<8x16x128xf32>
    %104 = vector.extract_strided_slice %89 {offsets = [2, 0, 0], sizes = [8, 16, 128], strides = [1, 1, 1]} : vector<12x16x128xf32> to vector<8x16x128xf32>
    %105 = vector.extract_strided_slice %11 {offsets = [12, 0], sizes = [1, 128], strides = [1, 1]} : vector<25x128xf32> to vector<1x128xf32>
    %106 = vector.shape_cast %105 : vector<1x128xf32> to vector<128xf32>
    %107 = vector.shape_cast %106 : vector<128xf32> to vector<1x1x128xf32>
    %108 = vector.broadcast %107 : vector<1x1x128xf32> to vector<8x16x128xf32>
    %109 = arith.mulf %104, %108 : vector<8x16x128xf32>
    %110 = arith.addf %103, %109 : vector<8x16x128xf32>
    %111 = vector.extract_strided_slice %89 {offsets = [3, 0, 0], sizes = [8, 16, 128], strides = [1, 1, 1]} : vector<12x16x128xf32> to vector<8x16x128xf32>
    %112 = vector.extract_strided_slice %11 {offsets = [17, 0], sizes = [1, 128], strides = [1, 1]} : vector<25x128xf32> to vector<1x128xf32>
    %113 = vector.shape_cast %112 : vector<1x128xf32> to vector<128xf32>
    %114 = vector.shape_cast %113 : vector<128xf32> to vector<1x1x128xf32>
    %115 = vector.broadcast %114 : vector<1x1x128xf32> to vector<8x16x128xf32>
    %116 = arith.mulf %111, %115 : vector<8x16x128xf32>
    %117 = arith.addf %110, %116 : vector<8x16x128xf32>
    %118 = vector.extract_strided_slice %89 {offsets = [4, 0, 0], sizes = [8, 16, 128], strides = [1, 1, 1]} : vector<12x16x128xf32> to vector<8x16x128xf32>
    %119 = vector.extract_strided_slice %11 {offsets = [22, 0], sizes = [1, 128], strides = [1, 1]} : vector<25x128xf32> to vector<1x128xf32>
    %120 = vector.shape_cast %119 : vector<1x128xf32> to vector<128xf32>
    %121 = vector.shape_cast %120 : vector<128xf32> to vector<1x1x128xf32>
    %122 = vector.broadcast %121 : vector<1x1x128xf32> to vector<8x16x128xf32>
    %123 = arith.mulf %118, %122 : vector<8x16x128xf32>
    %124 = arith.addf %117, %123 : vector<8x16x128xf32>
    %125 = vector.extract_strided_slice %15 {offsets = [0, 3, 0], sizes = [12, 16, 128], strides = [1, 1, 1]} : vector<12x20x128xf32> to vector<12x16x128xf32>
    %126 = vector.extract_strided_slice %125 {offsets = [0, 0, 0], sizes = [8, 16, 128], strides = [1, 1, 1]} : vector<12x16x128xf32> to vector<8x16x128xf32>
    %127 = vector.extract_strided_slice %11 {offsets = [3, 0], sizes = [1, 128], strides = [1, 1]} : vector<25x128xf32> to vector<1x128xf32>
    %128 = vector.shape_cast %127 : vector<1x128xf32> to vector<128xf32>
    %129 = vector.shape_cast %128 : vector<128xf32> to vector<1x1x128xf32>
    %130 = vector.broadcast %129 : vector<1x1x128xf32> to vector<8x16x128xf32>
    %131 = arith.mulf %126, %130 : vector<8x16x128xf32>
    %132 = arith.addf %124, %131 : vector<8x16x128xf32>
    %133 = vector.extract_strided_slice %125 {offsets = [1, 0, 0], sizes = [8, 16, 128], strides = [1, 1, 1]} : vector<12x16x128xf32> to vector<8x16x128xf32>
    %134 = vector.extract_strided_slice %11 {offsets = [8, 0], sizes = [1, 128], strides = [1, 1]} : vector<25x128xf32> to vector<1x128xf32>
    %135 = vector.shape_cast %134 : vector<1x128xf32> to vector<128xf32>
    %136 = vector.shape_cast %135 : vector<128xf32> to vector<1x1x128xf32>
    %137 = vector.broadcast %136 : vector<1x1x128xf32> to vector<8x16x128xf32>
    %138 = arith.mulf %133, %137 : vector<8x16x128xf32>
    %139 = arith.addf %132, %138 : vector<8x16x128xf32>
    %140 = vector.extract_strided_slice %125 {offsets = [2, 0, 0], sizes = [8, 16, 128], strides = [1, 1, 1]} : vector<12x16x128xf32> to vector<8x16x128xf32>
    %141 = vector.extract_strided_slice %11 {offsets = [13, 0], sizes = [1, 128], strides = [1, 1]} : vector<25x128xf32> to vector<1x128xf32>
    %142 = vector.shape_cast %141 : vector<1x128xf32> to vector<128xf32>
    %143 = vector.shape_cast %142 : vector<128xf32> to vector<1x1x128xf32>
    %144 = vector.broadcast %143 : vector<1x1x128xf32> to vector<8x16x128xf32>
    %145 = arith.mulf %140, %144 : vector<8x16x128xf32>
    %146 = arith.addf %139, %145 : vector<8x16x128xf32>
    %147 = vector.extract_strided_slice %125 {offsets = [3, 0, 0], sizes = [8, 16, 128], strides = [1, 1, 1]} : vector<12x16x128xf32> to vector<8x16x128xf32>
    %148 = vector.extract_strided_slice %11 {offsets = [18, 0], sizes = [1, 128], strides = [1, 1]} : vector<25x128xf32> to vector<1x128xf32>
    %149 = vector.shape_cast %148 : vector<1x128xf32> to vector<128xf32>
    %150 = vector.shape_cast %149 : vector<128xf32> to vector<1x1x128xf32>
    %151 = vector.broadcast %150 : vector<1x1x128xf32> to vector<8x16x128xf32>
    %152 = arith.mulf %147, %151 : vector<8x16x128xf32>
    %153 = arith.addf %146, %152 : vector<8x16x128xf32>
    %154 = vector.extract_strided_slice %125 {offsets = [4, 0, 0], sizes = [8, 16, 128], strides = [1, 1, 1]} : vector<12x16x128xf32> to vector<8x16x128xf32>
    %155 = vector.extract_strided_slice %11 {offsets = [23, 0], sizes = [1, 128], strides = [1, 1]} : vector<25x128xf32> to vector<1x128xf32>
    %156 = vector.shape_cast %155 : vector<1x128xf32> to vector<128xf32>
    %157 = vector.shape_cast %156 : vector<128xf32> to vector<1x1x128xf32>
    %158 = vector.broadcast %157 : vector<1x1x128xf32> to vector<8x16x128xf32>
    %159 = arith.mulf %154, %158 : vector<8x16x128xf32>
    %160 = arith.addf %153, %159 : vector<8x16x128xf32>
    %161 = vector.extract_strided_slice %15 {offsets = [0, 4, 0], sizes = [12, 16, 128], strides = [1, 1, 1]} : vector<12x20x128xf32> to vector<12x16x128xf32>
    %162 = vector.extract_strided_slice %161 {offsets = [0, 0, 0], sizes = [8, 16, 128], strides = [1, 1, 1]} : vector<12x16x128xf32> to vector<8x16x128xf32>
    %163 = vector.extract_strided_slice %11 {offsets = [4, 0], sizes = [1, 128], strides = [1, 1]} : vector<25x128xf32> to vector<1x128xf32>
    %164 = vector.shape_cast %163 : vector<1x128xf32> to vector<128xf32>
    %165 = vector.shape_cast %164 : vector<128xf32> to vector<1x1x128xf32>
    %166 = vector.broadcast %165 : vector<1x1x128xf32> to vector<8x16x128xf32>
    %167 = arith.mulf %162, %166 : vector<8x16x128xf32>
    %168 = arith.addf %160, %167 : vector<8x16x128xf32>
    %169 = vector.extract_strided_slice %161 {offsets = [1, 0, 0], sizes = [8, 16, 128], strides = [1, 1, 1]} : vector<12x16x128xf32> to vector<8x16x128xf32>
    %170 = vector.extract_strided_slice %11 {offsets = [9, 0], sizes = [1, 128], strides = [1, 1]} : vector<25x128xf32> to vector<1x128xf32>
    %171 = vector.shape_cast %170 : vector<1x128xf32> to vector<128xf32>
    %172 = vector.shape_cast %171 : vector<128xf32> to vector<1x1x128xf32>
    %173 = vector.broadcast %172 : vector<1x1x128xf32> to vector<8x16x128xf32>
    %174 = arith.mulf %169, %173 : vector<8x16x128xf32>
    %175 = arith.addf %168, %174 : vector<8x16x128xf32>
    %176 = vector.extract_strided_slice %161 {offsets = [2, 0, 0], sizes = [8, 16, 128], strides = [1, 1, 1]} : vector<12x16x128xf32> to vector<8x16x128xf32>
    %177 = vector.extract_strided_slice %11 {offsets = [14, 0], sizes = [1, 128], strides = [1, 1]} : vector<25x128xf32> to vector<1x128xf32>
    %178 = vector.shape_cast %177 : vector<1x128xf32> to vector<128xf32>
    %179 = vector.shape_cast %178 : vector<128xf32> to vector<1x1x128xf32>
    %180 = vector.broadcast %179 : vector<1x1x128xf32> to vector<8x16x128xf32>
    %181 = arith.mulf %176, %180 : vector<8x16x128xf32>
    %182 = arith.addf %175, %181 : vector<8x16x128xf32>
    %183 = vector.extract_strided_slice %161 {offsets = [3, 0, 0], sizes = [8, 16, 128], strides = [1, 1, 1]} : vector<12x16x128xf32> to vector<8x16x128xf32>
    %184 = vector.extract_strided_slice %11 {offsets = [19, 0], sizes = [1, 128], strides = [1, 1]} : vector<25x128xf32> to vector<1x128xf32>
    %185 = vector.shape_cast %184 : vector<1x128xf32> to vector<128xf32>
    %186 = vector.shape_cast %185 : vector<128xf32> to vector<1x1x128xf32>
    %187 = vector.broadcast %186 : vector<1x1x128xf32> to vector<8x16x128xf32>
    %188 = arith.mulf %183, %187 : vector<8x16x128xf32>
    %189 = arith.addf %182, %188 : vector<8x16x128xf32>
    %190 = vector.extract_strided_slice %161 {offsets = [4, 0, 0], sizes = [8, 16, 128], strides = [1, 1, 1]} : vector<12x16x128xf32> to vector<8x16x128xf32>
    %191 = vector.extract_strided_slice %11 {offsets = [24, 0], sizes = [1, 128], strides = [1, 1]} : vector<25x128xf32> to vector<1x128xf32>
    %192 = vector.shape_cast %191 : vector<1x128xf32> to vector<128xf32>
    %193 = vector.shape_cast %192 : vector<128xf32> to vector<1x1x128xf32>
    %194 = vector.broadcast %193 : vector<1x1x128xf32> to vector<8x16x128xf32>
    %195 = arith.mulf %190, %194 : vector<8x16x128xf32>
    %196 = arith.addf %189, %195 : vector<8x16x128xf32>
    %c0_24 = arith.constant 0 : index
    %197 = arith.index_cast %13 : i32 to index
    %c0_25 = arith.constant 0 : index
    %c0_26 = arith.constant 0 : index
    %198 = vector.load %arg4[%c0_24, %197, %c0_25, %c0_26] : memref<1x16x16x128xf32, #tpu.memory_space<vmem>>, vector<1x8x16x128xf32>
    %199 = vector.shape_cast %198 : vector<1x8x16x128xf32> to vector<8x16x128xf32>
    %200 = vector.shape_cast %196 : vector<8x16x128xf32> to vector<1x8x16x128xf32>
    tpu.vector_store %arg4[%c0_24, %197, %c0_25, %c0_26], %200 {strides = array<i32>} : memref<1x16x16x128xf32, #tpu.memory_space<vmem>>, vector<1x8x16x128xf32>,
    %c1_i32 = arith.constant 1 : i32
    %c8_i32_27 = arith.constant 8 : i32
    %201 = arith.muli %c1_i32, %c8_i32_27 : i32
    %202 = tpu.assume_multiple %201, 8 : i32
    %203 = arith.index_cast %202 : i32 to index
    %c0_28 = arith.constant 0 : index
    %c0_29 = arith.constant 0 : index
    %204 = vector.load %arg5[%203, %c0_28, %c0_29] : memref<20x20x128xf32, #tpu.memory_space<vmem>>, vector<12x20x128xf32>
    %cst_30 = arith.constant 0.000000e+00 : f32
    %205 = vector.broadcast %cst_30 : f32 to vector<8x16x128xf32>
    %206 = vector.extract_strided_slice %204 {offsets = [0, 0, 0], sizes = [12, 16, 128], strides = [1, 1, 1]} : vector<12x20x128xf32> to vector<12x16x128xf32>
    %207 = vector.extract_strided_slice %206 {offsets = [0, 0, 0], sizes = [8, 16, 128], strides = [1, 1, 1]} : vector<12x16x128xf32> to vector<8x16x128xf32>
    %208 = vector.extract_strided_slice %11 {offsets = [0, 0], sizes = [1, 128], strides = [1, 1]} : vector<25x128xf32> to vector<1x128xf32>
    %209 = vector.shape_cast %208 : vector<1x128xf32> to vector<128xf32>
    %210 = vector.shape_cast %209 : vector<128xf32> to vector<1x1x128xf32>
    %211 = vector.broadcast %210 : vector<1x1x128xf32> to vector<8x16x128xf32>
    %212 = arith.mulf %207, %211 : vector<8x16x128xf32>
    %213 = arith.addf %205, %212 : vector<8x16x128xf32>
    %214 = vector.extract_strided_slice %206 {offsets = [1, 0, 0], sizes = [8, 16, 128], strides = [1, 1, 1]} : vector<12x16x128xf32> to vector<8x16x128xf32>
    %215 = vector.extract_strided_slice %11 {offsets = [5, 0], sizes = [1, 128], strides = [1, 1]} : vector<25x128xf32> to vector<1x128xf32>
    %216 = vector.shape_cast %215 : vector<1x128xf32> to vector<128xf32>
    %217 = vector.shape_cast %216 : vector<128xf32> to vector<1x1x128xf32>
    %218 = vector.broadcast %217 : vector<1x1x128xf32> to vector<8x16x128xf32>
    %219 = arith.mulf %214, %218 : vector<8x16x128xf32>
    %220 = arith.addf %213, %219 : vector<8x16x128xf32>
    %221 = vector.extract_strided_slice %206 {offsets = [2, 0, 0], sizes = [8, 16, 128], strides = [1, 1, 1]} : vector<12x16x128xf32> to vector<8x16x128xf32>
    %222 = vector.extract_strided_slice %11 {offsets = [10, 0], sizes = [1, 128], strides = [1, 1]} : vector<25x128xf32> to vector<1x128xf32>
    %223 = vector.shape_cast %222 : vector<1x128xf32> to vector<128xf32>
    %224 = vector.shape_cast %223 : vector<128xf32> to vector<1x1x128xf32>
    %225 = vector.broadcast %224 : vector<1x1x128xf32> to vector<8x16x128xf32>
    %226 = arith.mulf %221, %225 : vector<8x16x128xf32>
    %227 = arith.addf %220, %226 : vector<8x16x128xf32>
    %228 = vector.extract_strided_slice %206 {offsets = [3, 0, 0], sizes = [8, 16, 128], strides = [1, 1, 1]} : vector<12x16x128xf32> to vector<8x16x128xf32>
    %229 = vector.extract_strided_slice %11 {offsets = [15, 0], sizes = [1, 128], strides = [1, 1]} : vector<25x128xf32> to vector<1x128xf32>
    %230 = vector.shape_cast %229 : vector<1x128xf32> to vector<128xf32>
    %231 = vector.shape_cast %230 : vector<128xf32> to vector<1x1x128xf32>
    %232 = vector.broadcast %231 : vector<1x1x128xf32> to vector<8x16x128xf32>
    %233 = arith.mulf %228, %232 : vector<8x16x128xf32>
    %234 = arith.addf %227, %233 : vector<8x16x128xf32>
    %235 = vector.extract_strided_slice %206 {offsets = [4, 0, 0], sizes = [8, 16, 128], strides = [1, 1, 1]} : vector<12x16x128xf32> to vector<8x16x128xf32>
    %236 = vector.extract_strided_slice %11 {offsets = [20, 0], sizes = [1, 128], strides = [1, 1]} : vector<25x128xf32> to vector<1x128xf32>
    %237 = vector.shape_cast %236 : vector<1x128xf32> to vector<128xf32>
    %238 = vector.shape_cast %237 : vector<128xf32> to vector<1x1x128xf32>
    %239 = vector.broadcast %238 : vector<1x1x128xf32> to vector<8x16x128xf32>
    %240 = arith.mulf %235, %239 : vector<8x16x128xf32>
    %241 = arith.addf %234, %240 : vector<8x16x128xf32>
    %242 = vector.extract_strided_slice %204 {offsets = [0, 1, 0], sizes = [12, 16, 128], strides = [1, 1, 1]} : vector<12x20x128xf32> to vector<12x16x128xf32>
    %243 = vector.extract_strided_slice %242 {offsets = [0, 0, 0], sizes = [8, 16, 128], strides = [1, 1, 1]} : vector<12x16x128xf32> to vector<8x16x128xf32>
    %244 = vector.extract_strided_slice %11 {offsets = [1, 0], sizes = [1, 128], strides = [1, 1]} : vector<25x128xf32> to vector<1x128xf32>
    %245 = vector.shape_cast %244 : vector<1x128xf32> to vector<128xf32>
    %246 = vector.shape_cast %245 : vector<128xf32> to vector<1x1x128xf32>
    %247 = vector.broadcast %246 : vector<1x1x128xf32> to vector<8x16x128xf32>
    %248 = arith.mulf %243, %247 : vector<8x16x128xf32>
    %249 = arith.addf %241, %248 : vector<8x16x128xf32>
    %250 = vector.extract_strided_slice %242 {offsets = [1, 0, 0], sizes = [8, 16, 128], strides = [1, 1, 1]} : vector<12x16x128xf32> to vector<8x16x128xf32>
    %251 = vector.extract_strided_slice %11 {offsets = [6, 0], sizes = [1, 128], strides = [1, 1]} : vector<25x128xf32> to vector<1x128xf32>
    %252 = vector.shape_cast %251 : vector<1x128xf32> to vector<128xf32>
    %253 = vector.shape_cast %252 : vector<128xf32> to vector<1x1x128xf32>
    %254 = vector.broadcast %253 : vector<1x1x128xf32> to vector<8x16x128xf32>
    %255 = arith.mulf %250, %254 : vector<8x16x128xf32>
    %256 = arith.addf %249, %255 : vector<8x16x128xf32>
    %257 = vector.extract_strided_slice %242 {offsets = [2, 0, 0], sizes = [8, 16, 128], strides = [1, 1, 1]} : vector<12x16x128xf32> to vector<8x16x128xf32>
    %258 = vector.extract_strided_slice %11 {offsets = [11, 0], sizes = [1, 128], strides = [1, 1]} : vector<25x128xf32> to vector<1x128xf32>
    %259 = vector.shape_cast %258 : vector<1x128xf32> to vector<128xf32>
    %260 = vector.shape_cast %259 : vector<128xf32> to vector<1x1x128xf32>
    %261 = vector.broadcast %260 : vector<1x1x128xf32> to vector<8x16x128xf32>
    %262 = arith.mulf %257, %261 : vector<8x16x128xf32>
    %263 = arith.addf %256, %262 : vector<8x16x128xf32>
    %264 = vector.extract_strided_slice %242 {offsets = [3, 0, 0], sizes = [8, 16, 128], strides = [1, 1, 1]} : vector<12x16x128xf32> to vector<8x16x128xf32>
    %265 = vector.extract_strided_slice %11 {offsets = [16, 0], sizes = [1, 128], strides = [1, 1]} : vector<25x128xf32> to vector<1x128xf32>
    %266 = vector.shape_cast %265 : vector<1x128xf32> to vector<128xf32>
    %267 = vector.shape_cast %266 : vector<128xf32> to vector<1x1x128xf32>
    %268 = vector.broadcast %267 : vector<1x1x128xf32> to vector<8x16x128xf32>
    %269 = arith.mulf %264, %268 : vector<8x16x128xf32>
    %270 = arith.addf %263, %269 : vector<8x16x128xf32>
    %271 = vector.extract_strided_slice %242 {offsets = [4, 0, 0], sizes = [8, 16, 128], strides = [1, 1, 1]} : vector<12x16x128xf32> to vector<8x16x128xf32>
    %272 = vector.extract_strided_slice %11 {offsets = [21, 0], sizes = [1, 128], strides = [1, 1]} : vector<25x128xf32> to vector<1x128xf32>
    %273 = vector.shape_cast %272 : vector<1x128xf32> to vector<128xf32>
    %274 = vector.shape_cast %273 : vector<128xf32> to vector<1x1x128xf32>
    %275 = vector.broadcast %274 : vector<1x1x128xf32> to vector<8x16x128xf32>
    %276 = arith.mulf %271, %275 : vector<8x16x128xf32>
    %277 = arith.addf %270, %276 : vector<8x16x128xf32>
    %278 = vector.extract_strided_slice %204 {offsets = [0, 2, 0], sizes = [12, 16, 128], strides = [1, 1, 1]} : vector<12x20x128xf32> to vector<12x16x128xf32>
    %279 = vector.extract_strided_slice %278 {offsets = [0, 0, 0], sizes = [8, 16, 128], strides = [1, 1, 1]} : vector<12x16x128xf32> to vector<8x16x128xf32>
    %280 = vector.extract_strided_slice %11 {offsets = [2, 0], sizes = [1, 128], strides = [1, 1]} : vector<25x128xf32> to vector<1x128xf32>
    %281 = vector.shape_cast %280 : vector<1x128xf32> to vector<128xf32>
    %282 = vector.shape_cast %281 : vector<128xf32> to vector<1x1x128xf32>
    %283 = vector.broadcast %282 : vector<1x1x128xf32> to vector<8x16x128xf32>
    %284 = arith.mulf %279, %283 : vector<8x16x128xf32>
    %285 = arith.addf %277, %284 : vector<8x16x128xf32>
    %286 = vector.extract_strided_slice %278 {offsets = [1, 0, 0], sizes = [8, 16, 128], strides = [1, 1, 1]} : vector<12x16x128xf32> to vector<8x16x128xf32>
    %287 = vector.extract_strided_slice %11 {offsets = [7, 0], sizes = [1, 128], strides = [1, 1]} : vector<25x128xf32> to vector<1x128xf32>
    %288 = vector.shape_cast %287 : vector<1x128xf32> to vector<128xf32>
    %289 = vector.shape_cast %288 : vector<128xf32> to vector<1x1x128xf32>
    %290 = vector.broadcast %289 : vector<1x1x128xf32> to vector<8x16x128xf32>
    %291 = arith.mulf %286, %290 : vector<8x16x128xf32>
    %292 = arith.addf %285, %291 : vector<8x16x128xf32>
    %293 = vector.extract_strided_slice %278 {offsets = [2, 0, 0], sizes = [8, 16, 128], strides = [1, 1, 1]} : vector<12x16x128xf32> to vector<8x16x128xf32>
    %294 = vector.extract_strided_slice %11 {offsets = [12, 0], sizes = [1, 128], strides = [1, 1]} : vector<25x128xf32> to vector<1x128xf32>
    %295 = vector.shape_cast %294 : vector<1x128xf32> to vector<128xf32>
    %296 = vector.shape_cast %295 : vector<128xf32> to vector<1x1x128xf32>
    %297 = vector.broadcast %296 : vector<1x1x128xf32> to vector<8x16x128xf32>
    %298 = arith.mulf %293, %297 : vector<8x16x128xf32>
    %299 = arith.addf %292, %298 : vector<8x16x128xf32>
    %300 = vector.extract_strided_slice %278 {offsets = [3, 0, 0], sizes = [8, 16, 128], strides = [1, 1, 1]} : vector<12x16x128xf32> to vector<8x16x128xf32>
    %301 = vector.extract_strided_slice %11 {offsets = [17, 0], sizes = [1, 128], strides = [1, 1]} : vector<25x128xf32> to vector<1x128xf32>
    %302 = vector.shape_cast %301 : vector<1x128xf32> to vector<128xf32>
    %303 = vector.shape_cast %302 : vector<128xf32> to vector<1x1x128xf32>
    %304 = vector.broadcast %303 : vector<1x1x128xf32> to vector<8x16x128xf32>
    %305 = arith.mulf %300, %304 : vector<8x16x128xf32>
    %306 = arith.addf %299, %305 : vector<8x16x128xf32>
    %307 = vector.extract_strided_slice %278 {offsets = [4, 0, 0], sizes = [8, 16, 128], strides = [1, 1, 1]} : vector<12x16x128xf32> to vector<8x16x128xf32>
    %308 = vector.extract_strided_slice %11 {offsets = [22, 0], sizes = [1, 128], strides = [1, 1]} : vector<25x128xf32> to vector<1x128xf32>
    %309 = vector.shape_cast %308 : vector<1x128xf32> to vector<128xf32>
    %310 = vector.shape_cast %309 : vector<128xf32> to vector<1x1x128xf32>
    %311 = vector.broadcast %310 : vector<1x1x128xf32> to vector<8x16x128xf32>
    %312 = arith.mulf %307, %311 : vector<8x16x128xf32>
    %313 = arith.addf %306, %312 : vector<8x16x128xf32>
    %314 = vector.extract_strided_slice %204 {offsets = [0, 3, 0], sizes = [12, 16, 128], strides = [1, 1, 1]} : vector<12x20x128xf32> to vector<12x16x128xf32>
    %315 = vector.extract_strided_slice %314 {offsets = [0, 0, 0], sizes = [8, 16, 128], strides = [1, 1, 1]} : vector<12x16x128xf32> to vector<8x16x128xf32>
    %316 = vector.extract_strided_slice %11 {offsets = [3, 0], sizes = [1, 128], strides = [1, 1]} : vector<25x128xf32> to vector<1x128xf32>
    %317 = vector.shape_cast %316 : vector<1x128xf32> to vector<128xf32>
    %318 = vector.shape_cast %317 : vector<128xf32> to vector<1x1x128xf32>
    %319 = vector.broadcast %318 : vector<1x1x128xf32> to vector<8x16x128xf32>
    %320 = arith.mulf %315, %319 : vector<8x16x128xf32>
    %321 = arith.addf %313, %320 : vector<8x16x128xf32>
    %322 = vector.extract_strided_slice %314 {offsets = [1, 0, 0], sizes = [8, 16, 128], strides = [1, 1, 1]} : vector<12x16x128xf32> to vector<8x16x128xf32>
    %323 = vector.extract_strided_slice %11 {offsets = [8, 0], sizes = [1, 128], strides = [1, 1]} : vector<25x128xf32> to vector<1x128xf32>
    %324 = vector.shape_cast %323 : vector<1x128xf32> to vector<128xf32>
    %325 = vector.shape_cast %324 : vector<128xf32> to vector<1x1x128xf32>
    %326 = vector.broadcast %325 : vector<1x1x128xf32> to vector<8x16x128xf32>
    %327 = arith.mulf %322, %326 : vector<8x16x128xf32>
    %328 = arith.addf %321, %327 : vector<8x16x128xf32>
    %329 = vector.extract_strided_slice %314 {offsets = [2, 0, 0], sizes = [8, 16, 128], strides = [1, 1, 1]} : vector<12x16x128xf32> to vector<8x16x128xf32>
    %330 = vector.extract_strided_slice %11 {offsets = [13, 0], sizes = [1, 128], strides = [1, 1]} : vector<25x128xf32> to vector<1x128xf32>
    %331 = vector.shape_cast %330 : vector<1x128xf32> to vector<128xf32>
    %332 = vector.shape_cast %331 : vector<128xf32> to vector<1x1x128xf32>
    %333 = vector.broadcast %332 : vector<1x1x128xf32> to vector<8x16x128xf32>
    %334 = arith.mulf %329, %333 : vector<8x16x128xf32>
    %335 = arith.addf %328, %334 : vector<8x16x128xf32>
    %336 = vector.extract_strided_slice %314 {offsets = [3, 0, 0], sizes = [8, 16, 128], strides = [1, 1, 1]} : vector<12x16x128xf32> to vector<8x16x128xf32>
    %337 = vector.extract_strided_slice %11 {offsets = [18, 0], sizes = [1, 128], strides = [1, 1]} : vector<25x128xf32> to vector<1x128xf32>
    %338 = vector.shape_cast %337 : vector<1x128xf32> to vector<128xf32>
    %339 = vector.shape_cast %338 : vector<128xf32> to vector<1x1x128xf32>
    %340 = vector.broadcast %339 : vector<1x1x128xf32> to vector<8x16x128xf32>
    %341 = arith.mulf %336, %340 : vector<8x16x128xf32>
    %342 = arith.addf %335, %341 : vector<8x16x128xf32>
    %343 = vector.extract_strided_slice %314 {offsets = [4, 0, 0], sizes = [8, 16, 128], strides = [1, 1, 1]} : vector<12x16x128xf32> to vector<8x16x128xf32>
    %344 = vector.extract_strided_slice %11 {offsets = [23, 0], sizes = [1, 128], strides = [1, 1]} : vector<25x128xf32> to vector<1x128xf32>
    %345 = vector.shape_cast %344 : vector<1x128xf32> to vector<128xf32>
    %346 = vector.shape_cast %345 : vector<128xf32> to vector<1x1x128xf32>
    %347 = vector.broadcast %346 : vector<1x1x128xf32> to vector<8x16x128xf32>
    %348 = arith.mulf %343, %347 : vector<8x16x128xf32>
    %349 = arith.addf %342, %348 : vector<8x16x128xf32>
    %350 = vector.extract_strided_slice %204 {offsets = [0, 4, 0], sizes = [12, 16, 128], strides = [1, 1, 1]} : vector<12x20x128xf32> to vector<12x16x128xf32>
    %351 = vector.extract_strided_slice %350 {offsets = [0, 0, 0], sizes = [8, 16, 128], strides = [1, 1, 1]} : vector<12x16x128xf32> to vector<8x16x128xf32>
    %352 = vector.extract_strided_slice %11 {offsets = [4, 0], sizes = [1, 128], strides = [1, 1]} : vector<25x128xf32> to vector<1x128xf32>
    %353 = vector.shape_cast %352 : vector<1x128xf32> to vector<128xf32>
    %354 = vector.shape_cast %353 : vector<128xf32> to vector<1x1x128xf32>
    %355 = vector.broadcast %354 : vector<1x1x128xf32> to vector<8x16x128xf32>
    %356 = arith.mulf %351, %355 : vector<8x16x128xf32>
    %357 = arith.addf %349, %356 : vector<8x16x128xf32>
    %358 = vector.extract_strided_slice %350 {offsets = [1, 0, 0], sizes = [8, 16, 128], strides = [1, 1, 1]} : vector<12x16x128xf32> to vector<8x16x128xf32>
    %359 = vector.extract_strided_slice %11 {offsets = [9, 0], sizes = [1, 128], strides = [1, 1]} : vector<25x128xf32> to vector<1x128xf32>
    %360 = vector.shape_cast %359 : vector<1x128xf32> to vector<128xf32>
    %361 = vector.shape_cast %360 : vector<128xf32> to vector<1x1x128xf32>
    %362 = vector.broadcast %361 : vector<1x1x128xf32> to vector<8x16x128xf32>
    %363 = arith.mulf %358, %362 : vector<8x16x128xf32>
    %364 = arith.addf %357, %363 : vector<8x16x128xf32>
    %365 = vector.extract_strided_slice %350 {offsets = [2, 0, 0], sizes = [8, 16, 128], strides = [1, 1, 1]} : vector<12x16x128xf32> to vector<8x16x128xf32>
    %366 = vector.extract_strided_slice %11 {offsets = [14, 0], sizes = [1, 128], strides = [1, 1]} : vector<25x128xf32> to vector<1x128xf32>
    %367 = vector.shape_cast %366 : vector<1x128xf32> to vector<128xf32>
    %368 = vector.shape_cast %367 : vector<128xf32> to vector<1x1x128xf32>
    %369 = vector.broadcast %368 : vector<1x1x128xf32> to vector<8x16x128xf32>
    %370 = arith.mulf %365, %369 : vector<8x16x128xf32>
    %371 = arith.addf %364, %370 : vector<8x16x128xf32>
    %372 = vector.extract_strided_slice %350 {offsets = [3, 0, 0], sizes = [8, 16, 128], strides = [1, 1, 1]} : vector<12x16x128xf32> to vector<8x16x128xf32>
    %373 = vector.extract_strided_slice %11 {offsets = [19, 0], sizes = [1, 128], strides = [1, 1]} : vector<25x128xf32> to vector<1x128xf32>
    %374 = vector.shape_cast %373 : vector<1x128xf32> to vector<128xf32>
    %375 = vector.shape_cast %374 : vector<128xf32> to vector<1x1x128xf32>
    %376 = vector.broadcast %375 : vector<1x1x128xf32> to vector<8x16x128xf32>
    %377 = arith.mulf %372, %376 : vector<8x16x128xf32>
    %378 = arith.addf %371, %377 : vector<8x16x128xf32>
    %379 = vector.extract_strided_slice %350 {offsets = [4, 0, 0], sizes = [8, 16, 128], strides = [1, 1, 1]} : vector<12x16x128xf32> to vector<8x16x128xf32>
    %380 = vector.extract_strided_slice %11 {offsets = [24, 0], sizes = [1, 128], strides = [1, 1]} : vector<25x128xf32> to vector<1x128xf32>
    %381 = vector.shape_cast %380 : vector<1x128xf32> to vector<128xf32>
    %382 = vector.shape_cast %381 : vector<128xf32> to vector<1x1x128xf32>
    %383 = vector.broadcast %382 : vector<1x1x128xf32> to vector<8x16x128xf32>
    %384 = arith.mulf %379, %383 : vector<8x16x128xf32>
    %385 = arith.addf %378, %384 : vector<8x16x128xf32>
    %c0_31 = arith.constant 0 : index
    %386 = arith.index_cast %202 : i32 to index
    %c0_32 = arith.constant 0 : index
    %c0_33 = arith.constant 0 : index
    %387 = vector.load %arg4[%c0_31, %386, %c0_32, %c0_33] : memref<1x16x16x128xf32, #tpu.memory_space<vmem>>, vector<1x8x16x128xf32>
    %388 = vector.shape_cast %387 : vector<1x8x16x128xf32> to vector<8x16x128xf32>
    %389 = vector.shape_cast %385 : vector<8x16x128xf32> to vector<1x8x16x128xf32>
    tpu.vector_store %arg4[%c0_31, %386, %c0_32, %c0_33], %389 {strides = array<i32>} : memref<1x16x16x128xf32, #tpu.memory_space<vmem>>, vector<1x8x16x128xf32>,
    %c2_i32 = arith.constant 2 : i32
    return
  }
  func.func @transform_0(%arg0: i32, %arg1: i32) -> (i32, i32, i32, i32) {
    %c0_i32 = arith.constant 0 : i32
    %c0_i32_0 = arith.constant 0 : i32
    %c0_i32_1 = arith.constant 0 : i32
    return %arg0, %c0_i32, %c0_i32_0, %arg1 : i32, i32, i32, i32
  }
  func.func @transform_1(%arg0: i32, %arg1: i32) -> (i32, i32) {
    %c0_i32 = arith.constant 0 : i32
    %c0_i32_0 = arith.constant 0 : i32
    return %c0_i32, %arg1 : i32, i32
  }
  func.func @transform_2(%arg0: i32, %arg1: i32) -> (i32, i32, i32, i32) {
    %c0_i32 = arith.constant 0 : i32
    %c0_i32_0 = arith.constant 0 : i32
    %c0_i32_1 = arith.constant 0 : i32
    return %arg0, %c0_i32, %c0_i32_0, %arg1 : i32, i32, i32, i32
  }
}

</mosaic_0001>

<bundles_post_ra>
// kernel: squeeze.1
= control target key start
LH: loop header
LB: loop body
LE: loop exit
PB: predicated region body
PF: predicated region fallthrough
CT: control target
= control target key end

     0   :  { %s68_s0 = inlined_call_operand.vmem [shape: f32[128,5,5], index: 0, kind: input, shape index: {}]   ;;  %s69_s1 = inlined_call_operand.vmem [shape: f32[128,25], index: 1, kind: output, shape index: {}]  }
   0x1   :  { %v2_v0 = vld [vmem:[%s68_s0] sm:$0x1f]   ;;  %v20_v1 = vld [vmem:[%s68_s0 + $0x8] sm:$0x1f]   ;;  %v22_v2 = vld [vmem:[%s68_s0 + $0x10] sm:$0x1f]  }
   0x2   :  { %3 = vst [vmem:[%s69_s1] sm:$0x1f] %v2_v0   ;;  %21 = vst [vmem:[%s69_s1 + $0x5] sm:$0x1f] %v20_v1   ;;  %v24_v3 = vld [vmem:[%s68_s0 + $0x18] sm:$0x1f]  }
   0x3   :  { %23 = vst [vmem:[%s69_s1 + $0xa] sm:$0x1f] %v22_v2   ;;  %v26_v4 = vld [vmem:[%s68_s0 + $0x20] sm:$0x1f]   ;;  %25 = vst [vmem:[%s69_s1 + $0xf] sm:$0x1f] %v24_v3  }
   0x4   :  { %27 = vst [vmem:[%s69_s1 + $0x14] sm:$0x1f] %v26_v4  }

// kernel: smoothing_forward.1
= control target key start
LH: loop header
LB: loop body
LE: loop exit
PB: predicated region body
PF: predicated region fallthrough
CT: control target
= control target key end

     0   :  { %7 = vsyncpa [#allocation4], 0  ;;  %s11881_s0 = inlined_call_operand.hbm [shape: f32[2,16,16,128], index: 0, kind: input, shape index: {}]   ;;  %s11882_s1 = inlined_call_operand.vmem [shape: f32[25,128], index: 1, kind: input, shape index: {}]   ;;  %s11883_s2 = inlined_call_operand.hbm [shape: f32[2,16,16,128], index: 2, kind: output, shape index: {}]  }
   0x1   :  { %9 = vsyncpa [#allocation4 + $0x1], 0 }
   0x2   :  { %10 = vsyncpa [#allocation5], 0 }
   0x3   :  { %12 = vsyncpa [#allocation5 + $0x1], 0  ;;  %s6054_s9 = smov 0   ;;  %s6056_s10 = smov 0  }
   0x4   :  { %s6058_s11 = smov 0   ;;  %s6060_s12 = smov 0  }
   0x5   :  { %s6062_s13 = smov 0   ;;  %s6064_s14 = smov 0  }
   0x6 LB: > { %s5763_s15 = sadd.s32 4294967295, %s6030_s14   ;;  %s5764_s16 = sadd.s32 4294967294, %s6030_s14   ;;  %s6030_s14 = sphi %s6064_s14, %s18_s14   ;;  %s6026_s13 = sphi %s6062_s13, %s13515_s13   ;;  %s6022_s12 = sphi %s6060_s12, %s13514_s12   ;;  %s6018_s11 = sphi %s6058_s11, %s13513_s11   ;;  %s6014_s10 = sphi %s6056_s10, %s13512_s10   ;;  %s6010_s9 = sphi %s6054_s9, %s13511_s9  }
   0x7   : > { %s30_s17 = sadd.s32 1, %s6026_s13  ;;  %s39_s18 = sadd.s32 1, %s6018_s11 }
   0x8   : > { %p32_p0 = scmp.ge.s32.totalorder %s30_s17, 2  ;;  %p46_p1 = scmp.ne.s32.totalorder %s6018_s11, %s6014_s10 }
   0x9   : > { %p47_p2 = scmp.eq.s32.totalorder %s6030_s14, 0  ;;  %p52_p3 = scmp.ne.s32.totalorder %s6014_s10, %s6010_s9 }
   0xa   : > { %s13517_s17 = smov (%p32_p0, %s30_s17), 0  ;;  %p53_p5 = scmp.eq.s32.totalorder %s5763_s15, 0 }
   0xb   : > { %p6095_p4 = por %p47_p2, %p46_p1  ;;  %s34_s20 = ssub.s32 %s6026_s13, %s13517_s17 }
   0xc   : > { %p104_p6 = scmp.eq.s32.totalorder %s5763_s15, 1  ;;  %p37_p7 = scmp.eq.s32.totalorder %s34_s20, 0 }
   0xd   : > { %p6101_p8 = por %p53_p5, %p52_p3  ;;  %p110_p10 = scmp.eq.s32.totalorder %s5764_s16, 1 }
   0xe   : > { %p6105_p9 = por %p104_p6, %p46_p1  ;;  %p5810_p13 = scmp.lt.s32.totalorder %s6030_s14, 2 }
   0xf   : > { %s6110_s23 = scalar_select %p37_p7, %s6018_s11, %s39_s18  }
  0x10   : > { %s12444_s22 = scalar_select %p6105_p9, 1, 0 }
  0x11   : > { %p6112_p11 = por %p110_p10, %p52_p3  ;;  %s137_s25 = sand.u32 1, %s6018_s11  }
  0x12   : > { %s5768_s26 = sshll.u32 %s137_s25, 8  ;;  %s5796_s27 = sshll.u32 %s6026_s13, 12 }
  0x13   : > { %s12445_s24 = scalar_select %p6112_p11, 1, 0 }
  0x14   : > { %s6123_s30 = scalar_lea.hbm %s11881_s0, %s5796_s27  ;;  %s141_s3 = scalar_lea.vmem [#allocation3], %s5768_s26 }
  0x15   : > { %s149_s4 = sshll.u32 %s141_s3, 4  ;;  %p6129_p0 = pnand %p5810_p13, %p6095_p4  ;;  %s6125_s4 = int_to_ptr.vmem [resolvable:$true] %s149_s4 }
  0x16   : > { %s6134_s6 = scalar_lea.sflag [#allocation4], %s137_s25  ;;  %s5918_s7 = scalar_lea.hbm %s6123_s30, 4096 }
  0x17   : > { %p5919_p2 = scmp.ne.s32.totalorder %s6123_s30, %s5918_s7  ;;  %p5920_p3 = pneg %p6129_p0 }
  0x18   : > { %s5923_s16 = scalar_lea.hbm %s11881_s0, 8192  ;;  %p5924_p4 = scmp.lt.u32.totalorder %s6123_s30, %s11881_s0 }
  0x19   : > { %p5921_p5 = pnand %p5920_p3, %p5919_p2  ;;  %p5925_p7 = scmp.lt.u32.totalorder %s5923_s16, %s5918_s7 }
  0x1a   : > { %p5927_p13 = scmp.lt.u32.totalorder %s5918_s7, %s6123_s30 }
  0x1b   : > { %p5922_p6 = pneg %p5921_p5  ;;  %p5926_p10 = por %p5925_p7, %p5924_p4 }
  0x1d   : > { %p5928_p12 = por %p5927_p13, %p5926_p10 }
  0x1f   : > { %p5929_p1 = pnand %p5928_p12, %p5922_p6 }
  0x21   : > { %5932 = shalt.err (!%p5929_p1)
}
  0x22   : > { %s5933_s20 = scalar_lea.vmem %s6125_s4, 4096  ;;  %s6032_s25 = smov [#allocation3]  }
  0x23   : > { %p5934_p2 = scmp.ne.s32.totalorder %s6125_s4, %s5933_s20  ;;  %s5938_s26 = sshll.u32 %s6032_s25, 4  ;;  %s5939_s26 = int_to_ptr.vmem [resolvable:$false] %s5938_s26 }
  0x24   : > { %s5940_s27 = scalar_lea.vmem %s5939_s26, 8192  ;;  %p5941_p9 = scmp.lt.s32.totalorder %s6125_s4, %s5939_s26 }
  0x25   : > { %p5936_p5 = pnand %p5934_p2, %p5920_p3  ;;  %p5942_p4 = scmp.lt.s32.totalorder %s5940_s27, %s5933_s20 }
  0x27   : > { %p5937_p11 = pneg %p5936_p5  ;;  %p5943_p7 = por %p5942_p4, %p5941_p9 }
  0x29   : > { %p5944_p10 = pnand %p5943_p7, %p5937_p11 }
  0x2b   : > { %5947 = shalt.err (!%p5944_p10)
}
  0x2c   : > { %s6033_s28 = smov 128   ;;  %s6034_s29 = smov 8  }
  0x2d   : > { %5805 = dma.hbm_to_vmem [thread:$0]  (!%p6129_p0), %s6123_s30, 4096, %s6125_s4, %s6134_s6, %s6033_s28, %s6033_s28, %s6034_s29  }
  0x2e   : > { %p157_p12 = scmp.lt.s32.totalorder %s6030_s14, 3  ;;  %p12447_p1 = scmp.ge.s32.totalorder %s6030_s14, 1 }
  0x30   : > { %p158_p3 = pnand %p12447_p1, %p157_p12 }
  0x32   : > { %161 = sbr.rel (%p158_p3) target bundleno = 1048 (0x418), region = 28 }
  0x39   : > { %s6166_s3 = sand.u32 1, %s6014_s10  }
  0x3a   : > { %s5772_s7 = sshll.u32 %s6166_s3, 8  ;;  %s164_s8 = scalar_lea.sflag [#allocation4], %s6166_s3 }
  0x3b   : > { %s6172_s15 = scalar_lea.vmem [#allocation3], %s5772_s7 }
  0x3c   : > { %6001 = dma.done.wait (%p6101_p8), %s164_s8, 4096  }
  0x3d   : > { %6003 = vsyncadd (%p6101_p8), %s164_s8, 4294963200  ;;  %v348_v0 = vlaneseq  ;;  %v6035_v1 = vmov 0.0   ;;  %v306_v11 = vld [vmem:[%s11882_s1] sm:$0xff]  ;;  %v243_v13 = vld [vmem:[%s6172_s15 + $0x8] sm:$0xff]  ;;  %vm580_vm0 = vcmask 1046528   ;;  %vm1201_vm1 = vcmask 1045504  }
  0x3e   : > { %196 = vst [vmem:[#allocation2] sm:$0xff] %v6035_v1  ;;  %198 = vst [vmem:[#allocation2 + $0x10] sm:$0xf] %v6035_v1  ;;  %v242_v12 = vld [vmem:[%s6172_s15] sm:$0xff]  ;;  %v244_v16 = vld [vmem:[%s6172_s15 + $0x10] sm:$0xff]  ;;  %vm1822_vm2 = vcmask 1044480  }
  0x3f   : > { %201 = vst [vmem:[#allocation2 + $0x28] sm:$0xf] %v6035_v1  ;;  %205 = vst [vmem:[#allocation2 + $0x1c0] sm:$0xf] %v6035_v1  ;;  %v349_v2 = vshrl.u32 %v348_v0, 7  ;;  %v245_v17 = vld [vmem:[%s6172_s15 + $0x18] sm:$0xff] }
  0x40   : > { %208 = vst [vmem:[#allocation2 + $0x1d8] sm:$0xf] %v6035_v1  ;;  %210 = vst [vmem:[#allocation2 + $0x30] sm:$0x3] %v6035_v1  ;;  %v246_v20 = vld [vmem:[%s6172_s15 + $0x20] sm:$0xff]  ;;  %v247_v21 = vld [vmem:[%s6172_s15 + $0x28] sm:$0xff] }
  0x41   : > { %211 = vst [vmem:[#allocation2 + $0x48] sm:$0x3] %v6035_v1  ;;  %212 = vst [vmem:[#allocation2 + $0x60] sm:$0x3] %v6035_v1  ;;  %v6178_v3 = vsub.s32 1, %v349_v2  ;;  %v6180_v4 = vsub.s32 0, %v349_v2 }
  0x42   : > { %213 = vst [vmem:[#allocation2 + $0x78] sm:$0x3] %v6035_v1  ;;  %214 = vst [vmem:[#allocation2 + $0x90] sm:$0x3] %v6035_v1  ;;  %v6182_v5 = vsub.s32 5, %v349_v2  ;;  %v6184_v6 = vsub.s32 2, %v349_v2 }
  0x43   : > { %215 = vst [vmem:[#allocation2 + $0xa8] sm:$0x3] %v6035_v1  ;;  %216 = vst [vmem:[#allocation2 + $0xc0] sm:$0x3] %v6035_v1  ;;  %v6186_v7 = vsub.s32 7, %v349_v2  ;;  %v6188_v8 = vsub.s32 6, %v349_v2  ;;  %v6202_v15 = vrot.slane %v306_v11, %v6178_v3  ;;  %v6207_v18 = vrot.slane %v306_v11, %v6180_v4 }
  0x44   : > { %217 = vst [vmem:[#allocation2 + $0xd8] sm:$0x3] %v6035_v1  ;;  %218 = vst [vmem:[#allocation2 + $0xf0] sm:$0x3] %v6035_v1  ;;  %v6190_v9 = vsub.s32 3, %v349_v2  ;;  %v6192_v10 = vsub.s32 4, %v349_v2  ;;  %v6210_v19 = vrot.slane %v306_v11, %v6182_v5  ;;  %v6219_v24 = vrot.slane %v306_v11, %v6184_v6 }
  0x45   : > { %219 = vst [vmem:[#allocation2 + $0x108] sm:$0x3] %v6035_v1  ;;  %220 = vst [vmem:[#allocation2 + $0x120] sm:$0x3] %v6035_v1  ;;  %v248_v22 = vld [vmem:[%s6172_s15 + $0x30] sm:$0xff]  ;;  %v6216_v23 = vrot.slane %v306_v11, %v6188_v8  ;;  %v6222_v25 = vrot.slane %v306_v11, %v6186_v7  ;;  %v249_v27 = vld [vmem:[%s6172_s15 + $0x38] sm:$0xff] }
  0x46   : > { %221 = vst [vmem:[#allocation2 + $0x138] sm:$0x3] %v6035_v1  ;;  %222 = vst [vmem:[#allocation2 + $0x150] sm:$0x3] %v6035_v1  ;;  %v6199_v14 = vld [vmem:[#allocation2 + $0x28] sm:$0xf]  ;;  %v6225_v26 = vrot.slane %v306_v11, %v6190_v9  ;;  %v6236_v33 = vrot.slane %v306_v11, %v6192_v10 }
  0x47   : > { %223 = vst [vmem:[#allocation2 + $0x168] sm:$0x3] %v6035_v1  ;;  %224 = vst [vmem:[#allocation2 + $0x180] sm:$0x3] %v6035_v1  ;;  %v250_v28 = vld [vmem:[%s6172_s15 + $0x40] sm:$0xff]  ;;  %v251_v29 = vld [vmem:[%s6172_s15 + $0x48] sm:$0xff]  ;;  %v659_v46 = vmul.f32 %v6216_v23, %v6199_v14  ;;  %v1280_v51 = vmul.f32 %v6222_v25, %v6199_v14  ;;  %v537_v52 = vmul.f32 %v6202_v15, %v6199_v14 }
  0x48   : > { %225 = vst [vmem:[#allocation2 + $0x198] sm:$0x3] %v6035_v1  ;;  %226 = vst [vmem:[#allocation2 + $0x42] sm:$0x3] %v6035_v1  ;;  %v6231_v30 = vmul.f32 0.0, %v6207_v18  ;;  %v388_v31 = vmul.f32 0.0, %v6210_v19 }
  0x49   : > { %227 = vst [vmem:[#allocation2 + $0x5a] sm:$0x3] %v6035_v1  ;;  %228 = vst [vmem:[#allocation2 + $0x72] sm:$0x3] %v6035_v1  ;;  %v532_v32 = vmul.f32 0.0, %v6202_v15  ;;  %v252_v34 = vld [vmem:[%s6172_s15 + $0x50] sm:$0xff] }
  0x4a   : > { %229 = vst [vmem:[#allocation2 + $0x8a] sm:$0x3] %v6035_v1  ;;  %230 = vst [vmem:[#allocation2 + $0xa2] sm:$0x3] %v6035_v1  ;;  %v253_v35 = vld [vmem:[%s6172_s15 + $0x58] sm:$0xff]  ;;  %v254_v36 = vld [vmem:[%s6172_s15 + $0x60] sm:$0xff]  ;;  %v6269_v56 = vadd.f32 %v388_v31, %v6231_v30 }
  0x4b   : > { %231 = vst [vmem:[#allocation2 + $0xba] sm:$0x3] %v6035_v1  ;;  %232 = vst [vmem:[#allocation2 + $0xd2] sm:$0x3] %v6035_v1  ;;  %v6242_v37 = vmul.f32 0.0, %v6216_v23  ;;  %v1153_v38 = vmul.f32 0.0, %v6219_v24 }
  0x4c   : > { %233 = vst [vmem:[#allocation2 + $0xea] sm:$0x3] %v6035_v1  ;;  %234 = vst [vmem:[#allocation2 + $0x102] sm:$0x3] %v6035_v1  ;;  %v6246_v39 = vmul.f32 0.0, %v6222_v25  ;;  %v1774_v40 = vmul.f32 0.0, %v6225_v26 }
  0x4d   : > { %235 = vst [vmem:[#allocation2 + $0x11a] sm:$0x3] %v6035_v1  ;;  %236 = vst [vmem:[#allocation2 + $0x132] sm:$0x3] %v6035_v1  ;;  %v255_v41 = vld [vmem:[%s6172_s15 + $0x68] sm:$0xff]  ;;  %v256_v42 = vld [vmem:[%s6172_s15 + $0x70] sm:$0xff] }
  0x4e   : > { %237 = vst [vmem:[#allocation2 + $0x14a] sm:$0x3] %v6035_v1  ;;  %238 = vst [vmem:[#allocation2 + $0x162] sm:$0x3] %v6035_v1  ;;  %v257_v43 = vld [vmem:[%s6172_s15 + $0x78] sm:$0xff]  ;;  %v6252_v44 = vrot.slane %v532_v32, 1 }
  0x4f   : > { %239 = vst [vmem:[#allocation2 + $0x17a] sm:$0x3] %v6035_v1  ;;  %240 = vst [vmem:[#allocation2 + $0x192] sm:$0x3] %v6035_v1  ;;  %v2395_v45 = vmul.f32 0.0, %v6236_v33  ;;  %v258_v47 = vld [vmem:[%s6172_s15 + $0x80] sm:$0xff] }
  0x50   : > { %241 = vst [vmem:[#allocation2 + $0x1aa] sm:$0x3] %v6035_v1  ;;  %12448 = vst [vmem:[#allocation9_spill] sm:$0xff] %v6202_v15  ;;  %v259_v48 = vld [vmem:[%s6172_s15 + $0x88] sm:$0xff]  ;;  %v260_v49 = vld [vmem:[%s6172_s15 + $0x90] sm:$0xff]  ;;  %v11886_v50 = vrot.slane %v6242_v37, 1 }
  0x51   : > { %274 = vst [vmem:[#allocation2 + $0x32] sm:$0xff] %v242_v12  ;;  %275 = vst [vmem:[#allocation2 + $0x3a] sm:$0xff] %v243_v13  ;;  %vm2443_vm3 = vcmask 1043456   ;;  %v261_v53 = vld [vmem:[%s6172_s15 + $0x98] sm:$0xff]  ;;  %v262_v54 = vld [vmem:[%s6172_s15 + $0xa0] sm:$0xff]  ;;  %v6271_v57 = vrot.slane %v1153_v38, 2 }
  0x52   : > { %12449 = vst [vmem:[#allocation10_spill] sm:$0xff] %v6207_v18  ;;  %12450 = vst [vmem:[#allocation11_spill] sm:$0xff] %v6210_v19  ;;  %v263_v55 = vld [vmem:[%s6172_s15 + $0xa8] sm:$0xff]  ;;  %v11885_v58 = vrot.slane %v6246_v39, 2  ;;  %v6278_v61 = vrot.slane %v1774_v40, 3  ;;  %v6280_v62 = vrot.slane %v2395_v45, 4  ;;  %v2400_v45 = vmul.f32 %v6236_v33, %v6199_v14 }
  0x53   : > { %276 = vst [vmem:[#allocation2 + $0x4a] sm:$0xff] %v244_v16  ;;  %277 = vst [vmem:[#allocation2 + $0x52] sm:$0xff] %v245_v17  ;;  %v708_v63 = vrot.slane %v659_v46, 1  ;;  %v1329_v1 = vrot.slane %v1280_v51, 2  ;;  %s6814_s20 = scalar_lea.vmem [#allocation6], %s5772_s7  ;;  %s5797_s4 = sshll.u32 %s6022_s12, 12 }
  0x54   : > { %12451 = vst [vmem:[#allocation12_spill] sm:$0xff] %v6216_v23  ;;  %12452 = vst [vmem:[#allocation13_spill] sm:$0xff] %v6219_v24  ;;  %s5661_s5 = sshll.u32 %s6814_s20, 4  ;;  %s11829_s18 = scalar_lea.hbm %s11883_s2, %s5797_s4  ;;  %s11831_s5 = int_to_ptr.vmem [resolvable:$true] %s5661_s5 }
  0x55   : > { %12453 = vst [vmem:[#allocation14_spill] sm:$0xff] %v6222_v25  ;;  %12454 = vst [vmem:[#allocation15_spill] sm:$0xff] %v6225_v26  ;;  %v6308_v31 = vsel %vm1201_vm1, %v11885_v58, %v1329_v1  ;;  %s5647_s12 = scalar_lea.sflag [#allocation5], %s6166_s3  ;;  %s5948_s19 = scalar_lea.vmem %s11831_s5, 4096 }
  0x56   : > { %278 = vst [vmem:[#allocation2 + $0x62] sm:$0xff] %v246_v20  ;;  %279 = vst [vmem:[#allocation2 + $0x6a] sm:$0xff] %v247_v21  ;;  %v589_v20 = vrot.slane %v537_v52, 1  ;;  %p5949_p8 = scmp.ne.s32.totalorder %s11831_s5, %s5948_s19  ;;  %p13508_p9 = scmp.ne.s32.totalorder %s12444_s22, 0 }
  0x57   : > { %280 = vst [vmem:[#allocation2 + $0x7a] sm:$0xff] %v248_v22  ;;  %12455 = vst [vmem:[#allocation16_spill] sm:$0xff] %v6236_v33  ;;  %s6036_s25 = smov [#allocation6]  }
  0x58   : > { %281 = vst [vmem:[#allocation2 + $0x82] sm:$0xff] %v249_v27  ;;  %282 = vst [vmem:[#allocation2 + $0x92] sm:$0xff] %v250_v28  ;;  %v6274_v59 = vld [vmem:[#allocation2 + $0x30] sm:$0xff]  ;;  %v6276_v60 = vld [vmem:[#allocation2 + $0x38] sm:$0xff]  ;;  %v1158_v28 = vmul.f32 %v6219_v24, %v6199_v14  ;;  %p5950_p11 = pnand %p5949_p8, %p13508_p9  ;;  %s5952_s26 = sshll.u32 %s6036_s25, 4  ;;  %s5953_s26 = int_to_ptr.vmem [resolvable:$false] %s5952_s26 }
  0x59   : > { %283 = vst [vmem:[#allocation2 + $0x9a] sm:$0xff] %v251_v29  ;;  %284 = vst [vmem:[#allocation2 + $0xaa] sm:$0xff] %v252_v34  ;;  %v6282_v0 = vld [vmem:[#allocation2 + $0x40] sm:$0xf]  ;;  %v390_v2 = vmul.f32 %v6210_v19, %v6274_v59  ;;  %v660_v11 = vmul.f32 %v6216_v23, %v6274_v59  ;;  %v661_v12 = vmul.f32 %v6216_v23, %v6276_v60  ;;  %s5954_s27 = scalar_lea.vmem %s5953_s26, 8192  ;;  %p5955_p6 = scmp.lt.s32.totalorder %s11831_s5, %s5953_s26 }
  0x5a   : > { %285 = vst [vmem:[#allocation2 + $0xb2] sm:$0xff] %v253_v35  ;;  %286 = vst [vmem:[#allocation2 + $0xc2] sm:$0xff] %v254_v36  ;;  %v1281_v13 = vmul.f32 %v6222_v25, %v6274_v59  ;;  %v1282_v16 = vmul.f32 %v6222_v25, %v6276_v60  ;;  %v391_v17 = vmul.f32 %v6210_v19, %v6276_v60  ;;  %v6313_v34 = vld [vmem:[#allocation2 + $0x48] sm:$0xff]  ;;  %v6324_v46 = vld [vmem:[#allocation2 + $0x50] sm:$0xff]  ;;  %p5951_p0 = pneg %p5950_p11  ;;  %p5956_p13 = scmp.lt.s32.totalorder %s5954_s27, %s5948_s19 }
  0x5b   : > { %287 = vst [vmem:[#allocation2 + $0xca] sm:$0xff] %v255_v41  ;;  %288 = vst [vmem:[#allocation2 + $0xda] sm:$0xff] %v256_v42  ;;  %v710_v21 = vrot.slane %v660_v11, 1  ;;  %v711_v22 = vrot.slane %v661_v12, 1  ;;  %v662_v27 = vmul.f32 %v6216_v23, %v6282_v0  ;;  %v6303_v29 = vsel %vm580_vm0, %v11886_v50, %v708_v63  ;;  %v264_v12 = vld [vmem:[%s6172_s15 + $0xb0] sm:$0xff] }
  0x5c   : > { %289 = vst [vmem:[#allocation2 + $0xe2] sm:$0xff] %v257_v43  ;;  %290 = vst [vmem:[#allocation2 + $0xf2] sm:$0xff] %v258_v47  ;;  %v6311_v32 = vadd.f32 %v390_v2, %v6231_v30  ;;  %v1331_v35 = vrot.slane %v1281_v13, 2  ;;  %v1332_v36 = vrot.slane %v1282_v16, 2  ;;  %v1283_v40 = vmul.f32 %v6222_v25, %v6282_v0  ;;  %v265_v13 = vld [vmem:[%s6172_s15 + $0xb8] sm:$0xff]  ;;  %p5957_p2 = por %p5956_p13, %p5955_p6 }
  0x5d   : > { %291 = vst [vmem:[#allocation2 + $0xfa] sm:$0xff] %v259_v48  ;;  %292 = vst [vmem:[#allocation2 + $0x10a] sm:$0xff] %v260_v49  ;;  %v713_v38 = vrot.slane %v662_v27, 1  ;;  %v6318_v41 = vadd.f32 %v391_v17, %v6231_v30  ;;  %v1210_v42 = vrot.slane %v1158_v28, 2  ;;  %v1779_v43 = vmul.f32 %v6225_v26, %v6199_v14  ;;  %v266_v27 = vld [vmem:[%s6172_s15 + $0xc0] sm:$0xff]  ;;  %v267_v28 = vld [vmem:[%s6172_s15 + $0xc8] sm:$0xff] }
  0x5e   : > { %12456 = vst [vmem:[#allocation17_spill] sm:$0xff] %v6274_v59  ;;  %12457 = vst [vmem:[#allocation18_spill] sm:$0xff] %v6276_v60  ;;  %v6327_v47 = vsel %vm580_vm0, %v710_v21, %v711_v22  ;;  %v6331_v48 = vsel %vm580_vm0, %v6252_v44, %v589_v20  ;;  %v1334_v30 = vrot.slane %v1283_v40, 2  ;;  %v356_v49 = vmul.f32 %v6207_v18, %v6274_v59  ;;  %p5958_p5 = pnand %p5957_p2, %p5951_p0 }
  0x5f   : > { %293 = vst [vmem:[#allocation2 + $0x112] sm:$0xff] %v261_v53  ;;  %294 = vst [vmem:[#allocation2 + $0x122] sm:$0xff] %v262_v54  ;;  %v1831_v52 = vrot.slane %v1779_v43, 3  ;;  %v2452_v53 = vrot.slane %v2400_v45, 4  ;;  %v392_v54 = vmul.f32 %v6210_v19, %v6313_v34  ;;  %v6340_v63 = vsel %vm1201_vm1, %v1331_v35, %v1332_v36  ;;  %v268_v35 = vld [vmem:[%s6172_s15 + $0xd0] sm:$0xff]  ;;  %v269_v43 = vld [vmem:[%s6172_s15 + $0xd8] sm:$0xff] }
  0x60   : > { %295 = vst [vmem:[#allocation2 + $0x12a] sm:$0xff] %v263_v55  ;;  %12458 = vst [vmem:[#allocation19_spill] sm:$0xff] %v6280_v62  ;;  %v538_v55 = vmul.f32 %v6202_v15, %v6274_v59  ;;  %v6343_v1 = vsel %vm580_vm0, %v711_v22, %v713_v38  ;;  %v6347_v2 = vmul.f32 %v6202_v15, %v6276_v60  ;;  %v270_v45 = vld [vmem:[%s6172_s15 + $0xe0] sm:$0xff] }
  0x61   : > { %12459 = vst [vmem:[#allocation20_spill] sm:$0xff] %v6308_v31  ;;  %12460 = vst [vmem:[#allocation21_spill] sm:$0xff] %v6311_v32  ;;  %v6351_v11 = vmul.f32 %v6216_v23, %v6313_v34  ;;  %v6357_v16 = vsel %vm1201_vm1, %v6271_v57, %v1210_v42  ;;  %v6361_v17 = vsel %vm2443_vm3, %v6280_v62, %v2452_v53  ;;  %v6632_v31 = vld [vmem:[#allocation2 + $0x10] sm:$0xf] }
  0x62   : > { %12461 = vst [vmem:[#allocation22_spill] sm:$0xff] %v6313_v34  ;;  %12462 = vst [vmem:[#allocation23_spill] sm:$0xff] %v6318_v41  ;;  %v591_v20 = vrot.slane %v538_v55, 1  ;;  %v6365_v21 = vmul.f32 %v6216_v23, %v6324_v46  ;;  %v6374_v38 = vsel %vm1201_vm1, %v1332_v36, %v1334_v30  ;;  %v11887_v40 = vrot.slane %v6347_v2, 1 }
  0x63   : > { %12463 = vst [vmem:[#allocation24_spill] sm:$0xff] %v6324_v46  ;;  %12464 = vst [vmem:[#allocation25_spill] sm:$0xff] %v6327_v47  ;;  %v3037_v51 = vld [vmem:[#allocation2 + $0xe8] sm:$0xf]  ;;  %v6379_v42 = vmul.f32 %v6219_v24, %v6274_v59  ;;  %v6386_v53 = vsel %vm1822_vm2, %v6278_v61, %v1831_v52  ;;  %v6388_v36 = vadd.f32 %v392_v54, %v356_v49 }
  0x64   : > { %12465 = vst [vmem:[#allocation26_spill] sm:$0xff] %v6331_v48  ;;  %12466 = vst [vmem:[#allocation27_spill] sm:$0xff] %v6340_v63  ;;  %v6368_v22 = vmul.f32 %v3037_v51, %v6202_v15  ;;  %v271_v51 = vld [vmem:[%s6172_s15 + $0xe8] sm:$0xff]  ;;  %v6393_v55 = vmul.f32 %v6219_v24, %v6276_v60  ;;  %v6405_v49 = vmul.f32 %v6222_v25, %v6313_v34  ;;  %v6583_v63 = vld [vmem:[%s11882_s1 + $0x18] ss:$0 sm:$0xff] }
  0x65   : > { %12467 = vst [vmem:[#allocation28_spill] sm:$0xff] %v6343_v1  ;;  %12468 = vst [vmem:[#allocation29_spill] sm:$0xff] %v6347_v2  ;;  %v6409_v54 = vmul.f32 %v6222_v25, %v6324_v46 }
  0x66   : > { %12469 = vst [vmem:[#allocation30_spill] sm:$0xff] %v6351_v11  ;;  %12470 = vst [vmem:[#allocation31_spill] sm:$0xff] %v6357_v16 }
  0x67   : > { %12471 = vst [vmem:[#allocation32_spill] sm:$0xff] %v6361_v17  ;;  %12472 = vst [vmem:[#allocation33_spill] sm:$0xff] %v6365_v21 }
  0x68   : > { %12473 = vst [vmem:[#allocation34_spill] sm:$0xff] %v6368_v22  ;;  %296 = vst [vmem:[#allocation2 + $0x13a] sm:$0xff] %v264_v12  ;;  %v272_v12 = vld [vmem:[%s6172_s15 + $0xf0] sm:$0xff]  ;;  %v6452_v22 = vld [vmem:[#allocation2 + $0x68] sm:$0xff] }
  0x69   : > { %297 = vst [vmem:[#allocation2 + $0x142] sm:$0xff] %v265_v13  ;;  %12474 = vst [vmem:[#allocation35_spill] sm:$0xff] %v6374_v38  ;;  %v273_v13 = vld [vmem:[%s6172_s15 + $0xf8] sm:$0xff] }
  0x6a   : > { %12475 = vst [vmem:[#allocation36_spill] sm:$0xff] %v6379_v42  ;;  %298 = vst [vmem:[#allocation2 + $0x152] sm:$0xff] %v266_v27  ;;  %v6400_v27 = vld [vmem:[%s11882_s1 + $0x8] sm:$0xff] }
  0x6b   : > { %299 = vst [vmem:[#allocation2 + $0x15a] sm:$0xff] %v267_v28  ;;  %300 = vst [vmem:[#allocation2 + $0x16a] sm:$0xff] %v268_v35  ;;  %v6413_v28 = vmul.f32 %v6225_v26, %v6274_v59  ;;  %v6418_v35 = vld [vmem:[%s11882_s1 + $0x10] sm:$0xff]  ;;  %v6449_v58 = vrot.slane %v6400_v27, %v6192_v10 }
  0x6c   : > { %12476 = vst [vmem:[#allocation37_spill] sm:$0xff] %v6386_v53  ;;  %12477 = vst [vmem:[#allocation38_spill] sm:$0xff] %v6388_v36  ;;  %v6441_v30 = vrot.slane %v6418_v35, %v6180_v4  ;;  %v6445_v52 = vrot.slane %v6418_v35, %v6182_v5  ;;  %v6464_v2 = vrot.slane %v6418_v35, %v6178_v3 }
  0x6d   : > { %12478 = vst [vmem:[#allocation39_spill] sm:$0xff] %v6393_v55  ;;  %301 = vst [vmem:[#allocation2 + $0x172] sm:$0xff] %v269_v43  ;;  %v6422_v43 = vrot.slane %v6400_v27, %v6184_v6  ;;  %v6499_v53 = vmul.f32 %v6225_v26, %v6276_v60 }
  0x6e   : > { %302 = vst [vmem:[#allocation2 + $0x182] sm:$0xff] %v270_v45  ;;  %303 = vst [vmem:[#allocation2 + $0x18a] sm:$0xff] %v271_v51  ;;  %v6426_v45 = vrot.slane %v6400_v27, %v6186_v7  ;;  %v6430_v51 = vrot.slane %v6400_v27, %v6190_v9  ;;  %v905_v19 = vmul.f32 %v6441_v30, %v6313_v34 }
  0x6f   : > { %12479 = vst [vmem:[#allocation40_spill] sm:$0xff] %v6405_v49  ;;  %12480 = vst [vmem:[#allocation41_spill] sm:$0xff] %v6409_v54  ;;  %v425_v23 = vmul.f32 %v6422_v43, %v6276_v60  ;;  %v6486_v54 = vmul.f32 %v6445_v52, %v6452_v22  ;;  %v1402_v49 = vmul.f32 %v6449_v58, %v6274_v59 }
  0x70   : > { %12481 = vst [vmem:[#allocation42_spill] sm:$0xff] %v6413_v28  ;;  %304 = vst [vmem:[#allocation2 + $0x19a] sm:$0xff] %v272_v12  ;;  %v6435_v12 = vsel %vm580_vm0, %v591_v20, %v11887_v40  ;;  %v424_v20 = vmul.f32 %v6422_v43, %v6274_v59  ;;  %v6458_v40 = vrot.slane %v6418_v35, %v6192_v10  ;;  %v953_v38 = vrot.slane %v905_v19, 1 }
  0x71   : > { %305 = vst [vmem:[#allocation2 + $0x1a2] sm:$0xff] %v273_v13  ;;  %12482 = vst [vmem:[#allocation43_spill] sm:$0xff] %v6422_v43  ;;  %v6437_v13 = vld [vmem:[#allocation2 + $0x60] sm:$0xff]  ;;  %v781_v25 = vmul.f32 %v6430_v51, %v6274_v59  ;;  %v6470_v50 = vmul.f32 %v6430_v51, %v6276_v60  ;;  %v6476_v10 = vmul.f32 %v6441_v30, %v6324_v46  ;;  %v12500_v48 = vrot.slane %v6486_v54, 1 }
  0x72   : > { %12483 = vst [vmem:[#allocation44_spill] sm:$0xff] %v6426_v45  ;;  %12484 = vst [vmem:[#allocation45_spill] sm:$0xff] %v6430_v51  ;;  %v440_v18 = vadd.f32 %v424_v20, %v6269_v56  ;;  %v460_v17 = vmul.f32 %v6426_v45, %v6313_v34  ;;  %v1029_v28 = vmul.f32 %v6445_v52, %v6437_v13 }
  0x73   : > { %12485 = vst [vmem:[#allocation46_spill] sm:$0xff] %v6435_v12  ;;  %12486 = vst [vmem:[#allocation47_spill] sm:$0xff] %v6437_v13  ;;  %v829_v42 = vrot.slane %v781_v25, 1  ;;  %v496_v20 = vmul.f32 %v6458_v40, %v6437_v13  ;;  %v6495_v25 = vmul.f32 %v6449_v58, %v6276_v60  ;;  %v6502_v12 = vadd.f32 %v425_v23, %v6269_v56 }
  0x74   : > { %12487 = vst [vmem:[#allocation48_spill] sm:$0xff] %v6441_v30  ;;  %12488 = vst [vmem:[#allocation49_spill] sm:$0xff] %v6445_v52  ;;  %v476_v21 = vadd.f32 %v460_v17, %v440_v18  ;;  %v11905_v16 = vrot.slane %v6476_v10, 1  ;;  %v1526_v18 = vmul.f32 %v6464_v2, %v6313_v34  ;;  %v12493_v11 = vrot.slane %v6470_v50, 1 }
  0x75   : > { %12489 = vst [vmem:[#allocation50_spill] sm:$0xff] %v6449_v58  ;;  %12490 = vst [vmem:[#allocation51_spill] sm:$0xff] %v6458_v40  ;;  %v1077_v36 = vrot.slane %v1029_v28, 1  ;;  %v6512_v1 = vmul.f32 %v6464_v2, %v6324_v46  ;;  %v1450_v23 = vrot.slane %v1402_v49, 2  ;;  %v6518_v56 = vrot.slane %v6418_v35, %v6188_v8 }
  0x76   : > { %12491 = vst [vmem:[#allocation52_spill] sm:$0xff] %v6464_v2  ;;  %12492 = vst [vmem:[#allocation53_spill] sm:$0xff] %v6499_v53  ;;  %v512_v17 = vadd.f32 %v496_v20, %v476_v21  ;;  %v831_v55 = vsel %vm580_vm0, %v829_v42, %v12493_v11  ;;  %v1574_v20 = vrot.slane %v1526_v18, 2  ;;  %v6523_v11 = vrot.slane %v6400_v27, %v6180_v4 }
  0x77   : > { %12494 = vst [vmem:[#allocation54_spill] sm:$0xff] %v6518_v56  ;;  %v6527_v42 = vrot.slane %v6400_v27, %v6182_v5  ;;  %v1650_v49 = vmul.f32 %v6518_v56, %v6437_v13  ;;  %v6534_v19 = vmul.f32 %v6518_v56, %v6452_v22  ;;  %v6538_v18 = vrot.slane %v6418_v35, %v6184_v6 }
  0x78   : > { %v637_v21 = vadd.f32 %v6252_v44, %v512_v17  ;;  %12495 = vst [vmem:[#allocation55_spill] sm:$0xff] %v6523_v11  ;;  %v12498_v4 = vrot.slane %v6242_v37, 1  ;;  %v955_v5 = vsel %vm580_vm0, %v953_v38, %v11905_v16  ;;  %v1079_v41 = vsel %vm580_vm0, %v1077_v36, %v12500_v48  ;;  %12504 = vst [vmem:[#allocation60_spill] sm:$0xff] %v6583_v63 }
  0x79   : > { %12496 = vst [vmem:[#allocation56_spill] sm:$0xff] %v6527_v42  ;;  %12497 = vst [vmem:[#allocation57_spill] sm:$0xff] %v6538_v18  ;;  %v2023_v28 = vmul.f32 %v6527_v42, %v6274_v59  ;;  %v6549_v53 = vmul.f32 %v6527_v42, %v6276_v60  ;;  %v12501_v6 = vrot.slane %v6495_v25, 2  ;;  %v2147_v38 = vmul.f32 %v6538_v18, %v6313_v34 }
  0x7a   : > { %v761_v17 = vadd.f32 %v12498_v4, %v637_v21  ;;  %v6558_v21 = vmul.f32 0.0, %v6523_v11  ;;  %v1698_v16 = vrot.slane %v1650_v49, 2  ;;  %v6565_v47 = vmul.f32 %v6538_v18, %v6324_v46 }
  0x7b   : > { %12499 = vst [vmem:[#allocation58_spill] sm:$0xff] %v6549_v53  ;;  %v1452_v37 = vsel %vm1201_vm1, %v1450_v23, %v12501_v6  ;;  %v12503_v48 = vrot.slane %v6512_v1, 2  ;;  %v2071_v32 = vrot.slane %v2023_v28, 3  ;;  %v6573_v6 = vrot.slane %v6418_v35, %v6186_v7 }
  0x7c   : > { %v885_v4 = vadd.f32 %v831_v55, %v761_v17  ;;  %12502 = vst [vmem:[#allocation59_spill] sm:$0xff] %v6565_v47  ;;  %v2195_v55 = vrot.slane %v2147_v38, 3  ;;  %v6578_v17 = vrot.slane %v6400_v27, %v6178_v3  ;;  %v6593_v28 = vrot.slane %v6400_v27, %v6188_v8 }
  0x7d   : > { %v1576_v36 = vsel %vm1201_vm1, %v1574_v20, %v12503_v48  ;;  %v2271_v20 = vmul.f32 %v6573_v6, %v6437_v13  ;;  %v6589_v7 = vmul.f32 %v6573_v6, %v6452_v22  ;;  %v6597_v3 = vrot.slane %v6418_v35, %v6190_v9 }
  0x7e   : > { %v1009_v43 = vadd.f32 %v955_v5, %v885_v4  ;;  %v12506_v38 = vrot.slane %v6534_v19, 2  ;;  %v6604_v49 = vmul.f32 0.0, %v6578_v17  ;;  %v2644_v8 = vmul.f32 %v6593_v28, %v6274_v59 }
  0x7f   : > { %12505 = vst [vmem:[#allocation61_spill] sm:$0xff] %v6597_v3  ;;  %v2319_v23 = vrot.slane %v2271_v20, 3  ;;  %v6611_v9 = vmul.f32 %v6593_v28, %v6276_v60  ;;  %v6618_v27 = vmul.f32 %v6597_v3, %v6324_v46  ;;  %v2892_v35 = vmul.f32 %v6583_v63, %v6437_v13  ;;  %v6634_v60 = vld [vmem:[#allocation2 + $0x58] sm:$0xf] }
  0x80   : > { %v1133_v5 = vadd.f32 %v1079_v41, %v1009_v43  ;;  %v1700_v4 = vsel %vm1201_vm1, %v1698_v16, %v12506_v38  ;;  %v2768_v16 = vmul.f32 %v6597_v3, %v6313_v34  ;;  %v12507_v43 = vrot.slane %v6549_v53, 3 }
  0x81   : > { %v12508_v38 = vrot.slane %v6565_v47, 3  ;;  %v12509_v59 = vrot.slane %v6246_v39, 2  ;;  %v12510_v13 = vrot.slane %v6589_v7, 3 }
  0x82   : > { %v1258_v41 = vadd.f32 %v6271_v57, %v1133_v5  ;;  %v2073_v20 = vsel %vm1822_vm2, %v2071_v32, %v12507_v43  ;;  %v6630_v5 = vmul.f32 %v6583_v63, %v6452_v22  ;;  %v2692_v43 = vrot.slane %v2644_v8, 4 }
  0x83   : > { %v2197_v48 = vsel %vm1822_vm2, %v2195_v55, %v12508_v38  ;;  %v6641_v53 = vsel %vm1822_vm2, %v2319_v23, %v12510_v13  ;;  %v6644_v55 = vld [vmem:[#allocation2 + $0x70] sm:$0xf]  ;;  %v2816_v47 = vrot.slane %v2768_v16, 4  ;;  %v461_v63 = vmul.f32 %v6426_v45, %v6324_v46 }
  0x84   : > { %v1382_v34 = vadd.f32 %v12509_v59, %v1258_v41  ;;  %v2940_v59 = vrot.slane %v2892_v35, 4  ;;  %v534_v13 = vmul.f32 %v6202_v15, %v6632_v31  ;;  %v497_v8 = vmul.f32 %v6458_v40, %v6452_v22 }
  0x85   : > { %v477_v23 = vadd.f32 %v461_v63, %v6502_v12  ;;  %v783_v16 = vmul.f32 %v6430_v51, %v6282_v0  ;;  %v907_v32 = vmul.f32 %v6441_v30, %v6634_v60  ;;  %v1404_v63 = vmul.f32 %v6449_v58, %v6282_v0 }
  0x86   : > { %v1506_v39 = vadd.f32 %v1452_v37, %v1382_v34  ;;  %v584_v38 = vrot.slane %v534_v13, 1  ;;  %v1031_v34 = vmul.f32 %v6445_v52, %v6644_v55  ;;  %v1155_v37 = vmul.f32 %v6219_v24, %v6632_v31 }
  0x87   : > { %v513_v35 = vadd.f32 %v497_v8, %v477_v23  ;;  %v832_v41 = vrot.slane %v783_v16, 1  ;;  %v12511_v15 = vrot.slane %v6611_v9, 4  ;;  %v12513_v23 = vrot.slane %v6630_v5, 4 }
  0x88   : > { %v1630_v62 = vadd.f32 %v1576_v36, %v1506_v39  ;;  %v12512_v36 = vrot.slane %v6618_v27, 4  ;;  %v585_v13 = vsel %vm580_vm0, %v6252_v44, %v584_v38  ;;  %v1528_v58 = vmul.f32 %v6464_v2, %v6634_v60 }
  0x89   : > { %v6669_v40 = vsel %vm2443_vm3, %v2692_v43, %v12511_v15  ;;  %v6681_v8 = vsel %vm2443_vm3, %v2940_v59, %v12513_v23  ;;  %v638_v16 = vadd.f32 %v585_v13, %v513_v35  ;;  %v1205_v15 = vrot.slane %v1155_v37, 2 }
  0x8a   : > { %v1754_v12 = vadd.f32 %v1700_v4, %v1630_v62  ;;  %v6674_v39 = vsel %vm2443_vm3, %v2816_v47, %v12512_v36  ;;  %v956_v62 = vrot.slane %v907_v32, 1  ;;  %v1080_v4 = vrot.slane %v1031_v34, 1 }
  0x8b   : > { %v1453_v43 = vrot.slane %v1404_v63, 2  ;;  %v762_v47 = vadd.f32 %v6303_v29, %v638_v16  ;;  %v12514_v36 = vrot.slane %v6470_v50, 1  ;;  %v1652_v59 = vmul.f32 %v6518_v56, %v6644_v55 }
  0x8c   : > { %v1879_v24 = vadd.f32 %v6278_v61, %v1754_v12  ;;  %v1776_v32 = vmul.f32 %v6225_v26, %v6632_v31  ;;  %v12515_v34 = vrot.slane %v6558_v21, 3  ;;  %v1577_v37 = vrot.slane %v1528_v58, 2 }
  0x8d   : > { %v833_v38 = vsel %vm580_vm0, %v12514_v36, %v832_v41  ;;  %v1901_v63 = vmul.f32 %v6523_v11, %v6199_v14  ;;  %v2025_v29 = vmul.f32 %v6527_v42, %v6282_v0  ;;  %v12516_v50 = vrot.slane %v6476_v10, 1 }
  0x8e   : > { %v2003_v35 = vadd.f32 %v12515_v34, %v1879_v24  ;;  %v886_v12 = vadd.f32 %v833_v38, %v762_v47  ;;  %v1701_v13 = vrot.slane %v1652_v59, 2  ;;  %v2149_v23 = vmul.f32 %v6538_v18, %v6634_v60 }
  0x8f   : > { %v957_v41 = vsel %vm580_vm0, %v12516_v50, %v956_v62  ;;  %v12517_v36 = vrot.slane %v6486_v54, 1  ;;  %v1206_v58 = vsel %vm1201_vm1, %v6271_v57, %v1205_v15  ;;  %v12518_v34 = vrot.slane %v6495_v25, 2 }
  0x90   : > { %v2127_v16 = vadd.f32 %v2073_v20, %v2003_v35  ;;  %v1010_v38 = vadd.f32 %v957_v41, %v886_v12  ;;  %v12519_v10 = vrot.slane %v6512_v1, 2  ;;  %v1826_v59 = vrot.slane %v1776_v32, 3  ;;  %v12521_v41 = vld [vmem:[#allocation60_spill] sm:$0xff] }
  0x91   : > { %v1081_v24 = vsel %vm580_vm0, %v12517_v36, %v1080_v4  ;;  %v1454_v47 = vsel %vm1201_vm1, %v12518_v34, %v1453_v43  ;;  %v1950_v50 = vrot.slane %v1901_v63, 3  ;;  %v12520_v20 = vrot.slane %v6534_v19, 2  ;;  %v12526_v34 = vld [vmem:[#allocation20_spill] sm:$0xff] }
  0x92   : > { %v1578_v62 = vsel %vm1201_vm1, %v12519_v10, %v1577_v37  ;;  %v2251_v26 = vadd.f32 %v2197_v48, %v2127_v16  ;;  %v2074_v4 = vrot.slane %v2025_v29, 3  ;;  %v2273_v15 = vmul.f32 %v6573_v6, %v6644_v55  ;;  %v12524_v16 = vld [vmem:[#allocation58_spill] sm:$0xff] }
  0x93   : > { %v1702_v54 = vsel %vm1201_vm1, %v12520_v20, %v1701_v13  ;;  %v1134_v35 = vadd.f32 %v1081_v24, %v1010_v38  ;;  %v2198_v25 = vrot.slane %v2149_v23, 3  ;;  %v2397_v43 = vmul.f32 %v6236_v33, %v6632_v31  ;;  %v12522_v23 = vld [vmem:[#allocation19_spill] sm:$0xff] }
  0x94   : > { %v2522_v1 = vmul.f32 %v6578_v17, %v6199_v14  ;;  %v2375_v32 = vadd.f32 %v6641_v53, %v2251_v26  ;;  %v2322_v37 = vrot.slane %v2273_v15, 3  ;;  %v2646_v19 = vmul.f32 %v6593_v28, %v6282_v0  ;;  %v12527_v38 = vld [vmem:[#allocation59_spill] sm:$0xff] }
  0x95   : > { %v2770_v48 = vmul.f32 %v6597_v3, %v6634_v60  ;;  %v1259_v63 = vadd.f32 %v1206_v58, %v1134_v35  ;;  %v2447_v29 = vrot.slane %v2397_v43, 4  ;;  %v2894_v13 = vmul.f32 %v12521_v41, %v6644_v55 }
  0x96   : > { %v2571_v12 = vrot.slane %v2522_v1, 4  ;;  %v2500_v31 = vadd.f32 %v12522_v23, %v2375_v32  ;;  %v1827_v14 = vsel %vm1822_vm2, %v6278_v61, %v1826_v59  ;;  %v12523_v26 = vrot.slane %v6558_v21, 3  ;;  %v12531_v1 = vld [vmem:[#allocation22_spill] sm:$0xff]  ;;  %v12532_v32 = vld [vmem:[#allocation43_spill] sm:$0xff] }
  0x97   : > { %v12525_v36 = vrot.slane %v12524_v16, 3  ;;  %v1383_v58 = vadd.f32 %v12526_v34, %v1259_v63  ;;  %v12528_v10 = vrot.slane %v12527_v38, 3  ;;  %v12529_v15 = vrot.slane %v6589_v7, 3  ;;  %v12535_v16 = vld [vmem:[#allocation47_spill] sm:$0xff] }
  0x98   : > { %v1951_v53 = vsel %vm1822_vm2, %v12523_v26, %v1950_v50  ;;  %v2695_v59 = vrot.slane %v2646_v19, 4  ;;  %v12530_v21 = vrot.slane %v6604_v49, 4  ;;  %v6754_v50 = vsel %vm2443_vm3, %v12522_v23, %v2447_v29  ;;  %v6758_v26 = vld [vmem:[#allocation2 + $0x78] sm:$0xff]  ;;  %v12548_v23 = vld [vmem:[#allocation27_spill] sm:$0xff] }
  0x99   : > { %v2075_v24 = vsel %vm1822_vm2, %v12525_v36, %v2074_v4  ;;  %v2199_v20 = vsel %vm1822_vm2, %v12528_v10, %v2198_v25  ;;  %v6748_v35 = vsel %vm1822_vm2, %v12529_v15, %v2322_v37  ;;  %v2819_v4 = vrot.slane %v2770_v48, 4  ;;  %12533 = vst [vmem:[#allocation60_spill] sm:$0xff] %v6758_v26  ;;  %v6767_v36 = vld [vmem:[#allocation2 + $0x80] sm:$0xff] }
  0x9a   : > { %v2624_v43 = vadd.f32 %v12530_v21, %v2500_v31  ;;  %v426_v63 = vmul.f32 %v12532_v32, %v12531_v1  ;;  %v1507_v25 = vadd.f32 %v1454_v47, %v1383_v58  ;;  %v12534_v7 = vmov %v12530_v21  ;;  %12536 = vst [vmem:[#allocation58_spill] sm:$0xff] %v6767_v36  ;;  %v12537_v48 = vld [vmem:[#allocation21_spill] sm:$0xff] }
  0x9b   : > { %v6763_v37 = vsel %vm2443_vm3, %v12534_v7, %v2571_v12  ;;  %v2943_v19 = vrot.slane %v2894_v13, 4  ;;  %v462_v31 = vmul.f32 %v6426_v45, %v12535_v16  ;;  %v784_v38 = vmul.f32 %v6430_v51, %v12531_v1 }
  0x9c   : > { %v2748_v29 = vadd.f32 %v6669_v40, %v2624_v43  ;;  %v442_v34 = vadd.f32 %v426_v63, %v12537_v48  ;;  %v6775_v47 = vmul.f32 %v6430_v51, %v6324_v46  ;;  %v1631_v49 = vadd.f32 %v1578_v62, %v1507_v25 }
  0x9d   : > { %v12538_v12 = vrot.slane %v6611_v9, 4  ;;  %v908_v58 = vmul.f32 %v6441_v30, %v12535_v16  ;;  %v6786_v40 = vmul.f32 %v6441_v30, %v6452_v22  ;;  %v12539_v15 = vrot.slane %v6618_v27, 4  ;;  %v12540_v9 = vld [vmem:[#allocation51_spill] sm:$0xff] }
  0x9e   : > { %v2872_v10 = vadd.f32 %v6674_v39, %v2748_v29  ;;  %v478_v62 = vadd.f32 %v462_v31, %v442_v34  ;;  %v1755_v43 = vadd.f32 %v1702_v54, %v1631_v49  ;;  %v12541_v63 = vrot.slane %v6630_v5, 4 }
  0x9f   : > { %v6780_v13 = vsel %vm2443_vm3, %v12538_v12, %v2695_v59  ;;  %v6792_v21 = vsel %vm2443_vm3, %v12539_v15, %v2819_v4  ;;  %v498_v59 = vmul.f32 %v12540_v9, %v6758_v26  ;;  %v1032_v7 = vmul.f32 %v6445_v52, %v6758_v26 }
  0xa0   : > { %v6799_v25 = vsel %vm2443_vm3, %v12541_v63, %v2943_v19  ;;  %v6805_v27 = vmul.f32 %v6445_v52, %v6767_v36  ;;  %v2996_v39 = vadd.f32 %v6681_v8, %v2872_v10  ;;  %v834_v31 = vrot.slane %v784_v38, 1  ;;  %v12542_v19 = vld [vmem:[#allocation50_spill] sm:$0xff] }
  0xa1   : > { %v514_v4 = vadd.f32 %v498_v59, %v478_v62  ;;  %v11932_v29 = vrot.slane %v6775_v47, 1  ;;  %v1880_v48 = vadd.f32 %v1827_v14, %v1755_v43  ;;  %v958_v54 = vrot.slane %v908_v58, 1  ;;  %v12543_v62 = vld [vmem:[#allocation25_spill] sm:$0xff] }
  0xa2   : > { %v1405_v34 = vmul.f32 %v12542_v19, %v12531_v1  ;;  %3014 = vst [vmem:[%s6814_s20] sm:$0xff] %v2996_v39  ;;  %v6820_v8 = vmul.f32 %v12542_v19, %v6324_v46  ;;  %v1529_v14 = vmul.f32 %v6464_v2, %v12535_v16  ;;  %v6826_v38 = vmul.f32 %v6464_v2, %v6452_v22 }
  0xa3   : > { %v639_v49 = vadd.f32 %v6252_v44, %v514_v4  ;;  %v2004_v12 = vadd.f32 %v1951_v53, %v1880_v48  ;;  %v1082_v58 = vrot.slane %v1032_v7, 1  ;;  %v1653_v15 = vmul.f32 %v6518_v56, %v6758_v26 }
  0xa4   : > { %v836_v59 = vsel %vm580_vm0, %v834_v31, %v11932_v29  ;;  %v1455_v43 = vrot.slane %v1405_v34, 2  ;;  %v11933_v63 = vrot.slane %v6820_v8, 2  ;;  %v1579_v4 = vrot.slane %v1529_v14, 2  ;;  %v12546_v31 = vld [vmem:[#allocation18_spill] sm:$0xff] }
  0xa5   : > { %v763_v44 = vadd.f32 %v12543_v62, %v639_v49  ;;  %v2128_v39 = vadd.f32 %v2075_v24, %v2004_v12  ;;  %v11937_v5 = vrot.slane %v6826_v38, 2  ;;  %v6839_v53 = vmul.f32 %v6518_v56, %v6767_v36  ;;  %v12545_v62 = vld [vmem:[#allocation17_spill] sm:$0xff] }
  0xa6   : > { %v12544_v48 = vrot.slane %v6786_v40, 1  ;;  %v1902_v10 = vmul.f32 %v6523_v11, %v12545_v62  ;;  %v6848_v34 = vmul.f32 %v6523_v11, %v12546_v31  ;;  %v12547_v14 = vrot.slane %v6805_v27, 1 }
  0xa7   : > { %v887_v7 = vadd.f32 %v836_v59, %v763_v44  ;;  %v2252_v24 = vadd.f32 %v2199_v20, %v2128_v39  ;;  %v1703_v29 = vrot.slane %v1653_v15, 2  ;;  %v2026_v44 = vmul.f32 %v6527_v42, %v12531_v1 }
  0xa8   : > { %v960_v49 = vsel %vm580_vm0, %v958_v54, %v12544_v48  ;;  %v1084_v12 = vsel %vm580_vm0, %v1082_v58, %v12547_v14  ;;  %v1457_v54 = vsel %vm1201_vm1, %v1455_v43, %v11933_v63  ;;  %v6860_v48 = vmul.f32 %v6527_v42, %v6324_v46 }
  0xa9   : > { %v1011_v59 = vadd.f32 %v960_v49, %v887_v7  ;;  %v2150_v20 = vmul.f32 %v6538_v18, %v12535_v16  ;;  %v2376_v39 = vadd.f32 %v6748_v35, %v2252_v24  ;;  %v1581_v58 = vsel %vm1201_vm1, %v1579_v4, %v11937_v5 }
  0xaa   : > { %v11940_v15 = vrot.slane %v6839_v53, 2  ;;  %v6871_v7 = vmul.f32 %v6538_v18, %v6452_v22  ;;  %v1952_v49 = vrot.slane %v1902_v10, 3  ;;  %v2076_v63 = vrot.slane %v2026_v44, 3 }
  0xab   : > { %v1135_v43 = vadd.f32 %v1084_v12, %v1011_v59  ;;  %v2501_v33 = vadd.f32 %v6754_v50, %v2376_v39  ;;  %v2274_v35 = vmul.f32 %v6573_v6, %v6758_v26  ;;  %v6880_v4 = vmul.f32 %v6573_v6, %v6767_v36 }
  0xac   : > { %v2200_v5 = vrot.slane %v2150_v20, 3  ;;  %v11939_v12 = vrot.slane %v6871_v7, 3  ;;  %v2523_v10 = vmul.f32 %v6578_v17, %v12545_v62  ;;  %v6890_v39 = vmul.f32 %v6578_v17, %v12546_v31 }
  0xad   : > { %v1260_v24 = vadd.f32 %v6271_v57, %v1135_v43  ;;  %v2625_v44 = vadd.f32 %v6763_v37, %v2501_v33  ;;  %v2324_v50 = vrot.slane %v2274_v35, 3  ;;  %v11938_v59 = vrot.slane %v6880_v4, 3 }
  0xae   : > { %v1705_v57 = vsel %vm1201_vm1, %v1703_v29, %v11940_v15  ;;  %v12549_v20 = vrot.slane %v6848_v34, 3  ;;  %v2647_v33 = vmul.f32 %v6593_v28, %v12531_v1  ;;  %v12550_v62 = vrot.slane %v6860_v48, 3  ;;  %v12552_v1 = vld [vmem:[#allocation23_spill] sm:$0xff] }
  0xaf   : > { %v1384_v14 = vadd.f32 %v12548_v23, %v1260_v24  ;;  %v2749_v37 = vadd.f32 %v6780_v13, %v2625_v44  ;;  %v6907_v23 = vmul.f32 %v6593_v28, %v6324_v46  ;;  %v2771_v29 = vmul.f32 %v6597_v3, %v12535_v16 }
  0xb0   : > { %v1954_v43 = vsel %vm1822_vm2, %v1952_v49, %v12549_v20  ;;  %v2078_v31 = vsel %vm1822_vm2, %v2076_v63, %v12550_v62  ;;  %v2202_v49 = vsel %vm1822_vm2, %v2200_v5, %v11939_v12  ;;  %v2573_v24 = vrot.slane %v2523_v10, 4 }
  0xb1   : > { %12551 = vst [vmem:[#allocation20_spill] sm:$0xff] %v6907_v23  ;;  %v1508_v35 = vadd.f32 %v1457_v54, %v1384_v14  ;;  %v6916_v13 = vmul.f32 %v6597_v3, %v6452_v22  ;;  %v2873_v44 = vadd.f32 %v6792_v21, %v2749_v37  ;;  %v2326_v63 = vsel %vm1822_vm2, %v2324_v50, %v11938_v59  ;;  %v6925_v14 = vld [vmem:[#allocation2 + $0x88] sm:$0xf] }
  0xb2   : > { %v2895_v54 = vmul.f32 %v12521_v41, %v6758_v26  ;;  %v2697_v10 = vrot.slane %v2647_v33, 4  ;;  %v6929_v62 = vmul.f32 %v12521_v41, %v6767_v36  ;;  %v427_v21 = vmul.f32 %v12532_v32, %v6324_v46 }
  0xb3   : > { %v1632_v5 = vadd.f32 %v1581_v58, %v1508_v35  ;;  %v2997_v37 = vadd.f32 %v6799_v25, %v2873_v44  ;;  %v2821_v59 = vrot.slane %v2771_v29, 4  ;;  %v463_v58 = vmul.f32 %v6426_v45, %v6452_v22 }
  0xb4   : > { %v2945_v20 = vrot.slane %v2895_v54, 4  ;;  %v443_v26 = vadd.f32 %v427_v21, %v12552_v1  ;;  %v786_v35 = vmul.f32 %v6430_v51, %v6634_v60  ;;  %v910_v25 = vmul.f32 %v6441_v30, %v6644_v55 }
  0xb5   : > { %v1756_v15 = vadd.f32 %v1705_v57, %v1632_v5  ;;  %3015 = vst [vmem:[%s6814_s20 + $0x8] sm:$0xff] %v2997_v37  ;;  %v1034_v29 = vmul.f32 %v6445_v52, %v6925_v14  ;;  %v499_v1 = vmul.f32 %v12540_v9, %v6767_v36  ;;  %v1407_v54 = vmul.f32 %v12542_v19, %v6634_v60 }
  0xb6   : > { %v479_v44 = vadd.f32 %v463_v58, %v443_v26  ;;  %v12553_v5 = vrot.slane %v6890_v39, 4  ;;  %v837_v37 = vrot.slane %v786_v35, 1  ;;  %v961_v33 = vrot.slane %v910_v25, 1 }
  0xb7   : > { %v1881_v57 = vadd.f32 %v6278_v61, %v1756_v15  ;;  %v1531_v12 = vmul.f32 %v6464_v2, %v6644_v55  ;;  %v12554_v46 = vrot.slane %v6907_v23, 4  ;;  %v1655_v15 = vmul.f32 %v6518_v56, %v6925_v14 }
  0xb8   : > { %v2575_v21 = vsel %vm2443_vm3, %v2573_v24, %v12553_v5  ;;  %v515_v26 = vadd.f32 %v499_v1, %v479_v44  ;;  %v12555_v58 = vrot.slane %v6916_v13, 4  ;;  %v12556_v24 = vrot.slane %v6929_v62, 4 }
  0xb9   : > { %v2005_v50 = vadd.f32 %v1954_v43, %v1881_v57  ;;  %v2699_v61 = vsel %vm2443_vm3, %v2697_v10, %v12554_v46  ;;  %v1085_v25 = vrot.slane %v1034_v29, 1  ;;  %v1458_v5 = vrot.slane %v1407_v54, 2  ;;  %v12557_v43 = vld [vmem:[#allocation26_spill] sm:$0xff]  ;;  %v12560_v29 = vld [vmem:[#allocation28_spill] sm:$0xff] }
  0xba   : > { %v2823_v19 = vsel %vm2443_vm3, %v2821_v59, %v12555_v58  ;;  %v2947_v35 = vsel %vm2443_vm3, %v2945_v20, %v12556_v24  ;;  %v640_v57 = vadd.f32 %v12557_v43, %v515_v26  ;;  %v12558_v23 = vrot.slane %v6775_v47, 1 }
  0xbb   : > { %v2129_v2 = vadd.f32 %v2078_v31, %v2005_v50  ;;  %v12559_v10 = vrot.slane %v6786_v40, 1  ;;  %v1582_v1 = vrot.slane %v1531_v12, 2  ;;  %v1904_v59 = vmul.f32 %v6523_v11, %v6282_v0 }
  0xbc   : > { %v838_v46 = vsel %vm580_vm0, %v12558_v23, %v837_v37  ;;  %v2028_v20 = vmul.f32 %v6527_v42, %v6634_v60  ;;  %v2152_v31 = vmul.f32 %v6538_v18, %v6644_v55  ;;  %v764_v54 = vadd.f32 %v12560_v29, %v640_v57 }
  0xbd   : > { %v962_v44 = vsel %vm580_vm0, %v12559_v10, %v961_v33  ;;  %v2253_v50 = vadd.f32 %v2202_v49, %v2129_v2  ;;  %v1706_v47 = vrot.slane %v1655_v15, 2  ;;  %v2276_v23 = vmul.f32 %v6573_v6, %v6925_v14 }
  0xbe   : > { %v12561_v40 = vrot.slane %v6805_v27, 1  ;;  %v1955_v33 = vrot.slane %v1904_v59, 3  ;;  %v2079_v37 = vrot.slane %v2028_v20, 3  ;;  %v2525_v26 = vmul.f32 %v6578_v17, %v6282_v0  ;;  %v12564_v59 = vld [vmem:[#allocation19_spill] sm:$0xff] }
  0xbf   : > { %v2377_v58 = vadd.f32 %v2326_v63, %v2253_v50  ;;  %v888_v24 = vadd.f32 %v838_v46, %v764_v54  ;;  %v2203_v43 = vrot.slane %v2152_v31, 3  ;;  %v2327_v10 = vrot.slane %v2276_v23, 3  ;;  %v7017_v31 = vld [vmem:[#allocation2 + $0x90] sm:$0xff] }
  0xc0   : > { %v1086_v12 = vsel %vm580_vm0, %v12561_v40, %v1085_v25  ;;  %v12562_v2 = vrot.slane %v6820_v8, 2  ;;  %v12563_v15 = vrot.slane %v6826_v38, 2  ;;  %v2576_v27 = vrot.slane %v2525_v26, 4  ;;  %12568 = vst [vmem:[#allocation59_spill] sm:$0xff] %v7017_v31  ;;  %v12572_v26 = vld [vmem:[#allocation38_spill] sm:$0xff] }
  0xc1   : > { %v2649_v25 = vmul.f32 %v6593_v28, %v6634_v60  ;;  %v2502_v20 = vadd.f32 %v12564_v59, %v2377_v58  ;;  %v1012_v29 = vadd.f32 %v962_v44, %v888_v24  ;;  %v12565_v0 = vrot.slane %v6839_v53, 2  ;;  %v12574_v24 = vld [vmem:[#allocation31_spill] sm:$0xff] }
  0xc2   : > { %v1459_v49 = vsel %vm1201_vm1, %v12562_v2, %v1458_v5  ;;  %v1583_v57 = vsel %vm1201_vm1, %v12563_v15, %v1582_v1  ;;  %v12566_v46 = vrot.slane %v6848_v34, 3  ;;  %v12567_v38 = vrot.slane %v6860_v48, 3 }
  0xc3   : > { %v1707_v63 = vsel %vm1201_vm1, %v12565_v0, %v1706_v47  ;;  %v2773_v1 = vmul.f32 %v6597_v3, %v6644_v55  ;;  %v2897_v44 = vmul.f32 %v12521_v41, %v6925_v14  ;;  %v428_v53 = vmul.f32 %v12532_v32, %v12535_v16 }
  0xc4   : > { %v7004_v8 = vsel %vm1822_vm2, %v12566_v46, %v1955_v33  ;;  %v7009_v5 = vsel %vm1822_vm2, %v12567_v38, %v2079_v37  ;;  %v2626_v34 = vadd.f32 %v2575_v21, %v2502_v20  ;;  %v1136_v50 = vadd.f32 %v1086_v12, %v1012_v29  ;;  %v12573_v21 = vld [vmem:[#allocation60_spill] sm:$0xff]  ;;  %v12576_v20 = vld [vmem:[#allocation35_spill] sm:$0xff] }
  0xc5   : > { %v12569_v54 = vrot.slane %v6871_v7, 3  ;;  %v12570_v47 = vrot.slane %v6880_v4, 3  ;;  %v12571_v40 = vrot.slane %v6890_v39, 4  ;;  %v2700_v37 = vrot.slane %v2649_v25, 4 }
  0xc6   : > { %v444_v58 = vadd.f32 %v428_v53, %v12572_v26  ;;  %v464_v12 = vmul.f32 %v6426_v45, %v12573_v21  ;;  %v2750_v7 = vadd.f32 %v2699_v61, %v2626_v34  ;;  %v2824_v2 = vrot.slane %v2773_v1, 4 }
  0xc7   : > { %v7022_v48 = vsel %vm1822_vm2, %v12569_v54, %v2203_v43  ;;  %v7027_v23 = vsel %vm1822_vm2, %v12570_v47, %v2327_v10  ;;  %v7032_v33 = vsel %vm2443_vm3, %v12571_v40, %v2576_v27  ;;  %v1261_v43 = vadd.f32 %v12574_v24, %v1136_v50  ;;  %v7040_v10 = vld [vmem:[#allocation2 + $0x98] sm:$0xff]  ;;  %v12579_v40 = vld [vmem:[#allocation46_spill] sm:$0xff] }
  0xc8   : > { %v787_v4 = vmul.f32 %v6430_v51, %v12535_v16  ;;  %12575 = vst [vmem:[#allocation47_spill] sm:$0xff] %v7040_v10  ;;  %v2948_v15 = vrot.slane %v2897_v44, 4  ;;  %v480_v39 = vadd.f32 %v464_v12, %v444_v58  ;;  %v500_v27 = vmul.f32 %v12540_v9, %v7017_v31  ;;  %v12580_v58 = vld [vmem:[#allocation33_spill] sm:$0xff] }
  0xc9   : > { %v7046_v25 = vmul.f32 %v6430_v51, %v6452_v22  ;;  %v2874_v59 = vadd.f32 %v2823_v19, %v2750_v7  ;;  %v1385_v61 = vadd.f32 %v12576_v20, %v1261_v43  ;;  %v911_v0 = vmul.f32 %v6441_v30, %v12573_v21  ;;  %v12577_v19 = vld [vmem:[#allocation20_spill] sm:$0xff]  ;;  %v12582_v7 = vld [vmem:[#allocation30_spill] sm:$0xff] }
  0xca   : > { %v839_v29 = vrot.slane %v787_v4, 1  ;;  %v516_v46 = vadd.f32 %v500_v27, %v480_v39  ;;  %v7054_v1 = vmul.f32 %v6441_v30, %v6767_v36  ;;  %v1035_v44 = vmul.f32 %v6445_v52, %v7017_v31 }
  0xcb   : > { %v11952_v38 = vrot.slane %v7046_v25, 1  ;;  %v2998_v53 = vadd.f32 %v2947_v35, %v2874_v59  ;;  %v1509_v34 = vadd.f32 %v1459_v49, %v1385_v61  ;;  %v12578_v50 = vrot.slane %v12577_v19, 4 }
  0xcc   : > { %v7065_v47 = vmul.f32 %v6445_v52, %v7040_v10  ;;  %v641_v26 = vadd.f32 %v12579_v40, %v516_v46  ;;  %v12581_v12 = vrot.slane %v12580_v58, 1  ;;  %v12583_v24 = vrot.slane %v12582_v7, 1  ;;  %v12590_v40 = vld [vmem:[#allocation41_spill] sm:$0xff] }
  0xcd   : > { %v7061_v54 = vsel %vm2443_vm3, %v12578_v50, %v2700_v37  ;;  %v963_v4 = vrot.slane %v911_v0, 1  ;;  %v11951_v35 = vrot.slane %v7054_v1, 1  ;;  %3016 = vst [vmem:[%s6814_s20 + $0x10] sm:$0xff] %v2998_v53  ;;  %v1633_v49 = vadd.f32 %v1583_v57, %v1509_v34  ;;  %v12586_v57 = vld [vmem:[#allocation50_spill] sm:$0xff]  ;;  %v12587_v34 = vld [vmem:[#allocation40_spill] sm:$0xff] }
  0xce   : > { %v717_v43 = vsel %vm580_vm0, %v12583_v24, %v12581_v12  ;;  %v12584_v37 = vrot.slane %v6916_v13, 4  ;;  %v1087_v27 = vrot.slane %v1035_v44, 1  ;;  %v11950_v59 = vrot.slane %v7065_v47, 1 }
  0xcf   : > { %v12585_v20 = vrot.slane %v6929_v62, 4  ;;  %v765_v46 = vadd.f32 %v717_v43, %v641_v26  ;;  %v841_v0 = vsel %vm580_vm0, %v839_v29, %v11952_v38  ;;  %v1408_v53 = vmul.f32 %v12586_v57, %v12535_v16  ;;  %v12589_v62 = vld [vmem:[#allocation52_spill] sm:$0xff] }
  0xd0   : > { %v7078_v39 = vsel %vm2443_vm3, %v12584_v37, %v2824_v2  ;;  %v1757_v13 = vadd.f32 %v1707_v63, %v1633_v49  ;;  %v1336_v2 = vrot.slane %v12587_v34, 2  ;;  %v7094_v44 = vmul.f32 %v12586_v57, %v6452_v22  ;;  %v12592_v63 = vld [vmem:[#allocation37_spill] sm:$0xff]  ;;  %v12598_v38 = vld [vmem:[#allocation36_spill] sm:$0xff] }
  0xd1   : > { %v7084_v61 = vsel %vm2443_vm3, %v12585_v20, %v2948_v15  ;;  %v1532_v19 = vmul.f32 %v12589_v62, %v12573_v21  ;;  %v889_v15 = vadd.f32 %v841_v0, %v765_v46  ;;  %v965_v50 = vsel %vm580_vm0, %v963_v4, %v11951_v35  ;;  %v12601_v0 = vld [vmem:[#allocation22_spill] sm:$0xff] }
  0xd2   : > { %12588 = vst [vmem:[#allocation21_spill] sm:$0xff] %v7094_v44  ;;  %v7104_v26 = vmul.f32 %v12589_v62, %v6767_v36  ;;  %v1882_v12 = vadd.f32 %v12592_v63, %v1757_v13  ;;  %v1089_v7 = vsel %vm580_vm0, %v1087_v27, %v11950_v59  ;;  %v1460_v24 = vrot.slane %v1408_v53, 2  ;;  %v12594_v13 = vld [vmem:[#allocation42_spill] sm:$0xff]  ;;  %v12595_v63 = vld [vmem:[#allocation53_spill] sm:$0xff]  ;;  %v12596_v59 = vld [vmem:[#allocation39_spill] sm:$0xff] }
  0xd3   : > { %v1656_v43 = vmul.f32 %v6518_v56, %v7017_v31  ;;  %v1013_v49 = vadd.f32 %v965_v50, %v889_v15  ;;  %v1584_v4 = vrot.slane %v1532_v19, 2  ;;  %v7115_v20 = vmul.f32 %v6518_v56, %v7040_v10  ;;  %v12602_v27 = vld [vmem:[#allocation24_spill] sm:$0xff] }
  0xd4   : > { %12591 = vst [vmem:[#allocation25_spill] sm:$0xff] %v7104_v26  ;;  %v2006_v46 = vadd.f32 %v7004_v8, %v1882_v12  ;;  %v1833_v34 = vrot.slane %v12594_v13, 3  ;;  %v12597_v35 = vrot.slane %v12596_v59, 2  ;;  %v12599_v15 = vrot.slane %v12598_v38, 2 }
  0xd5   : > { %12593 = vst [vmem:[#allocation17_spill] sm:$0xff] %v7115_v20  ;;  %v1137_v53 = vadd.f32 %v1089_v7, %v1013_v49  ;;  %v1708_v19 = vrot.slane %v1656_v43, 2  ;;  %v11955_v37 = vrot.slane %v7115_v20, 2  ;;  %v12600_v8 = vrot.slane %v12590_v40, 2 }
  0xd6   : > { %v1214_v50 = vsel %vm1201_vm1, %v12599_v15, %v12597_v35  ;;  %v2130_v29 = vadd.f32 %v7009_v5, %v2006_v46  ;;  %v1905_v13 = vmul.f32 %v6523_v11, %v12601_v0  ;;  %v7135_v7 = vmul.f32 %v6523_v11, %v12602_v27 }
  0xd7   : > { %v1338_v12 = vsel %vm1201_vm1, %v1336_v2, %v12600_v8  ;;  %v1262_v49 = vadd.f32 %v1214_v50, %v1137_v53  ;;  %v12603_v38 = vrot.slane %v7094_v44, 2  ;;  %v2029_v43 = vmul.f32 %v6527_v42, %v12535_v16 }
  0xd8   : > { %v7144_v5 = vmul.f32 %v6527_v42, %v6452_v22  ;;  %v2254_v2 = vadd.f32 %v7022_v48, %v2130_v29  ;;  %v12604_v46 = vrot.slane %v7104_v26, 2  ;;  %v12605_v8 = vrot.slane %v12595_v63, 3  ;;  %v5865_v26 = vld [vmem:[#allocation2 + $0x30] sm:$0xff] }
  0xd9   : > { %v1462_v35 = vsel %vm1201_vm1, %v1460_v24, %v12603_v38  ;;  %v2153_v24 = vmul.f32 %v6538_v18, %v12573_v21  ;;  %v1386_v50 = vadd.f32 %v1338_v12, %v1262_v49  ;;  %v1710_v38 = vsel %vm1201_vm1, %v1708_v19, %v11955_v37  ;;  %v12606_v37 = vld [vmem:[#allocation32_spill] sm:$0xff] }
  0xda   : > { %v1586_v15 = vsel %vm1201_vm1, %v1584_v4, %v12604_v46  ;;  %v1835_v53 = vsel %vm1822_vm2, %v1833_v34, %v12605_v8  ;;  %v7160_v42 = vmul.f32 %v6538_v18, %v6767_v36  ;;  %v2277_v48 = vmul.f32 %v6573_v6, %v7017_v31  ;;  %v12607_v18 = vld [vmem:[#allocation16_spill] sm:$0xff] }
  0xdb   : > { %v2378_v29 = vadd.f32 %v7027_v23, %v2254_v2  ;;  %v1957_v4 = vrot.slane %v1905_v13, 3  ;;  %v7168_v46 = vmul.f32 %v6573_v6, %v7040_v10  ;;  %v1510_v12 = vadd.f32 %v1462_v35, %v1386_v50  ;;  %v5866_v23 = vld [vmem:[#allocation2 + $0x38] sm:$0xff] }
  0xdc   : > { %v2081_v49 = vrot.slane %v2029_v43, 3  ;;  %v11965_v19 = vrot.slane %v7144_v5, 3  ;;  %v2205_v8 = vrot.slane %v2153_v24, 3  ;;  %v2401_v44 = vmul.f32 %v5865_v26, %v12607_v18 }
  0xdd   : > { %v2503_v63 = vadd.f32 %v12606_v37, %v2378_v29  ;;  %v7175_v13 = vmul.f32 %v5866_v23, %v12607_v18  ;;  %v1634_v2 = vadd.f32 %v1586_v15, %v1510_v12  ;;  %v2329_v34 = vrot.slane %v2277_v48, 3 }
  0xde   : > { %v2526_v35 = vmul.f32 %v6578_v17, %v12601_v0  ;;  %v7181_v43 = vmul.f32 %v6578_v17, %v12602_v27  ;;  %v11963_v24 = vrot.slane %v7168_v46, 3  ;;  %v2454_v50 = vrot.slane %v2401_v44, 4 }
  0xdf   : > { %v2627_v37 = vadd.f32 %v7032_v33, %v2503_v63  ;;  %v11962_v26 = vrot.slane %v7175_v13, 4  ;;  %v1758_v29 = vadd.f32 %v1710_v38, %v1634_v2  ;;  %v12608_v20 = vrot.slane %v7135_v7, 3 }
  0xe0   : > { %v2578_v48 = vrot.slane %v2526_v35, 4  ;;  %v11964_v12 = vrot.slane %v7181_v43, 4  ;;  %v2083_v27 = vsel %vm1822_vm2, %v2081_v49, %v11965_v19  ;;  %v2650_v33 = vmul.f32 %v6593_v28, %v12535_v16 }
  0xe1   : > { %v1959_v15 = vsel %vm1822_vm2, %v1957_v4, %v12608_v20  ;;  %v2751_v0 = vadd.f32 %v7061_v54, %v2627_v37  ;;  %v7198_v44 = vmul.f32 %v6593_v28, %v6452_v22  ;;  %v1883_v63 = vadd.f32 %v1835_v53, %v1758_v29  ;;  %v12612_v37 = vld [vmem:[#allocation10_spill] sm:$0xff] }
  0xe2   : > { %v12609_v38 = vrot.slane %v7160_v42, 3  ;;  %v2774_v4 = vmul.f32 %v6597_v3, %v12573_v21  ;;  %v7207_v54 = vmul.f32 %v6597_v3, %v6767_v36  ;;  %v2331_v16 = vsel %vm1822_vm2, %v2329_v34, %v11963_v24 }
  0xe3   : > { %v2875_v49 = vadd.f32 %v7078_v39, %v2751_v0  ;;  %v2456_v53 = vsel %vm2443_vm3, %v2454_v50, %v11962_v26  ;;  %v2007_v2 = vadd.f32 %v1959_v15, %v1883_v63  ;;  %v2580_v35 = vsel %vm2443_vm3, %v2578_v48, %v11964_v12  ;;  %v12614_v26 = vld [vmem:[#allocation11_spill] sm:$0xff]  ;;  %v7232_v63 = vld [vmem:[#allocation2 + $0xa0] sm:$0xf] }
  0xe4   : > { %v2207_v20 = vsel %vm1822_vm2, %v2205_v8, %v12609_v38  ;;  %12610 = vst [vmem:[#allocation18_spill] sm:$0xff] %v7207_v54  ;;  %v2898_v8 = vmul.f32 %v12521_v41, %v7017_v31  ;;  %v7223_v39 = vmul.f32 %v12521_v41, %v7040_v10  ;;  %v357_v29 = vmul.f32 %v5866_v23, %v12612_v37  ;;  %v7228_v38 = vld [vmem:[#allocation2 + $0x50] sm:$0xff]  ;;  %v12619_v12 = vld [vmem:[#allocation13_spill] sm:$0xff] }
  0xe5   : > { %v2999_v34 = vadd.f32 %v7084_v61, %v2875_v49  ;;  %v2702_v0 = vrot.slane %v2650_v33, 4  ;;  %12613 = vst [vmem:[#allocation23_spill] sm:$0xff] %v7228_v38  ;;  %v393_v15 = vmul.f32 %v7228_v38, %v12614_v26  ;;  %12615 = vst [vmem:[#allocation26_spill] sm:$0xff] %v7232_v63  ;;  %v2131_v24 = vadd.f32 %v2083_v27, %v2007_v2  ;;  %v5868_v33 = vld [vmem:[#allocation2 + $0x40] sm:$0xf]  ;;  %v12617_v27 = vld [vmem:[#allocation12_spill] sm:$0xff] }
  0xe6   : > { %12611 = vst [vmem:[#allocation27_spill] sm:$0xff] %v7223_v39  ;;  %v2826_v48 = vrot.slane %v2774_v4, 4  ;;  %v2950_v19 = vrot.slane %v2898_v8, 4  ;;  %v429_v61 = vmul.f32 %v12532_v32, %v6452_v22  ;;  %v12616_v49 = vld [vmem:[#allocation9_spill] sm:$0xff]  ;;  %v465_v38 = vmul.f32 %v6426_v45, %v6767_v36 }
  0xe7   : > { %3017 = vst [vmem:[%s6814_s20 + $0x18] sm:$0xff] %v2999_v34  ;;  %v409_v31 = vadd.f32 %v393_v15, %v357_v29  ;;  %v540_v50 = vmul.f32 %v5868_v33, %v12616_v49  ;;  %v2255_v21 = vadd.f32 %v2207_v20, %v2131_v24  ;;  %v665_v4 = vmul.f32 %v12617_v27, %v6634_v60 }
  0xe8   : > { %v789_v8 = vmul.f32 %v6430_v51, %v6644_v55  ;;  %v913_v29 = vmul.f32 %v6441_v30, %v6925_v14  ;;  %v1037_v22 = vmul.f32 %v6445_v52, %v7232_v63  ;;  %v12618_v24 = vrot.slane %v7198_v44, 4 }
  0xe9   : > { %v445_v2 = vadd.f32 %v429_v61, %v409_v31  ;;  %v594_v34 = vrot.slane %v540_v50, 1  ;;  %v2379_v15 = vadd.f32 %v2331_v16, %v2255_v21  ;;  %v718_v23 = vrot.slane %v665_v4, 1  ;;  %v12622_v16 = vld [vmem:[#allocation29_spill] sm:$0xff] }
  0xea   : > { %v2704_v20 = vsel %vm2443_vm3, %v2702_v0, %v12618_v24  ;;  %v1161_v36 = vmul.f32 %v5868_v33, %v12619_v12  ;;  %v12620_v45 = vrot.slane %v7207_v54, 4  ;;  %v12621_v31 = vrot.slane %v7223_v39, 4 }
  0xeb   : > { %v481_v61 = vadd.f32 %v465_v38, %v445_v2  ;;  %v501_v52 = vmul.f32 %v12540_v9, %v7040_v10  ;;  %v2504_v21 = vadd.f32 %v2456_v53, %v2379_v15  ;;  %v12623_v30 = vrot.slane %v12622_v16, 1 }
  0xec   : > { %v2828_v51 = vsel %vm2443_vm3, %v2826_v48, %v12620_v45  ;;  %v2952_v50 = vsel %vm2443_vm3, %v2950_v19, %v12621_v31  ;;  %v842_v4 = vrot.slane %v789_v8, 1  ;;  %v966_v24 = vrot.slane %v913_v29, 1  ;;  %v12624_v45 = vld [vmem:[#allocation14_spill] sm:$0xff] }
  0xed   : > { %v595_v0 = vsel %vm580_vm0, %v12623_v30, %v594_v34  ;;  %v517_v12 = vadd.f32 %v501_v52, %v481_v61  ;;  %v1090_v27 = vrot.slane %v1037_v22, 1  ;;  %v1215_v54 = vrot.slane %v1161_v36, 2  ;;  %v12626_v36 = vld [vmem:[#allocation15_spill] sm:$0xff] }
  0xee   : > { %v1286_v48 = vmul.f32 %v12624_v45, %v6634_v60  ;;  %v2628_v39 = vadd.f32 %v2580_v35, %v2504_v21  ;;  %v12625_v19 = vrot.slane %v12580_v58, 1  ;;  %v1410_v53 = vmul.f32 %v12586_v57, %v6644_v55 }
  0xef   : > { %v1534_v2 = vmul.f32 %v12589_v62, %v6925_v14  ;;  %v642_v30 = vadd.f32 %v595_v0, %v517_v12  ;;  %v1658_v52 = vmul.f32 %v6518_v56, %v7232_v63  ;;  %v1782_v34 = vmul.f32 %v5868_v33, %v12626_v36 }
  0xf0   : > { %v719_v38 = vsel %vm580_vm0, %v12625_v19, %v718_v23  ;;  %v1339_v8 = vrot.slane %v1286_v48, 2  ;;  %v2752_v29 = vadd.f32 %v2704_v20, %v2628_v39  ;;  %v12627_v35 = vrot.slane %v7046_v25, 1 }
  0xf1   : > { %v1463_v22 = vrot.slane %v1410_v53, 2  ;;  %v1907_v23 = vmul.f32 %v6523_v11, %v6634_v60  ;;  %v766_v15 = vadd.f32 %v719_v38, %v642_v30  ;;  %v12628_v31 = vrot.slane %v7054_v1, 1  ;;  %v12632_v1 = vld [vmem:[#allocation21_spill] sm:$0xff] }
  0xf2   : > { %v843_v58 = vsel %vm580_vm0, %v12627_v35, %v842_v4  ;;  %v12629_v61 = vrot.slane %v7065_v47, 1  ;;  %v12630_v16 = vrot.slane %v12596_v59, 2  ;;  %v2876_v25 = vadd.f32 %v2828_v51, %v2752_v29  ;;  %v12635_v51 = vld [vmem:[#allocation57_spill] sm:$0xff] }
  0xf3   : > { %v967_v12 = vsel %vm580_vm0, %v12628_v31, %v966_v24  ;;  %v12631_v20 = vrot.slane %v12590_v40, 2  ;;  %v1587_v4 = vrot.slane %v1534_v2, 2  ;;  %v1711_v48 = vrot.slane %v1658_v52, 2 }
  0xf4   : > { %v1091_v21 = vsel %vm580_vm0, %v12629_v61, %v1090_v27  ;;  %v1216_v39 = vsel %vm1201_vm1, %v12630_v16, %v1215_v54  ;;  %v890_v19 = vadd.f32 %v843_v58, %v766_v15  ;;  %v12633_v38 = vrot.slane %v12632_v1, 2  ;;  %v12634_v27 = vld [vmem:[#allocation56_spill] sm:$0xff] }
  0xf5   : > { %v1340_v0 = vsel %vm1201_vm1, %v12631_v20, %v1339_v8  ;;  %v1836_v47 = vrot.slane %v1782_v34, 3  ;;  %v2031_v53 = vmul.f32 %v12634_v27, %v6644_v55  ;;  %v3000_v59 = vadd.f32 %v2952_v50, %v2876_v25  ;;  %v12640_v25 = vld [vmem:[#allocation53_spill] sm:$0xff] }
  0xf6   : > { %v1464_v24 = vsel %vm1201_vm1, %v12633_v38, %v1463_v22  ;;  %v1960_v30 = vrot.slane %v1907_v23, 3  ;;  %v2155_v54 = vmul.f32 %v12635_v51, %v6925_v14  ;;  %v2279_v40 = vmul.f32 %v6573_v6, %v7232_v63  ;;  %v12636_v23 = vld [vmem:[#allocation25_spill] sm:$0xff] }
  0xf7   : > { %v1014_v8 = vadd.f32 %v967_v12, %v890_v19  ;;  %v2084_v2 = vrot.slane %v2031_v53, 3  ;;  %v2403_v52 = vmul.f32 %v5868_v33, %v12607_v18  ;;  %v2528_v29 = vmul.f32 %v6578_v17, %v6634_v60  ;;  %3018 = vst [vmem:[%s6814_s20 + $0x20] sm:$0xff] %v3000_v59  ;;  %v12638_v33 = vld [vmem:[#allocation17_spill] sm:$0xff] }
  0xf8   : > { %v2208_v34 = vrot.slane %v2155_v54, 3  ;;  %v2332_v35 = vrot.slane %v2279_v40, 3  ;;  %v2652_v50 = vmul.f32 %v6593_v28, %v6644_v55  ;;  %v2776_v58 = vmul.f32 %v6597_v3, %v6925_v14 }
  0xf9   : > { %v1138_v22 = vadd.f32 %v1091_v21, %v1014_v8  ;;  %v12637_v15 = vrot.slane %v12636_v23, 2  ;;  %v2457_v12 = vrot.slane %v2403_v52, 4  ;;  %v2581_v61 = vrot.slane %v2528_v29, 4 }
  0xfa   : > { %v12639_v16 = vrot.slane %v12638_v33, 2  ;;  %v12641_v20 = vrot.slane %v12640_v25, 3  ;;  %v12642_v55 = vrot.slane %v7135_v7, 3  ;;  %v2705_v38 = vrot.slane %v2652_v50, 4  ;;  %v12654_v33 = vld [vmem:[#allocation12_spill] sm:$0xff] }
  0xfb   : > { %v1588_v31 = vsel %vm1201_vm1, %v12637_v15, %v1587_v4  ;;  %v1263_v21 = vadd.f32 %v1216_v39, %v1138_v22  ;;  %v12643_v53 = vrot.slane %v7144_v5, 3  ;;  %v12644_v59 = vrot.slane %v7160_v42, 3  ;;  %v7341_v39 = vld [vmem:[#allocation2 + $0x48] sm:$0xff]  ;;  %v7345_v42 = vld [vmem:[#allocation2 + $0x60] sm:$0xff] }
  0xfc   : > { %v1712_v60 = vsel %vm1201_vm1, %v12639_v16, %v1711_v48  ;;  %v1837_v19 = vsel %vm1822_vm2, %v12641_v20, %v1836_v47  ;;  %v1961_v1 = vsel %vm1822_vm2, %v12642_v55, %v1960_v30  ;;  %v2829_v48 = vrot.slane %v2776_v58, 4  ;;  %v12650_v58 = vld [vmem:[#allocation60_spill] sm:$0xff]  ;;  %v7380_v16 = vld [vmem:[#allocation2 + $0x68] sm:$0xff]  ;;  %v12656_v55 = vld [vmem:[#allocation59_spill] sm:$0xff] }
  0xfd   : > { %v2085_v4 = vsel %vm1822_vm2, %v12643_v53, %v2084_v2  ;;  %v7329_v54 = vsel %vm1822_vm2, %v12644_v59, %v2208_v34  ;;  %v12645_v40 = vrot.slane %v7168_v46, 3  ;;  %v12646_v7 = vrot.slane %v7175_v13, 4  ;;  %v7349_v2 = vld [vmem:[#allocation2 + $0xa8] sm:$0xff]  ;;  %12655 = vst [vmem:[#allocation19_spill] sm:$0xff] %v7380_v16  ;;  %v12658_v53 = vld [vmem:[#allocation45_spill] sm:$0xff] }
  0xfe   : > { %v358_v5 = vmul.f32 %v7341_v39, %v12612_v37  ;;  %v394_v8 = vmul.f32 %v7345_v42, %v12614_v26  ;;  %12647 = vst [vmem:[#allocation28_spill] sm:$0xff] %v7349_v2  ;;  %v1387_v46 = vadd.f32 %v1340_v0, %v1263_v21  ;;  %v12648_v52 = vrot.slane %v7181_v43, 4  ;;  %v12651_v43 = vld [vmem:[#allocation23_spill] sm:$0xff] }
  0xff   : > { %v7334_v47 = vsel %vm1822_vm2, %v12645_v40, %v2332_v35  ;;  %v7339_v30 = vsel %vm2443_vm3, %v12646_v7, %v2457_v12  ;;  %v12649_v29 = vrot.slane %v7198_v44, 4  ;;  %v7363_v35 = vmul.f32 %v12521_v41, %v7232_v63  ;;  %v12652_v44 = vld [vmem:[#allocation18_spill] sm:$0xff] }
 0x100   : > { %v7354_v13 = vsel %vm2443_vm3, %v12648_v52, %v2581_v61  ;;  %v410_v50 = vadd.f32 %v394_v8, %v358_v5  ;;  %v430_v22 = vmul.f32 %v12532_v32, %v12650_v58  ;;  %v541_v0 = vmul.f32 %v7341_v39, %v12616_v49  ;;  %v12660_v8 = vld [vmem:[#allocation58_spill] sm:$0xff]  ;;  %v12663_v5 = vld [vmem:[#allocation49_spill] sm:$0xff] }
 0x101   : > { %v7359_v34 = vsel %vm2443_vm3, %v12649_v29, %v2705_v38  ;;  %v7371_v23 = vmul.f32 %v12651_v43, %v12616_v49  ;;  %v1511_v15 = vadd.f32 %v1464_v24, %v1387_v46  ;;  %v12653_v12 = vrot.slane %v12652_v44, 4  ;;  %v12657_v38 = vld [vmem:[#allocation44_spill] sm:$0xff] }
 0x102   : > { %v666_v41 = vmul.f32 %v7345_v42, %v12654_v33  ;;  %v7384_v25 = vmul.f32 %v7380_v16, %v12654_v33  ;;  %v446_v20 = vadd.f32 %v430_v22, %v410_v50  ;;  %v466_v21 = vmul.f32 %v12657_v38, %v12656_v55  ;;  %v12661_v22 = vld [vmem:[#allocation48_spill] sm:$0xff] }
 0x103   : > { %v7376_v61 = vsel %vm2443_vm3, %v12653_v12, %v2829_v48  ;;  %v502_v24 = vmul.f32 %v12540_v9, %v7349_v2  ;;  %v790_v59 = vmul.f32 %v12658_v53, %v12650_v58  ;;  %v7392_v48 = vld [vmem:[#allocation2 + $0xb0] sm:$0xff]  ;;  %v1635_v40 = vadd.f32 %v1588_v31, %v1511_v15 }
 0x104   : > { %12659 = vst [vmem:[#allocation38_spill] sm:$0xff] %v7392_v48  ;;  %v596_v7 = vrot.slane %v541_v0, 1  ;;  %v7397_v46 = vmul.f32 %v12658_v53, %v12660_v8  ;;  %v482_v52 = vadd.f32 %v466_v21, %v446_v20  ;;  %v720_v29 = vrot.slane %v666_v41, 1 }
 0x105   : > { %v914_v44 = vmul.f32 %v12661_v22, %v12656_v55  ;;  %v1759_v12 = vadd.f32 %v1712_v60, %v1635_v40  ;;  %v844_v9 = vrot.slane %v790_v59, 1  ;;  %v7405_v31 = vmul.f32 %v12661_v22, %v7040_v10  ;;  %v12666_v40 = vld [vmem:[#allocation13_spill] sm:$0xff] }
 0x106   : > { %v518_v0 = vadd.f32 %v502_v24, %v482_v52  ;;  %v1038_v63 = vmul.f32 %v12663_v5, %v7349_v2  ;;  %v7411_v41 = vmul.f32 %v12663_v5, %v7392_v48  ;;  %v12665_v21 = vrot.slane %v7371_v23, 1 }
 0x107   : > { %12662 = vst [vmem:[#allocation31_spill] sm:$0xff] %v7405_v31  ;;  %v968_v15 = vrot.slane %v914_v44, 1  ;;  %v1884_v20 = vadd.f32 %v1837_v19, %v1759_v12  ;;  %v1162_v38 = vmul.f32 %v7341_v39, %v12666_v40  ;;  %v7422_v44 = vmul.f32 %v12651_v43, %v12666_v40 }
 0x108   : > { %12664 = vst [vmem:[#allocation35_spill] sm:$0xff] %v7411_v41  ;;  %v598_v60 = vsel %vm580_vm0, %v596_v7, %v12665_v21  ;;  %v1092_v24 = vrot.slane %v1038_v63, 1  ;;  %v2953_v19 = vrot.slane %v7363_v35, 4  ;;  %v12667_v12 = vrot.slane %v7384_v25, 1 }
 0x109   : > { %v643_v50 = vadd.f32 %v598_v60, %v518_v0  ;;  %v2008_v5 = vadd.f32 %v1961_v1, %v1884_v20  ;;  %v1287_v21 = vmul.f32 %v7345_v42, %v12624_v45  ;;  %v12668_v0 = vrot.slane %v7397_v46, 1 }
 0x10a   : > { %v722_v7 = vsel %vm580_vm0, %v720_v29, %v12667_v12  ;;  %v12669_v60 = vrot.slane %v7405_v31, 1  ;;  %v7438_v1 = vmul.f32 %v7380_v16, %v12624_v45  ;;  %v1217_v20 = vrot.slane %v1162_v38, 2 }
 0x10b   : > { %v767_v59 = vadd.f32 %v722_v7, %v643_v50  ;;  %v846_v63 = vsel %vm580_vm0, %v844_v9, %v12668_v0  ;;  %v2132_v35 = vadd.f32 %v2085_v4, %v2008_v5  ;;  %v1411_v29 = vmul.f32 %v12586_v57, %v12650_v58 }
 0x10c   : > { %v970_v52 = vsel %vm580_vm0, %v968_v15, %v12669_v60  ;;  %v7444_v50 = vmul.f32 %v12586_v57, %v12660_v8  ;;  %v12670_v9 = vrot.slane %v7411_v41, 1  ;;  %v1535_v0 = vmul.f32 %v12589_v62, %v12656_v55 }
 0x10d   : > { %v891_v12 = vadd.f32 %v846_v63, %v767_v59  ;;  %v2256_v4 = vadd.f32 %v7329_v54, %v2132_v35  ;;  %v1341_v38 = vrot.slane %v1287_v21, 2  ;;  %v7456_v60 = vmul.f32 %v12589_v62, %v7040_v10  ;;  %v12673_v21 = vld [vmem:[#allocation27_spill] sm:$0xff] }
 0x10e   : > { %v1094_v7 = vsel %vm580_vm0, %v1092_v24, %v12670_v9  ;;  %v1465_v59 = vrot.slane %v1411_v29, 2  ;;  %v1659_v24 = vmul.f32 %v6518_v56, %v7349_v2  ;;  %v1589_v15 = vrot.slane %v1535_v0, 2 }
 0x10f   : > { %12671 = vst [vmem:[#allocation20_spill] sm:$0xff] %v7456_v60  ;;  %v1015_v31 = vadd.f32 %v970_v52, %v891_v12  ;;  %v2380_v9 = vadd.f32 %v7334_v47, %v2256_v4  ;;  %v7465_v54 = vmul.f32 %v6518_v56, %v7392_v48  ;;  %v12674_v35 = vrot.slane %v12673_v21, 4 }
 0x110   : > { %v1783_v29 = vmul.f32 %v7341_v39, %v12626_v36  ;;  %v7474_v12 = vmul.f32 %v12651_v43, %v12626_v36  ;;  %v12675_v0 = vrot.slane %v7422_v44, 2  ;;  %v1713_v41 = vrot.slane %v1659_v24, 2 }
 0x111   : > { %12672 = vst [vmem:[#allocation46_spill] sm:$0xff] %v7465_v54  ;;  %v2954_v5 = vsel %vm2443_vm3, %v12674_v35, %v2953_v19  ;;  %v1139_v52 = vadd.f32 %v1094_v7, %v1015_v31  ;;  %v2505_v47 = vadd.f32 %v7339_v30, %v2380_v9  ;;  %v12676_v19 = vrot.slane %v7438_v1, 2 }
 0x112   : > { %v1219_v4 = vsel %vm1201_vm1, %v1217_v20, %v12675_v0  ;;  %v1908_v7 = vmul.f32 %v7345_v42, %v6523_v11  ;;  %v7488_v35 = vmul.f32 %v7380_v16, %v6523_v11  ;;  %v12677_v9 = vrot.slane %v7444_v50, 2 }
 0x113   : > { %v1264_v21 = vadd.f32 %v1219_v4, %v1139_v52  ;;  %v1343_v31 = vsel %vm1201_vm1, %v1341_v38, %v12676_v19  ;;  %v2629_v30 = vadd.f32 %v7354_v13, %v2505_v47  ;;  %v12678_v24 = vrot.slane %v7456_v60, 2 }
 0x114   : > { %v1467_v20 = vsel %vm1201_vm1, %v1465_v59, %v12677_v9  ;;  %v2032_v38 = vmul.f32 %v12634_v27, %v12650_v58  ;;  %v1838_v4 = vrot.slane %v1783_v29, 3  ;;  %v7502_v63 = vmul.f32 %v12634_v27, %v12660_v8 }
 0x115   : > { %v1591_v52 = vsel %vm1201_vm1, %v1589_v15, %v12678_v24  ;;  %v1388_v0 = vadd.f32 %v1343_v31, %v1264_v21  ;;  %v2753_v13 = vadd.f32 %v7359_v34, %v2629_v30  ;;  %v12679_v47 = vrot.slane %v7465_v54, 2 }
 0x116   : > { %v2156_v15 = vmul.f32 %v12635_v51, %v12656_v55  ;;  %v7512_v9 = vmul.f32 %v12635_v51, %v7040_v10  ;;  %v1962_v21 = vrot.slane %v1908_v7, 3  ;;  %v2280_v24 = vmul.f32 %v6573_v6, %v7349_v2 }
 0x117   : > { %v1715_v59 = vsel %vm1201_vm1, %v1713_v41, %v12679_v47  ;;  %v1512_v29 = vadd.f32 %v1467_v20, %v1388_v0  ;;  %v2877_v34 = vadd.f32 %v7376_v61, %v2753_v13  ;;  %v2086_v30 = vrot.slane %v2032_v38, 3 }
 0x118   : > { %v7521_v47 = vmul.f32 %v6573_v6, %v7392_v48  ;;  %v2210_v54 = vrot.slane %v2156_v15, 3  ;;  %v11992_v20 = vrot.slane %v7512_v9, 3  ;;  %v2404_v7 = vmul.f32 %v7341_v39, %v12607_v18 }
 0x119   : > { %v1636_v19 = vadd.f32 %v1591_v52, %v1512_v29  ;;  %v3001_v0 = vadd.f32 %v2954_v5, %v2877_v34  ;;  %v2334_v31 = vrot.slane %v2280_v24, 3  ;;  %v7529_v61 = vmul.f32 %v12651_v43, %v12607_v18 }
 0x11a   : > { %v11991_v60 = vrot.slane %v7521_v47, 3  ;;  %v2459_v13 = vrot.slane %v2404_v7, 4  ;;  %v2529_v41 = vmul.f32 %v7345_v42, %v6578_v17  ;;  %v7535_v52 = vmul.f32 %v7380_v16, %v6578_v17 }
 0x11b   : > { %12680 = vst [vmem:[#allocation33_spill] sm:$0xff] %v7529_v61  ;;  %v1760_v38 = vadd.f32 %v1715_v59, %v1636_v19  ;;  %3019 = vst [vmem:[%s6814_s20 + $0x28] sm:$0xff] %v3001_v0  ;;  %v12682_v39 = vrot.slane %v7474_v12, 3  ;;  %v2653_v29 = vmul.f32 %v6593_v28, %v12650_v58  ;;  %v7546_v19 = vmul.f32 %v6593_v28, %v12660_v8 }
 0x11c   : > { %12681 = vst [vmem:[#allocation30_spill] sm:$0xff] %v7535_v52  ;;  %v2583_v24 = vrot.slane %v2529_v41, 4  ;;  %v11999_v34 = vrot.slane %v7535_v52, 4  ;;  %v2777_v7 = vmul.f32 %v6597_v3, %v12656_v55  ;;  %v12684_v0 = vrot.slane %v7488_v35, 3  ;;  %v7593_v55 = vld [vmem:[#allocation2 + $0x80] sm:$0xff] }
 0x11d   : > { %v1840_v5 = vsel %vm1822_vm2, %v1838_v4, %v12682_v39  ;;  %12683 = vst [vmem:[#allocation50_spill] sm:$0xff] %v7546_v19  ;;  %v12685_v39 = vrot.slane %v7502_v63, 3  ;;  %v2212_v58 = vsel %vm1822_vm2, %v2210_v54, %v11992_v20  ;;  %v7562_v8 = vmul.f32 %v6597_v3, %v7040_v10  ;;  %12689 = vst [vmem:[#allocation41_spill] sm:$0xff] %v7593_v55  ;;  %v12692_v20 = vld [vmem:[#allocation26_spill] sm:$0xff] }
 0x11e   : > { %v1885_v59 = vadd.f32 %v1840_v5, %v1760_v38  ;;  %v1964_v4 = vsel %vm1822_vm2, %v1962_v21, %v12684_v0  ;;  %v2336_v38 = vsel %vm1822_vm2, %v2334_v31, %v11991_v60  ;;  %v12686_v5 = vrot.slane %v7529_v61, 4 }
 0x11f   : > { %v2088_v15 = vsel %vm1822_vm2, %v2086_v30, %v12685_v39  ;;  %v7573_v30 = vld [vmem:[%s11882_s1 + $0x18] ss:$0 sm:$0xff]  ;;  %v2707_v0 = vrot.slane %v2653_v29, 4  ;;  %v359_v31 = vmul.f32 %v12651_v43, %v12612_v37  ;;  %v2831_v60 = vrot.slane %v2777_v7, 4 }
 0x120   : > { %v2009_v41 = vadd.f32 %v1964_v4, %v1885_v59  ;;  %v2461_v21 = vsel %vm2443_vm3, %v2459_v13, %v12686_v5  ;;  %12687 = vst [vmem:[#allocation40_spill] sm:$0xff] %v7573_v30  ;;  %v2901_v54 = vmul.f32 %v7573_v30, %v7349_v2  ;;  %v7580_v59 = vmul.f32 %v7573_v30, %v7392_v48  ;;  %v7584_v4 = vld [vmem:[#allocation2 + $0xb8] sm:$0xf] }
 0x121   : > { %12688 = vst [vmem:[#allocation52_spill] sm:$0xff] %v7584_v4  ;;  %v2585_v5 = vsel %vm2443_vm3, %v2583_v24, %v11999_v34  ;;  %v395_v29 = vmul.f32 %v7380_v16, %v12614_v26  ;;  %v431_v43 = vmul.f32 %v7593_v55, %v12532_v32  ;;  %v7598_v24 = vld [vmem:[#allocation2 + $0x70] sm:$0xf]  ;;  %v12691_v34 = vrot.slane %v7546_v19, 4  ;;  %v12694_v16 = vld [vmem:[#allocation44_spill] sm:$0xff] }
 0x122   : > { %v2133_v13 = vadd.f32 %v2088_v15, %v2009_v41  ;;  %v2955_v39 = vrot.slane %v2901_v54, 4  ;;  %v5874_v41 = vld [vmem:[#allocation2 + $0x58] sm:$0xf]  ;;  %12690 = vst [vmem:[#allocation37_spill] sm:$0xff] %v7598_v24  ;;  %v668_v7 = vmul.f32 %v7598_v24, %v12654_v33  ;;  %v792_v2 = vmul.f32 %v12658_v53, %v6925_v14 }
 0x123   : > { %v411_v15 = vadd.f32 %v395_v29, %v359_v31  ;;  %v543_v52 = vmul.f32 %v5874_v41, %v12616_v49  ;;  %v2709_v54 = vsel %vm2443_vm3, %v2707_v0, %v12691_v34  ;;  %v916_v55 = vmul.f32 %v12661_v22, %v12692_v20  ;;  %v12696_v34 = vld [vmem:[#allocation51_spill] sm:$0xff] }
 0x124   : > { %v2257_v30 = vadd.f32 %v2212_v58, %v2133_v13  ;;  %v12693_v58 = vld [vmem:[#allocation49_spill] sm:$0xff]  ;;  %v467_v49 = vmul.f32 %v12694_v16, %v7040_v10  ;;  %v12695_v33 = vrot.slane %v7562_v8, 4  ;;  %v503_v0 = vmul.f32 %v12696_v34, %v7392_v48 }
 0x125   : > { %v1040_v31 = vmul.f32 %v12693_v58, %v7584_v4  ;;  %v447_v29 = vadd.f32 %v431_v43, %v411_v15  ;;  %v599_v32 = vrot.slane %v543_v52, 1  ;;  %v723_v53 = vrot.slane %v668_v7, 1 }
 0x126   : > { %v2381_v13 = vadd.f32 %v2336_v38, %v2257_v30  ;;  %v2833_v19 = vsel %vm2443_vm3, %v2831_v60, %v12695_v33  ;;  %v1164_v26 = vmul.f32 %v5874_v41, %v12666_v40  ;;  %v12697_v61 = vrot.slane %v7580_v59, 4 }
 0x127   : > { %v483_v30 = vadd.f32 %v467_v49, %v447_v29  ;;  %v847_v43 = vrot.slane %v792_v2, 1  ;;  %v12698_v15 = vrot.slane %v7371_v23, 1  ;;  %v971_v58 = vrot.slane %v916_v55, 1  ;;  %v12703_v29 = vld [vmem:[#allocation35_spill] sm:$0xff] }
 0x128   : > { %v2506_v22 = vadd.f32 %v2461_v21, %v2381_v13  ;;  %v2957_v38 = vsel %vm2443_vm3, %v2955_v39, %v12697_v61  ;;  %v1095_v10 = vrot.slane %v1040_v31, 1  ;;  %v1220_v33 = vrot.slane %v1164_v26, 2  ;;  %v12701_v31 = vld [vmem:[#allocation31_spill] sm:$0xff] }
 0x129   : > { %v600_v52 = vsel %vm580_vm0, %v12698_v15, %v599_v32  ;;  %v519_v16 = vadd.f32 %v503_v0, %v483_v30  ;;  %v1289_v7 = vmul.f32 %v7598_v24, %v12624_v45  ;;  %v1413_v21 = vmul.f32 %v12586_v57, %v6925_v14 }
 0x12a   : > { %v2630_v60 = vadd.f32 %v2585_v5, %v2506_v22  ;;  %v12699_v13 = vrot.slane %v7384_v25, 1  ;;  %v1537_v2 = vmul.f32 %v12589_v62, %v12692_v20  ;;  %v1661_v32 = vmul.f32 %v6518_v56, %v7584_v4 }
 0x12b   : > { %v1785_v26 = vmul.f32 %v5874_v41, %v12626_v36  ;;  %v644_v55 = vadd.f32 %v600_v52, %v519_v16  ;;  %v1344_v22 = vrot.slane %v1289_v7, 2  ;;  %v1468_v61 = vrot.slane %v1413_v21, 2 }
 0x12c   : > { %v724_v49 = vsel %vm580_vm0, %v12699_v13, %v723_v53  ;;  %v2754_v23 = vadd.f32 %v2709_v54, %v2630_v60  ;;  %v12700_v39 = vrot.slane %v7397_v46, 1  ;;  %v12702_v25 = vrot.slane %v12701_v31, 1 }
 0x12d   : > { %v12704_v0 = vrot.slane %v12703_v29, 1  ;;  %v1910_v15 = vmul.f32 %v7598_v24, %v6523_v11  ;;  %v768_v16 = vadd.f32 %v724_v49, %v644_v55  ;;  %v12705_v54 = vrot.slane %v7422_v44, 2 }
 0x12e   : > { %v848_v5 = vsel %vm580_vm0, %v12700_v39, %v847_v43  ;;  %v972_v53 = vsel %vm580_vm0, %v12702_v25, %v971_v58  ;;  %v2878_v13 = vadd.f32 %v2833_v19, %v2754_v23  ;;  %v1592_v52 = vrot.slane %v1537_v2, 2  ;;  %v12708_v25 = vld [vmem:[#allocation20_spill] sm:$0xff] }
 0x12f   : > { %v1096_v30 = vsel %vm580_vm0, %v12704_v0, %v1095_v10  ;;  %v1221_v46 = vsel %vm1201_vm1, %v12705_v54, %v1220_v33  ;;  %v12706_v43 = vrot.slane %v7438_v1, 2  ;;  %v12707_v58 = vrot.slane %v7444_v50, 2  ;;  %v12710_v0 = vld [vmem:[#allocation46_spill] sm:$0xff] }
 0x130   : > { %v1716_v10 = vrot.slane %v1661_v32, 2  ;;  %v1841_v21 = vrot.slane %v1785_v26, 3  ;;  %v3002_v39 = vadd.f32 %v2957_v38, %v2878_v13  ;;  %v892_v31 = vadd.f32 %v848_v5, %v768_v16 }
 0x131   : > { %v1345_v60 = vsel %vm1201_vm1, %v12706_v43, %v1344_v22  ;;  %v1469_v7 = vsel %vm1201_vm1, %v12707_v58, %v1468_v61  ;;  %v2034_v19 = vmul.f32 %v12634_v27, %v6925_v14  ;;  %v2158_v44 = vmul.f32 %v12635_v51, %v12692_v20 }
 0x132   : > { %v1965_v33 = vrot.slane %v1910_v15, 3  ;;  %v2282_v1 = vmul.f32 %v6573_v6, %v7584_v4  ;;  %v2406_v49 = vmul.f32 %v5874_v41, %v12607_v18  ;;  %v2531_v50 = vmul.f32 %v7598_v24, %v6578_v17  ;;  %3020 = vst [vmem:[%s6814_s20 + $0x30] sm:$0xff] %v3002_v39 }
 0x133   : > { %v1016_v2 = vadd.f32 %v972_v53, %v892_v31  ;;  %v2089_v32 = vrot.slane %v2034_v19, 3  ;;  %v2213_v38 = vrot.slane %v2158_v44, 3  ;;  %v2655_v26 = vmul.f32 %v6593_v28, %v6925_v14  ;;  %v12717_v19 = vld [vmem:[#allocation33_spill] sm:$0xff] }
 0x134   : > { %v2337_v23 = vrot.slane %v2282_v1, 3  ;;  %v2462_v55 = vrot.slane %v2406_v49, 4  ;;  %v2586_v22 = vrot.slane %v2531_v50, 4  ;;  %v2779_v61 = vmul.f32 %v6597_v3, %v12692_v20  ;;  %v7710_v49 = vld [vmem:[#allocation2 + $0x78] sm:$0xff]  ;;  %v12723_v50 = vld [vmem:[#allocation11_spill] sm:$0xff]  ;;  %v7745_v20 = vld [vmem:[#allocation2 + $0xc8] sm:$0xff] }
 0x135   : > { %v1140_v5 = vadd.f32 %v1096_v30, %v1016_v2  ;;  %v12709_v29 = vrot.slane %v12708_v25, 2  ;;  %v12711_v15 = vrot.slane %v12710_v0, 2  ;;  %v2710_v13 = vrot.slane %v2655_v26, 4  ;;  %12722 = vst [vmem:[#allocation42_spill] sm:$0xff] %v7710_v49  ;;  %v12728_v25 = vld [vmem:[#allocation9_spill] sm:$0xff]  ;;  %12738 = vst [vmem:[#allocation22_spill] sm:$0xff] %v7745_v20 }
 0x136   : > { %v12712_v16 = vrot.slane %v7474_v12, 3  ;;  %v12713_v54 = vrot.slane %v7488_v35, 3  ;;  %v12714_v58 = vrot.slane %v7502_v63, 3  ;;  %v12715_v39 = vrot.slane %v7512_v9, 3 }
 0x137   : > { %v1593_v41 = vsel %vm1201_vm1, %v12709_v29, %v1592_v52  ;;  %v1717_v53 = vsel %vm1201_vm1, %v12711_v15, %v1716_v10  ;;  %v1265_v31 = vadd.f32 %v1221_v46, %v1140_v5  ;;  %v12716_v10 = vrot.slane %v7521_v47, 3  ;;  %v12721_v46 = vld [vmem:[#allocation40_spill] sm:$0xff]  ;;  %v7723_v29 = vld [vmem:[#allocation2 + $0xc0] sm:$0xff]  ;;  %v12730_v15 = vld [vmem:[#allocation19_spill] sm:$0xff] }
 0x138   : > { %v1842_v14 = vsel %vm1822_vm2, %v12712_v16, %v1841_v21  ;;  %v1966_v43 = vsel %vm1822_vm2, %v12713_v54, %v1965_v33  ;;  %v2090_v30 = vsel %vm1822_vm2, %v12714_v58, %v2089_v32  ;;  %v7689_v52 = vsel %vm1822_vm2, %v12715_v39, %v2213_v38  ;;  %v12719_v33 = vld [vmem:[#allocation30_spill] sm:$0xff]  ;;  %12729 = vst [vmem:[#allocation39_spill] sm:$0xff] %v7723_v29  ;;  %v12732_v54 = vld [vmem:[#allocation12_spill] sm:$0xff]  ;;  %v12733_v58 = vld [vmem:[#allocation41_spill] sm:$0xff] }
 0x139   : > { %v7694_v12 = vsel %vm1822_vm2, %v12716_v10, %v2337_v23  ;;  %v2834_v21 = vrot.slane %v2779_v61, 4  ;;  %v360_v35 = vmul.f32 %v7345_v42, %v12612_v37  ;;  %v12718_v44 = vrot.slane %v12717_v19, 4  ;;  %v12724_v38 = vld [vmem:[#allocation50_spill] sm:$0xff]  ;;  %v12727_v61 = vld [vmem:[#allocation43_spill] sm:$0xff] }
 0x13a   : > { %v12720_v9 = vrot.slane %v12719_v33, 4  ;;  %v2903_v47 = vmul.f32 %v12721_v46, %v7584_v4  ;;  %v396_v2 = vmul.f32 %v7710_v49, %v12723_v50  ;;  %v1389_v32 = vadd.f32 %v1345_v60, %v1265_v31 }
 0x13b   : > { %v7701_v63 = vsel %vm2443_vm3, %v12718_v44, %v2462_v55  ;;  %v12725_v26 = vrot.slane %v12724_v38, 4  ;;  %v12726_v55 = vld [vmem:[#allocation59_spill] sm:$0xff]  ;;  %v7727_v16 = vmul.f32 %v12730_v15, %v12728_v25  ;;  %v669_v60 = vmul.f32 %v7710_v49, %v12732_v54  ;;  %v12737_v38 = vld [vmem:[#allocation44_spill] sm:$0xff] }
 0x13c   : > { %v7706_v1 = vsel %vm2443_vm3, %v12720_v9, %v2586_v22  ;;  %v432_v5 = vmul.f32 %v12727_v61, %v12726_v55  ;;  %v544_v22 = vmul.f32 %v7345_v42, %v12728_v25  ;;  %v412_v0 = vadd.f32 %v396_v2, %v360_v35  ;;  %v12735_v35 = vld [vmem:[#allocation45_spill] sm:$0xff]  ;;  %v12736_v2 = vld [vmem:[#allocation28_spill] sm:$0xff] }
 0x13d   : > { %v7717_v23 = vsel %vm2443_vm3, %v12725_v26, %v2710_v13  ;;  %12731 = vst [vmem:[#allocation36_spill] sm:$0xff] %v7727_v16  ;;  %v7733_v13 = vmul.f32 %v12733_v58, %v12732_v54  ;;  %v1513_v39 = vadd.f32 %v1469_v7, %v1389_v32  ;;  %v12734_v31 = vrot.slane %v7562_v8, 4  ;;  %v12739_v7 = vld [vmem:[#allocation47_spill] sm:$0xff]  ;;  %v12740_v32 = vld [vmem:[#allocation48_spill] sm:$0xff] }
 0x13e   : > { %v601_v19 = vrot.slane %v544_v22, 1  ;;  %v793_v44 = vmul.f32 %v12735_v35, %v12726_v55  ;;  %v2958_v33 = vrot.slane %v2903_v47, 4  ;;  %v448_v9 = vadd.f32 %v432_v5, %v412_v0 }
 0x13f   : > { %v7738_v10 = vsel %vm2443_vm3, %v12734_v31, %v2834_v21  ;;  %v468_v26 = vmul.f32 %v12737_v38, %v12736_v2  ;;  %v1637_v54 = vadd.f32 %v1593_v41, %v1513_v39  ;;  %v504_v8 = vmul.f32 %v12696_v34, %v7723_v29 }
 0x140   : > { %v7751_v21 = vmul.f32 %v12735_v35, %v12739_v7  ;;  %v917_v22 = vmul.f32 %v12740_v32, %v12736_v2  ;;  %v725_v5 = vrot.slane %v669_v60, 1  ;;  %v12027_v0 = vrot.slane %v7733_v13, 1  ;;  %v12742_v35 = vld [vmem:[#allocation49_spill] sm:$0xff] }
 0x141   : > { %v484_v47 = vadd.f32 %v468_v26, %v448_v9  ;;  %v7758_v31 = vmul.f32 %v12740_v32, %v7392_v48  ;;  %v1761_v4 = vadd.f32 %v1717_v53, %v1637_v54  ;;  %v12741_v41 = vrot.slane %v7727_v16, 1 }
 0x142   : > { %v849_v34 = vrot.slane %v793_v44, 1  ;;  %v1041_v38 = vmul.f32 %v12742_v35, %v7723_v29  ;;  %v7768_v60 = vmul.f32 %v12742_v35, %v7745_v20  ;;  %v1165_v9 = vmul.f32 %v7345_v42, %v12666_v40 }
 0x143   : > { %v603_v39 = vsel %vm580_vm0, %v601_v19, %v12741_v41  ;;  %v520_v24 = vadd.f32 %v504_v8, %v484_v47  ;;  %v1886_v26 = vadd.f32 %v1842_v14, %v1761_v4  ;;  %v973_v53 = vrot.slane %v917_v22, 1 }
 0x144   : > { %v7775_v19 = vmul.f32 %v12730_v15, %v12666_v40  ;;  %v1097_v41 = vrot.slane %v1041_v38, 1  ;;  %v12026_v8 = vrot.slane %v7768_v60, 1  ;;  %v1222_v47 = vrot.slane %v1165_v9, 2 }
 0x145   : > { %v645_v44 = vadd.f32 %v603_v39, %v520_v24  ;;  %v2010_v25 = vadd.f32 %v1966_v43, %v1886_v26  ;;  %v727_v16 = vsel %vm580_vm0, %v725_v5, %v12027_v0  ;;  %v1290_v4 = vmul.f32 %v7710_v49, %v12624_v45 }
 0x146   : > { %v12025_v35 = vrot.slane %v7775_v19, 2  ;;  %v12743_v14 = vrot.slane %v7580_v59, 4  ;;  %v7789_v24 = vmul.f32 %v12733_v58, %v12624_v45  ;;  %v1414_v43 = vmul.f32 %v12586_v57, %v12726_v55 }
 0x147   : > { %v769_v54 = vadd.f32 %v727_v16, %v645_v44  ;;  %v2134_v38 = vadd.f32 %v2090_v30, %v2010_v25  ;;  %v12744_v5 = vrot.slane %v7751_v21, 1  ;;  %v12745_v9 = vrot.slane %v7758_v31, 1 }
 0x148   : > { %v2959_v22 = vsel %vm2443_vm3, %v12743_v14, %v2958_v33  ;;  %v7801_v59 = vmul.f32 %v12586_v57, %v12739_v7  ;;  %v1099_v33 = vsel %vm580_vm0, %v1097_v41, %v12026_v8  ;;  %v1224_v30 = vsel %vm1201_vm1, %v1222_v47, %v12025_v35 }
 0x149   : > { %v851_v39 = vsel %vm580_vm0, %v849_v34, %v12744_v5  ;;  %v975_v26 = vsel %vm580_vm0, %v973_v53, %v12745_v9  ;;  %v1538_v34 = vmul.f32 %v12589_v62, %v12736_v2  ;;  %v2258_v55 = vadd.f32 %v7689_v52, %v2134_v38 }
 0x14a   : > { %v893_v16 = vadd.f32 %v851_v39, %v769_v54  ;;  %v1346_v25 = vrot.slane %v1290_v4, 2  ;;  %v7814_v53 = vmul.f32 %v12589_v62, %v7392_v48  ;;  %v1662_v54 = vmul.f32 %v6518_v56, %v7723_v29 }
 0x14b   : > { %v12030_v41 = vrot.slane %v7789_v24, 2  ;;  %v1470_v14 = vrot.slane %v1414_v43, 2  ;;  %v7821_v47 = vmul.f32 %v6518_v56, %v7745_v20  ;;  %v2382_v5 = vadd.f32 %v7694_v12, %v2258_v55 }
 0x14c   : > { %v1017_v44 = vadd.f32 %v975_v26, %v893_v16  ;;  %v12029_v52 = vrot.slane %v7801_v59, 2  ;;  %v1594_v4 = vrot.slane %v1538_v34, 2  ;;  %v1786_v38 = vmul.f32 %v7345_v42, %v12626_v36 }
 0x14d   : > { %v12028_v9 = vrot.slane %v7814_v53, 2  ;;  %v1718_v35 = vrot.slane %v1662_v54, 2  ;;  %v7830_v26 = vmul.f32 %v12730_v15, %v12626_v36  ;;  %v2507_v43 = vadd.f32 %v7701_v63, %v2382_v5  ;;  %v7848_v5 = vld [vmem:[#allocation2 + $0x90] sm:$0xff] }
 0x14e   : > { %v1141_v39 = vadd.f32 %v1099_v33, %v1017_v44  ;;  %v12032_v16 = vrot.slane %v7821_v47, 2  ;;  %v1911_v12 = vmul.f32 %v7710_v49, %v6523_v11  ;;  %v7838_v34 = vmul.f32 %v12733_v58, %v6523_v11  ;;  %12746 = vst [vmem:[#allocation24_spill] sm:$0xff] %v7848_v5 }
 0x14f   : > { %v1348_v33 = vsel %vm1201_vm1, %v1346_v25, %v12030_v41  ;;  %v1843_v54 = vrot.slane %v1786_v38, 3  ;;  %v12031_v44 = vrot.slane %v7830_v26, 3  ;;  %v2631_v8 = vadd.f32 %v7706_v1, %v2507_v43 }
 0x150   : > { %v1266_v55 = vadd.f32 %v1224_v30, %v1141_v39  ;;  %v1472_v63 = vsel %vm1201_vm1, %v1470_v14, %v12029_v52  ;;  %v2035_v0 = vmul.f32 %v7848_v5, %v12634_v27  ;;  %v7854_v30 = vmul.f32 %v12634_v27, %v12739_v7 }
 0x151   : > { %v1596_v25 = vsel %vm1201_vm1, %v1594_v4, %v12028_v9  ;;  %v2159_v1 = vmul.f32 %v12635_v51, %v12736_v2  ;;  %v7863_v14 = vmul.f32 %v12635_v51, %v7392_v48  ;;  %v2755_v38 = vadd.f32 %v7717_v23, %v2631_v8 }
 0x152   : > { %v1390_v39 = vadd.f32 %v1348_v33, %v1266_v55  ;;  %v1720_v43 = vsel %vm1201_vm1, %v1718_v35, %v12032_v16  ;;  %v1967_v7 = vrot.slane %v1911_v12, 3  ;;  %v1845_v4 = vsel %vm1822_vm2, %v1843_v54, %v12031_v44 }
 0x153   : > { %v2091_v9 = vrot.slane %v2035_v0, 3  ;;  %v2283_v52 = vmul.f32 %v6573_v6, %v7723_v29  ;;  %v2879_v41 = vadd.f32 %v7738_v10, %v2755_v38  ;;  %v7879_v35 = vmul.f32 %v6573_v6, %v7745_v20 }
 0x154   : > { %v1514_v33 = vadd.f32 %v1472_v63, %v1390_v39  ;;  %v2407_v8 = vmul.f32 %v7345_v42, %v12607_v18  ;;  %v2215_v63 = vrot.slane %v2159_v1, 3  ;;  %v12036_v54 = vrot.slane %v7863_v14, 3 }
 0x155   : > { %v7886_v0 = vmul.f32 %v12730_v15, %v12607_v18  ;;  %v3003_v39 = vadd.f32 %v2959_v22, %v2879_v41  ;;  %v2339_v10 = vrot.slane %v2283_v52, 3  ;;  %v12035_v38 = vrot.slane %v7879_v35, 3  ;;  %v7902_v41 = vld [vmem:[#allocation2 + $0x98] sm:$0xff] }
 0x156   : > { %v1638_v12 = vadd.f32 %v1596_v25, %v1514_v33  ;;  %v2532_v44 = vmul.f32 %v7710_v49, %v6578_v17  ;;  %v2464_v23 = vrot.slane %v2407_v8, 4  ;;  %v7894_v42 = vmul.f32 %v12733_v58, %v6578_v17  ;;  %12750 = vst [vmem:[#allocation29_spill] sm:$0xff] %v7902_v41 }
 0x157   : > { %12747 = vst [vmem:[#allocation32_spill] sm:$0xff] %v7886_v0  ;;  %3021 = vst [vmem:[%s6814_s20 + $0x38] sm:$0xff] %v3003_v39  ;;  %v12749_v25 = vrot.slane %v7838_v34, 3  ;;  %v2656_v22 = vmul.f32 %v7848_v5, %v6593_v28  ;;  %v7906_v52 = vmul.f32 %v7902_v41, %v6593_v28  ;;  %v12752_v8 = vrot.slane %v7854_v30, 3 }
 0x158   : > { %v1762_v16 = vadd.f32 %v1720_v43, %v1638_v12  ;;  %12748 = vst [vmem:[#allocation16_spill] sm:$0xff] %v7894_v42  ;;  %v2780_v43 = vmul.f32 %v6597_v3, %v12736_v2  ;;  %v2588_v39 = vrot.slane %v2532_v44, 4  ;;  %v2341_v55 = vsel %vm1822_vm2, %v2339_v10, %v12035_v38  ;;  %v12758_v38 = vld [vmem:[#allocation37_spill] sm:$0xff] }
 0x159   : > { %v1969_v1 = vsel %vm1822_vm2, %v1967_v7, %v12749_v25  ;;  %12751 = vst [vmem:[#allocation21_spill] sm:$0xff] %v7906_v52  ;;  %v2093_v12 = vsel %vm1822_vm2, %v2091_v9, %v12752_v8  ;;  %v2217_v25 = vsel %vm1822_vm2, %v2215_v63, %v12036_v54  ;;  %v7922_v5 = vmul.f32 %v6597_v3, %v7392_v48 }
 0x15a   : > { %v1887_v33 = vadd.f32 %v1845_v4, %v1762_v16  ;;  %v2904_v16 = vmul.f32 %v12721_v46, %v7723_v29  ;;  %v12754_v9 = vrot.slane %v7886_v0, 4  ;;  %v7931_v8 = vmul.f32 %v12721_v46, %v7745_v20  ;;  %v7938_v29 = vld [vmem:[#allocation2 + $0xd0] sm:$0xf] }
 0x15b   : > { %12753 = vst [vmem:[#allocation56_spill] sm:$0xff] %v7922_v5  ;;  %v361_v63 = vmul.f32 %v12730_v15, %v12612_v37  ;;  %v2712_v10 = vrot.slane %v2656_v22, 4  ;;  %v2836_v54 = vrot.slane %v2780_v43, 4  ;;  %v397_v7 = vmul.f32 %v12733_v58, %v12723_v50  ;;  %12755 = vst [vmem:[#allocation25_spill] sm:$0xff] %v7938_v29  ;;  %v12757_v43 = vld [vmem:[#allocation9_spill] sm:$0xff]  ;;  %v12759_v50 = vld [vmem:[#allocation44_spill] sm:$0xff] }
 0x15c   : > { %v2011_v4 = vadd.f32 %v1969_v1, %v1887_v33  ;;  %v2466_v44 = vsel %vm2443_vm3, %v2464_v23, %v12754_v9  ;;  %v12756_v33 = vrot.slane %v7894_v42, 4  ;;  %v2960_v2 = vrot.slane %v2904_v16, 4  ;;  %v12760_v42 = vld [vmem:[#allocation12_spill] sm:$0xff]  ;;  %v12762_v16 = vld [vmem:[#allocation45_spill] sm:$0xff] }
 0x15d   : > { %v413_v15 = vadd.f32 %v397_v7, %v361_v63  ;;  %v433_v22 = vmul.f32 %v7902_v41, %v12727_v61  ;;  %v546_v49 = vmul.f32 %v12758_v38, %v12757_v43  ;;  %v12763_v63 = vld [vmem:[#allocation52_spill] sm:$0xff]  ;;  %v12764_v61 = vld [vmem:[#allocation49_spill] sm:$0xff]  ;;  %v12766_v37 = vrot.slane %v7922_v5, 4 }
 0x15e   : > { %v2135_v1 = vadd.f32 %v2093_v12, %v2011_v4  ;;  %v2590_v23 = vsel %vm2443_vm3, %v2588_v39, %v12756_v33  ;;  %v469_v12 = vmul.f32 %v12759_v50, %v7392_v48  ;;  %v7951_v4 = vld [vmem:[#allocation2 + $0x88] sm:$0xf]  ;;  %v919_v41 = vmul.f32 %v12740_v32, %v12763_v63 }
 0x15f   : > { %v671_v39 = vmul.f32 %v7951_v4, %v12760_v42  ;;  %v12761_v33 = vld [vmem:[#allocation26_spill] sm:$0xff]  ;;  %v449_v46 = vadd.f32 %v433_v22, %v413_v15  ;;  %v604_v7 = vrot.slane %v546_v49, 1  ;;  %v1043_v43 = vmul.f32 %v12764_v61, %v7938_v29  ;;  %v12768_v61 = vld [vmem:[#allocation51_spill] sm:$0xff] }
 0x160   : > { %v2259_v58 = vadd.f32 %v2217_v25, %v2135_v1  ;;  %v795_v9 = vmul.f32 %v12762_v16, %v12761_v33  ;;  %v12765_v1 = vrot.slane %v7906_v52, 4  ;;  %v1167_v42 = vmul.f32 %v12758_v38, %v12666_v40  ;;  %v12769_v16 = vld [vmem:[#allocation36_spill] sm:$0xff] }
 0x161   : > { %v728_v50 = vrot.slane %v671_v39, 1  ;;  %v2838_v15 = vsel %vm2443_vm3, %v2836_v54, %v12766_v37  ;;  %v12767_v49 = vrot.slane %v7931_v8, 4  ;;  %v485_v32 = vadd.f32 %v469_v12, %v449_v46 }
 0x162   : > { %v2383_v25 = vadd.f32 %v2341_v55, %v2259_v58  ;;  %v2714_v48 = vsel %vm2443_vm3, %v2712_v10, %v12765_v1  ;;  %v505_v58 = vmul.f32 %v12768_v61, %v7745_v20  ;;  %v12770_v52 = vrot.slane %v12769_v16, 1 }
 0x163   : > { %v2962_v22 = vsel %vm2443_vm3, %v2960_v2, %v12767_v49  ;;  %v852_v39 = vrot.slane %v795_v9, 1  ;;  %v976_v1 = vrot.slane %v919_v41, 1  ;;  %v1100_v0 = vrot.slane %v1043_v43, 1 }
 0x164   : > { %v2508_v55 = vadd.f32 %v2466_v44, %v2383_v25  ;;  %v605_v10 = vsel %vm580_vm0, %v12770_v52, %v604_v7  ;;  %v521_v40 = vadd.f32 %v505_v58, %v485_v32  ;;  %v1225_v5 = vrot.slane %v1167_v42, 2 }
 0x165   : > { %v1292_v37 = vmul.f32 %v7951_v4, %v12624_v45  ;;  %v12771_v2 = vrot.slane %v7733_v13, 1  ;;  %v1416_v44 = vmul.f32 %v12586_v57, %v12761_v33  ;;  %v1540_v12 = vmul.f32 %v12589_v62, %v12763_v63 }
 0x166   : > { %v2632_v54 = vadd.f32 %v2590_v23, %v2508_v55  ;;  %v646_v52 = vadd.f32 %v605_v10, %v521_v40  ;;  %v1664_v32 = vmul.f32 %v6518_v56, %v7938_v29  ;;  %v1788_v42 = vmul.f32 %v12758_v38, %v12626_v36 }
 0x167   : > { %v729_v46 = vsel %vm580_vm0, %v12771_v2, %v728_v50  ;;  %v1349_v9 = vrot.slane %v1292_v37, 2  ;;  %v12772_v23 = vrot.slane %v7751_v21, 1  ;;  %v1473_v50 = vrot.slane %v1416_v44, 2 }
 0x168   : > { %v2756_v41 = vadd.f32 %v2714_v48, %v2632_v54  ;;  %v1913_v43 = vmul.f32 %v7951_v4, %v6523_v11  ;;  %v770_v16 = vadd.f32 %v729_v46, %v646_v52  ;;  %v12773_v7 = vrot.slane %v7758_v31, 1 }
 0x169   : > { %v853_v13 = vsel %vm580_vm0, %v12772_v23, %v852_v39  ;;  %v12774_v25 = vrot.slane %v7768_v60, 1  ;;  %v12775_v58 = vrot.slane %v7775_v19, 2  ;;  %v12776_v55 = vrot.slane %v7789_v24, 2 }
 0x16a   : > { %v977_v40 = vsel %vm580_vm0, %v12773_v7, %v976_v1  ;;  %v2880_v21 = vadd.f32 %v2838_v15, %v2756_v41  ;;  %v1597_v39 = vrot.slane %v1540_v12, 2  ;;  %v1721_v37 = vrot.slane %v1664_v32, 2 }
 0x16b   : > { %v1101_v49 = vsel %vm580_vm0, %v12774_v25, %v1100_v0  ;;  %v1226_v48 = vsel %vm1201_vm1, %v12775_v58, %v1225_v5  ;;  %v1350_v10 = vsel %vm1201_vm1, %v12776_v55, %v1349_v9  ;;  %v894_v54 = vadd.f32 %v853_v13, %v770_v16 }
 0x16c   : > { %v12777_v31 = vrot.slane %v7801_v59, 2  ;;  %v1846_v60 = vrot.slane %v1788_v42, 3  ;;  %v2037_v0 = vmul.f32 %v12634_v27, %v12761_v33  ;;  %v3004_v19 = vadd.f32 %v2962_v22, %v2880_v21  ;;  %v8021_v33 = vld [vmem:[#allocation2 + $0xa0] sm:$0xf] }
 0x16d   : > { %v1970_v2 = vrot.slane %v1913_v43, 3  ;;  %v2161_v5 = vmul.f32 %v12635_v51, %v12763_v63  ;;  %v2285_v24 = vmul.f32 %v6573_v6, %v7938_v29  ;;  %v1018_v15 = vadd.f32 %v977_v40, %v894_v54  ;;  %12778 = vst [vmem:[#allocation17_spill] sm:$0xff] %v8021_v33 }
 0x16e   : > { %v1474_v1 = vsel %vm1201_vm1, %v12777_v31, %v1473_v50  ;;  %v2094_v46 = vrot.slane %v2037_v0, 3  ;;  %v2409_v44 = vmul.f32 %v12758_v38, %v12607_v18  ;;  %v2534_v59 = vmul.f32 %v7951_v4, %v6578_v17  ;;  %3022 = vst [vmem:[%s6814_s20 + $0x40] sm:$0xff] %v3004_v19  ;;  %v12791_v0 = vld [vmem:[#allocation24_spill] sm:$0xff] }
 0x16f   : > { %v2218_v12 = vrot.slane %v2161_v5, 3  ;;  %v2342_v52 = vrot.slane %v2285_v24, 3  ;;  %v2658_v22 = vmul.f32 %v8021_v33, %v6593_v28  ;;  %v2782_v9 = vmul.f32 %v6597_v3, %v12763_v63  ;;  %v8061_v19 = vld [vmem:[#allocation2 + $0xd8] sm:$0xff] }
 0x170   : > { %v1142_v32 = vadd.f32 %v1101_v49, %v1018_v15  ;;  %v12779_v42 = vrot.slane %v7814_v53, 2  ;;  %v2467_v38 = vrot.slane %v2409_v44, 4  ;;  %v2591_v23 = vrot.slane %v2534_v59, 4  ;;  %12792 = vst [vmem:[#allocation53_spill] sm:$0xff] %v8061_v19  ;;  %v12793_v5 = vld [vmem:[#allocation16_spill] sm:$0xff]  ;;  %v12795_v15 = vld [vmem:[#allocation21_spill] sm:$0xff] }
 0x171   : > { %v12780_v13 = vrot.slane %v7821_v47, 2  ;;  %v12781_v43 = vrot.slane %v7830_v26, 3  ;;  %v12782_v7 = vrot.slane %v7838_v34, 3  ;;  %v2715_v25 = vrot.slane %v2658_v22, 4  ;;  %v12786_v34 = vld [vmem:[#allocation32_spill] sm:$0xff] }
 0x172   : > { %v1598_v41 = vsel %vm1201_vm1, %v12779_v42, %v1597_v39  ;;  %v1267_v49 = vadd.f32 %v1226_v48, %v1142_v32  ;;  %v12783_v53 = vrot.slane %v7854_v30, 3  ;;  %v12784_v21 = vrot.slane %v7863_v14, 3  ;;  %v12788_v48 = vld [vmem:[#allocation10_spill] sm:$0xff]  ;;  %v12797_v59 = vld [vmem:[#allocation40_spill] sm:$0xff]  ;;  %v12800_v42 = vld [vmem:[#allocation9_spill] sm:$0xff] }
 0x173   : > { %v1722_v50 = vsel %vm1201_vm1, %v12780_v13, %v1721_v37  ;;  %v1847_v16 = vsel %vm1822_vm2, %v12781_v43, %v1846_v60  ;;  %v1971_v40 = vsel %vm1822_vm2, %v12782_v7, %v1970_v2  ;;  %v2839_v55 = vrot.slane %v2782_v9, 4  ;;  %v12789_v30 = vld [vmem:[#allocation42_spill] sm:$0xff]  ;;  %v12790_v60 = vld [vmem:[#allocation11_spill] sm:$0xff]  ;;  %v12798_v22 = vld [vmem:[#allocation28_spill] sm:$0xff] }
 0x174   : > { %v2095_v58 = vsel %vm1822_vm2, %v12783_v53, %v2094_v46  ;;  %v8045_v47 = vsel %vm1822_vm2, %v12784_v21, %v2218_v12  ;;  %v12785_v26 = vrot.slane %v7879_v35, 3  ;;  %v12787_v37 = vrot.slane %v12786_v34, 4  ;;  %v12799_v9 = vld [vmem:[#allocation43_spill] sm:$0xff]  ;;  %v12802_v43 = vld [vmem:[#allocation56_spill] sm:$0xff]  ;;  %v12805_v21 = vld [vmem:[#allocation29_spill] sm:$0xff] }
 0x175   : > { %v362_v31 = vmul.f32 %v12789_v30, %v12788_v48  ;;  %v398_v14 = vmul.f32 %v12791_v0, %v12790_v60  ;;  %v1391_v2 = vadd.f32 %v1350_v10, %v1267_v49  ;;  %v12794_v24 = vrot.slane %v12793_v5, 4  ;;  %v12804_v49 = vld [vmem:[#allocation12_spill] sm:$0xff] }
 0x176   : > { %v8050_v39 = vsel %vm1822_vm2, %v12785_v26, %v2342_v52  ;;  %v8055_v54 = vsel %vm2443_vm3, %v12787_v37, %v2467_v38  ;;  %v12796_v46 = vrot.slane %v12795_v15, 4  ;;  %v8075_v12 = vmul.f32 %v12797_v59, %v7938_v29  ;;  %v12801_v38 = vld [vmem:[#allocation41_spill] sm:$0xff]  ;;  %v12806_v37 = vld [vmem:[#allocation39_spill] sm:$0xff]  ;;  %v12811_v29 = vld [vmem:[#allocation48_spill] sm:$0xff] }
 0x177   : > { %v8066_v35 = vsel %vm2443_vm3, %v12794_v24, %v2591_v23  ;;  %v414_v52 = vadd.f32 %v398_v14, %v362_v31  ;;  %v434_v32 = vmul.f32 %v12799_v9, %v12798_v22  ;;  %v547_v10 = vmul.f32 %v12789_v30, %v12800_v42  ;;  %v12807_v31 = vld [vmem:[#allocation44_spill] sm:$0xff]  ;;  %v8102_v24 = vld [vmem:[#allocation2 + $0xe0] sm:$0xff] }
 0x178   : > { %v8071_v44 = vsel %vm2443_vm3, %v12796_v46, %v2715_v25  ;;  %v8083_v23 = vmul.f32 %v12801_v38, %v12800_v42  ;;  %v1515_v13 = vadd.f32 %v1474_v1, %v1391_v2  ;;  %v12803_v7 = vrot.slane %v12802_v43, 4  ;;  %v12808_v1 = vld [vmem:[#allocation45_spill] sm:$0xff]  ;;  %12809 = vst [vmem:[#allocation60_spill] sm:$0xff] %v8102_v24  ;;  %v12810_v43 = vld [vmem:[#allocation38_spill] sm:$0xff] }
 0x179   : > { %v672_v53 = vmul.f32 %v12791_v0, %v12804_v49  ;;  %v8094_v26 = vmul.f32 %v12805_v21, %v12804_v49  ;;  %v450_v34 = vadd.f32 %v434_v32, %v414_v52  ;;  %v470_v14 = vmul.f32 %v12807_v31, %v12806_v37  ;;  %v12812_v46 = vld [vmem:[#allocation49_spill] sm:$0xff] }
 0x17a   : > { %v8088_v25 = vsel %vm2443_vm3, %v12803_v7, %v2839_v55  ;;  %v506_v5 = vmul.f32 %v12768_v61, %v8061_v19  ;;  %v796_v2 = vmul.f32 %v12808_v1, %v12798_v22  ;;  %v1639_v55 = vadd.f32 %v1598_v41, %v1515_v13 }
 0x17b   : > { %v606_v15 = vrot.slane %v547_v10, 1  ;;  %v8107_v7 = vmul.f32 %v12808_v1, %v12810_v43  ;;  %v486_v52 = vadd.f32 %v470_v14, %v450_v34  ;;  %v730_v32 = vrot.slane %v672_v53, 1 }
 0x17c   : > { %v920_v61 = vmul.f32 %v12811_v29, %v12806_v37  ;;  %v1763_v63 = vadd.f32 %v1722_v50, %v1639_v55  ;;  %v854_v33 = vrot.slane %v796_v2, 1  ;;  %v8115_v41 = vmul.f32 %v12811_v29, %v7745_v20  ;;  %v12814_v55 = vld [vmem:[#allocation13_spill] sm:$0xff] }
 0x17d   : > { %v522_v10 = vadd.f32 %v506_v5, %v486_v52  ;;  %v1044_v1 = vmul.f32 %v12812_v46, %v8061_v19  ;;  %v8121_v53 = vmul.f32 %v12812_v46, %v8102_v24  ;;  %v12813_v14 = vrot.slane %v8083_v23, 1 }
 0x17e   : > { %v978_v13 = vrot.slane %v920_v61, 1  ;;  %v1888_v34 = vadd.f32 %v1847_v16, %v1763_v63  ;;  %v1168_v49 = vmul.f32 %v12789_v30, %v12814_v55  ;;  %v8132_v52 = vmul.f32 %v12801_v38, %v12814_v55 }
 0x17f   : > { %v608_v50 = vsel %vm580_vm0, %v606_v15, %v12813_v14  ;;  %v1102_v5 = vrot.slane %v1044_v1, 1  ;;  %v2963_v63 = vrot.slane %v8075_v12, 4  ;;  %v12815_v16 = vrot.slane %v8094_v26, 1 }
 0x180   : > { %v647_v31 = vadd.f32 %v608_v50, %v522_v10  ;;  %v2012_v46 = vadd.f32 %v1971_v40, %v1888_v34  ;;  %v1293_v14 = vmul.f32 %v12791_v0, %v12624_v45  ;;  %v12816_v10 = vrot.slane %v8107_v7, 1 }
 0x181   : > { %v732_v15 = vsel %vm580_vm0, %v730_v32, %v12815_v16  ;;  %v12817_v50 = vrot.slane %v8115_v41, 1  ;;  %v8148_v40 = vmul.f32 %v12805_v21, %v12624_v45  ;;  %v1227_v34 = vrot.slane %v1168_v49, 2 }
 0x182   : > { %v771_v2 = vadd.f32 %v732_v15, %v647_v31  ;;  %v856_v1 = vsel %vm580_vm0, %v854_v33, %v12816_v10  ;;  %v2136_v12 = vadd.f32 %v2095_v58, %v2012_v46  ;;  %v1417_v32 = vmul.f32 %v12586_v57, %v12798_v22 }
 0x183   : > { %v980_v61 = vsel %vm580_vm0, %v978_v13, %v12817_v50  ;;  %v8154_v31 = vmul.f32 %v12586_v57, %v12810_v43  ;;  %v12818_v33 = vrot.slane %v8121_v53, 1  ;;  %v1541_v10 = vmul.f32 %v12589_v62, %v12806_v37 }
 0x184   : > { %v895_v16 = vadd.f32 %v856_v1, %v771_v2  ;;  %v2260_v58 = vadd.f32 %v8045_v47, %v2136_v12  ;;  %v1351_v49 = vrot.slane %v1293_v14, 2  ;;  %v12066_v46 = vrot.slane %v8148_v40, 2  ;;  %v8212_v1 = vld [vmem:[#allocation2 + $0xb0] sm:$0xff] }
 0x185   : > { %v1104_v15 = vsel %vm580_vm0, %v1102_v5, %v12818_v33  ;;  %v8166_v22 = vmul.f32 %v12589_v62, %v7745_v20  ;;  %v1475_v2 = vrot.slane %v1417_v32, 2  ;;  %v1665_v5 = vmul.f32 %v6518_v56, %v8061_v19  ;;  %12826 = vst [vmem:[#allocation27_spill] sm:$0xff] %v8212_v1 }
 0x186   : > { %v1019_v43 = vadd.f32 %v980_v61, %v895_v16  ;;  %v2384_v50 = vadd.f32 %v8050_v39, %v2260_v58  ;;  %v1599_v33 = vrot.slane %v1541_v10, 2  ;;  %v8175_v47 = vmul.f32 %v6518_v56, %v8102_v24 }
 0x187   : > { %12819 = vst [vmem:[#allocation23_spill] sm:$0xff] %v8166_v22  ;;  %v12821_v14 = vrot.slane %v7931_v8, 4  ;;  %v1789_v32 = vmul.f32 %v12789_v30, %v12626_v36  ;;  %v8184_v16 = vmul.f32 %v12801_v38, %v12626_v36  ;;  %v12822_v10 = vrot.slane %v8132_v52, 2 }
 0x188   : > { %12820 = vst [vmem:[#allocation18_spill] sm:$0xff] %v8175_v47  ;;  %v1143_v61 = vadd.f32 %v1104_v15, %v1019_v43  ;;  %v2509_v39 = vadd.f32 %v8055_v54, %v2384_v50  ;;  %v1723_v13 = vrot.slane %v1665_v5, 2  ;;  %v1914_v15 = vmul.f32 %v12791_v0, %v6523_v11 }
 0x189   : > { %v2964_v12 = vsel %vm2443_vm3, %v12821_v14, %v2963_v63  ;;  %v1229_v58 = vsel %vm1201_vm1, %v1227_v34, %v12822_v10  ;;  %v1353_v63 = vsel %vm1201_vm1, %v1351_v49, %v12066_v46  ;;  %v8198_v43 = vmul.f32 %v12805_v21, %v6523_v11 }
 0x18a   : > { %v1268_v8 = vadd.f32 %v1229_v58, %v1143_v61  ;;  %v2633_v54 = vadd.f32 %v8066_v35, %v2509_v39  ;;  %v12823_v50 = vrot.slane %v8154_v31, 2  ;;  %v12824_v5 = vrot.slane %v8166_v22, 2  ;;  %v8207_v61 = vld [vmem:[#allocation2 + $0xa8] sm:$0xff] }
 0x18b   : > { %12825 = vst [vmem:[#allocation58_spill] sm:$0xff] %v8207_v61  ;;  %v2038_v49 = vmul.f32 %v8207_v61, %v12634_v27  ;;  %v1848_v58 = vrot.slane %v1789_v32, 3  ;;  %v8216_v35 = vmul.f32 %v8212_v1, %v12634_v27  ;;  %v12827_v39 = vrot.slane %v8175_v47, 2 }
 0x18c   : > { %v1477_v34 = vsel %vm1201_vm1, %v1475_v2, %v12823_v50  ;;  %v1601_v14 = vsel %vm1201_vm1, %v1599_v33, %v12824_v5  ;;  %v1392_v10 = vadd.f32 %v1353_v63, %v1268_v8  ;;  %v2757_v2 = vadd.f32 %v8071_v44, %v2633_v54 }
 0x18d   : > { %v1725_v33 = vsel %vm1201_vm1, %v1723_v13, %v12827_v39  ;;  %v2162_v50 = vmul.f32 %v12635_v51, %v12806_v37  ;;  %v8226_v32 = vmul.f32 %v12635_v51, %v7745_v20  ;;  %v1972_v63 = vrot.slane %v1914_v15, 3 }
 0x18e   : > { %v1516_v8 = vadd.f32 %v1477_v34, %v1392_v10  ;;  %v2286_v46 = vmul.f32 %v6573_v6, %v8061_v19  ;;  %v2881_v44 = vadd.f32 %v8088_v25, %v2757_v2  ;;  %v2096_v54 = vrot.slane %v2038_v49, 3 }
 0x18f   : > { %v8235_v39 = vmul.f32 %v6573_v6, %v8102_v24  ;;  %v2220_v22 = vrot.slane %v2162_v50, 3  ;;  %v12071_v34 = vrot.slane %v8226_v32, 3  ;;  %v2410_v15 = vmul.f32 %v12789_v30, %v12607_v18 }
 0x190   : > { %v1640_v47 = vadd.f32 %v1601_v14, %v1516_v8  ;;  %v3005_v10 = vadd.f32 %v2964_v12, %v2881_v44  ;;  %v2344_v5 = vrot.slane %v2286_v46, 3  ;;  %v8243_v25 = vmul.f32 %v12801_v38, %v12607_v18 }
 0x191   : > { %v2469_v2 = vrot.slane %v2410_v15, 4  ;;  %v2535_v13 = vmul.f32 %v12791_v0, %v6578_v17  ;;  %v8249_v14 = vmul.f32 %v12805_v21, %v6578_v17  ;;  %v12830_v30 = vrot.slane %v8184_v16, 3 }
 0x192   : > { %12828 = vst [vmem:[#allocation31_spill] sm:$0xff] %v8243_v25  ;;  %v1764_v49 = vadd.f32 %v1725_v33, %v1640_v47  ;;  %3023 = vst [vmem:[%s6814_s20 + $0x48] sm:$0xff] %v3005_v10  ;;  %v2659_v50 = vmul.f32 %v8207_v61, %v6593_v28  ;;  %v8260_v47 = vmul.f32 %v8212_v1, %v6593_v28  ;;  %v12832_v10 = vrot.slane %v8198_v43, 3 }
 0x193   : > { %12829 = vst [vmem:[#allocation35_spill] sm:$0xff] %v8249_v14  ;;  %v1850_v46 = vsel %vm1822_vm2, %v1848_v58, %v12830_v30  ;;  %v2593_v8 = vrot.slane %v2535_v13, 4  ;;  %v2783_v15 = vmul.f32 %v6597_v3, %v12806_v37  ;;  %v12833_v30 = vrot.slane %v8216_v35, 3 }
 0x194   : > { %12831 = vst [vmem:[#allocation20_spill] sm:$0xff] %v8260_v47  ;;  %v1889_v33 = vadd.f32 %v1850_v46, %v1764_v49  ;;  %v1974_v58 = vsel %vm1822_vm2, %v1972_v63, %v12832_v10  ;;  %v2222_v51 = vsel %vm1822_vm2, %v2220_v22, %v12071_v34  ;;  %v8276_v13 = vmul.f32 %v6597_v3, %v7745_v20  ;;  %v12842_v34 = vld [vmem:[#allocation45_spill] sm:$0xff] }
 0x195   : > { %v2098_v12 = vsel %vm1822_vm2, %v2096_v54, %v12833_v30  ;;  %v12834_v46 = vrot.slane %v8235_v39, 3  ;;  %v12835_v37 = vrot.slane %v8243_v25, 4  ;;  %v2907_v54 = vmul.f32 %v12797_v59, %v8061_v19 }
 0x196   : > { %v2013_v49 = vadd.f32 %v1974_v58, %v1889_v33  ;;  %v2717_v10 = vrot.slane %v2659_v50, 4  ;;  %v8289_v22 = vmul.f32 %v12797_v59, %v8102_v24  ;;  %v363_v33 = vmul.f32 %v12801_v38, %v12788_v48  ;;  %v8293_v58 = vld [vmem:[#allocation2 + $0xe8] sm:$0xf] }
 0x197   : > { %v2346_v44 = vsel %vm1822_vm2, %v2344_v5, %v12834_v46  ;;  %v2471_v63 = vsel %vm2443_vm3, %v2469_v2, %v12835_v37  ;;  %12836 = vst [vmem:[#allocation46_spill] sm:$0xff] %v8293_v58  ;;  %v12837_v46 = vrot.slane %v8249_v14, 4  ;;  %v2841_v2 = vrot.slane %v2783_v15, 4  ;;  %v12839_v14 = vld [vmem:[#allocation17_spill] sm:$0xff] }
 0x198   : > { %v2137_v5 = vadd.f32 %v2098_v12, %v2013_v49  ;;  %v399_v50 = vmul.f32 %v12805_v21, %v12790_v60  ;;  %v2965_v30 = vrot.slane %v2907_v54, 4  ;;  %v435_v19 = vmul.f32 %v8212_v1, %v12799_v9  ;;  %v12838_v49 = vld [vmem:[#allocation12_spill] sm:$0xff]  ;;  %v12843_v60 = vld [vmem:[#allocation25_spill] sm:$0xff] }
 0x199   : > { %v2595_v37 = vsel %vm2443_vm3, %v2593_v8, %v12837_v46  ;;  %v549_v12 = vmul.f32 %v7951_v4, %v12800_v42  ;;  %v674_v8 = vmul.f32 %v12839_v14, %v12838_v49  ;;  %v12840_v15 = vrot.slane %v8260_v47, 4  ;;  %v12841_v21 = vld [vmem:[#allocation52_spill] sm:$0xff]  ;;  %v12844_v1 = vld [vmem:[#allocation49_spill] sm:$0xff] }
 0x19a   : > { %v2261_v38 = vadd.f32 %v2222_v51, %v2137_v5  ;;  %v415_v61 = vadd.f32 %v399_v50, %v363_v33  ;;  %v798_v54 = vmul.f32 %v12842_v34, %v12841_v21  ;;  %v922_v59 = vmul.f32 %v12811_v29, %v12843_v60  ;;  %v12845_v50 = vld [vmem:[#allocation44_spill] sm:$0xff] }
 0x19b   : > { %v2719_v46 = vsel %vm2443_vm3, %v2717_v10, %v12840_v15  ;;  %v1046_v51 = vmul.f32 %v12844_v1, %v8293_v58  ;;  %v471_v42 = vmul.f32 %v12845_v50, %v7745_v20  ;;  %v609_v9 = vrot.slane %v549_v12, 1  ;;  %v12847_v10 = vld [vmem:[#allocation51_spill] sm:$0xff] }
 0x19c   : > { %v2385_v33 = vadd.f32 %v2346_v44, %v2261_v38  ;;  %v451_v5 = vadd.f32 %v435_v19, %v415_v61  ;;  %v12846_v49 = vrot.slane %v8276_v13, 4  ;;  %v507_v15 = vmul.f32 %v12847_v10, %v8102_v24 }
 0x19d   : > { %v733_v34 = vrot.slane %v674_v8, 1  ;;  %v1170_v29 = vmul.f32 %v7951_v4, %v12814_v55  ;;  %v12848_v1 = vrot.slane %v8289_v22, 4  ;;  %v857_v44 = vrot.slane %v798_v54, 1 }
 0x19e   : > { %v2843_v47 = vsel %vm2443_vm3, %v2841_v2, %v12846_v49  ;;  %v2510_v25 = vadd.f32 %v2471_v63, %v2385_v33  ;;  %v487_v61 = vadd.f32 %v471_v42, %v451_v5  ;;  %v12849_v38 = vrot.slane %v8083_v23, 1 }
 0x19f   : > { %v2967_v19 = vsel %vm2443_vm3, %v2965_v30, %v12848_v1  ;;  %v981_v20 = vrot.slane %v922_v59, 1  ;;  %v1105_v2 = vrot.slane %v1046_v51, 1  ;;  %v1230_v49 = vrot.slane %v1170_v29, 2 }
 0x1a0   : > { %v610_v12 = vsel %vm580_vm0, %v12849_v38, %v609_v9  ;;  %v2634_v50 = vadd.f32 %v2595_v37, %v2510_v25  ;;  %v523_v24 = vadd.f32 %v507_v15, %v487_v61  ;;  %v1295_v8 = vmul.f32 %v12839_v14, %v12624_v45 }
 0x1a1   : > { %v1419_v63 = vmul.f32 %v12586_v57, %v12841_v21  ;;  %v12850_v33 = vrot.slane %v8094_v26, 1  ;;  %v1543_v23 = vmul.f32 %v12589_v62, %v12843_v60  ;;  %v1667_v9 = vmul.f32 %v6518_v56, %v8293_v58 }
 0x1a2   : > { %v1791_v29 = vmul.f32 %v7951_v4, %v12626_v36  ;;  %v2758_v1 = vadd.f32 %v2719_v46, %v2634_v50  ;;  %v648_v25 = vadd.f32 %v610_v12, %v523_v24  ;;  %v1354_v30 = vrot.slane %v1295_v8, 2 }
 0x1a3   : > { %v734_v42 = vsel %vm580_vm0, %v12850_v33, %v733_v34  ;;  %v1478_v37 = vrot.slane %v1419_v63, 2  ;;  %v12851_v59 = vrot.slane %v8107_v7, 1  ;;  %v12852_v26 = vrot.slane %v8115_v41, 1 }
 0x1a4   : > { %v12853_v51 = vrot.slane %v8121_v53, 1  ;;  %v1916_v15 = vmul.f32 %v12839_v14, %v6523_v11  ;;  %v2882_v61 = vadd.f32 %v2843_v47, %v2758_v1  ;;  %v772_v24 = vadd.f32 %v734_v42, %v648_v25 }
 0x1a5   : > { %v858_v54 = vsel %vm580_vm0, %v12851_v59, %v857_v44  ;;  %v982_v34 = vsel %vm580_vm0, %v12852_v26, %v981_v20  ;;  %v12854_v46 = vrot.slane %v8132_v52, 2  ;;  %v1602_v50 = vrot.slane %v1543_v23, 2  ;;  %v12857_v52 = vld [vmem:[#allocation57_spill] sm:$0xff]  ;;  %v12861_v26 = vld [vmem:[#allocation18_spill] sm:$0xff] }
 0x1a6   : > { %v1106_v5 = vsel %vm580_vm0, %v12853_v51, %v1105_v2  ;;  %v12855_v44 = vrot.slane %v8148_v40, 2  ;;  %v12856_v20 = vrot.slane %v8154_v31, 2  ;;  %v1726_v38 = vrot.slane %v1667_v9, 2  ;;  %v8376_v9 = vld [vmem:[#allocation2 + $0xb8] sm:$0xf] }
 0x1a7   : > { %v1231_v7 = vsel %vm1201_vm1, %v12854_v46, %v1230_v49  ;;  %v1851_v12 = vrot.slane %v1791_v29, 3  ;;  %v3006_v2 = vadd.f32 %v2967_v19, %v2882_v61  ;;  %v896_v8 = vadd.f32 %v858_v54, %v772_v24  ;;  %12858 = vst [vmem:[#allocation33_spill] sm:$0xff] %v8376_v9 }
 0x1a8   : > { %v1355_v41 = vsel %vm1201_vm1, %v12855_v44, %v1354_v30  ;;  %v1479_v53 = vsel %vm1201_vm1, %v12856_v20, %v1478_v37  ;;  %v2040_v47 = vmul.f32 %v12634_v27, %v12841_v21  ;;  %v2164_v63 = vmul.f32 %v12857_v52, %v12843_v60 }
 0x1a9   : > { %v1975_v49 = vrot.slane %v1916_v15, 3  ;;  %v2288_v40 = vmul.f32 %v6573_v6, %v8293_v58  ;;  %v2412_v33 = vmul.f32 %v7951_v4, %v12607_v18  ;;  %v2537_v31 = vmul.f32 %v12839_v14, %v6578_v17  ;;  %3024 = vst [vmem:[%s6814_s20 + $0x50] sm:$0xff] %v3006_v2  ;;  %v12859_v4 = vld [vmem:[#allocation23_spill] sm:$0xff] }
 0x1aa   : > { %v1020_v42 = vadd.f32 %v982_v34, %v896_v8  ;;  %v2099_v19 = vrot.slane %v2040_v47, 3  ;;  %v2223_v23 = vrot.slane %v2164_v63, 3  ;;  %v2661_v21 = vmul.f32 %v8376_v9, %v6593_v28  ;;  %v12868_v47 = vld [vmem:[#allocation31_spill] sm:$0xff] }
 0x1ab   : > { %v2347_v29 = vrot.slane %v2288_v40, 3  ;;  %v2472_v1 = vrot.slane %v2412_v33, 4  ;;  %v2596_v25 = vrot.slane %v2537_v31, 4  ;;  %v2785_v30 = vmul.f32 %v6597_v3, %v12843_v60  ;;  %v12872_v33 = vld [vmem:[#allocation11_spill] sm:$0xff]  ;;  %v12873_v31 = vld [vmem:[#allocation58_spill] sm:$0xff]  ;;  %v8459_v60 = vld [vmem:[#allocation2 + $0xf8] sm:$0xff] }
 0x1ac   : > { %v1144_v37 = vadd.f32 %v1106_v5, %v1020_v42  ;;  %v12860_v59 = vrot.slane %v12859_v4, 2  ;;  %v12862_v34 = vrot.slane %v12861_v26, 2  ;;  %v2720_v15 = vrot.slane %v2661_v21, 4  ;;  %12888 = vst [vmem:[#allocation59_spill] sm:$0xff] %v8459_v60 }
 0x1ad   : > { %v12863_v61 = vrot.slane %v8184_v16, 3  ;;  %v12864_v46 = vrot.slane %v8198_v43, 3  ;;  %v12865_v20 = vrot.slane %v8216_v35, 3  ;;  %v12866_v2 = vrot.slane %v8226_v32, 3 }
 0x1ae   : > { %v1603_v54 = vsel %vm1201_vm1, %v12860_v59, %v1602_v50  ;;  %v1727_v51 = vsel %vm1201_vm1, %v12862_v34, %v1726_v38  ;;  %v1269_v8 = vadd.f32 %v1231_v7, %v1144_v37  ;;  %v12867_v38 = vrot.slane %v8235_v39, 3  ;;  %v8422_v39 = vld [vmem:[%s11882_s1 + $0x18] ss:$0 sm:$0xff]  ;;  %v12878_v37 = vld [vmem:[#allocation9_spill] sm:$0xff]  ;;  %v8437_v59 = vld [vmem:[#allocation2 + $0xf0] sm:$0xff] }
 0x1af   : > { %v1852_v24 = vsel %vm1822_vm2, %v12863_v61, %v1851_v12  ;;  %v1976_v44 = vsel %vm1822_vm2, %v12864_v46, %v1975_v49  ;;  %v2100_v5 = vsel %vm1822_vm2, %v12865_v20, %v2099_v19  ;;  %v8400_v50 = vsel %vm1822_vm2, %v12866_v2, %v2223_v23  ;;  %v12870_v49 = vld [vmem:[#allocation35_spill] sm:$0xff]  ;;  %v12874_v23 = vld [vmem:[#allocation20_spill] sm:$0xff]  ;;  %12879 = vst [vmem:[#allocation30_spill] sm:$0xff] %v8437_v59  ;;  %v12880_v34 = vld [vmem:[#allocation29_spill] sm:$0xff] }
 0x1b0   : > { %v8405_v16 = vsel %vm1822_vm2, %v12867_v38, %v2347_v29  ;;  %v2844_v12 = vrot.slane %v2785_v30, 4  ;;  %v364_v43 = vmul.f32 %v12791_v0, %v12788_v48  ;;  %v12869_v63 = vrot.slane %v12868_v47, 4  ;;  %v12882_v46 = vld [vmem:[#allocation12_spill] sm:$0xff]  ;;  %v12883_v20 = vld [vmem:[#allocation27_spill] sm:$0xff] }
 0x1b1   : > { %v12871_v32 = vrot.slane %v12870_v49, 4  ;;  %v2909_v7 = vmul.f32 %v8422_v39, %v8293_v58  ;;  %v400_v42 = vmul.f32 %v12873_v31, %v12872_v33  ;;  %v1393_v19 = vadd.f32 %v1355_v41, %v1269_v8 }
 0x1b2   : > { %v8412_v35 = vsel %vm2443_vm3, %v12869_v63, %v2472_v1  ;;  %v12875_v21 = vrot.slane %v12874_v23, 4  ;;  %v12876_v1 = vld [vmem:[#allocation39_spill] sm:$0xff]  ;;  %v550_v4 = vmul.f32 %v12791_v0, %v12878_v37  ;;  %v8441_v61 = vmul.f32 %v12880_v34, %v12878_v37  ;;  %v12887_v23 = vld [vmem:[#allocation44_spill] sm:$0xff] }
 0x1b3   : > { %v8417_v40 = vsel %vm2443_vm3, %v12871_v32, %v2596_v25  ;;  %v12877_v25 = vld [vmem:[#allocation43_spill] sm:$0xff]  ;;  %v416_v26 = vadd.f32 %v400_v42, %v364_v43  ;;  %v675_v41 = vmul.f32 %v12873_v31, %v12882_v46  ;;  %v1517_v2 = vadd.f32 %v1479_v53, %v1393_v19  ;;  %v12885_v43 = vld [vmem:[#allocation45_spill] sm:$0xff]  ;;  %v12889_v53 = vld [vmem:[#allocation22_spill] sm:$0xff] }
 0x1b4   : > { %v8431_v29 = vsel %vm2443_vm3, %v12875_v21, %v2720_v15  ;;  %v436_v30 = vmul.f32 %v12877_v25, %v12876_v1  ;;  %12881 = vst [vmem:[#allocation50_spill] sm:$0xff] %v8441_v61  ;;  %v8447_v15 = vmul.f32 %v12883_v20, %v12882_v46  ;;  %v12884_v8 = vrot.slane %v8276_v13, 4  ;;  %v12886_v42 = vld [vmem:[#allocation53_spill] sm:$0xff]  ;;  %v12890_v19 = vld [vmem:[#allocation48_spill] sm:$0xff] }
 0x1b5   : > { %v611_v47 = vrot.slane %v550_v4, 1  ;;  %v799_v63 = vmul.f32 %v12885_v43, %v12876_v1  ;;  %v2968_v49 = vrot.slane %v2909_v7, 4  ;;  %v472_v21 = vmul.f32 %v12887_v23, %v12886_v42 }
 0x1b6   : > { %v8452_v38 = vsel %vm2443_vm3, %v12884_v8, %v2844_v12  ;;  %v452_v32 = vadd.f32 %v436_v30, %v416_v26  ;;  %v1641_v9 = vadd.f32 %v1603_v54, %v1517_v2  ;;  %v508_v13 = vmul.f32 %v12847_v10, %v8437_v59  ;;  %v12891_v8 = vld [vmem:[#allocation60_spill] sm:$0xff] }
 0x1b7   : > { %v8465_v12 = vmul.f32 %v12885_v43, %v12889_v53  ;;  %v923_v4 = vmul.f32 %v12890_v19, %v12886_v42  ;;  %v735_v30 = vrot.slane %v675_v41, 1  ;;  %v12104_v26 = vrot.slane %v8447_v15, 1  ;;  %v12893_v43 = vld [vmem:[#allocation49_spill] sm:$0xff] }
 0x1b8   : > { %v488_v7 = vadd.f32 %v472_v21, %v452_v32  ;;  %v8472_v58 = vmul.f32 %v12890_v19, %v12891_v8  ;;  %v1765_v46 = vadd.f32 %v1727_v51, %v1641_v9  ;;  %v12892_v54 = vrot.slane %v8441_v61, 1 }
 0x1b9   : > { %v859_v10 = vrot.slane %v799_v63, 1  ;;  %v1047_v23 = vmul.f32 %v12893_v43, %v8437_v59  ;;  %v8482_v41 = vmul.f32 %v12893_v43, %v8459_v60  ;;  %v1171_v32 = vmul.f32 %v12791_v0, %v12814_v55 }
 0x1ba   : > { %v613_v2 = vsel %vm580_vm0, %v611_v47, %v12892_v54  ;;  %v524_v14 = vadd.f32 %v508_v13, %v488_v7  ;;  %v1890_v21 = vadd.f32 %v1852_v24, %v1765_v46  ;;  %v983_v9 = vrot.slane %v923_v4, 1 }
 0x1bb   : > { %v8489_v47 = vmul.f32 %v12880_v34, %v12814_v55  ;;  %v1107_v54 = vrot.slane %v1047_v23, 1  ;;  %v12103_v13 = vrot.slane %v8482_v41, 1  ;;  %v1232_v7 = vrot.slane %v1171_v32, 2 }
 0x1bc   : > { %v649_v63 = vadd.f32 %v613_v2, %v524_v14  ;;  %v2014_v37 = vadd.f32 %v1976_v44, %v1890_v21  ;;  %v737_v61 = vsel %vm580_vm0, %v735_v30, %v12104_v26  ;;  %v1296_v24 = vmul.f32 %v12873_v31, %v12624_v45  ;;  %v8566_v26 = vld [vmem:[#allocation2 + $0xc8] sm:$0xff] }
 0x1bd   : > { %v12102_v43 = vrot.slane %v8489_v47, 2  ;;  %v12894_v46 = vrot.slane %v8289_v22, 4  ;;  %v8503_v14 = vmul.f32 %v12883_v20, %v12624_v45  ;;  %v1420_v44 = vmul.f32 %v12586_v57, %v12876_v1  ;;  %12899 = vst [vmem:[#allocation37_spill] sm:$0xff] %v8566_v26 }
 0x1be   : > { %v773_v51 = vadd.f32 %v737_v61, %v649_v63  ;;  %v2138_v23 = vadd.f32 %v2100_v5, %v2014_v37  ;;  %v12895_v30 = vrot.slane %v8465_v12, 1  ;;  %v12896_v32 = vrot.slane %v8472_v58, 1 }
 0x1bf   : > { %v2969_v4 = vsel %vm2443_vm3, %v12894_v46, %v2968_v49  ;;  %v8515_v22 = vmul.f32 %v12586_v57, %v12889_v53  ;;  %v1109_v49 = vsel %vm580_vm0, %v1107_v54, %v12103_v13  ;;  %v1234_v5 = vsel %vm1201_vm1, %v1232_v7, %v12102_v43 }
 0x1c0   : > { %v861_v2 = vsel %vm580_vm0, %v859_v10, %v12895_v30  ;;  %v985_v21 = vsel %vm580_vm0, %v983_v9, %v12896_v32  ;;  %v1544_v10 = vmul.f32 %v12589_v62, %v12886_v42  ;;  %v2262_v1 = vadd.f32 %v8400_v50, %v2138_v23 }
 0x1c1   : > { %v897_v61 = vadd.f32 %v861_v2, %v773_v51  ;;  %v1356_v37 = vrot.slane %v1296_v24, 2  ;;  %v8528_v9 = vmul.f32 %v12589_v62, %v12891_v8  ;;  %v1668_v53 = vmul.f32 %v6518_v56, %v8437_v59 }
 0x1c2   : > { %v12107_v63 = vrot.slane %v8503_v14, 2  ;;  %v1480_v54 = vrot.slane %v1420_v44, 2  ;;  %v8535_v7 = vmul.f32 %v6518_v56, %v8459_v60  ;;  %v2386_v46 = vadd.f32 %v8405_v16, %v2262_v1 }
 0x1c3   : > { %12897 = vst [vmem:[#allocation19_spill] sm:$0xff] %v8528_v9  ;;  %v1021_v51 = vadd.f32 %v985_v21, %v897_v61  ;;  %v12105_v50 = vrot.slane %v8515_v22, 2  ;;  %v1604_v24 = vrot.slane %v1544_v10, 2  ;;  %v1792_v23 = vmul.f32 %v12791_v0, %v12626_v36 }
 0x1c4   : > { %v12106_v2 = vrot.slane %v8528_v9, 2  ;;  %v1728_v32 = vrot.slane %v1668_v53, 2  ;;  %v8544_v21 = vmul.f32 %v12880_v34, %v12626_v36  ;;  %v2511_v44 = vadd.f32 %v8412_v35, %v2386_v46  ;;  %v8562_v46 = vld [vmem:[#allocation2 + $0xc0] sm:$0xff] }
 0x1c5   : > { %v1145_v30 = vadd.f32 %v1109_v49, %v1021_v51  ;;  %v12110_v61 = vrot.slane %v8535_v7, 2  ;;  %v1917_v16 = vmul.f32 %v12873_v31, %v6523_v11  ;;  %v8552_v10 = vmul.f32 %v12883_v20, %v6523_v11  ;;  %12898 = vst [vmem:[#allocation47_spill] sm:$0xff] %v8562_v46 }
 0x1c6   : > { %v1358_v49 = vsel %vm1201_vm1, %v1356_v37, %v12107_v63  ;;  %v1853_v53 = vrot.slane %v1792_v23, 3  ;;  %v12109_v51 = vrot.slane %v8544_v21, 3  ;;  %v2635_v43 = vadd.f32 %v8417_v40, %v2511_v44 }
 0x1c7   : > { %v1270_v1 = vadd.f32 %v1234_v5, %v1145_v30  ;;  %v1482_v35 = vsel %vm1201_vm1, %v1480_v54, %v12105_v50  ;;  %v2041_v13 = vmul.f32 %v8562_v46, %v12634_v27  ;;  %v8570_v5 = vmul.f32 %v8566_v26, %v12634_v27 }
 0x1c8   : > { %v1606_v40 = vsel %vm1201_vm1, %v1604_v24, %v12106_v2  ;;  %v2165_v23 = vmul.f32 %v12857_v52, %v12886_v42  ;;  %v8579_v54 = vmul.f32 %v12857_v52, %v12891_v8  ;;  %v2759_v30 = vadd.f32 %v8431_v29, %v2635_v43 }
 0x1c9   : > { %v1394_v37 = vadd.f32 %v1358_v49, %v1270_v1  ;;  %v1730_v44 = vsel %vm1201_vm1, %v1728_v32, %v12110_v61  ;;  %v1977_v50 = vrot.slane %v1917_v16, 3  ;;  %v1855_v24 = vsel %vm1822_vm2, %v1853_v53, %v12109_v51 }
 0x1ca   : > { %v2101_v2 = vrot.slane %v2041_v13, 3  ;;  %v2289_v63 = vmul.f32 %v6573_v6, %v8437_v59  ;;  %v2883_v9 = vadd.f32 %v8452_v38, %v2759_v30  ;;  %v8595_v43 = vmul.f32 %v6573_v6, %v8459_v60 }
 0x1cb   : > { %v1518_v49 = vadd.f32 %v1482_v35, %v1394_v37  ;;  %v2413_v32 = vmul.f32 %v12791_v0, %v12607_v18  ;;  %v2225_v35 = vrot.slane %v2165_v23, 3  ;;  %v12112_v53 = vrot.slane %v8579_v54, 3 }
 0x1cc   : > { %v8602_v13 = vmul.f32 %v12880_v34, %v12607_v18  ;;  %v3007_v37 = vadd.f32 %v2969_v4, %v2883_v9  ;;  %v2349_v38 = vrot.slane %v2289_v63, 3  ;;  %v12111_v30 = vrot.slane %v8595_v43, 3 }
 0x1cd   : > { %v1642_v16 = vadd.f32 %v1606_v40, %v1518_v49  ;;  %v2538_v51 = vmul.f32 %v12873_v31, %v6578_v17  ;;  %v2474_v29 = vrot.slane %v2413_v32, 4  ;;  %v8610_v0 = vmul.f32 %v12883_v20, %v6578_v17 }
 0x1ce   : > { %12900 = vst [vmem:[#allocation26_spill] sm:$0xff] %v8602_v13  ;;  %3025 = vst [vmem:[%s6814_s20 + $0x58] sm:$0xff] %v3007_v37  ;;  %v12902_v40 = vrot.slane %v8552_v10, 3  ;;  %v2662_v4 = vmul.f32 %v8562_v46, %v6593_v28  ;;  %v8620_v9 = vmul.f32 %v8566_v26, %v6593_v28  ;;  %v2786_v63 = vmul.f32 %v6597_v3, %v12886_v42  ;;  %v8656_v42 = vld [vmem:[#allocation2 + $0x100] sm:$0xf]  ;;  %v12915_v46 = vld [vmem:[#allocation46_spill] sm:$0xff] }
 0x1cf   : > { %v1766_v61 = vadd.f32 %v1730_v44, %v1642_v16  ;;  %12901 = vst [vmem:[#allocation36_spill] sm:$0xff] %v8610_v0  ;;  %v12904_v49 = vrot.slane %v8570_v5, 3  ;;  %v2598_v16 = vrot.slane %v2538_v51, 4  ;;  %v8636_v1 = vmul.f32 %v6597_v3, %v12891_v8 }
 0x1d0   : > { %v1979_v23 = vsel %vm1822_vm2, %v1977_v50, %v12902_v40  ;;  %12903 = vst [vmem:[#allocation32_spill] sm:$0xff] %v8620_v9  ;;  %v2227_v50 = vsel %vm1822_vm2, %v2225_v35, %v12112_v53  ;;  %v2351_v40 = vsel %vm1822_vm2, %v2349_v38, %v12111_v30  ;;  %v365_v35 = vmul.f32 %v12880_v34, %v12788_v48  ;;  %v12909_v30 = vld [vmem:[#allocation17_spill] sm:$0xff] }
 0x1d1   : > { %v1891_v44 = vadd.f32 %v1855_v24, %v1766_v61  ;;  %v2103_v32 = vsel %vm1822_vm2, %v2101_v2, %v12904_v49  ;;  %12905 = vst [vmem:[#allocation42_spill] sm:$0xff] %v8636_v1  ;;  %v2910_v61 = vmul.f32 %v8422_v39, %v8437_v59  ;;  %v12906_v2 = vrot.slane %v8602_v13, 4 }
 0x1d2   : > { %v8645_v49 = vmul.f32 %v8422_v39, %v8459_v60  ;;  %v2722_v38 = vrot.slane %v2662_v4, 4  ;;  %v2846_v53 = vrot.slane %v2786_v63, 4  ;;  %v401_v37 = vmul.f32 %v12883_v20, %v12872_v33  ;;  %v12908_v63 = vld [vmem:[#allocation9_spill] sm:$0xff] }
 0x1d3   : > { %v2015_v24 = vadd.f32 %v1979_v23, %v1891_v44  ;;  %v2476_v51 = vsel %vm2443_vm3, %v2474_v29, %v12906_v2  ;;  %v12907_v23 = vrot.slane %v8610_v0, 4  ;;  %v2970_v2 = vrot.slane %v2910_v61, 4  ;;  %v12911_v0 = vld [vmem:[#allocation12_spill] sm:$0xff]  ;;  %v12913_v29 = vld [vmem:[#allocation25_spill] sm:$0xff] }
 0x1d4   : > { %v417_v34 = vadd.f32 %v401_v37, %v365_v35  ;;  %v437_v4 = vmul.f32 %v8566_v26, %v12877_v25  ;;  %v552_v13 = vmul.f32 %v12909_v30, %v12908_v63  ;;  %v12914_v61 = vld [vmem:[#allocation45_spill] sm:$0xff]  ;;  %v925_v37 = vmul.f32 %v12890_v19, %v12915_v46 }
 0x1d5   : > { %v2139_v59 = vadd.f32 %v2103_v32, %v2015_v24  ;;  %v2600_v44 = vsel %vm2443_vm3, %v2598_v16, %v12907_v23  ;;  %v12910_v32 = vld [vmem:[#allocation44_spill] sm:$0xff]  ;;  %v12912_v16 = vld [vmem:[#allocation33_spill] sm:$0xff]  ;;  %v801_v20 = vmul.f32 %v12914_v61, %v12913_v29  ;;  %v12921_v61 = vld [vmem:[#allocation50_spill] sm:$0xff] }
 0x1d6   : > { %v473_v24 = vmul.f32 %v12910_v32, %v12891_v8  ;;  %v677_v23 = vmul.f32 %v12912_v16, %v12911_v0  ;;  %v453_v31 = vadd.f32 %v437_v4, %v417_v34  ;;  %v614_v48 = vrot.slane %v552_v13, 1  ;;  %v12916_v35 = vld [vmem:[#allocation49_spill] sm:$0xff] }
 0x1d7   : > { %v2263_v33 = vadd.f32 %v2227_v50, %v2139_v59  ;;  %v1049_v25 = vmul.f32 %v12916_v35, %v8656_v42  ;;  %v12917_v59 = vrot.slane %v8620_v9, 4  ;;  %v1173_v0 = vmul.f32 %v12909_v30, %v12814_v55  ;;  %v12920_v35 = vld [vmem:[#allocation51_spill] sm:$0xff] }
 0x1d8   : > { %v738_v63 = vrot.slane %v677_v23, 1  ;;  %v12918_v32 = vrot.slane %v8636_v1, 4  ;;  %v12919_v13 = vrot.slane %v8645_v49, 4  ;;  %v489_v19 = vadd.f32 %v473_v24, %v453_v31 }
 0x1d9   : > { %v2387_v26 = vadd.f32 %v2351_v40, %v2263_v33  ;;  %v2724_v50 = vsel %vm2443_vm3, %v2722_v38, %v12917_v59  ;;  %v509_v33 = vmul.f32 %v12920_v35, %v8459_v60  ;;  %v12922_v8 = vrot.slane %v12921_v61, 1 }
 0x1da   : > { %v2848_v34 = vsel %vm2443_vm3, %v2846_v53, %v12918_v32  ;;  %v2972_v4 = vsel %vm2443_vm3, %v2970_v2, %v12919_v13  ;;  %v862_v23 = vrot.slane %v801_v20, 1  ;;  %v986_v59 = vrot.slane %v925_v37, 1 }
 0x1db   : > { %v2512_v40 = vadd.f32 %v2476_v51, %v2387_v26  ;;  %v615_v38 = vsel %vm580_vm0, %v12922_v8, %v614_v48  ;;  %v525_v55 = vadd.f32 %v509_v33, %v489_v19  ;;  %v1110_v9 = vrot.slane %v1049_v25, 1 }
 0x1dc   : > { %v1235_v1 = vrot.slane %v1173_v0, 2  ;;  %v1298_v53 = vmul.f32 %v12912_v16, %v12624_v45  ;;  %v12923_v2 = vrot.slane %v8447_v15, 1  ;;  %v1422_v26 = vmul.f32 %v12586_v57, %v12913_v29 }
 0x1dd   : > { %v2636_v32 = vadd.f32 %v2600_v44, %v2512_v40  ;;  %v1546_v51 = vmul.f32 %v12589_v62, %v12915_v46  ;;  %v650_v48 = vadd.f32 %v615_v38, %v525_v55  ;;  %v1670_v25 = vmul.f32 %v6518_v56, %v8656_v42 }
 0x1de   : > { %v739_v31 = vsel %vm580_vm0, %v12923_v2, %v738_v63  ;;  %v1359_v20 = vrot.slane %v1298_v53, 2  ;;  %v1794_v19 = vmul.f32 %v12909_v30, %v12626_v36  ;;  %v12924_v0 = vrot.slane %v8465_v12, 1 }
 0x1df   : > { %v2760_v8 = vadd.f32 %v2724_v50, %v2636_v32  ;;  %v1483_v44 = vrot.slane %v1422_v26, 2  ;;  %v1919_v63 = vmul.f32 %v12912_v16, %v6523_v11  ;;  %v774_v24 = vadd.f32 %v739_v31, %v650_v48 }
 0x1e0   : > { %v863_v15 = vsel %vm580_vm0, %v12924_v0, %v862_v23  ;;  %v12925_v61 = vrot.slane %v8472_v58, 1  ;;  %v12926_v37 = vrot.slane %v8482_v41, 1  ;;  %v12927_v33 = vrot.slane %v8489_v47, 2 }
 0x1e1   : > { %v2884_v12 = vadd.f32 %v2848_v34, %v2760_v8  ;;  %v12928_v40 = vrot.slane %v8503_v14, 2  ;;  %v1607_v23 = vrot.slane %v1546_v51, 2  ;;  %v1731_v53 = vrot.slane %v1670_v25, 2 }
 0x1e2   : > { %v987_v55 = vsel %vm580_vm0, %v12925_v61, %v986_v59  ;;  %v1111_v13 = vsel %vm580_vm0, %v12926_v37, %v1110_v9  ;;  %v1236_v50 = vsel %vm1201_vm1, %v12927_v33, %v1235_v1  ;;  %v898_v32 = vadd.f32 %v863_v15, %v774_v24 }
 0x1e3   : > { %v1360_v38 = vsel %vm1201_vm1, %v12928_v40, %v1359_v20  ;;  %v12929_v58 = vrot.slane %v8515_v22, 2  ;;  %v1856_v41 = vrot.slane %v1794_v19, 3  ;;  %v2043_v9 = vmul.f32 %v12634_v27, %v12913_v29  ;;  %v8733_v29 = vld [vmem:[#allocation2 + $0xd0] sm:$0xf] }
 0x1e4   : > { %v3008_v47 = vadd.f32 %v2972_v4, %v2884_v12  ;;  %v1980_v2 = vrot.slane %v1919_v63, 3  ;;  %v2167_v1 = vmul.f32 %v12857_v52, %v12915_v46  ;;  %v2291_v14 = vmul.f32 %v6573_v6, %v8656_v42  ;;  %v12930_v19 = vld [vmem:[#allocation19_spill] sm:$0xff] }
 0x1e5   : > { %v1484_v59 = vsel %vm1201_vm1, %v12929_v58, %v1483_v44  ;;  %v1022_v34 = vadd.f32 %v987_v55, %v898_v32  ;;  %v2104_v31 = vrot.slane %v2043_v9, 3  ;;  %v2415_v26 = vmul.f32 %v12909_v30, %v12607_v18  ;;  %v12938_v58 = vld [vmem:[#allocation10_spill] sm:$0xff] }
 0x1e6   : > { %v2540_v22 = vmul.f32 %v12912_v16, %v6578_v17  ;;  %3026 = vst [vmem:[%s6814_s20 + $0x60] sm:$0xff] %v3008_v47  ;;  %v2228_v51 = vrot.slane %v2167_v1, 3  ;;  %v2352_v48 = vrot.slane %v2291_v14, 3  ;;  %v2664_v4 = vmul.f32 %v8733_v29, %v6593_v28  ;;  %v12943_v14 = vld [vmem:[#allocation11_spill] sm:$0xff] }
 0x1e7   : > { %v2788_v20 = vmul.f32 %v6597_v3, %v12915_v46  ;;  %v1146_v25 = vadd.f32 %v1111_v13, %v1022_v34  ;;  %v12931_v8 = vrot.slane %v12930_v19, 2  ;;  %v12932_v30 = vrot.slane %v8535_v7, 2  ;;  %v12944_v34 = vld [vmem:[#allocation47_spill] sm:$0xff]  ;;  %v12950_v19 = vld [vmem:[#allocation53_spill] sm:$0xff] }
 0x1e8   : > { %v2477_v44 = vrot.slane %v2415_v26, 4  ;;  %v12933_v63 = vrot.slane %v8544_v21, 3  ;;  %v12934_v61 = vrot.slane %v8552_v10, 3  ;;  %v2601_v37 = vrot.slane %v2540_v22, 4  ;;  %v12946_v22 = vld [vmem:[#allocation36_spill] sm:$0xff] }
 0x1e9   : > { %v1608_v0 = vsel %vm1201_vm1, %v12931_v8, %v1607_v23  ;;  %v1732_v15 = vsel %vm1201_vm1, %v12932_v30, %v1731_v53  ;;  %v2725_v33 = vrot.slane %v2664_v4, 4  ;;  %v1271_v13 = vadd.f32 %v1236_v50, %v1146_v25  ;;  %v12939_v50 = vld [vmem:[#allocation58_spill] sm:$0xff]  ;;  %v12948_v4 = vld [vmem:[#allocation32_spill] sm:$0xff]  ;;  %v12951_v8 = vld [vmem:[#allocation43_spill] sm:$0xff] }
 0x1ea   : > { %v1857_v24 = vsel %vm1822_vm2, %v12933_v63, %v1856_v41  ;;  %v1981_v55 = vsel %vm1822_vm2, %v12934_v61, %v1980_v2  ;;  %v12935_v12 = vrot.slane %v8570_v5, 3  ;;  %v12936_v7 = vrot.slane %v8579_v54, 3  ;;  %v12940_v5 = vld [vmem:[#allocation27_spill] sm:$0xff]  ;;  %v12941_v54 = vld [vmem:[#allocation26_spill] sm:$0xff] }
 0x1eb   : > { %v2912_v21 = vmul.f32 %v8422_v39, %v8656_v42  ;;  %v12937_v53 = vrot.slane %v8595_v43, 3  ;;  %v2849_v32 = vrot.slane %v2788_v20, 4  ;;  %v366_v41 = vmul.f32 %v12939_v50, %v12938_v58  ;;  %v12945_v43 = vld [vmem:[#allocation37_spill] sm:$0xff] }
 0x1ec   : > { %v2105_v40 = vsel %vm1822_vm2, %v12935_v12, %v2104_v31  ;;  %v8757_v23 = vsel %vm1822_vm2, %v12936_v7, %v2228_v51  ;;  %v367_v9 = vmul.f32 %v12940_v5, %v12938_v58  ;;  %v1395_v47 = vadd.f32 %v1360_v38, %v1271_v13  ;;  %v12952_v13 = vld [vmem:[#allocation60_spill] sm:$0xff]  ;;  %v8793_v7 = vld [vmem:[#allocation2 + $0x108] sm:$0xff] }
 0x1ed   : > { %v8764_v10 = vsel %vm1822_vm2, %v12937_v53, %v2352_v48  ;;  %v12942_v2 = vrot.slane %v12941_v54, 4  ;;  %v402_v31 = vmul.f32 %v12944_v34, %v12943_v14  ;;  %v403_v26 = vmul.f32 %v12945_v43, %v12943_v14  ;;  %v12953_v53 = vld [vmem:[#allocation30_spill] sm:$0xff] }
 0x1ee   : > { %v12947_v51 = vrot.slane %v12946_v22, 4  ;;  %v12949_v20 = vrot.slane %v12948_v4, 4  ;;  %v2973_v25 = vrot.slane %v2912_v21, 4  ;;  %v438_v30 = vmul.f32 %v12951_v8, %v12950_v19  ;;  %v12956_v4 = vld [vmem:[#allocation12_spill] sm:$0xff] }
 0x1ef   : > { %v8773_v1 = vsel %vm2443_vm3, %v12942_v2, %v2477_v44  ;;  %v1519_v44 = vadd.f32 %v1484_v59, %v1395_v47  ;;  %v418_v63 = vadd.f32 %v402_v31, %v366_v41  ;;  %v419_v61 = vadd.f32 %v403_v26, %v367_v9  ;;  %v8805_v31 = vld [vmem:[#allocation2 + $0x110] sm:$0xff] }
 0x1f0   : > { %v8782_v48 = vsel %vm2443_vm3, %v12947_v51, %v2601_v37  ;;  %v8787_v38 = vsel %vm2443_vm3, %v12949_v20, %v2725_v33  ;;  %v439_v12 = vmul.f32 %v12951_v8, %v12952_v13  ;;  %v12954_v37 = vld [vmem:[#allocation44_spill] sm:$0xff]  ;;  %v12955_v33 = vld [vmem:[#allocation9_spill] sm:$0xff]  ;;  %v678_v20 = vmul.f32 %v12944_v34, %v12956_v4 }
 0x1f1   : > { %v474_v54 = vmul.f32 %v12954_v37, %v12953_v53  ;;  %v475_v2 = vmul.f32 %v12954_v37, %v8459_v60  ;;  %v553_v21 = vmul.f32 %v12939_v50, %v12955_v33  ;;  %v554_v22 = vmul.f32 %v12940_v5, %v12955_v33 }
 0x1f2   : > { %v1643_v59 = vadd.f32 %v1608_v0, %v1519_v44  ;;  %v454_v41 = vadd.f32 %v438_v30, %v418_v63  ;;  %v455_v9 = vadd.f32 %v439_v12, %v419_v61  ;;  %v555_v47 = vmul.f32 %v12912_v16, %v12955_v33  ;;  %v12957_v30 = vld [vmem:[#allocation42_spill] sm:$0xff] }
 0x1f3   : > { %v616_v26 = vrot.slane %v553_v21, 1  ;;  %v617_v51 = vrot.slane %v554_v22, 1  ;;  %v8811_v37 = vmul.f32 %v12945_v43, %v12956_v4  ;;  %v510_v0 = vmul.f32 %v12920_v35, %v8793_v7 }
 0x1f4   : > { %v1767_v8 = vadd.f32 %v1732_v15, %v1643_v59  ;;  %v490_v14 = vadd.f32 %v474_v54, %v454_v41  ;;  %v491_v58 = vadd.f32 %v475_v2, %v455_v9  ;;  %v12958_v44 = vrot.slane %v12957_v30, 4 }
 0x1f5   : > { %v12959_v61 = vrot.slane %v8645_v49, 4  ;;  %v740_v21 = vrot.slane %v678_v20, 1  ;;  %v12141_v22 = vrot.slane %v8811_v37, 1  ;;  %v511_v15 = vmul.f32 %v12920_v35, %v8805_v31  ;;  %v12960_v49 = vld [vmem:[#allocation45_spill] sm:$0xff] }
 0x1f6   : > { %v8818_v63 = vsel %vm2443_vm3, %v12958_v44, %v2849_v32  ;;  %v1892_v33 = vadd.f32 %v1857_v24, %v1767_v8  ;;  %v526_v54 = vadd.f32 %v510_v0, %v490_v14  ;;  %v619_v2 = vrot.slane %v555_v47, 1  ;;  %v12961_v14 = vld [vmem:[#allocation48_spill] sm:$0xff] }
 0x1f7   : > { %v8823_v12 = vsel %vm2443_vm3, %v12959_v61, %v2973_v25  ;;  %v618_v59 = vsel %vm580_vm0, %v616_v26, %v617_v51  ;;  %v8831_v32 = vmul.f32 %v8733_v29, %v12956_v4  ;;  %v802_v41 = vmul.f32 %v12960_v49, %v12950_v19 }
 0x1f8   : > { %v8837_v25 = vmul.f32 %v12960_v49, %v12952_v13  ;;  %v2016_v9 = vadd.f32 %v1981_v55, %v1892_v33  ;;  %v8839_v24 = vadd.f32 %v511_v15, %v491_v58  ;;  %v651_v8 = vadd.f32 %v618_v59, %v526_v54 }
 0x1f9   : > { %v926_v47 = vmul.f32 %v12961_v14, %v12953_v53  ;;  %v742_v26 = vsel %vm580_vm0, %v740_v21, %v12141_v22  ;;  %v864_v20 = vrot.slane %v802_v41, 1  ;;  %v8849_v19 = vmul.f32 %v12961_v14, %v8459_v60  ;;  %v12962_v21 = vld [vmem:[#allocation49_spill] sm:$0xff] }
 0x1fa   : > { %v12137_v0 = vrot.slane %v8837_v25, 1  ;;  %v2140_v30 = vadd.f32 %v2105_v40, %v2016_v9  ;;  %v620_v55 = vsel %vm580_vm0, %v617_v51, %v619_v2  ;;  %v775_v58 = vadd.f32 %v742_v26, %v651_v8  ;;  %v12963_v41 = vld [vmem:[#allocation13_spill] sm:$0xff] }
 0x1fb   : > { %v988_v33 = vrot.slane %v926_v47, 1  ;;  %v12138_v61 = vrot.slane %v8849_v19, 1  ;;  %v1050_v15 = vmul.f32 %v12962_v21, %v8793_v7  ;;  %v8860_v54 = vmul.f32 %v12962_v21, %v8805_v31 }
 0x1fc   : > { %v866_v44 = vsel %vm580_vm0, %v864_v20, %v12137_v0  ;;  %v2264_v59 = vadd.f32 %v8757_v23, %v2140_v30  ;;  %v1174_v51 = vmul.f32 %v12939_v50, %v12963_v41  ;;  %v8867_v2 = vmul.f32 %v12940_v5, %v12963_v41 }
 0x1fd   : > { %v899_v40 = vadd.f32 %v866_v44, %v775_v58  ;;  %v990_v9 = vsel %vm580_vm0, %v988_v33, %v12138_v61  ;;  %v1112_v8 = vrot.slane %v1050_v15, 1  ;;  %v12139_v47 = vrot.slane %v8860_v54, 1  ;;  %v8884_v15 = vld [vmem:[#allocation2 + $0xd8] sm:$0xff] }
 0x1fe   : > { %v1299_v26 = vmul.f32 %v12944_v34, %v12624_v45  ;;  %v2388_v23 = vadd.f32 %v8764_v10, %v2264_v59  ;;  %v1237_v30 = vrot.slane %v1174_v51, 2  ;;  %v12140_v58 = vrot.slane %v8867_v2, 2  ;;  %12964 = vst [vmem:[#allocation24_spill] sm:$0xff] %v8884_v15 }
 0x1ff   : > { %v1023_v20 = vadd.f32 %v990_v9, %v899_v40  ;;  %v1114_v44 = vsel %vm580_vm0, %v1112_v8, %v12139_v47  ;;  %v8882_v0 = vmul.f32 %v12945_v43, %v12624_v45  ;;  %v1423_v61 = vmul.f32 %v8884_v15, %v12586_v57 }
 0x200   : > { %v1361_v33 = vrot.slane %v1299_v26, 2  ;;  %v2513_v10 = vadd.f32 %v8773_v1, %v2388_v23  ;;  %v1239_v40 = vsel %vm1201_vm1, %v1237_v30, %v12140_v58  ;;  %v8894_v51 = vmul.f32 %v12586_v57, %v12952_v13 }
 0x201   : > { %v1147_v59 = vadd.f32 %v1114_v44, %v1023_v20  ;;  %v12143_v9 = vrot.slane %v8882_v0, 2  ;;  %v1485_v8 = vrot.slane %v1423_v61, 2  ;;  %v1547_v26 = vmul.f32 %v12589_v62, %v12953_v53 }
 0x202   : > { %v8901_v47 = vmul.f32 %v12589_v62, %v8459_v60  ;;  %v2637_v1 = vadd.f32 %v8782_v48, %v2513_v10  ;;  %v12144_v20 = vrot.slane %v8894_v51, 2  ;;  %v1671_v30 = vmul.f32 %v6518_v56, %v8793_v7 }
 0x203   : > { %v1272_v23 = vadd.f32 %v1239_v40, %v1147_v59  ;;  %v1363_v13 = vsel %vm1201_vm1, %v1361_v33, %v12143_v9  ;;  %v1609_v61 = vrot.slane %v1547_v26, 2  ;;  %v8913_v58 = vmul.f32 %v6518_v56, %v8805_v31 }
 0x204   : > { %12965 = vst [vmem:[#allocation16_spill] sm:$0xff] %v8901_v47  ;;  %v12149_v44 = vrot.slane %v8901_v47, 2  ;;  %v2761_v22 = vadd.f32 %v8787_v38, %v2637_v1  ;;  %v743_v48 = vrot.slane %v8831_v32, 1  ;;  %v1733_v59 = vrot.slane %v1671_v30, 2  ;;  %v8946_v47 = vld [vmem:[#allocation2 + $0xe0] sm:$0xff] }
 0x205   : > { %v1396_v10 = vadd.f32 %v1363_v13, %v1272_v23  ;;  %v1487_v40 = vsel %vm1201_vm1, %v1485_v8, %v12144_v20  ;;  %v12148_v35 = vrot.slane %v8913_v58, 2  ;;  %v1795_v33 = vmul.f32 %v12939_v50, %v12626_v36  ;;  %12966 = vst [vmem:[#allocation21_spill] sm:$0xff] %v8946_v47 }
 0x206   : > { %v8925_v26 = vmul.f32 %v12940_v5, %v12626_v36  ;;  %v2885_v9 = vadd.f32 %v8818_v63, %v2761_v22  ;;  %v1920_v32 = vmul.f32 %v12944_v34, %v6523_v11  ;;  %v8932_v1 = vmul.f32 %v12945_v43, %v6523_v11 }
 0x207   : > { %v1520_v38 = vadd.f32 %v1487_v40, %v1396_v10  ;;  %v1611_v8 = vsel %vm1201_vm1, %v1609_v61, %v12149_v44  ;;  %v1858_v23 = vrot.slane %v1795_v33, 3  ;;  %v2044_v13 = vmul.f32 %v8884_v15, %v12634_v27 }
 0x208   : > { %v12147_v30 = vrot.slane %v8925_v26, 3  ;;  %v3009_v63 = vadd.f32 %v8823_v12, %v2885_v9  ;;  %v652_v22 = vadd.f32 %v620_v55, %v8839_v24  ;;  %v1735_v40 = vsel %vm1201_vm1, %v1733_v59, %v12148_v35 }
 0x209   : > { %v1644_v10 = vadd.f32 %v1611_v8, %v1520_v38  ;;  %v1982_v20 = vrot.slane %v1920_v32, 3  ;;  %v12150_v4 = vrot.slane %v8932_v1, 3  ;;  %v8950_v61 = vmul.f32 %v8946_v47, %v12634_v27 }
 0x20a   : > { %v2168_v33 = vmul.f32 %v12857_v52, %v12953_v53  ;;  %3027 = vst [vmem:[%s6814_s20 + $0x68] sm:$0xff] %v3009_v63  ;;  %v2106_v24 = vrot.slane %v2044_v13, 3  ;;  %v8957_v55 = vmul.f32 %v12857_v52, %v8459_v60  ;;  %v2292_v9 = vmul.f32 %v6573_v6, %v8793_v7 }
 0x20b   : > { %v1768_v12 = vadd.f32 %v1735_v40, %v1644_v10  ;;  %v1860_v59 = vsel %vm1822_vm2, %v1858_v23, %v12147_v30  ;;  %v12153_v38 = vrot.slane %v8950_v61, 3  ;;  %v8967_v32 = vmul.f32 %v6573_v6, %v8805_v31 }
 0x20c   : > { %v2416_v8 = vmul.f32 %v12939_v50, %v12607_v18  ;;  %v2230_v63 = vrot.slane %v2168_v33, 3  ;;  %v12152_v10 = vrot.slane %v8957_v55, 3  ;;  %v8974_v40 = vmul.f32 %v12940_v5, %v12607_v18 }
 0x20d   : > { %v1893_v13 = vadd.f32 %v1860_v59, %v1768_v12  ;;  %v1984_v23 = vsel %vm1822_vm2, %v1982_v20, %v12150_v4  ;;  %v2354_v30 = vrot.slane %v2292_v9, 3  ;;  %v12151_v35 = vrot.slane %v8967_v32, 3 }
 0x20e   : > { %v2541_v44 = vmul.f32 %v12944_v34, %v6578_v17  ;;  %v12967_v50 = vrot.slane %v8811_v37, 1  ;;  %v2108_v5 = vsel %vm1822_vm2, %v2106_v24, %v12153_v38  ;;  %v8990_v59 = vmul.f32 %v12945_v43, %v6578_v17 }
 0x20f   : > { %v2017_v12 = vadd.f32 %v1984_v23, %v1893_v13  ;;  %v2479_v20 = vrot.slane %v2416_v8, 4  ;;  %v12154_v9 = vrot.slane %v8974_v40, 4  ;;  %v2665_v4 = vmul.f32 %v8884_v15, %v6593_v28 }
 0x210   : > { %v744_v33 = vsel %vm580_vm0, %v12967_v50, %v743_v48  ;;  %v8997_v34 = vmul.f32 %v8946_v47, %v6593_v28  ;;  %v2232_v24 = vsel %vm1822_vm2, %v2230_v63, %v12152_v10  ;;  %v2789_v43 = vmul.f32 %v6597_v3, %v12953_v53 }
 0x211   : > { %v776_v37 = vadd.f32 %v744_v33, %v652_v22  ;;  %v2141_v48 = vadd.f32 %v2108_v5, %v2017_v12  ;;  %v2356_v8 = vsel %vm1822_vm2, %v2354_v30, %v12151_v35  ;;  %v2603_v13 = vrot.slane %v2541_v44, 4  ;;  %v9012_v22 = vld [vmem:[#allocation2 + $0x118] sm:$0xf] }
 0x212   : > { %v12157_v23 = vrot.slane %v8990_v59, 4  ;;  %v9010_v50 = vmul.f32 %v6597_v3, %v8459_v60  ;;  %v2727_v12 = vrot.slane %v2665_v4, 4  ;;  %v12162_v63 = vrot.slane %v8997_v34, 4 }
 0x213   : > { %v2265_v33 = vadd.f32 %v2232_v24, %v2141_v48  ;;  %v2913_v5 = vmul.f32 %v8422_v39, %v8793_v7  ;;  %v2481_v30 = vsel %vm2443_vm3, %v2479_v20, %v12154_v9  ;;  %v2851_v44 = vrot.slane %v2789_v43, 4 }
 0x214   : > { %v9022_v35 = vmul.f32 %v8422_v39, %v8805_v31  ;;  %v804_v10 = vmul.f32 %v12960_v49, %v12915_v46  ;;  %v928_v48 = vmul.f32 %v12961_v14, %v8656_v42  ;;  %v1052_v7 = vmul.f32 %v12962_v21, %v9012_v22 }
 0x215   : > { %v2389_v38 = vadd.f32 %v2356_v8, %v2265_v33  ;;  %v2605_v20 = vsel %vm2443_vm3, %v2603_v13, %v12157_v23  ;;  %v1176_v31 = vmul.f32 %v12912_v16, %v12963_v41  ;;  %v1301_v43 = vmul.f32 %v8733_v29, %v12624_v45 }
 0x216   : > { %v867_v24 = vrot.slane %v804_v10, 1  ;;  %v2729_v33 = vsel %vm2443_vm3, %v2727_v12, %v12162_v63  ;;  %v2975_v9 = vrot.slane %v2913_v5, 4  ;;  %v991_v4 = vrot.slane %v928_v48, 1 }
 0x217   : > { %v2514_v8 = vadd.f32 %v2481_v30, %v2389_v38  ;;  %v2976_v21 = vrot.slane %v9022_v35, 4  ;;  %v12968_v14 = vrot.slane %v8837_v25, 1  ;;  %v1115_v10 = vrot.slane %v1052_v7, 1 }
 0x218   : > { %v1425_v23 = vmul.f32 %v12586_v57, %v12915_v46  ;;  %v12969_v45 = vrot.slane %v9010_v50, 4  ;;  %v1240_v60 = vrot.slane %v1176_v31, 2  ;;  %v12970_v12 = vrot.slane %v8849_v19, 1 }
 0x219   : > { %v868_v13 = vsel %vm580_vm0, %v12968_v14, %v867_v24  ;;  %v2638_v41 = vadd.f32 %v2605_v20, %v2514_v8  ;;  %v1364_v48 = vrot.slane %v1301_v43, 2  ;;  %v1549_v25 = vmul.f32 %v12589_v62, %v8656_v42 }
 0x21a   : > { %v2853_v38 = vsel %vm2443_vm3, %v2851_v44, %v12969_v45  ;;  %v900_v30 = vadd.f32 %v868_v13, %v776_v37  ;;  %v992_v5 = vsel %vm580_vm0, %v12970_v12, %v991_v4  ;;  %v1488_v63 = vrot.slane %v1425_v23, 2 }
 0x21b   : > { %v2762_v14 = vadd.f32 %v2729_v33, %v2638_v41  ;;  %v1673_v20 = vmul.f32 %v6518_v56, %v9012_v22  ;;  %v1797_v24 = vmul.f32 %v12912_v16, %v12626_v36  ;;  %v12971_v45 = vrot.slane %v8860_v54, 1 }
 0x21c   : > { %v1024_v7 = vadd.f32 %v992_v5, %v900_v30  ;;  %v1612_v19 = vrot.slane %v1549_v25, 2  ;;  %v1922_v44 = vmul.f32 %v8733_v29, %v6523_v11  ;;  %v2046_v23 = vmul.f32 %v12634_v27, %v12915_v46 }
 0x21d   : > { %v1116_v37 = vsel %vm580_vm0, %v12971_v45, %v1115_v10  ;;  %v2886_v4 = vadd.f32 %v2853_v38, %v2762_v14  ;;  %v2977_v41 = vsel %vm2443_vm3, %v2975_v9, %v2976_v21  ;;  %v12972_v43 = vrot.slane %v8867_v2, 2  ;;  %v12975_v9 = vld [vmem:[#allocation16_spill] sm:$0xff] }
 0x21e   : > { %v1148_v31 = vadd.f32 %v1116_v37, %v1024_v7  ;;  %v12973_v8 = vrot.slane %v8882_v0, 2  ;;  %v12974_v13 = vrot.slane %v8894_v51, 2  ;;  %v1736_v46 = vrot.slane %v1673_v20, 2  ;;  %v5890_v20 = vld [vmem:[#allocation2 + $0xe8] sm:$0xf]  ;;  %v9091_v37 = vld [vmem:[#allocation2 + $0xc0] sm:$0xff] }
 0x21f   : > { %v1241_v54 = vsel %vm1201_vm1, %v12972_v43, %v1240_v60  ;;  %v2170_v38 = vmul.f32 %v12857_v52, %v8656_v42  ;;  %v3010_v30 = vadd.f32 %v2977_v41, %v2886_v4  ;;  %v12976_v5 = vrot.slane %v12975_v9, 2 }
 0x220   : > { %v1365_v33 = vsel %vm1201_vm1, %v12973_v8, %v1364_v48  ;;  %v1489_v10 = vsel %vm1201_vm1, %v12974_v13, %v1488_v63  ;;  %v1273_v12 = vadd.f32 %v1241_v54, %v1148_v31  ;;  %v1861_v25 = vrot.slane %v1797_v24, 3 }
 0x221   : > { %v1613_v2 = vsel %vm1201_vm1, %v12976_v5, %v1612_v19  ;;  %v1985_v60 = vrot.slane %v1922_v44, 3  ;;  %v2109_v14 = vrot.slane %v2046_v23, 3  ;;  %v2233_v0 = vrot.slane %v2170_v38, 3  ;;  %3028 = vst [vmem:[%s6814_s20 + $0x70] sm:$0xff] %v3010_v30  ;;  %v9114_v30 = vld [vmem:[#allocation2 + $0xc8] sm:$0xff] }
 0x222   : > { %v2294_v48 = vmul.f32 %v6573_v6, %v9012_v22  ;;  %v1397_v51 = vadd.f32 %v1365_v33, %v1273_v12  ;;  %v2418_v63 = vmul.f32 %v12912_v16, %v12607_v18  ;;  %v2543_v7 = vmul.f32 %v8733_v29, %v6578_v17  ;;  %v9116_v12 = vld [vmem:[#allocation2 + $0x108] sm:$0xff] }
 0x223   : > { %v2667_v45 = vmul.f32 %v5890_v20, %v6593_v28  ;;  %v12977_v24 = vrot.slane %v8913_v58, 2  ;;  %v2791_v23 = vmul.f32 %v6597_v3, %v8656_v42  ;;  %v2915_v4 = vmul.f32 %v8422_v39, %v9012_v22  ;;  %v12979_v58 = vld [vmem:[#allocation10_spill] sm:$0xff]  ;;  %12983 = vst [vmem:[#allocation40_spill] sm:$0xff] %v9116_v12 }
 0x224   : > { %v2357_v44 = vrot.slane %v2294_v48, 3  ;;  %v1521_v16 = vadd.f32 %v1489_v10, %v1397_v51  ;;  %v2482_v41 = vrot.slane %v2418_v63, 4  ;;  %v2606_v31 = vrot.slane %v2543_v7, 4 }
 0x225   : > { %v1737_v19 = vsel %vm1201_vm1, %v12977_v24, %v1736_v46  ;;  %v2730_v29 = vrot.slane %v2667_v45, 4  ;;  %v12978_v43 = vrot.slane %v8925_v26, 3  ;;  %v2854_v8 = vrot.slane %v2791_v23, 4  ;;  %v12992_v45 = vld [vmem:[#allocation9_spill] sm:$0xff] }
 0x226   : > { %v2978_v33 = vrot.slane %v2915_v4, 4  ;;  %v3068_v13 = vmul.f32 %v9091_v37, %v12979_v58  ;;  %v1645_v46 = vadd.f32 %v1613_v2, %v1521_v16  ;;  %v12980_v38 = vrot.slane %v8932_v1, 3  ;;  %v9160_v4 = vld [vmem:[#allocation2 + $0x110] sm:$0xff] }
 0x227   : > { %v1862_v54 = vsel %vm1822_vm2, %v12978_v43, %v1861_v25  ;;  %v12981_v39 = vrot.slane %v8950_v61, 3  ;;  %v12982_v10 = vrot.slane %v8957_v55, 3  ;;  %v12984_v9 = vrot.slane %v8967_v32, 3  ;;  %12995 = vst [vmem:[#allocation41_spill] sm:$0xff] %v9160_v4 }
 0x228   : > { %v1986_v42 = vsel %vm1822_vm2, %v12980_v38, %v1985_v60  ;;  %v12985_v1 = vrot.slane %v8974_v40, 4  ;;  %v12986_v61 = vrot.slane %v8990_v59, 4  ;;  %v12987_v60 = vld [vmem:[#allocation11_spill] sm:$0xff]  ;;  %v12989_v32 = vrot.slane %v9010_v50, 4  ;;  %v9144_v59 = vld [vmem:[#allocation2 + $0x120] sm:$0xff] }
 0x229   : > { %v2110_v22 = vsel %vm1822_vm2, %v12981_v39, %v2109_v14  ;;  %v2234_v26 = vsel %vm1822_vm2, %v12982_v10, %v2233_v0  ;;  %v2358_v5 = vsel %vm1822_vm2, %v12984_v9, %v2357_v44  ;;  %v3100_v55 = vmul.f32 %v8884_v15, %v12987_v60  ;;  %12990 = vst [vmem:[#allocation28_spill] sm:$0xff] %v9144_v59  ;;  %v12998_v9 = vld [vmem:[#allocation59_spill] sm:$0xff] }
 0x22a   : > { %v2483_v2 = vsel %vm2443_vm3, %v12985_v1, %v2482_v41  ;;  %v2607_v25 = vsel %vm2443_vm3, %v12986_v61, %v2606_v31  ;;  %v1769_v14 = vadd.f32 %v1737_v19, %v1645_v46  ;;  %v12988_v0 = vrot.slane %v8997_v34, 4  ;;  %v12991_v34 = vld [vmem:[#allocation43_spill] sm:$0xff]  ;;  %v12993_v19 = vld [vmem:[#allocation44_spill] sm:$0xff]  ;;  %v9173_v46 = vld [vmem:[#allocation2 + $0x128] sm:$0xff] }
 0x22b   : > { %v9137_v51 = vsel %vm2443_vm3, %v12989_v32, %v2854_v8  ;;  %v9142_v40 = vsel %vm2443_vm3, %v2976_v21, %v2978_v33  ;;  %v3069_v63 = vmul.f32 %v9114_v30, %v12979_v58  ;;  %v3116_v7 = vadd.f32 %v3100_v55, %v3068_v13  ;;  %v12994_v21 = vld [vmem:[#allocation12_spill] sm:$0xff]  ;;  %v12996_v8 = vld [vmem:[#allocation51_spill] sm:$0xff]  ;;  %12997 = vst [vmem:[#allocation56_spill] sm:$0xff] %v9173_v46 }
 0x22c   : > { %v9132_v48 = vsel %vm2443_vm3, %v12988_v0, %v2730_v29  ;;  %v3132_v20 = vmul.f32 %v12991_v34, %v12953_v53  ;;  %v3228_v50 = vmul.f32 %v9091_v37, %v12992_v45  ;;  %v1894_v24 = vadd.f32 %v1862_v54, %v1769_v14  ;;  %v12999_v55 = vld [vmem:[#allocation48_spill] sm:$0xff] }
 0x22d   : > { %v3164_v44 = vmul.f32 %v9116_v12, %v12993_v19  ;;  %v9156_v35 = vmul.f32 %v9114_v30, %v12992_v45  ;;  %v3348_v23 = vmul.f32 %v8884_v15, %v12994_v21  ;;  %v9164_v31 = vmul.f32 %v8946_v47, %v12994_v21 }
 0x22e   : > { %v3148_v16 = vadd.f32 %v3132_v20, %v3116_v7  ;;  %v3276_v41 = vrot.slane %v3228_v50, 1  ;;  %v3468_v29 = vmul.f32 %v12960_v49, %v12953_v53  ;;  %v2018_v43 = vadd.f32 %v1986_v42, %v1894_v24  ;;  %v13000_v50 = vld [vmem:[#allocation49_spill] sm:$0xff] }
 0x22f   : > { %v3101_v54 = vmul.f32 %v8946_v47, %v12987_v60  ;;  %v3196_v33 = vmul.f32 %v9144_v59, %v12996_v8  ;;  %v12163_v13 = vrot.slane %v9156_v35, 1  ;;  %v3396_v39 = vrot.slane %v3348_v23, 1  ;;  %v13002_v60 = vld [vmem:[#allocation14_spill] sm:$0xff] }
 0x230   : > { %v3180_v38 = vadd.f32 %v3164_v44, %v3148_v16  ;;  %v12165_v10 = vrot.slane %v9164_v31, 1  ;;  %v9178_v1 = vmul.f32 %v12960_v49, %v12998_v9  ;;  %v2142_v61 = vadd.f32 %v2110_v22, %v2018_v43 }
 0x231   : > { %v3516_v42 = vrot.slane %v3468_v29, 1  ;;  %v3588_v14 = vmul.f32 %v9116_v12, %v12999_v55  ;;  %v9184_v0 = vmul.f32 %v9160_v4, %v12999_v55  ;;  %v3278_v7 = vsel %vm580_vm0, %v3276_v41, %v12163_v13 }
 0x232   : > { %v3212_v32 = vadd.f32 %v3196_v33, %v3180_v38  ;;  %v3708_v24 = vmul.f32 %v9144_v59, %v13000_v50  ;;  %v2266_v44 = vadd.f32 %v2234_v26, %v2142_v61  ;;  %v9195_v16 = vmul.f32 %v9173_v46, %v13000_v50  ;;  %v13001_v33 = vld [vmem:[#allocation13_spill] sm:$0xff] }
 0x233   : > { %v3636_v22 = vrot.slane %v3588_v14, 1  ;;  %v3133_v29 = vmul.f32 %v12991_v34, %v12998_v9  ;;  %v3398_v41 = vsel %vm580_vm0, %v3396_v39, %v12165_v10  ;;  %v3828_v38 = vmul.f32 %v9091_v37, %v13001_v33 }
 0x234   : > { %v3332_v43 = vadd.f32 %v3278_v7, %v3212_v32  ;;  %v2390_v13 = vadd.f32 %v2358_v5, %v2266_v44  ;;  %v3756_v26 = vrot.slane %v3708_v24, 1  ;;  %v9207_v14 = vmul.f32 %v9114_v30, %v13001_v33 }
 0x235   : > { %v3117_v23 = vadd.f32 %v3101_v54, %v3069_v63  ;;  %v3948_v32 = vmul.f32 %v8884_v15, %v13002_v60  ;;  %v9213_v7 = vmul.f32 %v8946_v47, %v13002_v60  ;;  %v13003_v10 = vrot.slane %v9178_v1, 1 }
 0x236   : > { %v3452_v20 = vadd.f32 %v3398_v41, %v3332_v43  ;;  %v2515_v39 = vadd.f32 %v2483_v2, %v2390_v13  ;;  %v13004_v24 = vrot.slane %v9184_v0, 1  ;;  %v4068_v63 = vmul.f32 %v12586_v57, %v12953_v53 }
 0x237   : > { %v3518_v5 = vsel %vm580_vm0, %v3516_v42, %v13003_v10  ;;  %v3876_v43 = vrot.slane %v3828_v38, 2  ;;  %v12167_v41 = vrot.slane %v9207_v14, 2  ;;  %v9226_v61 = vmul.f32 %v12586_v57, %v12998_v9 }
 0x238   : > { %v3638_v44 = vsel %vm580_vm0, %v3636_v22, %v13004_v24  ;;  %v3572_v54 = vadd.f32 %v3518_v5, %v3452_v20  ;;  %v2639_v2 = vadd.f32 %v2607_v25, %v2515_v39  ;;  %v13005_v13 = vrot.slane %v9195_v16, 1 }
 0x239   : > { %v3996_v42 = vrot.slane %v3948_v32, 2  ;;  %v4188_v22 = vmul.f32 %v9116_v12, %v12589_v62  ;;  %v4116_v20 = vrot.slane %v4068_v63, 2  ;;  %v9236_v38 = vmul.f32 %v9160_v4, %v12589_v62 }
 0x23a   : > { %v3758_v10 = vsel %vm580_vm0, %v3756_v26, %v13005_v13  ;;  %v3692_v24 = vadd.f32 %v3638_v44, %v3572_v54  ;;  %v2763_v9 = vadd.f32 %v9132_v48, %v2639_v2  ;;  %v4308_v39 = vmul.f32 %v9144_v59, %v6518_v56 }
 0x23b   : > { %v9244_v26 = vmul.f32 %v9173_v46, %v6518_v56  ;;  %v3878_v5 = vsel %vm1201_vm1, %v3876_v43, %v12167_v41  ;;  %v4236_v44 = vrot.slane %v4188_v22, 2  ;;  %v12166_v63 = vrot.slane %v9236_v38, 2 }
 0x23c   : > { %v3812_v32 = vadd.f32 %v3758_v10, %v3692_v24  ;;  %v2887_v54 = vadd.f32 %v9137_v51, %v2763_v9  ;;  %v4356_v48 = vrot.slane %v4308_v39, 2  ;;  %v4428_v13 = vmul.f32 %v9091_v37, %v12626_v36 }
 0x23d   : > { %13006 = vst [vmem:[#allocation38_spill] sm:$0xff] %v9244_v26  ;;  %v12169_v2 = vrot.slane %v9244_v26, 2  ;;  %v9254_v25 = vadd.f32 %v3133_v29, %v3117_v23  ;;  %v9258_v10 = vmul.f32 %v9114_v30, %v12626_v36  ;;  %v4548_v43 = vmul.f32 %v8884_v15, %v6523_v11 }
 0x23e   : > { %v3932_v53 = vadd.f32 %v3878_v5, %v3812_v32  ;;  %v3011_v22 = vadd.f32 %v9142_v40, %v2887_v54  ;;  %v13007_v51 = vrot.slane %v9213_v7, 2  ;;  %v13008_v9 = vrot.slane %v9226_v61, 2  ;;  %v9276_v5 = vld [vmem:[#allocation2 + $0xf0] sm:$0xff]  ;;  %v9280_v54 = vld [vmem:[#allocation2 + $0xf8] sm:$0xff] }
 0x23f   : > { %v9271_v23 = vmul.f32 %v8946_v47, %v6523_v11  ;;  %v4238_v32 = vsel %vm1201_vm1, %v4236_v44, %v12166_v63  ;;  %13009 = vst [vmem:[#allocation52_spill] sm:$0xff] %v9276_v5  ;;  %v4668_v40 = vmul.f32 %v9276_v5, %v12634_v27  ;;  %13010 = vst [vmem:[#allocation23_spill] sm:$0xff] %v9280_v54  ;;  %v4596_v63 = vrot.slane %v4548_v43, 3 }
 0x240   : > { %v3998_v24 = vsel %vm1201_vm1, %v3996_v42, %v13007_v51  ;;  %v4118_v39 = vsel %vm1201_vm1, %v4116_v20, %v13008_v9  ;;  %v9284_v42 = vmul.f32 %v9280_v54, %v12634_v27  ;;  %3029 = vst [vmem:[%s6814_s20 + $0x78] sm:$0xff] %v3011_v22  ;;  %v4476_v20 = vrot.slane %v4428_v13, 3 }
 0x241   : > { %v4052_v29 = vadd.f32 %v3998_v24, %v3932_v53  ;;  %v4358_v53 = vsel %vm1201_vm1, %v4356_v48, %v12169_v2  ;;  %v4788_v44 = vmul.f32 %v9116_v12, %v12857_v52  ;;  %v9294_v51 = vmul.f32 %v9160_v4, %v12857_v52 }
 0x242   : > { %v4908_v41 = vmul.f32 %v9144_v59, %v6573_v6  ;;  %v4716_v34 = vrot.slane %v4668_v40, 3  ;;  %v9303_v13 = vmul.f32 %v9173_v46, %v6573_v6  ;;  %v9311_v22 = vmul.f32 %v9114_v30, %v12607_v18 }
 0x243   : > { %v4172_v24 = vadd.f32 %v4118_v39, %v4052_v29  ;;  %v4836_v58 = vrot.slane %v4788_v44, 3  ;;  %v5028_v39 = vmul.f32 %v9091_v37, %v12607_v18  ;;  %v5148_v40 = vmul.f32 %v8884_v15, %v6578_v17  ;;  %v9364_v15 = vld [vmem:[%s11882_s1 + $0x18] ss:$0 sm:$0xff] }
 0x244   : > { %v4956_v43 = vrot.slane %v4908_v41, 3  ;;  %v5268_v44 = vmul.f32 %v9276_v5, %v6593_v28  ;;  %v13012_v37 = vrot.slane %v9258_v10, 3  ;;  %v9327_v29 = vmul.f32 %v9280_v54, %v6593_v28  ;;  %13021 = vst [vmem:[#allocation20_spill] sm:$0xff] %v9364_v15 }
 0x245   : > { %v4292_v2 = vadd.f32 %v4238_v32, %v4172_v24  ;;  %v5076_v9 = vrot.slane %v5028_v39, 4  ;;  %v9317_v32 = vmul.f32 %v8946_v47, %v6578_v17  ;;  %v5196_v30 = vrot.slane %v5148_v40, 4 }
 0x246   : > { %v4478_v41 = vsel %vm1822_vm2, %v4476_v20, %v13012_v37  ;;  %v5388_v47 = vmul.f32 %v9116_v12, %v6597_v3  ;;  %v13014_v5 = vrot.slane %v9284_v42, 3  ;;  %v13015_v40 = vrot.slane %v9294_v51, 3 }
 0x247   : > { %v4412_v48 = vadd.f32 %v4358_v53, %v4292_v2  ;;  %13011 = vst [vmem:[#allocation18_spill] sm:$0xff] %v9317_v32  ;;  %v13013_v53 = vrot.slane %v9271_v23, 3  ;;  %v13016_v24 = vrot.slane %v9303_v13, 3  ;;  %v13018_v54 = vrot.slane %v9311_v22, 4 }
 0x248   : > { %v4718_v20 = vsel %vm1822_vm2, %v4716_v34, %v13014_v5  ;;  %v4838_v37 = vsel %vm1822_vm2, %v4836_v58, %v13015_v40  ;;  %v5316_v5 = vrot.slane %v5268_v44, 4  ;;  %v9356_v40 = vld [vmem:[#allocation2 + $0x118] sm:$0xf]  ;;  %v5436_v12 = vrot.slane %v5388_v47, 4 }
 0x249   : > { %v4532_v2 = vadd.f32 %v4478_v41, %v4412_v48  ;;  %v4598_v39 = vsel %vm1822_vm2, %v4596_v63, %v13013_v53  ;;  %v4958_v48 = vsel %vm1822_vm2, %v4956_v43, %v13016_v24  ;;  %v9346_v63 = vmul.f32 %v9160_v4, %v6597_v3  ;;  %v9348_v41 = vld [vmem:[#allocation2 + $0xd0] sm:$0xf]  ;;  %v9350_v53 = vld [vmem:[#allocation2 + $0x100] sm:$0xf]  ;;  %13019 = vst [vmem:[#allocation35_spill] sm:$0xff] %v9356_v40 }
 0x24a   : > { %13017 = vst [vmem:[#allocation31_spill] sm:$0xff] %v9350_v53  ;;  %v5078_v34 = vsel %vm2443_vm3, %v5076_v9, %v13018_v54  ;;  %v13020_v43 = vrot.slane %v9317_v32, 4  ;;  %v3165_v54 = vmul.f32 %v9160_v4, %v12993_v19  ;;  %v9370_v9 = vld [vmem:[#allocation2 + $0x130] sm:$0xf]  ;;  %v3230_v47 = vmul.f32 %v9348_v41, %v12992_v45 }
 0x24b   : > { %v4652_v26 = vadd.f32 %v4598_v39, %v4532_v2  ;;  %v5508_v2 = vmul.f32 %v9364_v15, %v9144_v59  ;;  %13022 = vst [vmem:[#allocation39_spill] sm:$0xff] %v9370_v9  ;;  %v3197_v58 = vmul.f32 %v9173_v46, %v12996_v8  ;;  %v9382_v59 = vld [vmem:[#allocation2 + $0xe8] sm:$0xf]  ;;  %v13024_v39 = vrot.slane %v9327_v29, 4 }
 0x24c   : > { %v5198_v24 = vsel %vm2443_vm3, %v5196_v30, %v13020_v43  ;;  %v9375_v30 = vmul.f32 %v9364_v15, %v9173_v46  ;;  %v3181_v43 = vadd.f32 %v3165_v54, %v9254_v25  ;;  %13023 = vst [vmem:[#allocation29_spill] sm:$0xff] %v9382_v59  ;;  %v3350_v4 = vmul.f32 %v9382_v59, %v12994_v21 }
 0x24d   : > { %v4772_v44 = vadd.f32 %v4718_v20, %v4652_v26  ;;  %v3470_v26 = vmul.f32 %v9350_v53, %v12960_v49  ;;  %v5318_v19 = vsel %vm2443_vm3, %v5316_v5, %v13024_v39  ;;  %v3279_v15 = vrot.slane %v3230_v47, 1 }
 0x24e   : > { %v3590_v25 = vmul.f32 %v9356_v40, %v12999_v55  ;;  %v5556_v54 = vrot.slane %v5508_v2, 4  ;;  %v3213_v45 = vadd.f32 %v3197_v58, %v3181_v43  ;;  %v3399_v46 = vrot.slane %v3350_v4, 1 }
 0x24f   : > { %v4892_v20 = vadd.f32 %v4838_v37, %v4772_v44  ;;  %v3710_v8 = vmul.f32 %v9370_v9, %v13000_v50  ;;  %v13025_v21 = vrot.slane %v9156_v35, 1  ;;  %v3519_v37 = vrot.slane %v3470_v26, 1 }
 0x250   : > { %v3830_v44 = vmul.f32 %v9348_v41, %v13001_v33  ;;  %v13026_v5 = vrot.slane %v9346_v63, 4  ;;  %v12196_v2 = vrot.slane %v9375_v30, 4  ;;  %v3639_v4 = vrot.slane %v3590_v25, 1 }
 0x251   : > { %v5012_v32 = vadd.f32 %v4958_v48, %v4892_v20  ;;  %v3280_v49 = vsel %vm580_vm0, %v13025_v21, %v3279_v15  ;;  %v13027_v43 = vrot.slane %v9164_v31, 1  ;;  %v3759_v35 = vrot.slane %v3710_v8, 1 }
 0x252   : > { %v5438_v39 = vsel %vm2443_vm3, %v5436_v12, %v13026_v5  ;;  %v3333_v58 = vadd.f32 %v3280_v49, %v3213_v45  ;;  %v3950_v15 = vmul.f32 %v9382_v59, %v13002_v60  ;;  %v3879_v26 = vrot.slane %v3830_v44, 2 }
 0x253   : > { %v5132_v47 = vadd.f32 %v5078_v34, %v5012_v32  ;;  %v3400_v48 = vsel %vm580_vm0, %v13027_v43, %v3399_v46  ;;  %v4070_v20 = vmul.f32 %v9350_v53, %v12586_v57  ;;  %v4190_v12 = vmul.f32 %v9356_v40, %v12589_v62 }
 0x254   : > { %v3453_v21 = vadd.f32 %v3400_v48, %v3333_v58  ;;  %v13028_v49 = vrot.slane %v9178_v1, 1  ;;  %v3999_v31 = vrot.slane %v3950_v15, 2  ;;  %v4310_v8 = vmul.f32 %v9370_v9, %v6518_v56 }
 0x255   : > { %v5252_v5 = vadd.f32 %v5198_v24, %v5132_v47  ;;  %v5558_v46 = vsel %vm2443_vm3, %v5556_v54, %v12196_v2  ;;  %v4119_v34 = vrot.slane %v4070_v20, 2  ;;  %v4430_v25 = vmul.f32 %v9348_v41, %v12626_v36 }
 0x256   : > { %v3520_v45 = vsel %vm580_vm0, %v13028_v49, %v3519_v37  ;;  %v13029_v24 = vrot.slane %v9184_v0, 1  ;;  %v13030_v37 = vrot.slane %v9195_v16, 1  ;;  %v4550_v47 = vmul.f32 %v9382_v59, %v6523_v11 }
 0x257   : > { %v3573_v32 = vadd.f32 %v3520_v45, %v3453_v21  ;;  %v5372_v44 = vadd.f32 %v5318_v19, %v5252_v5  ;;  %v13031_v54 = vrot.slane %v9207_v14, 2  ;;  %v13032_v15 = vrot.slane %v9213_v7, 2 }
 0x258   : > { %v3640_v1 = vsel %vm580_vm0, %v13029_v24, %v3639_v4  ;;  %v3760_v58 = vsel %vm580_vm0, %v13030_v37, %v3759_v35  ;;  %v4239_v21 = vrot.slane %v4190_v12, 2  ;;  %v13033_v4 = vrot.slane %v9226_v61, 2 }
 0x259   : > { %v3693_v43 = vadd.f32 %v3640_v1, %v3573_v32  ;;  %v3880_v48 = vsel %vm1201_vm1, %v13031_v54, %v3879_v26  ;;  %v4000_v19 = vsel %vm1201_vm1, %v13032_v15, %v3999_v31  ;;  %v5492_v0 = vadd.f32 %v5438_v39, %v5372_v44 }
 0x25a   : > { %v4120_v16 = vsel %vm1201_vm1, %v13033_v4, %v4119_v34  ;;  %v4359_v35 = vrot.slane %v4310_v8, 2  ;;  %v4670_v20 = vmul.f32 %v9350_v53, %v12634_v27  ;;  %v4479_v49 = vrot.slane %v4430_v25, 3 }
 0x25b   : > { %v3813_v5 = vadd.f32 %v3760_v58, %v3693_v43  ;;  %v4790_v14 = vmul.f32 %v9356_v40, %v12857_v52  ;;  %v4910_v7 = vmul.f32 %v9370_v9, %v6573_v6  ;;  %v5612_v26 = vadd.f32 %v5558_v46, %v5492_v0 }
 0x25c   : > { %v4599_v12 = vrot.slane %v4550_v47, 3  ;;  %v4719_v39 = vrot.slane %v4670_v20, 3  ;;  %v5030_v61 = vmul.f32 %v9348_v41, %v12607_v18  ;;  %v5150_v32 = vmul.f32 %v9382_v59, %v6578_v17  ;;  %v13035_v41 = vld [vmem:[#allocation38_spill] sm:$0xff] }
 0x25d   : > { %v3933_v45 = vadd.f32 %v3880_v48, %v3813_v5  ;;  %v4839_v31 = vrot.slane %v4790_v14, 3  ;;  %v4959_v8 = vrot.slane %v4910_v7, 3  ;;  %5775 = vst [vmem:[%s6814_s20 + $0x80] sm:$0xff] %v5612_v26  ;;  %v13034_v34 = vrot.slane %v9236_v38, 2  ;;  %v13042_v5 = vld [vmem:[#allocation10_spill] sm:$0xff]  ;;  %v13045_v7 = vld [vmem:[#allocation52_spill] sm:$0xff] }
 0x25e   : > { %v5079_v44 = vrot.slane %v5030_v61, 4  ;;  %v5270_v46 = vmul.f32 %v9350_v53, %v6593_v28  ;;  %v5390_v24 = vmul.f32 %v9356_v40, %v6597_v3  ;;  %v13036_v37 = vrot.slane %v13035_v41, 2  ;;  %v13054_v41 = vld [vmem:[#allocation44_spill] sm:$0xff] }
 0x25f   : > { %v4240_v25 = vsel %vm1201_vm1, %v13034_v34, %v4239_v21  ;;  %v4053_v1 = vadd.f32 %v4000_v19, %v3933_v45  ;;  %v13037_v47 = vrot.slane %v9258_v10, 3  ;;  %v5199_v54 = vrot.slane %v5150_v32, 4 }
 0x260   : > { %v4360_v58 = vsel %vm1201_vm1, %v13036_v37, %v4359_v35  ;;  %v13038_v38 = vrot.slane %v9271_v23, 3  ;;  %v13039_v15 = vrot.slane %v9284_v42, 3  ;;  %v13040_v0 = vrot.slane %v9294_v51, 3  ;;  %v13044_v23 = vld [vmem:[#allocation11_spill] sm:$0xff]  ;;  %v13055_v37 = vld [vmem:[#allocation28_spill] sm:$0xff] }
 0x261   : > { %v4480_v43 = vsel %vm1822_vm2, %v13037_v47, %v4479_v49  ;;  %v5319_v4 = vrot.slane %v5270_v46, 4  ;;  %v4173_v20 = vadd.f32 %v4120_v16, %v4053_v1  ;;  %v13041_v35 = vrot.slane %v9303_v13, 3  ;;  %v13043_v49 = vld [vmem:[#allocation24_spill] sm:$0xff] }
 0x262   : > { %v4600_v48 = vsel %vm1822_vm2, %v13038_v38, %v4599_v12  ;;  %v4720_v21 = vsel %vm1822_vm2, %v13039_v15, %v4719_v39  ;;  %v4840_v19 = vsel %vm1822_vm2, %v13040_v0, %v4839_v31  ;;  %v3070_v14 = vmul.f32 %v13043_v49, %v13042_v5  ;;  %v13047_v39 = vld [vmem:[#allocation18_spill] sm:$0xff]  ;;  %v13049_v13 = vld [vmem:[#allocation20_spill] sm:$0xff]  ;;  %v13057_v38 = vld [vmem:[#allocation21_spill] sm:$0xff] }
 0x263   : > { %v4960_v10 = vsel %vm1822_vm2, %v13041_v35, %v4959_v8  ;;  %v3102_v26 = vmul.f32 %v13045_v7, %v13044_v23  ;;  %v13046_v42 = vrot.slane %v9311_v22, 4  ;;  %v13048_v51 = vrot.slane %v13047_v39, 4  ;;  %v13051_v22 = vld [vmem:[#allocation43_spill] sm:$0xff]  ;;  %v13052_v46 = vld [vmem:[#allocation40_spill] sm:$0xff] }
 0x264   : > { %v5439_v16 = vrot.slane %v5390_v24, 4  ;;  %v9490_v45 = vmul.f32 %v13049_v13, %v9370_v9  ;;  %v4293_v31 = vadd.f32 %v4240_v25, %v4173_v20  ;;  %v13050_v8 = vrot.slane %v9327_v29, 4  ;;  %v9499_v1 = vld [vmem:[#allocation2 + $0x138] sm:$0xff]  ;;  %v13056_v24 = vld [vmem:[#allocation9_spill] sm:$0xff]  ;;  %v13060_v20 = vld [vmem:[#allocation23_spill] sm:$0xff] }
 0x265   : > { %v5080_v12 = vsel %vm2443_vm3, %v13046_v42, %v5079_v44  ;;  %v9486_v61 = vsel %vm2443_vm3, %v13048_v51, %v5199_v54  ;;  %v3118_v34 = vadd.f32 %v3102_v26, %v3070_v14  ;;  %v3134_v44 = vmul.f32 %v13052_v46, %v13051_v22  ;;  %13053 = vst [vmem:[#allocation22_spill] sm:$0xff] %v9499_v1  ;;  %v13059_v29 = vld [vmem:[#allocation12_spill] sm:$0xff]  ;;  %v13062_v14 = vld [vmem:[#allocation45_spill] sm:$0xff] }
 0x266   : > { %v9495_v32 = vsel %vm2443_vm3, %v13050_v8, %v5319_v4  ;;  %v3166_v47 = vmul.f32 %v13055_v37, %v13054_v41  ;;  %v3231_v54 = vmul.f32 %v13043_v49, %v13056_v24  ;;  %v9507_v25 = vmul.f32 %v13057_v38, %v13056_v24  ;;  %v13063_v8 = vld [vmem:[#allocation41_spill] sm:$0xff]  ;;  %v13067_v39 = vld [vmem:[#allocation56_spill] sm:$0xff] }
 0x267   : > { %v3351_v15 = vmul.f32 %v13045_v7, %v13059_v29  ;;  %v4413_v0 = vadd.f32 %v4360_v58, %v4293_v31  ;;  %v3150_v4 = vadd.f32 %v3134_v44, %v3118_v34  ;;  %v9513_v35 = vmul.f32 %v13060_v20, %v13059_v29  ;;  %v9522_v24 = vld [vmem:[#allocation2 + $0x140] sm:$0xff]  ;;  %v13065_v31 = vld [vmem:[#allocation51_spill] sm:$0xff] }
 0x268   : > { %13058 = vst [vmem:[#allocation17_spill] sm:$0xff] %v9507_v25  ;;  %v3471_v26 = vmul.f32 %v13052_v46, %v13062_v14  ;;  %v3281_v42 = vrot.slane %v3231_v54, 1  ;;  %v9520_v2 = vmul.f32 %v13063_v8, %v13062_v14  ;;  %13064 = vst [vmem:[#allocation25_spill] sm:$0xff] %v9522_v24  ;;  %v3198_v34 = vmul.f32 %v9499_v1, %v13065_v31 }
 0x269   : > { %13061 = vst [vmem:[#allocation33_spill] sm:$0xff] %v9513_v35  ;;  %v3401_v51 = vrot.slane %v3351_v15, 1  ;;  %v4533_v59 = vadd.f32 %v4480_v43, %v4413_v0  ;;  %v3182_v58 = vadd.f32 %v3166_v47, %v3150_v4  ;;  %v12205_v44 = vrot.slane %v9513_v35, 1 }
 0x26a   : > { %v13066_v41 = vrot.slane %v9346_v63, 4  ;;  %v3521_v9 = vrot.slane %v3471_v26, 1  ;;  %v3591_v15 = vmul.f32 %v13055_v37, %v12999_v55  ;;  %v9534_v40 = vmul.f32 %v13067_v39, %v12999_v55 }
 0x26b   : > { %v4653_v14 = vadd.f32 %v4600_v48, %v4533_v59  ;;  %v3214_v43 = vadd.f32 %v3198_v34, %v3182_v58  ;;  %v13068_v47 = vrot.slane %v9507_v25, 1  ;;  %v3711_v4 = vmul.f32 %v9499_v1, %v13000_v50 }
 0x26c   : > { %v5440_v54 = vsel %vm2443_vm3, %v13066_v41, %v5439_v16  ;;  %v3403_v63 = vsel %vm580_vm0, %v3401_v51, %v12205_v44  ;;  %v3641_v41 = vrot.slane %v3591_v15, 1  ;;  %v9547_v26 = vmul.f32 %v9522_v24, %v13000_v50 }
 0x26d   : > { %v3283_v0 = vsel %vm580_vm0, %v3281_v42, %v13068_v47  ;;  %v4773_v59 = vadd.f32 %v4720_v21, %v4653_v14  ;;  %v3831_v42 = vmul.f32 %v13043_v49, %v13001_v33  ;;  %v3761_v34 = vrot.slane %v3711_v4, 1 }
 0x26e   : > { %v3334_v48 = vadd.f32 %v3283_v0, %v3214_v43  ;;  %v9555_v51 = vmul.f32 %v13057_v38, %v13001_v33  ;;  %v3951_v15 = vmul.f32 %v13045_v7, %v13002_v60  ;;  %v9561_v21 = vmul.f32 %v13060_v20, %v13002_v60 }
 0x26f   : > { %v4893_v44 = vadd.f32 %v4840_v19, %v4773_v59  ;;  %v3881_v35 = vrot.slane %v3831_v42, 2  ;;  %v5559_v14 = vrot.slane %v9490_v45, 4  ;;  %v13069_v43 = vrot.slane %v9520_v2, 1 }
 0x270   : > { %v3454_v16 = vadd.f32 %v3403_v63, %v3334_v48  ;;  %v12208_v4 = vrot.slane %v9555_v51, 2  ;;  %v4071_v47 = vmul.f32 %v13052_v46, %v12586_v57  ;;  %v13070_v19 = vrot.slane %v9534_v40, 1 }
 0x271   : > { %v3523_v0 = vsel %vm580_vm0, %v3521_v9, %v13069_v43  ;;  %v5013_v58 = vadd.f32 %v4960_v10, %v4893_v44  ;;  %v9575_v59 = vmul.f32 %v13063_v8, %v12586_v57  ;;  %v13071_v45 = vrot.slane %v9547_v26, 1 }
 0x272   : > { %v3574_v25 = vadd.f32 %v3523_v0, %v3454_v16  ;;  %v3643_v63 = vsel %vm580_vm0, %v3641_v41, %v13070_v19  ;;  %v4001_v9 = vrot.slane %v3951_v15, 2  ;;  %v4191_v42 = vmul.f32 %v13055_v37, %v12589_v62 }
 0x273   : > { %v3763_v48 = vsel %vm580_vm0, %v3761_v34, %v13071_v45  ;;  %v9584_v10 = vmul.f32 %v13067_v39, %v12589_v62  ;;  %v5133_v44 = vadd.f32 %v5080_v12, %v5013_v58  ;;  %v3883_v41 = vsel %vm1201_vm1, %v3881_v35, %v12208_v4 }
 0x274   : > { %v3694_v16 = vadd.f32 %v3643_v63, %v3574_v25  ;;  %v4121_v0 = vrot.slane %v4071_v47, 2  ;;  %v4311_v34 = vmul.f32 %v9499_v1, %v6518_v56  ;;  %v9595_v15 = vmul.f32 %v9522_v24, %v6518_v56 }
 0x275   : > { %v5253_v45 = vadd.f32 %v9486_v61, %v5133_v44  ;;  %v4241_v25 = vrot.slane %v4191_v42, 2  ;;  %v4431_v58 = vmul.f32 %v13043_v49, %v12626_v36  ;;  %v9604_v4 = vmul.f32 %v13057_v38, %v12626_v36 }
 0x276   : > { %v3814_v12 = vadd.f32 %v3763_v48, %v3694_v16  ;;  %v4361_v63 = vrot.slane %v4311_v34, 2  ;;  %v13073_v43 = vrot.slane %v9375_v30, 4  ;;  %v4551_v42 = vmul.f32 %v13045_v7, %v6523_v11 }
 0x277   : > { %13072 = vst [vmem:[#allocation46_spill] sm:$0xff] %v9604_v4  ;;  %v5373_v19 = vadd.f32 %v9495_v32, %v5253_v45  ;;  %v13074_v44 = vrot.slane %v9561_v21, 2  ;;  %v4481_v34 = vrot.slane %v4431_v58, 3  ;;  %v9618_v35 = vmul.f32 %v13060_v20, %v6523_v11 }
 0x278   : > { %v5560_v61 = vsel %vm2443_vm3, %v13073_v43, %v5559_v14  ;;  %v3934_v48 = vadd.f32 %v3883_v41, %v3814_v12  ;;  %v4671_v14 = vmul.f32 %v13052_v46, %v12634_v27  ;;  %v9624_v41 = vmul.f32 %v13063_v8, %v12634_v27 }
 0x279   : > { %v4003_v16 = vsel %vm1201_vm1, %v4001_v9, %v13074_v44  ;;  %13075 = vst [vmem:[#allocation50_spill] sm:$0xff] %v9618_v35  ;;  %v5493_v32 = vadd.f32 %v5440_v54, %v5373_v19  ;;  %v13076_v43 = vrot.slane %v9575_v59, 2  ;;  %v13077_v45 = vrot.slane %v9584_v10, 2 }
 0x27a   : > { %v4054_v30 = vadd.f32 %v4003_v16, %v3934_v48  ;;  %v13078_v58 = vrot.slane %v9595_v15, 2  ;;  %v4791_v19 = vmul.f32 %v13055_v37, %v12857_v52  ;;  %v4601_v16 = vrot.slane %v4551_v42, 3 }
 0x27b   : > { %v4123_v9 = vsel %vm1201_vm1, %v4121_v0, %v13076_v43  ;;  %v4243_v12 = vsel %vm1201_vm1, %v4241_v25, %v13077_v45  ;;  %v5613_v48 = vadd.f32 %v5560_v61, %v5493_v32  ;;  %v9639_v47 = vmul.f32 %v13067_v39, %v12857_v52 }
 0x27c   : > { %v4363_v54 = vsel %vm1201_vm1, %v4361_v63, %v13078_v58  ;;  %v4174_v44 = vadd.f32 %v4123_v9, %v4054_v30  ;;  %v13079_v0 = vrot.slane %v9604_v4, 3  ;;  %v4911_v45 = vmul.f32 %v9499_v1, %v6573_v6 }
 0x27d   : > { %v9649_v63 = vmul.f32 %v9522_v24, %v6573_v6  ;;  %5776 = vst [vmem:[%s6814_s20 + $0x88] sm:$0xff] %v5613_v48  ;;  %v4721_v42 = vrot.slane %v4671_v14, 3  ;;  %v5031_v30 = vmul.f32 %v13043_v49, %v12607_v18  ;;  %v4841_v9 = vrot.slane %v4791_v19, 3 }
 0x27e   : > { %v4483_v43 = vsel %vm1822_vm2, %v4481_v34, %v13079_v0  ;;  %v4294_v61 = vadd.f32 %v4243_v12, %v4174_v44  ;;  %v9658_v58 = vmul.f32 %v13057_v38, %v12607_v18  ;;  %v5151_v0 = vmul.f32 %v13045_v7, %v6578_v17 }
 0x27f   : > { %v4961_v4 = vrot.slane %v4911_v45, 3  ;;  %v9665_v14 = vmul.f32 %v13060_v20, %v6578_v17  ;;  %v5081_v48 = vrot.slane %v5031_v30, 4  ;;  %v5271_v44 = vmul.f32 %v13052_v46, %v6593_v28 }
 0x280   : > { %13080 = vst [vmem:[#allocation19_spill] sm:$0xff] %v9658_v58  ;;  %v4414_v25 = vadd.f32 %v4363_v54, %v4294_v61  ;;  %v5201_v19 = vrot.slane %v5151_v0, 4  ;;  %v9673_v54 = vmul.f32 %v13063_v8, %v6593_v28  ;;  %v5391_v45 = vmul.f32 %v13055_v37, %v6597_v3 }
 0x281   : > { %v13082_v61 = vrot.slane %v9618_v35, 3  ;;  %v5321_v12 = vrot.slane %v5271_v44, 4  ;;  %v9682_v0 = vmul.f32 %v13067_v39, %v6597_v3  ;;  %v13084_v32 = vrot.slane %v9624_v41, 3 }
 0x282   : > { %v4534_v34 = vadd.f32 %v4483_v43, %v4414_v25  ;;  %13081 = vst [vmem:[#allocation58_spill] sm:$0xff] %v9673_v54  ;;  %v5511_v43 = vmul.f32 %v13049_v13, %v9499_v1  ;;  %v13085_v46 = vrot.slane %v9639_v47, 3  ;;  %v5441_v7 = vrot.slane %v5391_v45, 4  ;;  %v13092_v45 = vld [vmem:[#allocation34_spill] sm:$0xff] }
 0x283   : > { %v4603_v30 = vsel %vm1822_vm2, %v4601_v16, %v13082_v61  ;;  %13083 = vst [vmem:[#allocation27_spill] sm:$0xff] %v9682_v0  ;;  %v4723_v49 = vsel %vm1822_vm2, %v4721_v42, %v13084_v32  ;;  %v13086_v16 = vrot.slane %v9649_v63, 3  ;;  %v13087_v61 = vrot.slane %v9658_v58, 4  ;;  %v9705_v32 = vld [vmem:[#allocation2 + $0x148] sm:$0xf] }
 0x284   : > { %v4654_v25 = vadd.f32 %v4603_v30, %v4534_v34  ;;  %v4843_v37 = vsel %vm1822_vm2, %v4841_v9, %v13085_v46  ;;  %v9701_v34 = vmul.f32 %v13049_v13, %v9522_v24  ;;  %v3071_v42 = vmul.f32 %v13057_v38, %v13042_v5  ;;  %13089 = vst [vmem:[#allocation47_spill] sm:$0xff] %v9705_v32 }
 0x285   : > { %v4963_v44 = vsel %vm1822_vm2, %v4961_v4, %v13086_v16  ;;  %v5083_v35 = vsel %vm2443_vm3, %v5081_v48, %v13087_v61  ;;  %v13090_v9 = vrot.slane %v9665_v14, 4  ;;  %v3103_v4 = vmul.f32 %v13060_v20, %v13044_v23  ;;  %v13094_v20 = vld [vmem:[#allocation35_spill] sm:$0xff] }
 0x286   : > { %13088 = vst [vmem:[#allocation26_spill] sm:$0xff] %v9701_v34  ;;  %v4774_v46 = vadd.f32 %v4723_v49, %v4654_v25  ;;  %v13091_v48 = vrot.slane %v9673_v54, 4  ;;  %v12224_v61 = vrot.slane %v9682_v0, 4  ;;  %v5561_v1 = vrot.slane %v5511_v43, 4  ;;  %v13101_v0 = vld [vmem:[#allocation33_spill] sm:$0xff] }
 0x287   : > { %v5203_v30 = vsel %vm2443_vm3, %v5201_v19, %v13090_v9  ;;  %v3119_v5 = vadd.f32 %v3103_v4, %v3071_v42  ;;  %v3135_v49 = vmul.f32 %v13063_v8, %v13051_v22  ;;  %v3353_v19 = vmul.f32 %v9350_v53, %v13059_v29  ;;  %v13093_v9 = vld [vmem:[#allocation45_spill] sm:$0xff]  ;;  %v13096_v42 = vld [vmem:[#allocation44_spill] sm:$0xff] }
 0x288   : > { %v5323_v16 = vsel %vm2443_vm3, %v5321_v12, %v13091_v48  ;;  %v4894_v58 = vadd.f32 %v4843_v37, %v4774_v46  ;;  %v3284_v25 = vrot.slane %v13092_v45, 1  ;;  %v3473_v54 = vmul.f32 %v13094_v20, %v13093_v9  ;;  %v13095_v12 = vld [vmem:[#allocation39_spill] sm:$0xff]  ;;  %v13098_v29 = vld [vmem:[#allocation29_spill] sm:$0xff] }
 0x289   : > { %v3593_v48 = vmul.f32 %v13095_v12, %v12999_v55  ;;  %v3713_v43 = vmul.f32 %v9705_v32, %v13000_v50  ;;  %v3151_v37 = vadd.f32 %v3135_v49, %v3119_v5  ;;  %v3167_v46 = vmul.f32 %v13067_v39, %v13096_v42 }
 0x28a   : > { %v5014_v38 = vadd.f32 %v4963_v44, %v4894_v58  ;;  %v3404_v4 = vrot.slane %v3353_v19, 1  ;;  %v5443_v8 = vsel %vm2443_vm3, %v5441_v7, %v12224_v61  ;;  %v13097_v45 = vrot.slane %v9701_v34, 4  ;;  %v13099_v19 = vld [vmem:[#allocation17_spill] sm:$0xff] }
 0x28b   : > { %v3199_v55 = vmul.f32 %v9522_v24, %v13065_v31  ;;  %v3833_v50 = vmul.f32 %v13098_v29, %v13001_v33  ;;  %v3183_v5 = vadd.f32 %v3167_v46, %v3151_v37  ;;  %v3524_v44 = vrot.slane %v3473_v54, 1 }
 0x28c   : > { %v5563_v9 = vsel %vm2443_vm3, %v5561_v1, %v13097_v45  ;;  %v5134_v58 = vadd.f32 %v5083_v35, %v5014_v38  ;;  %v3953_v49 = vmul.f32 %v9350_v53, %v13002_v60  ;;  %v13100_v42 = vrot.slane %v13099_v19, 1 }
 0x28d   : > { %v3644_v61 = vrot.slane %v3593_v48, 1  ;;  %v3764_v34 = vrot.slane %v3713_v43, 1  ;;  %v3884_v39 = vrot.slane %v3833_v50, 2  ;;  %v3215_v45 = vadd.f32 %v3199_v55, %v3183_v5 }
 0x28e   : > { %v3285_v7 = vsel %vm580_vm0, %v13100_v42, %v3284_v25  ;;  %v5254_v1 = vadd.f32 %v5203_v30, %v5134_v58  ;;  %v13102_v24 = vrot.slane %v13101_v0, 1  ;;  %v4073_v35 = vmul.f32 %v13094_v20, %v12586_v57 }
 0x28f   : > { %v4004_v54 = vrot.slane %v3953_v49, 2  ;;  %v4193_v38 = vmul.f32 %v13095_v12, %v12589_v62  ;;  %v4313_v37 = vmul.f32 %v9705_v32, %v6518_v56  ;;  %v4433_v25 = vmul.f32 %v13098_v29, %v12626_v36 }
 0x290   : > { %v3405_v31 = vsel %vm580_vm0, %v13102_v24, %v3404_v4  ;;  %v5374_v50 = vadd.f32 %v5323_v16, %v5254_v1  ;;  %v3335_v30 = vadd.f32 %v3285_v7, %v3215_v45  ;;  %v13103_v55 = vrot.slane %v9520_v2, 1 }
 0x291   : > { %v4124_v24 = vrot.slane %v4073_v35, 2  ;;  %v13104_v48 = vrot.slane %v9534_v40, 1  ;;  %v13105_v42 = vrot.slane %v9547_v26, 1  ;;  %v13106_v4 = vrot.slane %v9555_v51, 2 }
 0x292   : > { %v3525_v0 = vsel %vm580_vm0, %v13103_v55, %v3524_v44  ;;  %v4553_v16 = vmul.f32 %v9350_v53, %v6523_v11  ;;  %v5494_v5 = vadd.f32 %v5443_v8, %v5374_v50  ;;  %v3455_v2 = vadd.f32 %v3405_v31, %v3335_v30 }
 0x293   : > { %v3645_v43 = vsel %vm580_vm0, %v13104_v48, %v3644_v61  ;;  %v3765_v46 = vsel %vm580_vm0, %v13105_v42, %v3764_v34  ;;  %v3885_v58 = vsel %vm1201_vm1, %v13106_v4, %v3884_v39  ;;  %v4244_v44 = vrot.slane %v4193_v38, 2 }
 0x294   : > { %v4673_v40 = vmul.f32 %v13094_v20, %v12634_v27  ;;  %v13107_v61 = vrot.slane %v9561_v21, 2  ;;  %v13108_v34 = vrot.slane %v9575_v59, 2  ;;  %v4364_v49 = vrot.slane %v4313_v37, 2 }
 0x295   : > { %v4484_v39 = vrot.slane %v4433_v25, 3  ;;  %v5614_v19 = vadd.f32 %v5563_v9, %v5494_v5  ;;  %v3575_v7 = vadd.f32 %v3525_v0, %v3455_v2  ;;  %v4604_v1 = vrot.slane %v4553_v16, 3  ;;  %v13113_v16 = vld [vmem:[#allocation50_spill] sm:$0xff] }
 0x296   : > { %v4005_v26 = vsel %vm1201_vm1, %v13107_v61, %v4004_v54  ;;  %v4125_v51 = vsel %vm1201_vm1, %v13108_v34, %v4124_v24  ;;  %v4793_v8 = vmul.f32 %v13095_v12, %v12857_v52  ;;  %v4724_v31 = vrot.slane %v4673_v40, 3 }
 0x297   : > { %v4913_v45 = vmul.f32 %v9705_v32, %v6573_v6  ;;  %v5033_v21 = vmul.f32 %v13098_v29, %v12607_v18  ;;  %v5153_v59 = vmul.f32 %v9350_v53, %v6578_v17  ;;  %5777 = vst [vmem:[%s6814_s20 + $0x90] sm:$0xff] %v5614_v19  ;;  %v3695_v35 = vadd.f32 %v3645_v43, %v3575_v7  ;;  %v13111_v43 = vld [vmem:[#allocation46_spill] sm:$0xff]  ;;  %v13119_v7 = vld [vmem:[#allocation52_spill] sm:$0xff]  ;;  %v13144_v53 = vld [vmem:[#allocation49_spill] sm:$0xff] }
 0x298   : > { %v13109_v54 = vrot.slane %v9584_v10, 2  ;;  %v4844_v38 = vrot.slane %v4793_v8, 3  ;;  %v5273_v37 = vmul.f32 %v13094_v20, %v6593_v28  ;;  %v5393_v55 = vmul.f32 %v13095_v12, %v6597_v3  ;;  %v13118_v19 = vld [vmem:[#allocation10_spill] sm:$0xff] }
 0x299   : > { %v4964_v25 = vrot.slane %v4913_v45, 3  ;;  %v5084_v50 = vrot.slane %v5033_v21, 4  ;;  %v5204_v30 = vrot.slane %v5153_v59, 4  ;;  %v3815_v29 = vadd.f32 %v3765_v46, %v3695_v35  ;;  %v9832_v59 = vld [vmem:[#allocation2 + $0x150] sm:$0xff] }
 0x29a   : > { %v4245_v9 = vsel %vm1201_vm1, %v13109_v54, %v4244_v44  ;;  %v13110_v0 = vrot.slane %v9595_v15, 2  ;;  %v5324_v48 = vrot.slane %v5273_v37, 4  ;;  %v5513_v10 = vmul.f32 %v13049_v13, %v9705_v32  ;;  %13124 = vst [vmem:[#allocation37_spill] sm:$0xff] %v9832_v59  ;;  %v13125_v54 = vld [vmem:[#allocation58_spill] sm:$0xff] }
 0x29b   : > { %v13112_v42 = vrot.slane %v13111_v43, 3  ;;  %v13114_v5 = vrot.slane %v13113_v16, 3  ;;  %v13115_v44 = vrot.slane %v9624_v41, 3  ;;  %v13116_v15 = vrot.slane %v9639_v47, 3  ;;  %v13132_v16 = vld [vmem:[#allocation27_spill] sm:$0xff] }
 0x29c   : > { %v4365_v24 = vsel %vm1201_vm1, %v13110_v0, %v4364_v49  ;;  %v3935_v61 = vadd.f32 %v3885_v58, %v3815_v29  ;;  %v13117_v34 = vrot.slane %v9649_v63, 3  ;;  %v3072_v8 = vmul.f32 %v13119_v7, %v13118_v19  ;;  %v13123_v63 = vld [vmem:[#allocation40_spill] sm:$0xff]  ;;  %v13129_v29 = vld [vmem:[#allocation23_spill] sm:$0xff] }
 0x29d   : > { %v4485_v4 = vsel %vm1822_vm2, %v13112_v42, %v4484_v39  ;;  %v4605_v2 = vsel %vm1822_vm2, %v13114_v5, %v4604_v1  ;;  %v4725_v46 = vsel %vm1822_vm2, %v13115_v44, %v4724_v31  ;;  %v9811_v40 = vsel %vm1822_vm2, %v13116_v15, %v4844_v38  ;;  %v13120_v1 = vld [vmem:[#allocation19_spill] sm:$0xff]  ;;  %v13134_v15 = vld [vmem:[#allocation45_spill] sm:$0xff] }
 0x29e   : > { %v9816_v49 = vsel %vm1822_vm2, %v13117_v34, %v4964_v25  ;;  %v5444_v39 = vrot.slane %v5393_v55, 4  ;;  %v13121_v45 = vrot.slane %v13120_v1, 4  ;;  %v13122_v47 = vrot.slane %v9665_v14, 4  ;;  %v13127_v25 = vld [vmem:[#allocation28_spill] sm:$0xff]  ;;  %v13128_v55 = vld [vmem:[#allocation9_spill] sm:$0xff]  ;;  %v13136_v1 = vld [vmem:[#allocation26_spill] sm:$0xff] }
 0x29f   : > { %v5564_v58 = vrot.slane %v5513_v10, 4  ;;  %v3104_v21 = vmul.f32 %v13123_v63, %v13044_v23  ;;  %v4055_v35 = vadd.f32 %v4005_v26, %v3935_v61  ;;  %v13126_v38 = vrot.slane %v13125_v54, 4  ;;  %v13130_v10 = vld [vmem:[#allocation12_spill] sm:$0xff]  ;;  %v13131_v26 = vld [vmem:[#allocation41_spill] sm:$0xff] }
 0x2a0   : > { %v9823_v41 = vsel %vm2443_vm3, %v13121_v45, %v5084_v50  ;;  %v9828_v31 = vsel %vm2443_vm3, %v13122_v47, %v5204_v30  ;;  %v3136_v50 = vmul.f32 %v13127_v25, %v13051_v22  ;;  %v3234_v14 = vmul.f32 %v13119_v7, %v13128_v55  ;;  %v13135_v34 = vld [vmem:[#allocation56_spill] sm:$0xff] }
 0x2a1   : > { %v9837_v37 = vsel %vm2443_vm3, %v13126_v38, %v5324_v48  ;;  %v3120_v30 = vadd.f32 %v3104_v21, %v3072_v8  ;;  %v9845_v0 = vmul.f32 %v13129_v29, %v13128_v55  ;;  %v3354_v43 = vmul.f32 %v13123_v63, %v13130_v10  ;;  %v13138_v54 = vld [vmem:[#allocation44_spill] sm:$0xff]  ;;  %v13140_v38 = vld [vmem:[#allocation51_spill] sm:$0xff] }
 0x2a2   : > { %v9851_v42 = vmul.f32 %v13131_v26, %v13130_v10  ;;  %v4175_v48 = vadd.f32 %v4125_v51, %v4055_v35  ;;  %v13133_v5 = vrot.slane %v13132_v16, 4  ;;  %v3474_v61 = vmul.f32 %v13127_v25, %v13134_v15  ;;  %v13139_v51 = vld [vmem:[#allocation22_spill] sm:$0xff]  ;;  %v9873_v16 = vld [vmem:[#allocation2 + $0x158] sm:$0xff] }
 0x2a3   : > { %v9862_v8 = vmul.f32 %v13135_v34, %v13134_v15  ;;  %v13137_v45 = vrot.slane %v13136_v1, 4  ;;  %v3152_v21 = vadd.f32 %v3136_v50, %v3120_v30  ;;  %v3168_v35 = vmul.f32 %v13139_v51, %v13138_v54  ;;  %13141 = vst [vmem:[#allocation36_spill] sm:$0xff] %v9873_v16  ;;  %v13142_v15 = vld [vmem:[#allocation48_spill] sm:$0xff]  ;;  %v13143_v50 = vld [vmem:[#allocation25_spill] sm:$0xff] }
 0x2a4   : > { %v9856_v44 = vsel %vm2443_vm3, %v13133_v5, %v5444_v39  ;;  %v3200_v39 = vmul.f32 %v9832_v59, %v13140_v38  ;;  %v4295_v5 = vadd.f32 %v4245_v9, %v4175_v48  ;;  %v3286_v32 = vrot.slane %v3234_v14, 1 }
 0x2a5   : > { %v9867_v47 = vsel %vm2443_vm3, %v13137_v45, %v5564_v58  ;;  %v3594_v20 = vmul.f32 %v13139_v51, %v13142_v15  ;;  %v3184_v1 = vadd.f32 %v3168_v35, %v3152_v21  ;;  %v3406_v10 = vrot.slane %v3354_v43, 1 }
 0x2a6   : > { %v9881_v30 = vmul.f32 %v13143_v50, %v13142_v15  ;;  %v4415_v45 = vadd.f32 %v4365_v24, %v4295_v5  ;;  %v3526_v54 = vrot.slane %v3474_v61, 1  ;;  %v12240_v38 = vrot.slane %v9862_v8, 1 }
 0x2a7   : > { %v3714_v9 = vmul.f32 %v9832_v59, %v13144_v53  ;;  %v3216_v14 = vadd.f32 %v3200_v39, %v3184_v1  ;;  %v3646_v48 = vrot.slane %v3594_v20, 1  ;;  %v9889_v43 = vmul.f32 %v9873_v16, %v13144_v53 }
 0x2a8   : > { %v4535_v21 = vadd.f32 %v4485_v4, %v4415_v45  ;;  %v13145_v35 = vrot.slane %v9845_v0, 1  ;;  %v3834_v24 = vmul.f32 %v13119_v7, %v13001_v33  ;;  %v9898_v61 = vmul.f32 %v13129_v29, %v13001_v33 }
 0x2a9   : > { %v3766_v20 = vrot.slane %v3714_v9, 1  ;;  %v12239_v5 = vrot.slane %v9889_v43, 1  ;;  %v3954_v1 = vmul.f32 %v13123_v63, %v13002_v60  ;;  %v13147_v4 = vrot.slane %v9851_v42, 1 }
 0x2aa   : > { %v3288_v58 = vsel %vm580_vm0, %v3286_v32, %v13145_v35  ;;  %13146 = vst [vmem:[#allocation32_spill] sm:$0xff] %v9898_v61  ;;  %v4655_v12 = vadd.f32 %v4605_v2, %v4535_v21  ;;  %v3528_v32 = vsel %vm580_vm0, %v3526_v54, %v12240_v38  ;;  %v9911_v35 = vmul.f32 %v13131_v26, %v13002_v60 }
 0x2ab   : > { %v3336_v39 = vadd.f32 %v3288_v58, %v3216_v14  ;;  %v3408_v45 = vsel %vm580_vm0, %v3406_v10, %v13147_v4  ;;  %v13148_v9 = vrot.slane %v9881_v30, 1  ;;  %v4074_v2 = vmul.f32 %v13127_v25, %v12586_v57 }
 0x2ac   : > { %v9920_v63 = vmul.f32 %v13135_v34, %v12586_v57  ;;  %v4775_v10 = vadd.f32 %v4725_v46, %v4655_v12  ;;  %v3886_v21 = vrot.slane %v3834_v24, 2  ;;  %v12242_v54 = vrot.slane %v9898_v61, 2  ;;  %v9962_v61 = vld [vmem:[#allocation2 + $0x110] sm:$0xff] }
 0x2ad   : > { %v3456_v58 = vadd.f32 %v3408_v45, %v3336_v39  ;;  %v3648_v14 = vsel %vm580_vm0, %v3646_v48, %v13148_v9  ;;  %v4194_v26 = vmul.f32 %v13139_v51, %v12589_v62  ;;  %v3768_v39 = vsel %vm580_vm0, %v3766_v20, %v12239_v5  ;;  %v9955_v5 = vld [vmem:[#allocation2 + $0x108] sm:$0xff]  ;;  %13152 = vst [vmem:[#allocation30_spill] sm:$0xff] %v9962_v61 }
 0x2ae   : > { %v4006_v48 = vrot.slane %v3954_v1, 2  ;;  %v9930_v25 = vmul.f32 %v13143_v50, %v12589_v62  ;;  %v4895_v45 = vadd.f32 %v9811_v40, %v4775_v10  ;;  %v4126_v46 = vrot.slane %v4074_v2, 2  ;;  %13150 = vst [vmem:[#allocation60_spill] sm:$0xff] %v9955_v5 }
 0x2af   : > { %v3576_v4 = vadd.f32 %v3528_v32, %v3456_v58  ;;  %v4314_v24 = vmul.f32 %v9832_v59, %v6518_v56  ;;  %v4246_v58 = vrot.slane %v4194_v26, 2  ;;  %v9939_v20 = vmul.f32 %v9873_v16, %v6518_v56 }
 0x2b0   : > { %v5015_v1 = vadd.f32 %v9816_v49, %v4895_v45  ;;  %v4434_v40 = vmul.f32 %v13119_v7, %v12626_v36  ;;  %v9947_v2 = vmul.f32 %v13129_v29, %v12626_v36  ;;  %v4554_v32 = vmul.f32 %v9955_v5, %v6523_v11 }
 0x2b1   : > { %v3696_v9 = vadd.f32 %v3648_v14, %v3576_v4  ;;  %13149 = vst [vmem:[#allocation53_spill] sm:$0xff] %v9939_v20  ;;  %v3888_v14 = vsel %vm1201_vm1, %v3886_v21, %v12242_v54  ;;  %v4366_v26 = vrot.slane %v4314_v24, 2  ;;  %v12243_v4 = vrot.slane %v9939_v20, 2 }
 0x2b2   : > { %v5135_v38 = vadd.f32 %v9823_v41, %v5015_v1  ;;  %v4486_v49 = vrot.slane %v4434_v40, 3  ;;  %v9966_v21 = vmul.f32 %v9962_v61, %v6523_v11  ;;  %v9968_v41 = vld [vmem:[#allocation2 + $0x120] sm:$0xff]  ;;  %v13155_v40 = vrot.slane %v9920_v63, 2 }
 0x2b3   : > { %v3816_v10 = vadd.f32 %v3768_v39, %v3696_v9  ;;  %v13151_v39 = vrot.slane %v9911_v35, 2  ;;  %13154 = vst [vmem:[#allocation16_spill] sm:$0xff] %v9968_v41  ;;  %v4674_v24 = vmul.f32 %v9968_v41, %v12634_v27  ;;  %v4368_v45 = vsel %vm1201_vm1, %v4366_v26, %v12243_v4 }
 0x2b4   : > { %13153 = vst [vmem:[#allocation42_spill] sm:$0xff] %v9966_v21  ;;  %v5255_v1 = vadd.f32 %v9828_v31, %v5135_v38  ;;  %v4794_v31 = vmul.f32 %v13139_v51, %v12857_v52  ;;  %v9990_v38 = vmul.f32 %v13143_v50, %v12857_v52  ;;  %v10001_v4 = vmul.f32 %v9873_v16, %v6573_v6 }
 0x2b5   : > { %v3936_v12 = vadd.f32 %v3888_v14, %v3816_v10  ;;  %v4008_v9 = vsel %vm1201_vm1, %v4006_v48, %v13151_v39  ;;  %v4128_v10 = vsel %vm1201_vm1, %v4126_v46, %v13155_v40  ;;  %v13156_v14 = vrot.slane %v9930_v25, 2 }
 0x2b6   : > { %v9981_v39 = vmul.f32 %v13135_v34, %v12634_v27  ;;  %v5375_v46 = vadd.f32 %v9837_v37, %v5255_v1  ;;  %v4606_v34 = vrot.slane %v4554_v32, 3  ;;  %v4846_v1 = vrot.slane %v4794_v31, 3 }
 0x2b7   : > { %v4248_v48 = vsel %vm1201_vm1, %v4246_v58, %v13156_v14  ;;  %v4056_v54 = vadd.f32 %v4008_v9, %v3936_v12  ;;  %v13157_v58 = vrot.slane %v9947_v2, 3  ;;  %v4914_v12 = vmul.f32 %v9832_v59, %v6573_v6 }
 0x2b8   : > { %v4726_v14 = vrot.slane %v4674_v24, 3  ;;  %v5495_v20 = vadd.f32 %v9856_v44, %v5375_v46  ;;  %v12251_v37 = vrot.slane %v9981_v39, 3  ;;  %v5034_v32 = vmul.f32 %v13119_v7, %v12607_v18 }
 0x2b9   : > { %v4488_v40 = vsel %vm1822_vm2, %v4486_v49, %v13157_v58  ;;  %v4176_v9 = vadd.f32 %v4128_v10, %v4056_v54  ;;  %v4966_v54 = vrot.slane %v4914_v12, 3  ;;  %v10010_v24 = vmul.f32 %v13129_v29, %v12607_v18 }
 0x2ba   : > { %v5615_v10 = vadd.f32 %v9867_v47, %v5495_v20  ;;  %v5154_v44 = vmul.f32 %v9955_v5, %v6578_v17  ;;  %v10018_v31 = vmul.f32 %v9962_v61, %v6578_v17  ;;  %v5274_v12 = vmul.f32 %v9968_v41, %v6593_v28  ;;  %v10025_v20 = vld [vmem:[#allocation2 + $0x128] sm:$0xff] }
 0x2bb   : > { %v4296_v49 = vadd.f32 %v4248_v48, %v4176_v9  ;;  %13158 = vst [vmem:[#allocation59_spill] sm:$0xff] %v10010_v24  ;;  %v5086_v48 = vrot.slane %v5034_v32, 4  ;;  %13160 = vst [vmem:[#allocation24_spill] sm:$0xff] %v10025_v20  ;;  %v10029_v26 = vmul.f32 %v10025_v20, %v6593_v28  ;;  %v5394_v58 = vmul.f32 %v13139_v51, %v6597_v3 }
 0x2bc   : > { %13159 = vst [vmem:[#allocation38_spill] sm:$0xff] %v10018_v31  ;;  %5778 = vst [vmem:[%s6814_s20 + $0x98] sm:$0xff] %v5615_v10  ;;  %v5206_v9 = vrot.slane %v5154_v44, 4  ;;  %v10035_v32 = vmul.f32 %v13143_v50, %v6597_v3  ;;  %v4728_v44 = vsel %vm1822_vm2, %v4726_v14, %v12251_v37  ;;  %v13164_v47 = vrot.slane %v9990_v38, 3 }
 0x2bd   : > { %v4416_v7 = vadd.f32 %v4368_v45, %v4296_v49  ;;  %13161 = vst [vmem:[#allocation18_spill] sm:$0xff] %v10029_v26  ;;  %v13163_v49 = vrot.slane %v9966_v21, 3  ;;  %v13165_v41 = vrot.slane %v10001_v4, 3  ;;  %v5326_v51 = vrot.slane %v5274_v12, 4 }
 0x2be   : > { %13162 = vst [vmem:[#allocation20_spill] sm:$0xff] %v10035_v32  ;;  %v4848_v46 = vsel %vm1822_vm2, %v4846_v1, %v13164_v47  ;;  %v3073_v21 = vmul.f32 %v13129_v29, %v13118_v19  ;;  %v13167_v14 = vrot.slane %v10018_v31, 4  ;;  %v5446_v1 = vrot.slane %v5394_v58, 4  ;;  %v13169_v58 = vld [vmem:[#allocation31_spill] sm:$0xff] }
 0x2bf   : > { %v4536_v45 = vadd.f32 %v4488_v40, %v4416_v7  ;;  %v4608_v10 = vsel %vm1822_vm2, %v4606_v34, %v13163_v49  ;;  %v4968_v40 = vsel %vm1822_vm2, %v4966_v54, %v13165_v41  ;;  %v13166_v34 = vrot.slane %v10010_v24, 4  ;;  %v10060_v41 = vld [vmem:[#allocation2 + $0x160] sm:$0xf]  ;;  %v13176_v24 = vld [vmem:[#allocation44_spill] sm:$0xff] }
 0x2c0   : > { %v5208_v37 = vsel %vm2443_vm3, %v5206_v9, %v13167_v14  ;;  %v3105_v47 = vmul.f32 %v9962_v61, %v13044_v23  ;;  %13168 = vst [vmem:[#allocation21_spill] sm:$0xff] %v10060_v41  ;;  %v5514_v29 = vmul.f32 %v13049_v13, %v9832_v59  ;;  %v3137_v9 = vmul.f32 %v10025_v20, %v13051_v22  ;;  %v13171_v14 = vld [vmem:[#allocation35_spill] sm:$0xff]  ;;  %v13173_v59 = vld [vmem:[#allocation45_spill] sm:$0xff] }
 0x2c1   : > { %v4656_v7 = vadd.f32 %v4608_v10, %v4536_v45  ;;  %v5088_v49 = vsel %vm2443_vm3, %v5086_v48, %v13166_v34  ;;  %v10067_v45 = vmul.f32 %v13049_v13, %v9873_v16  ;;  %v3236_v10 = vmul.f32 %v13169_v58, %v13128_v55  ;;  %v13170_v34 = vld [vmem:[#allocation12_spill] sm:$0xff]  ;;  %v13174_v61 = vld [vmem:[#allocation39_spill] sm:$0xff] }
 0x2c2   : > { %v3121_v48 = vadd.f32 %v3105_v47, %v3073_v21  ;;  %v3356_v5 = vmul.f32 %v13171_v14, %v13170_v34  ;;  %v3476_v31 = vmul.f32 %v13174_v61, %v13173_v59  ;;  %v13175_v13 = vld [vmem:[#allocation47_spill] sm:$0xff]  ;;  %v3169_v20 = vmul.f32 %v13143_v50, %v13176_v24 }
 0x2c3   : > { %v4776_v54 = vadd.f32 %v4728_v44, %v4656_v7  ;;  %v13172_v7 = vrot.slane %v10029_v26, 4  ;;  %v3596_v21 = vmul.f32 %v13175_v13, %v13142_v15  ;;  %v3289_v22 = vrot.slane %v3236_v10, 1 }
 0x2c4   : > { %v3153_v47 = vadd.f32 %v3137_v9, %v3121_v48  ;;  %v3716_v55 = vmul.f32 %v10060_v41, %v13144_v53  ;;  %v12268_v26 = vrot.slane %v10067_v45, 4  ;;  %v13178_v48 = vld [vmem:[#allocation51_spill] sm:$0xff]  ;;  %v3409_v50 = vrot.slane %v3356_v5, 1 }
 0x2c5   : > { %v4896_v44 = vadd.f32 %v4848_v46, %v4776_v54  ;;  %v5328_v12 = vsel %vm2443_vm3, %v5326_v51, %v13172_v7  ;;  %v13177_v46 = vrot.slane %v10035_v32, 4  ;;  %v5566_v51 = vrot.slane %v5514_v29, 4 }
 0x2c6   : > { %v3836_v7 = vmul.f32 %v13169_v58, %v13001_v33  ;;  %v3185_v15 = vadd.f32 %v3169_v20, %v3153_v47  ;;  %v3201_v9 = vmul.f32 %v9873_v16, %v13178_v48  ;;  %v13179_v24 = vrot.slane %v9845_v0, 1 }
 0x2c7   : > { %v5016_v34 = vadd.f32 %v4968_v40, %v4896_v44  ;;  %v5448_v54 = vsel %vm2443_vm3, %v5446_v1, %v13177_v46  ;;  %v3529_v44 = vrot.slane %v3476_v31, 1  ;;  %v3649_v53 = vrot.slane %v3596_v21, 1 }
 0x2c8   : > { %v3290_v40 = vsel %vm580_vm0, %v13179_v24, %v3289_v22  ;;  %v3217_v32 = vadd.f32 %v3201_v9, %v3185_v15  ;;  %v3769_v1 = vrot.slane %v3716_v55, 1  ;;  %v3889_v29 = vrot.slane %v3836_v7, 2  ;;  %v13184_v7 = vld [vmem:[#allocation32_spill] sm:$0xff] }
 0x2c9   : > { %v5136_v10 = vadd.f32 %v5088_v49, %v5016_v34  ;;  %v3956_v46 = vmul.f32 %v13171_v14, %v13002_v60  ;;  %v4076_v20 = vmul.f32 %v13174_v61, %v12586_v57  ;;  %v4196_v5 = vmul.f32 %v13175_v13, %v12589_v62 }
 0x2ca   : > { %v4316_v0 = vmul.f32 %v10060_v41, %v6518_v56  ;;  %v5568_v22 = vsel %vm2443_vm3, %v5566_v51, %v12268_v26  ;;  %v3337_v15 = vadd.f32 %v3290_v40, %v3217_v32  ;;  %v13180_v55 = vrot.slane %v9851_v42, 1 }
 0x2cb   : > { %v5256_v33 = vadd.f32 %v5208_v37, %v5136_v10  ;;  %v4436_v37 = vmul.f32 %v13169_v58, %v12626_v36  ;;  %v13181_v49 = vrot.slane %v9862_v8, 1  ;;  %v13182_v21 = vrot.slane %v9881_v30, 1 }
 0x2cc   : > { %v3410_v24 = vsel %vm580_vm0, %v13180_v55, %v3409_v50  ;;  %v4556_v51 = vmul.f32 %v13171_v14, %v6523_v11  ;;  %v13183_v42 = vrot.slane %v9889_v43, 1  ;;  %v13185_v9 = vrot.slane %v13184_v7, 2 }
 0x2cd   : > { %v5376_v31 = vadd.f32 %v5328_v12, %v5256_v33  ;;  %v3530_v34 = vsel %vm580_vm0, %v13181_v49, %v3529_v44  ;;  %v3650_v47 = vsel %vm580_vm0, %v13182_v21, %v3649_v53  ;;  %v3457_v32 = vadd.f32 %v3410_v24, %v3337_v15 }
 0x2ce   : > { %v3770_v50 = vsel %vm580_vm0, %v13183_v42, %v3769_v1  ;;  %v3890_v33 = vsel %vm1201_vm1, %v13185_v9, %v3889_v29  ;;  %v4009_v12 = vrot.slane %v3956_v46, 2  ;;  %v4129_v10 = vrot.slane %v4076_v20, 2 }
 0x2cf   : > { %v5496_v8 = vadd.f32 %v5448_v54, %v5376_v31  ;;  %v4249_v40 = vrot.slane %v4196_v5, 2  ;;  %v4369_v30 = vrot.slane %v4316_v0, 2  ;;  %v3577_v44 = vadd.f32 %v3530_v34, %v3457_v32  ;;  %v13189_v32 = vld [vmem:[#allocation53_spill] sm:$0xff] }
 0x2d0   : > { %v4489_v53 = vrot.slane %v4436_v37, 3  ;;  %v4676_v55 = vmul.f32 %v13174_v61, %v12634_v27  ;;  %v4796_v43 = vmul.f32 %v13175_v13, %v12857_v52  ;;  %v4609_v1 = vrot.slane %v4556_v51, 3 }
 0x2d1   : > { %v5616_v15 = vadd.f32 %v5568_v22, %v5496_v8  ;;  %v4916_v24 = vmul.f32 %v10060_v41, %v6573_v6  ;;  %v5036_v54 = vmul.f32 %v13169_v58, %v12607_v18  ;;  %v3697_v29 = vadd.f32 %v3650_v47, %v3577_v44 }
 0x2d2   : > { %v4729_v46 = vrot.slane %v4676_v55, 3  ;;  %v4849_v20 = vrot.slane %v4796_v43, 3  ;;  %v5156_v5 = vmul.f32 %v13171_v14, %v6578_v17  ;;  %v13186_v0 = vrot.slane %v9911_v35, 2 }
 0x2d3   : > { %5779 = vst [vmem:[%s6814_s20 + $0xa0] sm:$0xff] %v5616_v15  ;;  %v4969_v31 = vrot.slane %v4916_v24, 3  ;;  %v5276_v22 = vmul.f32 %v13174_v61, %v6593_v28  ;;  %v5396_v49 = vmul.f32 %v13175_v13, %v6597_v3  ;;  %v3817_v34 = vadd.f32 %v3770_v50, %v3697_v29  ;;  %v13199_v24 = vld [vmem:[#allocation59_spill] sm:$0xff]  ;;  %v13201_v29 = vld [vmem:[#allocation38_spill] sm:$0xff] }
 0x2d4   : > { %v4010_v37 = vsel %vm1201_vm1, %v13186_v0, %v4009_v12  ;;  %v13187_v58 = vrot.slane %v9920_v63, 2  ;;  %v5089_v47 = vrot.slane %v5036_v54, 4  ;;  %v5209_v51 = vrot.slane %v5156_v5, 4  ;;  %v13192_v12 = vld [vmem:[#allocation42_spill] sm:$0xff] }
 0x2d5   : > { %v13188_v14 = vrot.slane %v9930_v25, 2  ;;  %v13190_v42 = vrot.slane %v13189_v32, 2  ;;  %v13191_v61 = vrot.slane %v9947_v2, 3  ;;  %v13193_v50 = vrot.slane %v13192_v12, 3  ;;  %v13209_v32 = vld [vmem:[#allocation12_spill] sm:$0xff] }
 0x2d6   : > { %v4130_v21 = vsel %vm1201_vm1, %v13187_v58, %v4129_v10  ;;  %v3937_v8 = vadd.f32 %v3890_v33, %v3817_v34  ;;  %v13194_v10 = vrot.slane %v9981_v39, 3  ;;  %v13195_v25 = vrot.slane %v9990_v38, 3  ;;  %v13198_v33 = vld [vmem:[#allocation16_spill] sm:$0xff]  ;;  %v13207_v58 = vld [vmem:[#allocation30_spill] sm:$0xff] }
 0x2d7   : > { %v4250_v35 = vsel %vm1201_vm1, %v13188_v14, %v4249_v40  ;;  %v4370_v7 = vsel %vm1201_vm1, %v13190_v42, %v4369_v30  ;;  %v4490_v9 = vsel %vm1822_vm2, %v13191_v61, %v4489_v53  ;;  %v4610_v63 = vsel %vm1822_vm2, %v13193_v50, %v4609_v1  ;;  %v13196_v30 = vld [vmem:[#allocation60_spill] sm:$0xff] }
 0x2d8   : > { %v4730_v44 = vsel %vm1822_vm2, %v13194_v10, %v4729_v46  ;;  %v10166_v40 = vsel %vm1822_vm2, %v13195_v25, %v4849_v20  ;;  %v3074_v55 = vmul.f32 %v13196_v30, %v13118_v19  ;;  %v13197_v2 = vrot.slane %v10001_v4, 3  ;;  %v10190_v4 = vld [vmem:[%s11882_s1 + $0x18] ss:$0 sm:$0xff] }
 0x2d9   : > { %v5329_v43 = vrot.slane %v5276_v22, 4  ;;  %v5449_v15 = vrot.slane %v5396_v49, 4  ;;  %v3106_v39 = vmul.f32 %v13198_v33, %v13044_v23  ;;  %v4057_v1 = vadd.f32 %v4010_v37, %v3937_v8  ;;  %13203 = vst [vmem:[#allocation34_spill] sm:$0xff] %v10190_v4  ;;  %v13204_v37 = vld [vmem:[#allocation43_spill] sm:$0xff]  ;;  %v13206_v49 = vld [vmem:[#allocation9_spill] sm:$0xff]  ;;  %v13210_v61 = vld [vmem:[#allocation24_spill] sm:$0xff] }
 0x2da   : > { %v10173_v53 = vsel %vm1822_vm2, %v13197_v2, %v4969_v31  ;;  %v13200_v54 = vrot.slane %v13199_v24, 4  ;;  %v13202_v46 = vrot.slane %v13201_v29, 4  ;;  %v10194_v5 = vmul.f32 %v10190_v4, %v10060_v41  ;;  %v13205_v31 = vld [vmem:[#allocation22_spill] sm:$0xff]  ;;  %v13217_v24 = vld [vmem:[#allocation37_spill] sm:$0xff]  ;;  %v10226_v29 = vld [vmem:[#allocation2 + $0x170] sm:$0xff] }
 0x2db   : > { %v3122_v0 = vadd.f32 %v3106_v39, %v3074_v55  ;;  %v3138_v22 = vmul.f32 %v13205_v31, %v13204_v37  ;;  %v3237_v34 = vmul.f32 %v13196_v30, %v13206_v49  ;;  %v4177_v14 = vadd.f32 %v4130_v21, %v4057_v1  ;;  %v13212_v8 = vld [vmem:[#allocation18_spill] sm:$0xff]  ;;  %v13214_v55 = vld [vmem:[#allocation20_spill] sm:$0xff]  ;;  %13218 = vst [vmem:[#allocation33_spill] sm:$0xff] %v10226_v29 }
 0x2dc   : > { %v10180_v38 = vsel %vm2443_vm3, %v13200_v54, %v5089_v47  ;;  %v10185_v20 = vsel %vm2443_vm3, %v13202_v46, %v5209_v51  ;;  %v10202_v47 = vmul.f32 %v13207_v58, %v13206_v49  ;;  %v10204_v51 = vld [vmem:[#allocation2 + $0x168] sm:$0xff]  ;;  %v3357_v42 = vmul.f32 %v13198_v33, %v13209_v32  ;;  %v13216_v1 = vld [vmem:[#allocation44_spill] sm:$0xff] }
 0x2dd   : > { %13208 = vst [vmem:[#allocation29_spill] sm:$0xff] %v10204_v51  ;;  %v10210_v12 = vmul.f32 %v13210_v61, %v13209_v32  ;;  %v3477_v50 = vmul.f32 %v13205_v31, %v13173_v59  ;;  %v13213_v10 = vrot.slane %v13212_v8, 4  ;;  %v13215_v2 = vrot.slane %v13214_v55, 4  ;;  %v13219_v8 = vld [vmem:[#allocation25_spill] sm:$0xff] }
 0x2de   : > { %v3154_v21 = vadd.f32 %v3138_v22, %v3122_v0  ;;  %v3170_v54 = vmul.f32 %v13217_v24, %v13216_v1  ;;  %v4297_v46 = vadd.f32 %v4250_v35, %v4177_v14  ;;  %v3291_v26 = vrot.slane %v3237_v34, 1  ;;  %v13222_v1 = vld [vmem:[#allocation49_spill] sm:$0xff] }
 0x2df   : > { %13211 = vst [vmem:[#allocation17_spill] sm:$0xff] %v10210_v12  ;;  %v10217_v25 = vsel %vm2443_vm3, %v13213_v10, %v5329_v43  ;;  %v10222_v39 = vsel %vm2443_vm3, %v13215_v2, %v5449_v15  ;;  %v10231_v13 = vmul.f32 %v13219_v8, %v13173_v59  ;;  %v3202_v10 = vmul.f32 %v10204_v51, %v13178_v48  ;;  %v13221_v15 = vld [vmem:[#allocation48_spill] sm:$0xff] }
 0x2e0   : > { %v3186_v43 = vadd.f32 %v3170_v54, %v3154_v21  ;;  %v3597_v0 = vmul.f32 %v13217_v24, %v13221_v15  ;;  %v10239_v22 = vmul.f32 %v9873_v16, %v13221_v15  ;;  %v4417_v55 = vadd.f32 %v4370_v7, %v4297_v46 }
 0x2e1   : > { %13220 = vst [vmem:[#allocation46_spill] sm:$0xff] %v10231_v13  ;;  %v3411_v35 = vrot.slane %v3357_v42, 1  ;;  %v3531_v14 = vrot.slane %v3477_v50, 1  ;;  %v3717_v21 = vmul.f32 %v10204_v51, %v13222_v1  ;;  %v10247_v54 = vmul.f32 %v10226_v29, %v13222_v1 }
 0x2e2   : > { %v3218_v2 = vadd.f32 %v3202_v10, %v3186_v43  ;;  %v4537_v48 = vadd.f32 %v4490_v9, %v4417_v55  ;;  %v13223_v59 = vrot.slane %v10202_v47, 1  ;;  %v3651_v7 = vrot.slane %v3597_v0, 1  ;;  %v13224_v43 = vld [vmem:[#allocation13_spill] sm:$0xff] }
 0x2e3   : > { %v5569_v50 = vrot.slane %v10194_v5, 4  ;;  %v3837_v10 = vmul.f32 %v13196_v30, %v13224_v43  ;;  %v10258_v41 = vmul.f32 %v13207_v58, %v13224_v43  ;;  %v13225_v9 = vrot.slane %v10210_v12, 1 }
 0x2e4   : > { %v3293_v15 = vsel %vm580_vm0, %v3291_v26, %v13223_v59  ;;  %v4657_v34 = vadd.f32 %v4610_v63, %v4537_v48  ;;  %v3957_v59 = vmul.f32 %v13198_v33, %v13002_v60  ;;  %v10267_v26 = vmul.f32 %v13210_v61, %v13002_v60 }
 0x2e5   : > { %v3338_v46 = vadd.f32 %v3293_v15, %v3218_v2  ;;  %v3413_v55 = vsel %vm580_vm0, %v3411_v35, %v13225_v9  ;;  %v13226_v15 = vrot.slane %v10231_v13, 1  ;;  %v3771_v2 = vrot.slane %v3717_v21, 1 }
 0x2e6   : > { %v12277_v42 = vrot.slane %v10247_v54, 1  ;;  %v4777_v48 = vadd.f32 %v4730_v44, %v4657_v34  ;;  %v13227_v63 = vrot.slane %v10239_v22, 1  ;;  %v4077_v9 = vmul.f32 %v13205_v31, %v12586_v57 }
 0x2e7   : > { %v3458_v5 = vadd.f32 %v3413_v55, %v3338_v46  ;;  %v3533_v0 = vsel %vm580_vm0, %v3531_v14, %v13226_v15  ;;  %v10280_v12 = vmul.f32 %v13219_v8, %v12586_v57  ;;  %v3891_v55 = vrot.slane %v3837_v10, 2 }
 0x2e8   : > { %v3653_v35 = vsel %vm580_vm0, %v3651_v7, %v13227_v63  ;;  %v12280_v13 = vrot.slane %v10258_v41, 2  ;;  %v4197_v14 = vmul.f32 %v13217_v24, %v12589_v62  ;;  %v4897_v44 = vadd.f32 %v10166_v40, %v4777_v48 }
 0x2e9   : > { %v3578_v46 = vadd.f32 %v3533_v0, %v3458_v5  ;;  %v4011_v34 = vrot.slane %v3957_v59, 2  ;;  %v12279_v21 = vrot.slane %v10267_v26, 2  ;;  %v10289_v7 = vmul.f32 %v9873_v16, %v12589_v62 }
 0x2ea   : > { %v3773_v8 = vsel %vm580_vm0, %v3771_v2, %v12277_v42  ;;  %v4317_v10 = vmul.f32 %v10204_v51, %v6518_v56  ;;  %v10298_v5 = vmul.f32 %v10226_v29, %v6518_v56  ;;  %v5017_v40 = vadd.f32 %v10173_v53, %v4897_v44 }
 0x2eb   : > { %v3698_v31 = vadd.f32 %v3653_v35, %v3578_v46  ;;  %v4131_v59 = vrot.slane %v4077_v9, 2  ;;  %v12278_v15 = vrot.slane %v10280_v12, 2  ;;  %v4437_v0 = vmul.f32 %v13196_v30, %v12626_v36 }
 0x2ec   : > { %v4251_v63 = vrot.slane %v4197_v14, 2  ;;  %v10307_v2 = vmul.f32 %v13207_v58, %v12626_v36  ;;  %v5137_v46 = vadd.f32 %v10180_v38, %v5017_v40  ;;  %v13229_v42 = vrot.slane %v10067_v45, 4 }
 0x2ed   : > { %v3818_v48 = vadd.f32 %v3773_v8, %v3698_v31  ;;  %v3893_v9 = vsel %vm1201_vm1, %v3891_v55, %v12280_v13  ;;  %v4013_v14 = vsel %vm1201_vm1, %v4011_v34, %v12279_v21  ;;  %v4371_v31 = vrot.slane %v4317_v10, 2 }
 0x2ee   : > { %13228 = vst [vmem:[#allocation50_spill] sm:$0xff] %v10307_v2  ;;  %v5570_v53 = vsel %vm2443_vm3, %v13229_v42, %v5569_v50  ;;  %v12281_v8 = vrot.slane %v10298_v5, 2  ;;  %v4557_v35 = vmul.f32 %v13198_v33, %v6523_v11  ;;  %v5257_v38 = vadd.f32 %v10185_v20, %v5137_v46  ;;  %v10339_v46 = vld [vmem:[#allocation2 + $0x140] sm:$0xff] }
 0x2ef   : > { %v3938_v44 = vadd.f32 %v3893_v9, %v3818_v48  ;;  %v4491_v45 = vrot.slane %v4437_v0, 3  ;;  %v12282_v42 = vrot.slane %v10307_v2, 3  ;;  %v10326_v50 = vmul.f32 %v13210_v61, %v6523_v11  ;;  %v10334_v48 = vld [vmem:[#allocation2 + $0x138] sm:$0xff]  ;;  %13232 = vst [vmem:[#allocation52_spill] sm:$0xff] %v10339_v46 }
 0x2f0   : > { %v4133_v34 = vsel %vm1201_vm1, %v4131_v59, %v12278_v15  ;;  %v13230_v10 = vrot.slane %v10289_v7, 2  ;;  %13231 = vst [vmem:[#allocation10_spill] sm:$0xff] %v10334_v48  ;;  %v4677_v20 = vmul.f32 %v10334_v48, %v12634_v27  ;;  %v5377_v0 = vadd.f32 %v10217_v25, %v5257_v38 }
 0x2f1   : > { %v4058_v55 = vadd.f32 %v4013_v14, %v3938_v44  ;;  %v10343_v9 = vmul.f32 %v10339_v46, %v12634_v27  ;;  %v4797_v59 = vmul.f32 %v13217_v24, %v12857_v52  ;;  %v10349_v14 = vmul.f32 %v9873_v16, %v12857_v52 }
 0x2f2   : > { %v4253_v40 = vsel %vm1201_vm1, %v4251_v63, %v13230_v10  ;;  %v4373_v44 = vsel %vm1201_vm1, %v4371_v31, %v12281_v8  ;;  %v4611_v10 = vrot.slane %v4557_v35, 3  ;;  %v4917_v25 = vmul.f32 %v10204_v51, %v6573_v6 }
 0x2f3   : > { %v4178_v63 = vadd.f32 %v4133_v34, %v4058_v55  ;;  %v5497_v38 = vadd.f32 %v10222_v39, %v5377_v0  ;;  %v4493_v15 = vsel %vm1822_vm2, %v4491_v45, %v12282_v42  ;;  %v10363_v55 = vmul.f32 %v10226_v29, %v6573_v6 }
 0x2f4   : > { %v4731_v13 = vrot.slane %v4677_v20, 3  ;;  %v5037_v35 = vmul.f32 %v13196_v30, %v12607_v18  ;;  %v10369_v31 = vmul.f32 %v13207_v58, %v12607_v18  ;;  %v12284_v0 = vrot.slane %v10343_v9, 3 }
 0x2f5   : > { %13233 = vst [vmem:[#allocation19_spill] sm:$0xff] %v10363_v55  ;;  %v4298_v34 = vadd.f32 %v4253_v40, %v4178_v63  ;;  %v5617_v39 = vadd.f32 %v5570_v53, %v5497_v38  ;;  %v4851_v8 = vrot.slane %v4797_v59, 3  ;;  %v12285_v45 = vrot.slane %v10349_v14, 3 }
 0x2f6   : > { %13234 = vst [vmem:[#allocation40_spill] sm:$0xff] %v10369_v31  ;;  %v4971_v21 = vrot.slane %v4917_v25, 3  ;;  %v12289_v2 = vrot.slane %v10363_v55, 3  ;;  %v5157_v40 = vmul.f32 %v13198_v33, %v6578_v17  ;;  %v5091_v20 = vrot.slane %v5037_v35, 4 }
 0x2f7   : > { %v4418_v42 = vadd.f32 %v4373_v44, %v4298_v34  ;;  %5780 = vst [vmem:[%s6814_s20 + $0xa8] sm:$0xff] %v5617_v39  ;;  %v10380_v63 = vmul.f32 %v13210_v61, %v6578_v17  ;;  %v5277_v53 = vmul.f32 %v10334_v48, %v6593_v28  ;;  %v13236_v44 = vrot.slane %v10326_v50, 3 }
 0x2f8   : > { %v10389_v38 = vmul.f32 %v10339_v46, %v6593_v28  ;;  %v5397_v34 = vmul.f32 %v13217_v24, %v6597_v3  ;;  %v4733_v35 = vsel %vm1822_vm2, %v4731_v13, %v12284_v0  ;;  %v4853_v39 = vsel %vm1822_vm2, %v4851_v8, %v12285_v45 }
 0x2f9   : > { %13235 = vst [vmem:[#allocation58_spill] sm:$0xff] %v10380_v63  ;;  %v4538_v59 = vadd.f32 %v4493_v15, %v4418_v42  ;;  %v4613_v25 = vsel %vm1822_vm2, %v4611_v10, %v13236_v44  ;;  %v10401_v15 = vmul.f32 %v9873_v16, %v6597_v3  ;;  %v5517_v42 = vmul.f32 %v10190_v4, %v10204_v51 }
 0x2fa   : > { %13237 = vst [vmem:[#allocation28_spill] sm:$0xff] %v10389_v38  ;;  %v4973_v44 = vsel %vm1822_vm2, %v4971_v21, %v12289_v2  ;;  %v5211_v30 = vrot.slane %v5157_v40, 4  ;;  %v10410_v13 = vmul.f32 %v10190_v4, %v10226_v29  ;;  %v13238_v0 = vrot.slane %v10369_v31, 4  ;;  %v13243_v21 = vld [vmem:[#allocation47_spill] sm:$0xff] }
 0x2fb   : > { %v4658_v10 = vadd.f32 %v4613_v25, %v4538_v59  ;;  %v5331_v24 = vrot.slane %v5277_v53, 4  ;;  %v3075_v51 = vmul.f32 %v13207_v58, %v13118_v19  ;;  %v10418_v59 = vld [vmem:[#allocation2 + $0x178] sm:$0xf]  ;;  %v5451_v40 = vrot.slane %v5397_v34, 4 }
 0x2fc   : > { %v5093_v8 = vsel %vm2443_vm3, %v5091_v20, %v13238_v0  ;;  %13239 = vst [vmem:[#allocation23_spill] sm:$0xff] %v10418_v59  ;;  %v3107_v2 = vmul.f32 %v13210_v61, %v13044_v23  ;;  %v5571_v48 = vrot.slane %v5517_v42, 4  ;;  %v5902_v20 = vld [vmem:[#allocation2 + $0x118] sm:$0xf]  ;;  %v3139_v58 = vmul.f32 %v10339_v46, %v13204_v37  ;;  %v13242_v42 = vld [vmem:[#allocation45_spill] sm:$0xff] }
 0x2fd   : > { %v4778_v25 = vadd.f32 %v4733_v35, %v4658_v10  ;;  %v3239_v53 = vmul.f32 %v5902_v20, %v13206_v49  ;;  %v10428_v35 = vld [vmem:[#allocation2 + $0x130] sm:$0xf]  ;;  %v13241_v10 = vrot.slane %v10380_v63, 4  ;;  %v3479_v0 = vmul.f32 %v13243_v21, %v13242_v42  ;;  %v13244_v61 = vld [vmem:[#allocation48_spill] sm:$0xff]  ;;  %v13245_v23 = vld [vmem:[#allocation21_spill] sm:$0xff] }
 0x2fe   : > { %v3123_v31 = vadd.f32 %v3107_v2, %v3075_v51  ;;  %13240 = vst [vmem:[#allocation41_spill] sm:$0xff] %v10428_v35  ;;  %v3359_v34 = vmul.f32 %v10428_v35, %v13209_v32  ;;  %v3599_v49 = vmul.f32 %v13245_v23, %v13244_v61  ;;  %v3719_v51 = vmul.f32 %v10418_v59, %v13222_v1  ;;  %v13249_v63 = vld [vmem:[#allocation51_spill] sm:$0xff] }
 0x2ff   : > { %v4898_v45 = vadd.f32 %v4853_v39, %v4778_v25  ;;  %v5213_v4 = vsel %vm2443_vm3, %v5211_v30, %v13241_v10  ;;  %v13246_v25 = vld [vmem:[#allocation44_spill] sm:$0xff]  ;;  %v3839_v32 = vmul.f32 %v5902_v20, %v13224_v43  ;;  %v13247_v37 = vrot.slane %v10389_v38, 4 }
 0x300   : > { %v3155_v39 = vadd.f32 %v3139_v58, %v3123_v31  ;;  %v3171_v46 = vmul.f32 %v9873_v16, %v13246_v25  ;;  %v13248_v10 = vrot.slane %v10401_v15, 4  ;;  %v3203_v61 = vmul.f32 %v10226_v29, %v13249_v63 }
 0x301   : > { %v5018_v2 = vadd.f32 %v4973_v44, %v4898_v45  ;;  %v5333_v30 = vsel %vm2443_vm3, %v5331_v24, %v13247_v37  ;;  %v3294_v55 = vrot.slane %v3239_v53, 1  ;;  %v13250_v31 = vrot.slane %v10410_v13, 4 }
 0x302   : > { %v5453_v42 = vsel %vm2443_vm3, %v5451_v40, %v13248_v10  ;;  %v3187_v44 = vadd.f32 %v3171_v46, %v3155_v39  ;;  %v3414_v58 = vrot.slane %v3359_v34, 1  ;;  %v3534_v43 = vrot.slane %v3479_v0, 1 }
 0x303   : > { %v5138_v1 = vadd.f32 %v5093_v8, %v5018_v2  ;;  %v5573_v45 = vsel %vm2443_vm3, %v5571_v48, %v13250_v31  ;;  %v3654_v16 = vrot.slane %v3599_v49, 1  ;;  %v3774_v25 = vrot.slane %v3719_v51, 1 }
 0x304   : > { %v3894_v38 = vrot.slane %v3839_v32, 2  ;;  %v3219_v24 = vadd.f32 %v3203_v61, %v3187_v44  ;;  %v3959_v40 = vmul.f32 %v10428_v35, %v13002_v60  ;;  %v4079_v10 = vmul.f32 %v13243_v21, %v12586_v57 }
 0x305   : > { %v5258_v37 = vadd.f32 %v5213_v4, %v5138_v1  ;;  %v13251_v8 = vrot.slane %v10202_v47, 1  ;;  %v4199_v48 = vmul.f32 %v13245_v23, %v12589_v62  ;;  %v4319_v49 = vmul.f32 %v10418_v59, %v6518_v56  ;;  %v13252_v1 = vld [vmem:[#allocation17_spill] sm:$0xff]  ;;  %v13254_v47 = vld [vmem:[#allocation46_spill] sm:$0xff] }
 0x306   : > { %v4439_v32 = vmul.f32 %v5902_v20, %v12626_v36  ;;  %v13253_v46 = vrot.slane %v13252_v1, 1  ;;  %v4559_v34 = vmul.f32 %v10428_v35, %v6523_v11  ;;  %v13255_v51 = vrot.slane %v13254_v47, 1 }
 0x307   : > { %v3295_v53 = vsel %vm580_vm0, %v13251_v8, %v3294_v55  ;;  %v5378_v4 = vadd.f32 %v5333_v30, %v5258_v37  ;;  %v13256_v2 = vrot.slane %v10239_v22, 1  ;;  %v13257_v31 = vrot.slane %v10247_v54, 1 }
 0x308   : > { %v3339_v61 = vadd.f32 %v3295_v53, %v3219_v24  ;;  %v3415_v0 = vsel %vm580_vm0, %v13253_v46, %v3414_v58  ;;  %v3535_v55 = vsel %vm580_vm0, %v13255_v51, %v3534_v43  ;;  %v13258_v44 = vrot.slane %v10258_v41, 2 }
 0x309   : > { %v3655_v39 = vsel %vm580_vm0, %v13256_v2, %v3654_v16  ;;  %v3775_v30 = vsel %vm580_vm0, %v13257_v31, %v3774_v25  ;;  %v5498_v58 = vadd.f32 %v5453_v42, %v5378_v4  ;;  %v4014_v8 = vrot.slane %v3959_v40, 2 }
 0x30a   : > { %v3895_v37 = vsel %vm1201_vm1, %v13258_v44, %v3894_v38  ;;  %v3459_v24 = vadd.f32 %v3415_v0, %v3339_v61  ;;  %v4134_v53 = vrot.slane %v4079_v10, 2  ;;  %v4254_v1 = vrot.slane %v4199_v48, 2 }
 0x30b   : > { %v4374_v46 = vrot.slane %v4319_v49, 2  ;;  %v4494_v43 = vrot.slane %v4439_v32, 3  ;;  %v4679_v22 = vmul.f32 %v13243_v21, %v12634_v27  ;;  %v5618_v16 = vadd.f32 %v5573_v45, %v5498_v58  ;;  %v10494_v49 = vld [vmem:[#allocation2 + $0x148] sm:$0xf] }
 0x30c   : > { %v3579_v47 = vadd.f32 %v3535_v55, %v3459_v24  ;;  %v4614_v54 = vrot.slane %v4559_v34, 3  ;;  %v4799_v25 = vmul.f32 %v13245_v23, %v12857_v52  ;;  %v4919_v38 = vmul.f32 %v10418_v59, %v6573_v6  ;;  %13259 = vst [vmem:[#allocation27_spill] sm:$0xff] %v10494_v49  ;;  %v13264_v58 = vld [vmem:[#allocation50_spill] sm:$0xff] }
 0x30d   : > { %v4734_v41 = vrot.slane %v4679_v22, 3  ;;  %v5039_v42 = vmul.f32 %v5902_v20, %v12607_v18  ;;  %v5159_v40 = vmul.f32 %v10428_v35, %v6578_v17  ;;  %5781 = vst [vmem:[%s6814_s20 + $0xb0] sm:$0xff] %v5618_v16  ;;  %v5279_v21 = vmul.f32 %v10494_v49, %v6593_v28 }
 0x30e   : > { %v3699_v10 = vadd.f32 %v3655_v39, %v3579_v47  ;;  %v4854_v48 = vrot.slane %v4799_v25, 3  ;;  %v5399_v45 = vmul.f32 %v13245_v23, %v6597_v3  ;;  %v13260_v32 = vrot.slane %v10267_v26, 2  ;;  %v13292_v23 = vld [vmem:[#allocation36_spill] sm:$0xff] }
 0x30f   : > { %v4974_v61 = vrot.slane %v4919_v38, 3  ;;  %v5094_v20 = vrot.slane %v5039_v42, 4  ;;  %v5214_v0 = vrot.slane %v5159_v40, 4  ;;  %v13261_v51 = vrot.slane %v10280_v12, 2  ;;  %v13276_v42 = vld [vmem:[#allocation10_spill] sm:$0xff] }
 0x310   : > { %v4015_v4 = vsel %vm1201_vm1, %v13260_v32, %v4014_v8  ;;  %v3819_v34 = vadd.f32 %v3775_v30, %v3699_v10  ;;  %v13262_v2 = vrot.slane %v10289_v7, 2  ;;  %v13263_v31 = vrot.slane %v10298_v5, 2 }
 0x311   : > { %v4135_v55 = vsel %vm1201_vm1, %v13261_v51, %v4134_v53  ;;  %v13265_v26 = vrot.slane %v13264_v58, 3  ;;  %v13266_v8 = vrot.slane %v10326_v50, 3  ;;  %v13267_v12 = vrot.slane %v10343_v9, 3  ;;  %v13284_v58 = vld [vmem:[#allocation12_spill] sm:$0xff] }
 0x312   : > { %v4255_v39 = vsel %vm1201_vm1, %v13262_v2, %v4254_v1  ;;  %v4375_v44 = vsel %vm1201_vm1, %v13263_v31, %v4374_v46  ;;  %v13268_v7 = vrot.slane %v10349_v14, 3  ;;  %v3939_v5 = vadd.f32 %v3895_v37, %v3819_v34  ;;  %v13273_v14 = vld [vmem:[#allocation58_spill] sm:$0xff]  ;;  %v13275_v37 = vld [vmem:[#allocation11_spill] sm:$0xff] }
 0x313   : > { %v4495_v24 = vsel %vm1822_vm2, %v13265_v26, %v4494_v43  ;;  %v4615_v30 = vsel %vm1822_vm2, %v13266_v8, %v4614_v54  ;;  %v4735_v53 = vsel %vm1822_vm2, %v13267_v12, %v4734_v41  ;;  %v5334_v22 = vrot.slane %v5279_v21, 4  ;;  %v13269_v43 = vld [vmem:[#allocation19_spill] sm:$0xff]  ;;  %v13271_v54 = vld [vmem:[#allocation40_spill] sm:$0xff] }
 0x314   : > { %v10524_v1 = vsel %vm1822_vm2, %v13268_v7, %v4854_v48  ;;  %v5454_v46 = vrot.slane %v5399_v45, 4  ;;  %v3076_v16 = vmul.f32 %v13198_v33, %v13118_v19  ;;  %v13270_v47 = vrot.slane %v13269_v43, 3  ;;  %v13277_v48 = vld [vmem:[#allocation34_spill] sm:$0xff]  ;;  %v13278_v45 = vld [vmem:[#allocation9_spill] sm:$0xff]  ;;  %v13282_v2 = vld [vmem:[#allocation43_spill] sm:$0xff] }
 0x315   : > { %v13272_v9 = vrot.slane %v13271_v54, 4  ;;  %v13274_v41 = vrot.slane %v13273_v14, 4  ;;  %v3108_v40 = vmul.f32 %v13276_v42, %v13275_v37  ;;  %v4059_v10 = vadd.f32 %v4015_v4, %v3939_v5  ;;  %v13285_v4 = vld [vmem:[#allocation52_spill] sm:$0xff]  ;;  %v13290_v54 = vld [vmem:[#allocation29_spill] sm:$0xff] }
 0x316   : > { %v10531_v50 = vsel %vm1822_vm2, %v13270_v47, %v4974_v61  ;;  %v5519_v21 = vmul.f32 %v13277_v48, %v10418_v59  ;;  %v3240_v32 = vmul.f32 %v13198_v33, %v13278_v45  ;;  %v13279_v61 = vld [vmem:[#allocation24_spill] sm:$0xff]  ;;  %v3360_v26 = vmul.f32 %v13276_v42, %v13284_v58 }
 0x317   : > { %v10536_v25 = vsel %vm2443_vm3, %v13272_v9, %v5094_v20  ;;  %v10541_v38 = vsel %vm2443_vm3, %v13274_v41, %v5214_v0  ;;  %v10551_v34 = vmul.f32 %v13279_v61, %v13278_v45  ;;  %v10553_v20 = vld [vmem:[#allocation2 + $0x180] sm:$0xff]  ;;  %v3124_v51 = vadd.f32 %v3108_v40, %v3076_v16  ;;  %v13287_v7 = vld [vmem:[#allocation28_spill] sm:$0xff] }
 0x318   : > { %13281 = vst [vmem:[#allocation26_spill] sm:$0xff] %v10553_v20  ;;  %v13283_v0 = vld [vmem:[#allocation37_spill] sm:$0xff]  ;;  %v10561_v8 = vmul.f32 %v13285_v4, %v13284_v58  ;;  %v4179_v12 = vadd.f32 %v4135_v55, %v4059_v10  ;;  %v13288_v5 = vrot.slane %v13287_v7, 4  ;;  %v13289_v47 = vld [vmem:[#allocation44_spill] sm:$0xff]  ;;  %v3296_v40 = vrot.slane %v3240_v32, 1  ;;  %v10577_v55 = vld [vmem:[#allocation2 + $0x188] sm:$0xff] }
 0x319   : > { %13280 = vst [vmem:[#allocation56_spill] sm:$0xff] %v10551_v34  ;;  %v3140_v31 = vmul.f32 %v13283_v0, %v13282_v2  ;;  %v3172_v9 = vmul.f32 %v13290_v54, %v13289_v47  ;;  %v13291_v16 = vld [vmem:[#allocation45_spill] sm:$0xff]  ;;  %13293 = vst [vmem:[#allocation35_spill] sm:$0xff] %v10577_v55  ;;  %v3416_v7 = vrot.slane %v3360_v26, 1  ;;  %v13294_v32 = vld [vmem:[#allocation48_spill] sm:$0xff] }
 0x31a   : > { %13286 = vst [vmem:[#allocation31_spill] sm:$0xff] %v10561_v8  ;;  %v10566_v43 = vsel %vm2443_vm3, %v13288_v5, %v5334_v22  ;;  %v3480_v14 = vmul.f32 %v13283_v0, %v13291_v16  ;;  %v10575_v49 = vmul.f32 %v13292_v23, %v13291_v16  ;;  %v4299_v10 = vadd.f32 %v4255_v39, %v4179_v12  ;;  %v13296_v26 = vld [vmem:[#allocation49_spill] sm:$0xff] }
 0x31b   : > { %v3156_v41 = vadd.f32 %v3140_v31, %v3124_v51  ;;  %v3204_v22 = vmul.f32 %v10553_v20, %v13249_v63  ;;  %v12319_v5 = vrot.slane %v10561_v8, 1  ;;  %v3600_v31 = vmul.f32 %v13290_v54, %v13294_v32 }
 0x31c   : > { %v3536_v58 = vrot.slane %v3480_v14, 1  ;;  %v4419_v59 = vadd.f32 %v4375_v44, %v4299_v10  ;;  %v13295_v16 = vrot.slane %v10401_v15, 4  ;;  %v10592_v39 = vmul.f32 %v10226_v29, %v13294_v32 }
 0x31d   : > { %v3188_v47 = vadd.f32 %v3172_v9, %v3156_v41  ;;  %v3720_v12 = vmul.f32 %v10553_v20, %v13296_v26  ;;  %v5574_v9 = vrot.slane %v5519_v21, 4  ;;  %v13297_v41 = vrot.slane %v10551_v34, 1 }
 0x31e   : > { %v10588_v35 = vsel %vm2443_vm3, %v13295_v16, %v5454_v46  ;;  %v10601_v44 = vmul.f32 %v10577_v55, %v13296_v26  ;;  %v4539_v15 = vadd.f32 %v4495_v24, %v4419_v59  ;;  %v3418_v46 = vsel %vm580_vm0, %v3416_v7, %v12319_v5  ;;  %v13298_v16 = vld [vmem:[#allocation13_spill] sm:$0xff] }
 0x31f   : > { %v3220_v14 = vadd.f32 %v3204_v22, %v3188_v47  ;;  %v3298_v51 = vsel %vm580_vm0, %v3296_v40, %v13297_v41  ;;  %v3840_v10 = vmul.f32 %v13198_v33, %v13298_v16  ;;  %v10610_v21 = vmul.f32 %v13279_v61, %v13298_v16 }
 0x320   : > { %v13299_v22 = vrot.slane %v10575_v49, 1  ;;  %v3656_v41 = vrot.slane %v3600_v31, 1  ;;  %v3960_v59 = vmul.f32 %v13276_v42, %v13002_v60  ;;  %v4659_v24 = vadd.f32 %v4615_v30, %v4539_v15 }
 0x321   : > { %v3340_v47 = vadd.f32 %v3298_v51, %v3220_v14  ;;  %v12326_v8 = vrot.slane %v10592_v39, 1  ;;  %v3776_v7 = vrot.slane %v3720_v12, 1  ;;  %v10620_v5 = vmul.f32 %v13285_v4, %v13002_v60 }
 0x322   : > { %v3538_v40 = vsel %vm580_vm0, %v3536_v58, %v13299_v22  ;;  %v12325_v16 = vrot.slane %v10601_v44, 1  ;;  %v4080_v51 = vmul.f32 %v13283_v0, %v12586_v57  ;;  %v10627_v58 = vmul.f32 %v13292_v23, %v12586_v57 }
 0x323   : > { %v3460_v34 = vadd.f32 %v3418_v46, %v3340_v47  ;;  %v4779_v31 = vadd.f32 %v4735_v53, %v4659_v24  ;;  %v3896_v14 = vrot.slane %v3840_v10, 2  ;;  %v12324_v30 = vrot.slane %v10610_v21, 2 }
 0x324   : > { %v4200_v12 = vmul.f32 %v13290_v54, %v12589_v62  ;;  %v4016_v22 = vrot.slane %v3960_v59, 2  ;;  %v10635_v47 = vmul.f32 %v10226_v29, %v12589_v62  ;;  %v13301_v23 = vrot.slane %v10410_v13, 4 }
 0x325   : > { %v3580_v15 = vadd.f32 %v3538_v40, %v3460_v34  ;;  %v4899_v0 = vadd.f32 %v10524_v1, %v4779_v31  ;;  %v3658_v10 = vsel %vm580_vm0, %v3656_v41, %v12326_v8  ;;  %v4320_v34 = vmul.f32 %v10553_v20, %v6518_v56 }
 0x326   : > { %13300 = vst [vmem:[#allocation39_spill] sm:$0xff] %v10635_v47  ;;  %v5575_v53 = vsel %vm2443_vm3, %v13301_v23, %v5574_v9  ;;  %v4136_v59 = vrot.slane %v4080_v51, 2  ;;  %v12322_v24 = vrot.slane %v10627_v58, 2  ;;  %v10649_v46 = vmul.f32 %v10577_v55, %v6518_v56 }
 0x327   : > { %v3700_v40 = vadd.f32 %v3658_v10, %v3580_v15  ;;  %v5019_v1 = vadd.f32 %v10531_v50, %v4899_v0  ;;  %v3778_v13 = vsel %vm580_vm0, %v3776_v7, %v12325_v16  ;;  %v4256_v9 = vrot.slane %v4200_v12, 2 }
 0x328   : > { %13302 = vst [vmem:[#allocation32_spill] sm:$0xff] %v10649_v46  ;;  %v12323_v41 = vrot.slane %v10635_v47, 2  ;;  %v3898_v51 = vsel %vm1201_vm1, %v3896_v14, %v12324_v30  ;;  %v13303_v15 = vrot.slane %v10620_v5, 2  ;;  %v4440_v10 = vmul.f32 %v13198_v33, %v12626_v36 }
 0x329   : > { %v3820_v31 = vadd.f32 %v3778_v13, %v3700_v40  ;;  %v5139_v50 = vadd.f32 %v10536_v25, %v5019_v1  ;;  %v4376_v0 = vrot.slane %v4320_v34, 2  ;;  %v12328_v7 = vrot.slane %v10649_v46, 2  ;;  %v10683_v1 = vld [vmem:[#allocation2 + $0x150] sm:$0xff] }
 0x32a   : > { %v4018_v23 = vsel %vm1201_vm1, %v4016_v22, %v13303_v15  ;;  %v10668_v12 = vmul.f32 %v13279_v61, %v12626_v36  ;;  %v4138_v14 = vsel %vm1201_vm1, %v4136_v59, %v12322_v24  ;;  %v4560_v22 = vmul.f32 %v13276_v42, %v6523_v11  ;;  %13304 = vst [vmem:[#allocation53_spill] sm:$0xff] %v10683_v1 }
 0x32b   : > { %v3940_v40 = vadd.f32 %v3898_v51, %v3820_v31  ;;  %v10677_v13 = vmul.f32 %v13285_v4, %v6523_v11  ;;  %v5259_v25 = vadd.f32 %v10541_v38, %v5139_v50  ;;  %v4258_v34 = vsel %vm1201_vm1, %v4256_v9, %v12323_v41  ;;  %v10687_v51 = vld [vmem:[#allocation2 + $0x158] sm:$0xff] }
 0x32c   : > { %v4680_v31 = vmul.f32 %v10683_v1, %v12634_v27  ;;  %13305 = vst [vmem:[#allocation42_spill] sm:$0xff] %v10687_v51  ;;  %v10691_v59 = vmul.f32 %v10687_v51, %v12634_v27  ;;  %v4496_v24 = vrot.slane %v4440_v10, 3  ;;  %v4800_v38 = vmul.f32 %v13290_v54, %v12857_v52 }
 0x32d   : > { %v4060_v15 = vadd.f32 %v4018_v23, %v3940_v40  ;;  %v10697_v50 = vmul.f32 %v10226_v29, %v12857_v52  ;;  %v5379_v9 = vadd.f32 %v10566_v43, %v5259_v25  ;;  %v4378_v41 = vsel %vm1201_vm1, %v4376_v0, %v12328_v7 }
 0x32e   : > { %v4920_v16 = vmul.f32 %v10553_v20, %v6573_v6  ;;  %v4616_v10 = vrot.slane %v4560_v22, 3  ;;  %v10709_v8 = vmul.f32 %v10577_v55, %v6573_v6  ;;  %v4736_v25 = vrot.slane %v4680_v31, 3 }
 0x32f   : > { %v4180_v23 = vadd.f32 %v4138_v14, %v4060_v15  ;;  %v5499_v43 = vadd.f32 %v10588_v35, %v5379_v9  ;;  %v12333_v46 = vrot.slane %v10691_v59, 3  ;;  %v5040_v0 = vmul.f32 %v13198_v33, %v12607_v18 }
 0x330   : > { %13306 = vst [vmem:[#allocation60_spill] sm:$0xff] %v10709_v8  ;;  %v4856_v30 = vrot.slane %v4800_v38, 3  ;;  %v12330_v14 = vrot.slane %v10697_v50, 3  ;;  %v10718_v22 = vmul.f32 %v13279_v61, %v12607_v18  ;;  %v4976_v40 = vrot.slane %v4920_v16, 3 }
 0x331   : > { %v4300_v7 = vadd.f32 %v4258_v34, %v4180_v23  ;;  %v5619_v15 = vadd.f32 %v5575_v53, %v5499_v43  ;;  %v12331_v47 = vrot.slane %v10709_v8, 3  ;;  %v5160_v35 = vmul.f32 %v13276_v42, %v6578_v17  ;;  %v10780_v8 = vld [vmem:[#allocation2 + $0x190] sm:$0xf] }
 0x332   : > { %13307 = vst [vmem:[#allocation16_spill] sm:$0xff] %v10718_v22  ;;  %v13308_v9 = vrot.slane %v10668_v12, 3  ;;  %v5096_v34 = vrot.slane %v5040_v0, 4  ;;  %v12332_v38 = vrot.slane %v10718_v22, 4  ;;  %v10730_v23 = vmul.f32 %v13285_v4, %v6578_v17  ;;  %13318 = vst [vmem:[#allocation30_spill] sm:$0xff] %v10780_v8 }
 0x333   : > { %v4420_v31 = vadd.f32 %v4378_v41, %v4300_v7  ;;  %5782 = vst [vmem:[%s6814_s20 + $0xb8] sm:$0xff] %v5619_v15  ;;  %v5280_v16 = vmul.f32 %v10683_v1, %v6593_v28  ;;  %v13309_v43 = vrot.slane %v10677_v13, 3  ;;  %v10739_v7 = vmul.f32 %v10687_v51, %v6593_v28 }
 0x334   : > { %v4498_v33 = vsel %vm1822_vm2, %v4496_v24, %v13308_v9  ;;  %v4738_v24 = vsel %vm1822_vm2, %v4736_v25, %v12333_v46  ;;  %v4858_v0 = vsel %vm1822_vm2, %v4856_v30, %v12330_v14  ;;  %v4978_v15 = vsel %vm1822_vm2, %v4976_v40, %v12331_v47  ;;  %v13314_v46 = vld [vmem:[#allocation12_spill] sm:$0xff] }
 0x335   : > { %v4540_v53 = vadd.f32 %v4498_v33, %v4420_v31  ;;  %v4618_v41 = vsel %vm1822_vm2, %v4616_v10, %v13309_v43  ;;  %13310 = vst [vmem:[#allocation59_spill] sm:$0xff] %v10739_v7  ;;  %v5216_v31 = vrot.slane %v5160_v35, 4  ;;  %v5400_v10 = vmul.f32 %v13290_v54, %v6597_v3  ;;  %v13315_v43 = vld [vmem:[#allocation27_spill] sm:$0xff]  ;;  %v13316_v54 = vld [vmem:[#allocation45_spill] sm:$0xff] }
 0x336   : > { %v10754_v33 = vmul.f32 %v10226_v29, %v6597_v3  ;;  %v3077_v25 = vmul.f32 %v13279_v61, %v13118_v19  ;;  %v5098_v30 = vsel %vm2443_vm3, %v5096_v34, %v12332_v38  ;;  %v5336_v14 = vrot.slane %v5280_v16, 4  ;;  %v13313_v38 = vld [vmem:[#allocation41_spill] sm:$0xff] }
 0x337   : > { %v4660_v9 = vadd.f32 %v4618_v41, %v4540_v53  ;;  %v3109_v40 = vmul.f32 %v13285_v4, %v13275_v37  ;;  %v5520_v41 = vmul.f32 %v13277_v48, %v10553_v20  ;;  %v10769_v47 = vmul.f32 %v13277_v48, %v10577_v55  ;;  %v13317_v20 = vld [vmem:[#allocation21_spill] sm:$0xff] }
 0x338   : > { %13311 = vst [vmem:[#allocation38_spill] sm:$0xff] %v10754_v33  ;;  %v3141_v34 = vmul.f32 %v10687_v51, %v13282_v2  ;;  %v3242_v16 = vmul.f32 %v13313_v38, %v13278_v45  ;;  %v3362_v4 = vmul.f32 %v13315_v43, %v13314_v46  ;;  %v3482_v22 = vmul.f32 %v13317_v20, %v13316_v54  ;;  %v13320_v2 = vld [vmem:[#allocation23_spill] sm:$0xff] }
 0x339   : > { %v4780_v35 = vadd.f32 %v4738_v24, %v4660_v9  ;;  %13312 = vst [vmem:[#allocation22_spill] sm:$0xff] %v10769_v47  ;;  %v3125_v61 = vadd.f32 %v3109_v40, %v3077_v25  ;;  %v5456_v9 = vrot.slane %v5400_v10, 4  ;;  %v13319_v25 = vld [vmem:[#allocation44_spill] sm:$0xff]  ;;  %v3602_v45 = vmul.f32 %v13320_v2, %v13294_v32 }
 0x33a   : > { %v3173_v40 = vmul.f32 %v10226_v29, %v13319_v25  ;;  %v3299_v51 = vrot.slane %v3242_v16, 1  ;;  %v13321_v46 = vrot.slane %v10730_v23, 4  ;;  %v13322_v10 = vrot.slane %v10739_v7, 4  ;;  %v13324_v7 = vld [vmem:[#allocation56_spill] sm:$0xff] }
 0x33b   : > { %v4900_v24 = vadd.f32 %v4858_v0, %v4780_v35  ;;  %v3157_v48 = vadd.f32 %v3141_v34, %v3125_v61  ;;  %v5576_v53 = vrot.slane %v5520_v41, 4  ;;  %v3205_v34 = vmul.f32 %v10577_v55, %v13249_v63 }
 0x33c   : > { %v5218_v0 = vsel %vm2443_vm3, %v5216_v31, %v13321_v46  ;;  %v5338_v35 = vsel %vm2443_vm3, %v5336_v14, %v13322_v10  ;;  %v3419_v16 = vrot.slane %v3362_v4, 1  ;;  %v13323_v32 = vrot.slane %v10754_v33, 4 }
 0x33d   : > { %v5020_v1 = vadd.f32 %v4978_v15, %v4900_v24  ;;  %v3189_v61 = vadd.f32 %v3173_v40, %v3157_v48  ;;  %v3539_v24 = vrot.slane %v3482_v22, 1  ;;  %v3722_v46 = vmul.f32 %v10780_v8, %v13296_v26  ;;  %v13326_v48 = vld [vmem:[#allocation13_spill] sm:$0xff] }
 0x33e   : > { %v5458_v15 = vsel %vm2443_vm3, %v5456_v9, %v13323_v32  ;;  %v13325_v14 = vrot.slane %v13324_v7, 1  ;;  %v3659_v10 = vrot.slane %v3602_v45, 1  ;;  %v3842_v40 = vmul.f32 %v13313_v38, %v13326_v48 }
 0x33f   : > { %v5140_v29 = vadd.f32 %v5098_v30, %v5020_v1  ;;  %v3221_v31 = vadd.f32 %v3205_v34, %v3189_v61  ;;  %v3962_v4 = vmul.f32 %v13315_v43, %v13002_v60  ;;  %v4082_v32 = vmul.f32 %v13317_v20, %v12586_v57 }
 0x340   : > { %v3300_v41 = vsel %vm580_vm0, %v13325_v14, %v3299_v51  ;;  %v4202_v1 = vmul.f32 %v13320_v2, %v12589_v62  ;;  %v13327_v22 = vrot.slane %v10769_v47, 4  ;;  %v13328_v51 = vld [vmem:[#allocation31_spill] sm:$0xff]  ;;  %v13330_v61 = vrot.slane %v10575_v49, 1 }
 0x341   : > { %v5260_v54 = vadd.f32 %v5218_v0, %v5140_v29  ;;  %v3341_v30 = vadd.f32 %v3300_v41, %v3221_v31  ;;  %v13329_v45 = vrot.slane %v13328_v51, 1  ;;  %v4322_v29 = vmul.f32 %v10780_v8, %v6518_v56 }
 0x342   : > { %v5578_v7 = vsel %vm2443_vm3, %v5576_v53, %v13327_v22  ;;  %v3540_v34 = vsel %vm580_vm0, %v13330_v61, %v3539_v24  ;;  %v3779_v14 = vrot.slane %v3722_v46, 1  ;;  %v4442_v33 = vmul.f32 %v13313_v38, %v12626_v36 }
 0x343   : > { %v3420_v9 = vsel %vm580_vm0, %v13329_v45, %v3419_v16  ;;  %v5380_v0 = vadd.f32 %v5338_v35, %v5260_v54  ;;  %v13331_v53 = vrot.slane %v10592_v39, 1  ;;  %v3899_v41 = vrot.slane %v3842_v40, 2 }
 0x344   : > { %v3461_v47 = vadd.f32 %v3420_v9, %v3341_v30  ;;  %v4562_v16 = vmul.f32 %v13315_v43, %v6523_v11  ;;  %v4019_v54 = vrot.slane %v3962_v4, 2  ;;  %v4139_v35 = vrot.slane %v4082_v32, 2 }
 0x345   : > { %v3660_v31 = vsel %vm580_vm0, %v13331_v53, %v3659_v10  ;;  %v5500_v22 = vadd.f32 %v5458_v15, %v5380_v0  ;;  %v4259_v49 = vrot.slane %v4202_v1, 2  ;;  %v4379_v24 = vrot.slane %v4322_v29, 2  ;;  %v13337_v53 = vld [vmem:[#allocation39_spill] sm:$0xff] }
 0x346   : > { %v3581_v51 = vadd.f32 %v3540_v34, %v3461_v47  ;;  %v4682_v46 = vmul.f32 %v13317_v20, %v12634_v27  ;;  %v4802_v30 = vmul.f32 %v13320_v2, %v12857_v52  ;;  %v4499_v45 = vrot.slane %v4442_v33, 3  ;;  %v10849_v34 = vld [vmem:[#allocation2 + $0x160] sm:$0xf] }
 0x347   : > { %v5620_v39 = vadd.f32 %v5578_v7, %v5500_v22  ;;  %v4922_v10 = vmul.f32 %v10780_v8, %v6573_v6  ;;  %v5042_v15 = vmul.f32 %v13313_v38, %v12607_v18  ;;  %v13332_v4 = vrot.slane %v10601_v44, 1  ;;  %13335 = vst [vmem:[#allocation18_spill] sm:$0xff] %v10849_v34 }
 0x348   : > { %v3701_v40 = vadd.f32 %v3660_v31, %v3581_v51  ;;  %v13333_v32 = vrot.slane %v10610_v21, 2  ;;  %v4619_v1 = vrot.slane %v4562_v16, 3  ;;  %v13334_v7 = vrot.slane %v10620_v5, 2  ;;  %v13339_v16 = vld [vmem:[#allocation32_spill] sm:$0xff] }
 0x349   : > { %v3780_v47 = vsel %vm580_vm0, %v13332_v4, %v3779_v14  ;;  %5783 = vst [vmem:[%s6814_s20 + $0xc0] sm:$0xff] %v5620_v39  ;;  %v4739_v9 = vrot.slane %v4682_v46, 3  ;;  %v4859_v29 = vrot.slane %v4802_v30, 3  ;;  %v5162_v38 = vmul.f32 %v13315_v43, %v6578_v17 }
 0x34a   : > { %v3900_v20 = vsel %vm1201_vm1, %v13333_v32, %v3899_v41  ;;  %v4020_v33 = vsel %vm1201_vm1, %v13334_v7, %v4019_v54  ;;  %v3821_v0 = vadd.f32 %v3780_v47, %v3701_v40  ;;  %v4979_v61 = vrot.slane %v4922_v10, 3  ;;  %v13346_v47 = vld [vmem:[#allocation60_spill] sm:$0xff] }
 0x34b   : > { %v5099_v44 = vrot.slane %v5042_v15, 4  ;;  %v10853_v21 = vmul.f32 %v10849_v34, %v6593_v28  ;;  %v13336_v14 = vrot.slane %v10627_v58, 2  ;;  %v13338_v31 = vrot.slane %v13337_v53, 2 }
 0x34c   : > { %v13340_v22 = vrot.slane %v13339_v16, 2  ;;  %v13341_v51 = vrot.slane %v10668_v12, 3  ;;  %v3941_v30 = vadd.f32 %v3900_v20, %v3821_v0  ;;  %v13342_v39 = vrot.slane %v10677_v13, 3  ;;  %v13345_v13 = vld [vmem:[#allocation53_spill] sm:$0xff]  ;;  %v13350_v0 = vld [vmem:[#allocation43_spill] sm:$0xff] }
 0x34d   : > { %v4140_v5 = vsel %vm1201_vm1, %v13336_v14, %v4139_v35  ;;  %v4260_v41 = vsel %vm1201_vm1, %v13338_v31, %v4259_v49  ;;  %v10872_v58 = vmul.f32 %v13320_v2, %v6597_v3  ;;  %v3078_v35 = vmul.f32 %v13276_v42, %v13118_v19  ;;  %v13352_v14 = vld [vmem:[#allocation9_spill] sm:$0xff] }
 0x34e   : > { %v4380_v54 = vsel %vm1201_vm1, %v13340_v22, %v4379_v24  ;;  %v4500_v46 = vsel %vm1822_vm2, %v13341_v51, %v4499_v45  ;;  %v4620_v10 = vsel %vm1822_vm2, %v13342_v39, %v4619_v1  ;;  %v13343_v49 = vrot.slane %v10691_v59, 3  ;;  %v13348_v1 = vld [vmem:[#allocation16_spill] sm:$0xff]  ;;  %v13357_v51 = vld [vmem:[#allocation42_spill] sm:$0xff]  ;;  %v13363_v2 = vld [vmem:[#allocation33_spill] sm:$0xff] }
 0x34f   : > { %v13344_v12 = vrot.slane %v10697_v50, 3  ;;  %v5219_v15 = vrot.slane %v5162_v38, 4  ;;  %v3110_v40 = vmul.f32 %v13345_v13, %v13275_v37  ;;  %v4061_v4 = vadd.f32 %v4020_v33, %v3941_v30  ;;  %v13353_v33 = vld [vmem:[#allocation52_spill] sm:$0xff]  ;;  %v13359_v30 = vld [vmem:[#allocation45_spill] sm:$0xff] }
 0x350   : > { %v4740_v24 = vsel %vm1822_vm2, %v13343_v49, %v4739_v9  ;;  %v13347_v32 = vrot.slane %v13346_v47, 3  ;;  %v13349_v7 = vrot.slane %v13348_v1, 4  ;;  %v5339_v9 = vrot.slane %v10853_v21, 4  ;;  %v13356_v22 = vld [vmem:[#allocation12_spill] sm:$0xff]  ;;  %v10921_v47 = vld [vmem:[#allocation2 + $0x1a0] sm:$0xff] }
 0x351   : > { %v4860_v45 = vsel %vm1822_vm2, %v13344_v12, %v4859_v29  ;;  %v3126_v50 = vadd.f32 %v3110_v40, %v3078_v35  ;;  %v13351_v29 = vld [vmem:[#allocation29_spill] sm:$0xff]  ;;  %v3243_v53 = vmul.f32 %v13276_v42, %v13352_v14  ;;  %v10901_v31 = vmul.f32 %v13353_v33, %v13352_v14  ;;  %13362 = vst [vmem:[#allocation17_spill] sm:$0xff] %v10921_v47 }
 0x352   : > { %v10887_v20 = vsel %vm1822_vm2, %v13347_v32, %v4979_v61  ;;  %v10892_v59 = vsel %vm2443_vm3, %v13349_v7, %v5099_v44  ;;  %v3142_v38 = vmul.f32 %v13351_v29, %v13350_v0  ;;  %v10903_v61 = vld [vmem:[#allocation2 + $0x198] sm:$0xff]  ;;  %v4181_v16 = vadd.f32 %v4140_v5, %v4061_v4  ;;  %v13361_v5 = vld [vmem:[#allocation26_spill] sm:$0xff] }
 0x353   : > { %13354 = vst [vmem:[#allocation20_spill] sm:$0xff] %v10901_v31  ;;  %13355 = vst [vmem:[#allocation25_spill] sm:$0xff] %v10903_v61  ;;  %v3363_v44 = vmul.f32 %v13345_v13, %v13356_v22  ;;  %v10909_v21 = vmul.f32 %v13357_v51, %v13356_v22  ;;  %v3483_v39 = vmul.f32 %v13351_v29, %v13359_v30  ;;  %v13360_v35 = vrot.slane %v10730_v23, 4 }
 0x354   : > { %v5459_v12 = vrot.slane %v10872_v58, 4  ;;  %v3158_v40 = vadd.f32 %v3142_v38, %v3126_v50  ;;  %v3174_v4 = vmul.f32 %v13361_v5, %v13319_v25  ;;  %v4301_v32 = vadd.f32 %v4260_v41, %v4181_v16  ;;  %v13366_v25 = vld [vmem:[#allocation34_spill] sm:$0xff] }
 0x355   : > { %13358 = vst [vmem:[#allocation47_spill] sm:$0xff] %v10909_v21  ;;  %v10916_v49 = vsel %vm2443_vm3, %v13360_v35, %v5219_v15  ;;  %v3301_v1 = vrot.slane %v3243_v53, 1  ;;  %v10926_v34 = vmul.f32 %v13363_v2, %v13359_v30  ;;  %v3206_v15 = vmul.f32 %v10903_v61, %v13249_v63  ;;  %v13364_v35 = vld [vmem:[#allocation48_spill] sm:$0xff] }
 0x356   : > { %v3190_v23 = vadd.f32 %v3174_v4, %v3158_v40  ;;  %v3603_v58 = vmul.f32 %v13361_v5, %v13364_v35  ;;  %v10934_v50 = vmul.f32 %v10577_v55, %v13364_v35  ;;  %v4421_v38 = vadd.f32 %v4380_v54, %v4301_v32 }
 0x357   : > { %v3421_v41 = vrot.slane %v3363_v44, 1  ;;  %v12361_v53 = vrot.slane %v10909_v21, 1  ;;  %v3541_v16 = vrot.slane %v3483_v39, 1  ;;  %v3723_v40 = vmul.f32 %v10903_v61, %v13296_v26 }
 0x358   : > { %13365 = vst [vmem:[#allocation46_spill] sm:$0xff] %v10934_v50  ;;  %v3222_v7 = vadd.f32 %v3206_v15, %v3190_v23  ;;  %v10942_v4 = vmul.f32 %v10921_v47, %v13296_v26  ;;  %v4541_v63 = vadd.f32 %v4500_v46, %v4421_v38  ;;  %v10946_v35 = vmul.f32 %v13366_v25, %v10780_v8 }
 0x359   : > { %v13367_v54 = vrot.slane %v10901_v31, 1  ;;  %v3843_v39 = vmul.f32 %v13276_v42, %v13326_v48  ;;  %v3661_v23 = vrot.slane %v3603_v58, 1  ;;  %v10956_v30 = vmul.f32 %v13353_v33, %v13326_v48 }
 0x35a   : > { %v4661_v46 = vadd.f32 %v4620_v10, %v4541_v63  ;;  %v3423_v25 = vsel %vm580_vm0, %v3421_v41, %v12361_v53  ;;  %v3963_v38 = vmul.f32 %v13345_v13, %v13002_v60  ;;  %v13368_v58 = vrot.slane %v10926_v34, 1 }
 0x35b   : > { %v3303_v44 = vsel %vm580_vm0, %v3301_v1, %v13367_v54  ;;  %v10965_v1 = vmul.f32 %v13357_v51, %v13002_v60  ;;  %v12368_v15 = vrot.slane %v10942_v4, 1  ;;  %v3901_v10 = vrot.slane %v3843_v39, 2 }
 0x35c   : > { %v3342_v32 = vadd.f32 %v3303_v44, %v3222_v7  ;;  %v3543_v54 = vsel %vm580_vm0, %v3541_v16, %v13368_v58  ;;  %v3781_v44 = vrot.slane %v3723_v40, 1  ;;  %v4781_v63 = vadd.f32 %v4740_v24, %v4661_v46 }
 0x35d   : > { %v12365_v21 = vrot.slane %v10956_v30, 2  ;;  %v4083_v41 = vmul.f32 %v13351_v29, %v12586_v57  ;;  %v13369_v31 = vrot.slane %v10934_v50, 1  ;;  %v4203_v24 = vmul.f32 %v13361_v5, %v12589_v62  ;;  %v13371_v29 = vld [vmem:[#allocation59_spill] sm:$0xff] }
 0x35e   : > { %v3462_v7 = vadd.f32 %v3423_v25, %v3342_v32  ;;  %v4021_v32 = vrot.slane %v3963_v38, 2  ;;  %v10979_v25 = vmul.f32 %v13363_v2, %v12586_v57  ;;  %v4901_v16 = vadd.f32 %v4860_v45, %v4781_v63 }
 0x35f   : > { %v3663_v60 = vsel %vm580_vm0, %v3661_v23, %v13369_v31  ;;  %v10986_v39 = vmul.f32 %v10577_v55, %v12589_v62  ;;  %v13372_v46 = vrot.slane %v13371_v29, 4  ;;  %v13373_v31 = vld [vmem:[#allocation38_spill] sm:$0xff]  ;;  %v5579_v58 = vrot.slane %v10946_v35, 4 }
 0x360   : > { %v3582_v53 = vadd.f32 %v3543_v54, %v3462_v7  ;;  %v13374_v23 = vrot.slane %v13373_v31, 4  ;;  %v5021_v54 = vadd.f32 %v10887_v20, %v4901_v16  ;;  %v3783_v63 = vsel %vm580_vm0, %v3781_v44, %v12368_v15 }
 0x361   : > { %13370 = vst [vmem:[#allocation50_spill] sm:$0xff] %v10986_v39  ;;  %v5340_v7 = vsel %vm2443_vm3, %v13372_v46, %v5339_v9  ;;  %v3903_v40 = vsel %vm1201_vm1, %v3901_v10, %v12365_v21  ;;  %v4141_v29 = vrot.slane %v4083_v41, 2  ;;  %v12366_v9 = vrot.slane %v10979_v25, 2 }
 0x362   : > { %v5460_v38 = vsel %vm2443_vm3, %v13374_v23, %v5459_v12  ;;  %v3702_v45 = vadd.f32 %v3663_v60, %v3582_v53  ;;  %v4323_v12 = vmul.f32 %v10903_v61, %v6518_v56  ;;  %v11007_v60 = vmul.f32 %v10921_v47, %v6518_v56 }
 0x363   : > { %v5141_v20 = vadd.f32 %v10892_v59, %v5021_v54  ;;  %v13375_v35 = vrot.slane %v10965_v1, 2  ;;  %v4261_v44 = vrot.slane %v4203_v24, 2  ;;  %v12367_v10 = vrot.slane %v10986_v39, 2 }
 0x364   : > { %v3822_v50 = vadd.f32 %v3783_v63, %v3702_v45  ;;  %v4443_v16 = vmul.f32 %v13276_v42, %v12626_v36  ;;  %v11018_v46 = vmul.f32 %v13353_v33, %v12626_v36  ;;  %v4563_v31 = vmul.f32 %v13345_v13, %v6523_v11 }
 0x365   : > { %v4023_v53 = vsel %vm1201_vm1, %v4021_v32, %v13375_v35  ;;  %v5261_v59 = vadd.f32 %v10916_v49, %v5141_v20  ;;  %v11025_v23 = vmul.f32 %v13357_v51, %v6523_v11  ;;  %v11027_v32 = vld [vmem:[#allocation2 + $0x168] sm:$0xff]  ;;  %v4143_v45 = vsel %vm1201_vm1, %v4141_v29, %v12366_v9 }
 0x366   : > { %v3942_v41 = vadd.f32 %v3903_v40, %v3822_v50  ;;  %13376 = vst [vmem:[#allocation19_spill] sm:$0xff] %v11027_v32  ;;  %v4683_v50 = vmul.f32 %v11027_v32, %v12634_v27  ;;  %v11033_v40 = vmul.f32 %v13363_v2, %v12634_v27  ;;  %v4381_v54 = vrot.slane %v4323_v12, 2 }
 0x367   : > { %v5381_v63 = vadd.f32 %v5340_v7, %v5261_v59  ;;  %v4263_v20 = vsel %vm1201_vm1, %v4261_v44, %v12367_v10  ;;  %v4803_v35 = vmul.f32 %v13361_v5, %v12857_v52  ;;  %v11046_v2 = vmul.f32 %v10577_v55, %v12857_v52  ;;  %v13377_v44 = vld [vmem:[#allocation22_spill] sm:$0xff] }
 0x368   : > { %v4062_v24 = vadd.f32 %v4023_v53, %v3942_v41  ;;  %v4501_v41 = vrot.slane %v4443_v16, 3  ;;  %v12373_v21 = vrot.slane %v11018_v46, 3  ;;  %v4621_v29 = vrot.slane %v4563_v31, 3 }
 0x369   : > { %v5501_v12 = vadd.f32 %v5460_v38, %v5381_v63  ;;  %v12372_v7 = vrot.slane %v11025_v23, 3  ;;  %v4741_v59 = vrot.slane %v4683_v50, 3  ;;  %v12371_v9 = vrot.slane %v11033_v40, 3 }
 0x36a   : > { %v4182_v53 = vadd.f32 %v4143_v45, %v4062_v24  ;;  %v13378_v10 = vrot.slane %v13377_v44, 4  ;;  %v4923_v39 = vmul.f32 %v10903_v61, %v6573_v6  ;;  %v11058_v16 = vmul.f32 %v10921_v47, %v6573_v6  ;;  %v11092_v44 = vld [vmem:[#allocation2 + $0x170] sm:$0xff] }
 0x36b   : > { %v13380_v38 = vrot.slane %v11007_v60, 2  ;;  %v4861_v50 = vrot.slane %v4803_v35, 3  ;;  %v12370_v45 = vrot.slane %v11046_v2, 3  ;;  %13383 = vst [vmem:[#allocation10_spill] sm:$0xff] %v11092_v44 }
 0x36c   : > { %v5580_v15 = vsel %vm2443_vm3, %v13378_v10, %v5579_v58  ;;  %v4302_v49 = vadd.f32 %v4263_v20, %v4182_v53  ;;  %13379 = vst [vmem:[#allocation40_spill] sm:$0xff] %v11058_v16  ;;  %v5043_v58 = vmul.f32 %v13276_v42, %v12607_v18  ;;  %v11068_v10 = vmul.f32 %v13353_v33, %v12607_v18 }
 0x36d   : > { %v5621_v31 = vadd.f32 %v5580_v15, %v5501_v12  ;;  %v4383_v24 = vsel %vm1201_vm1, %v4381_v54, %v13380_v38  ;;  %v4503_v15 = vsel %vm1822_vm2, %v4501_v41, %v12373_v21  ;;  %v4623_v54 = vsel %vm1822_vm2, %v4621_v29, %v12372_v7 }
 0x36e   : > { %v4422_v63 = vadd.f32 %v4383_v24, %v4302_v49  ;;  %13381 = vst [vmem:[#allocation58_spill] sm:$0xff] %v11068_v10  ;;  %v4743_v49 = vsel %vm1822_vm2, %v4741_v59, %v12371_v9  ;;  %v4981_v35 = vrot.slane %v4923_v39, 3  ;;  %v12381_v42 = vrot.slane %v11058_v16, 3 }
 0x36f   : > { %5784 = vst [vmem:[%s6814_s20 + $0xc8] sm:$0xff] %v5621_v31  ;;  %v5163_v53 = vmul.f32 %v13345_v13, %v6578_v17  ;;  %v4863_v12 = vsel %vm1822_vm2, %v4861_v50, %v12370_v45  ;;  %v11088_v41 = vmul.f32 %v13357_v51, %v6578_v17  ;;  %v5283_v29 = vmul.f32 %v11027_v32, %v6593_v28 }
 0x370   : > { %v4542_v20 = vadd.f32 %v4503_v15, %v4422_v63  ;;  %v11096_v39 = vmul.f32 %v11092_v44, %v6593_v28  ;;  %v5101_v31 = vrot.slane %v5043_v58, 4  ;;  %v5403_v24 = vmul.f32 %v13361_v5, %v6597_v3  ;;  %v11108_v63 = vld [vmem:[%s11882_s1 + $0x18] ss:$0 sm:$0xff] }
 0x371   : > { %13382 = vst [vmem:[#allocation11_spill] sm:$0xff] %v11088_v41  ;;  %v11103_v50 = vmul.f32 %v10577_v55, %v6597_v3  ;;  %13386 = vst [vmem:[#allocation28_spill] sm:$0xff] %v11108_v63  ;;  %v5523_v15 = vmul.f32 %v11108_v63, %v10903_v61  ;;  %v11114_v58 = vmul.f32 %v11108_v63, %v10921_v47  ;;  %v5221_v9 = vrot.slane %v5163_v53, 4 }
 0x372   : > { %13384 = vst [vmem:[#allocation24_spill] sm:$0xff] %v11096_v39  ;;  %v4662_v59 = vadd.f32 %v4623_v54, %v4542_v20  ;;  %v3079_v54 = vmul.f32 %v13353_v33, %v13118_v19  ;;  %v4983_v45 = vsel %vm1822_vm2, %v4981_v35, %v12381_v42  ;;  %v3111_v7 = vmul.f32 %v13357_v51, %v13275_v37  ;;  %v13389_v51 = vld [vmem:[#allocation44_spill] sm:$0xff] }
 0x373   : > { %13385 = vst [vmem:[#allocation37_spill] sm:$0xff] %v11103_v50  ;;  %13387 = vst [vmem:[#allocation36_spill] sm:$0xff] %v11114_v58  ;;  %v5341_v38 = vrot.slane %v5283_v29, 4  ;;  %v3245_v63 = vmul.f32 %v13315_v43, %v13352_v14  ;;  %v5461_v32 = vrot.slane %v5403_v24, 4  ;;  %v5581_v53 = vrot.slane %v5523_v15, 4  ;;  %v13388_v29 = vld [vmem:[#allocation18_spill] sm:$0xff] }
 0x374   : > { %v4782_v20 = vadd.f32 %v4743_v49, %v4662_v59  ;;  %v3127_v33 = vadd.f32 %v3111_v7, %v3079_v54  ;;  %v3143_v49 = vmul.f32 %v11092_v44, %v13350_v0  ;;  %v11129_v59 = vld [vmem:[#allocation2 + $0x1a8] sm:$0xf]  ;;  %v3365_v21 = vmul.f32 %v13388_v29, %v13356_v22  ;;  %v13390_v24 = vld [vmem:[#allocation45_spill] sm:$0xff]  ;;  %v13391_v7 = vld [vmem:[#allocation23_spill] sm:$0xff] }
 0x375   : > { %v3485_v54 = vmul.f32 %v13391_v7, %v13390_v24  ;;  %v13393_v35 = vrot.slane %v11088_v41, 4  ;;  %v3304_v42 = vrot.slane %v3245_v63, 1  ;;  %v13394_v0 = vld [vmem:[#allocation48_spill] sm:$0xff]  ;;  %v13398_v63 = vrot.slane %v11114_v58, 4 }
 0x376   : > { %v4902_v5 = vadd.f32 %v4863_v12, %v4782_v20  ;;  %v3159_v16 = vadd.f32 %v3143_v49, %v3127_v33  ;;  %v3175_v12 = vmul.f32 %v10577_v55, %v13389_v51  ;;  %v13392_v20 = vrot.slane %v11068_v10, 4  ;;  %v13395_v33 = vld [vmem:[#allocation51_spill] sm:$0xff] }
 0x377   : > { %v5223_v15 = vsel %vm2443_vm3, %v5221_v9, %v13393_v35  ;;  %v3605_v22 = vmul.f32 %v10780_v8, %v13394_v0  ;;  %v3207_v49 = vmul.f32 %v10921_v47, %v13395_v33  ;;  %v3725_v55 = vmul.f32 %v11129_v59, %v13296_v26  ;;  %v13399_v26 = vld [vmem:[#allocation20_spill] sm:$0xff] }
 0x378   : > { %v5022_v61 = vadd.f32 %v4983_v45, %v4902_v5  ;;  %v5103_v44 = vsel %vm2443_vm3, %v5101_v31, %v13392_v20  ;;  %v3191_v45 = vadd.f32 %v3175_v12, %v3159_v16  ;;  %v13396_v10 = vrot.slane %v11096_v39, 4 }
 0x379   : > { %v13397_v20 = vrot.slane %v11103_v50, 4  ;;  %v5583_v35 = vsel %vm2443_vm3, %v5581_v53, %v13398_v63  ;;  %v3544_v12 = vrot.slane %v3485_v54, 1  ;;  %v3845_v41 = vmul.f32 %v13315_v43, %v13326_v48  ;;  %v13405_v63 = vld [vmem:[#allocation46_spill] sm:$0xff] }
 0x37a   : > { %v5142_v5 = vadd.f32 %v5103_v44, %v5022_v61  ;;  %v5343_v31 = vsel %vm2443_vm3, %v5341_v38, %v13396_v10  ;;  %v3424_v61 = vrot.slane %v3365_v21, 1  ;;  %v3223_v44 = vadd.f32 %v3207_v49, %v3191_v45  ;;  %v13401_v38 = vld [vmem:[#allocation14_spill] sm:$0xff] }
 0x37b   : > { %v5463_v9 = vsel %vm2443_vm3, %v5461_v32, %v13397_v20  ;;  %v13400_v47 = vrot.slane %v13399_v26, 1  ;;  %v3664_v10 = vrot.slane %v3605_v22, 1  ;;  %v3965_v50 = vmul.f32 %v13388_v29, %v13401_v38 }
 0x37c   : > { %v5262_v16 = vadd.f32 %v5223_v15, %v5142_v5  ;;  %v4085_v32 = vmul.f32 %v13391_v7, %v12586_v57  ;;  %v3784_v21 = vrot.slane %v3725_v55, 1  ;;  %v4205_v54 = vmul.f32 %v10780_v8, %v12589_v62  ;;  %v13402_v15 = vld [vmem:[#allocation47_spill] sm:$0xff] }
 0x37d   : > { %v3305_v39 = vsel %vm580_vm0, %v13400_v47, %v3304_v42  ;;  %v13403_v5 = vrot.slane %v13402_v15, 1  ;;  %v4325_v26 = vmul.f32 %v11129_v59, %v6518_v56  ;;  %v4445_v22 = vmul.f32 %v13315_v43, %v12626_v36 }
 0x37e   : > { %v5382_v20 = vadd.f32 %v5343_v31, %v5262_v16  ;;  %v3343_v53 = vadd.f32 %v3305_v39, %v3223_v44  ;;  %v4565_v47 = vmul.f32 %v13388_v29, %v6523_v11  ;;  %v13404_v55 = vrot.slane %v10926_v34, 1 }
 0x37f   : > { %v3425_v45 = vsel %vm580_vm0, %v13403_v5, %v3424_v61  ;;  %v3904_v31 = vrot.slane %v3845_v41, 2  ;;  %v13406_v16 = vrot.slane %v13405_v63, 1  ;;  %v4024_v44 = vrot.slane %v3965_v50, 2 }
 0x380   : > { %v5502_v42 = vadd.f32 %v5463_v9, %v5382_v20  ;;  %v3463_v39 = vadd.f32 %v3425_v45, %v3343_v53  ;;  %v3545_v49 = vsel %vm580_vm0, %v13404_v55, %v3544_v12  ;;  %v4144_v15 = vrot.slane %v4085_v32, 2 }
 0x381   : > { %v3665_v61 = vsel %vm580_vm0, %v13406_v16, %v3664_v10  ;;  %v4685_v5 = vmul.f32 %v13391_v7, %v12634_v27  ;;  %v4264_v11 = vrot.slane %v4205_v54, 2  ;;  %v4805_v9 = vmul.f32 %v10780_v8, %v12857_v52 }
 0x382   : > { %v5622_v58 = vadd.f32 %v5583_v35, %v5502_v42  ;;  %v3583_v36 = vadd.f32 %v3545_v49, %v3463_v39  ;;  %v13407_v34 = vrot.slane %v10942_v4, 1  ;;  %v4384_v41 = vrot.slane %v4325_v26, 2  ;;  %v11212_v39 = vld [vmem:[#allocation2 + $0x178] sm:$0xf] }
 0x383   : > { %v4504_v20 = vrot.slane %v4445_v22, 3  ;;  %v4624_v53 = vrot.slane %v4565_v47, 3  ;;  %v13408_v50 = vrot.slane %v10956_v30, 2  ;;  %v4744_v7 = vrot.slane %v4685_v5, 3  ;;  %v13411_v22 = vld [vmem:[#allocation50_spill] sm:$0xff] }
 0x384   : > { %v3785_v12 = vsel %vm580_vm0, %v13407_v34, %v3784_v21  ;;  %5785 = vst [vmem:[%s6814_s20 + $0xd0] sm:$0xff] %v5622_v58  ;;  %v3703_v10 = vadd.f32 %v3665_v61, %v3583_v36  ;;  %v4925_v35 = vmul.f32 %v11129_v59, %v6573_v6  ;;  %v13409_v54 = vrot.slane %v10965_v1, 2  ;;  %v13418_v34 = vld [vmem:[#allocation19_spill] sm:$0xff] }
 0x385   : > { %v3905_v32 = vsel %vm1201_vm1, %v13408_v50, %v3904_v31  ;;  %v4864_v4 = vrot.slane %v4805_v9, 3  ;;  %v5045_v21 = vmul.f32 %v13315_v43, %v12607_v18  ;;  %v5165_v58 = vmul.f32 %v13388_v29, %v6578_v17 }
 0x386   : > { %v4025_v45 = vsel %vm1201_vm1, %v13409_v54, %v4024_v44  ;;  %v3823_v36 = vadd.f32 %v3785_v12, %v3703_v10  ;;  %v13410_v30 = vrot.slane %v10979_v25, 2  ;;  %v13412_v47 = vrot.slane %v13411_v22, 2  ;;  %v13423_v54 = vld [vmem:[#allocation12_spill] sm:$0xff] }
 0x387   : > { %v11216_v1 = vmul.f32 %v11212_v39, %v6593_v28  ;;  %v13413_v43 = vrot.slane %v11007_v60, 2  ;;  %v13414_v49 = vrot.slane %v11018_v46, 3  ;;  %v13415_v31 = vrot.slane %v11025_v23, 3 }
 0x388   : > { %v4145_v26 = vsel %vm1201_vm1, %v13410_v30, %v4144_v15  ;;  %v4265_v42 = vsel %vm1201_vm1, %v13412_v47, %v4264_v11  ;;  %v11229_v11 = vmul.f32 %v10780_v8, %v6597_v3  ;;  %v3943_v16 = vadd.f32 %v3905_v32, %v3823_v36  ;;  %v13421_v32 = vld [vmem:[#allocation43_spill] sm:$0xff]  ;;  %v13426_v30 = vld [vmem:[#allocation10_spill] sm:$0xff] }
 0x389   : > { %v4385_v55 = vsel %vm1201_vm1, %v13413_v43, %v4384_v41  ;;  %v4505_v25 = vsel %vm1822_vm2, %v13414_v49, %v4504_v20  ;;  %v4625_v63 = vsel %vm1822_vm2, %v13415_v31, %v4624_v53  ;;  %v13416_v61 = vrot.slane %v11033_v40, 3  ;;  %v13419_v53 = vld [vmem:[#allocation42_spill] sm:$0xff]  ;;  %v13428_v43 = vld [vmem:[#allocation25_spill] sm:$0xff] }
 0x38a   : > { %v4984_v60 = vrot.slane %v4925_v35, 3  ;;  %v3080_v15 = vmul.f32 %v13345_v13, %v13118_v19  ;;  %v13417_v46 = vrot.slane %v11046_v2, 3  ;;  %v5104_v23 = vrot.slane %v5045_v21, 4  ;;  %v11264_v31 = vld [vmem:[#allocation2] sm:$0xff] }
 0x38b   : > { %v4745_v44 = vsel %vm1822_vm2, %v13416_v61, %v4744_v7  ;;  %v5224_v9 = vrot.slane %v5165_v58, 4  ;;  %v3112_v12 = vmul.f32 %v13418_v34, %v13275_v37  ;;  %v4063_v41 = vadd.f32 %v4025_v45, %v3943_v16  ;;  %v13422_v7 = vld [vmem:[#allocation26_spill] sm:$0xff]  ;;  %v13424_v45 = vld [vmem:[#allocation40_spill] sm:$0xff] }
 0x38c   : > { %v4865_v5 = vsel %vm1822_vm2, %v13417_v46, %v4864_v4  ;;  %v5344_v20 = vrot.slane %v11216_v1, 4  ;;  %v3246_v40 = vmul.f32 %v13345_v13, %v13352_v14  ;;  %v11246_v10 = vmul.f32 %v13419_v53, %v13352_v14 }
 0x38d   : > { %v5464_v50 = vrot.slane %v11229_v11, 4  ;;  %v3128_v2 = vadd.f32 %v3112_v12, %v3080_v15  ;;  %v3144_v35 = vmul.f32 %v13422_v7, %v13421_v32  ;;  %v3366_v4 = vmul.f32 %v13418_v34, %v13423_v54  ;;  %v13430_v11 = vld [vmem:[#allocation35_spill] sm:$0xff] }
 0x38e   : > { %13420 = vst [vmem:[#allocation41_spill] sm:$0xff] %v11246_v10  ;;  %v4183_v21 = vadd.f32 %v4145_v26, %v4063_v41  ;;  %v13425_v58 = vrot.slane %v13424_v45, 3  ;;  %v11258_v22 = vmul.f32 %v13426_v30, %v13423_v54  ;;  %v3486_v47 = vmul.f32 %v13422_v7, %v13390_v24 }
 0x38f   : > { %v3160_v1 = vadd.f32 %v3144_v35, %v3128_v2  ;;  %v3176_v49 = vmul.f32 %v13428_v43, %v13389_v51  ;;  %v11268_v26 = vmul.f32 %v11264_v31, %v13395_v33  ;;  %v11272_v16 = vmul.f32 %v13430_v11, %v13390_v24  ;;  %v13433_v33 = vld [vmem:[#allocation17_spill] sm:$0xff] }
 0x390   : > { %v4985_v36 = vsel %vm1822_vm2, %v13425_v58, %v4984_v60  ;;  %13427 = vst [vmem:[#allocation27_spill] sm:$0xff] %v11258_v22  ;;  %v4303_v61 = vadd.f32 %v4265_v42, %v4183_v21  ;;  %v13431_v60 = vld [vmem:[#allocation58_spill] sm:$0xff]  ;;  %v3306_v12 = vrot.slane %v3246_v40, 1  ;;  %v12405_v41 = vrot.slane %v11246_v10, 1  ;;  %v13434_v40 = vld [vmem:[#allocation49_spill] sm:$0xff] }
 0x391   : > { %13429 = vst [vmem:[#allocation21_spill] sm:$0xff] %v11268_v26  ;;  %v13432_v15 = vrot.slane %v13431_v60, 4  ;;  %v3192_v2 = vadd.f32 %v3176_v49, %v3160_v1  ;;  %v3426_v35 = vrot.slane %v3366_v4, 1  ;;  %v3606_v45 = vmul.f32 %v13428_v43, %v13394_v0 }
 0x392   : > { %v11282_v58 = vmul.f32 %v13433_v33, %v13394_v0  ;;  %v4423_v8 = vadd.f32 %v4385_v55, %v4303_v61  ;;  %v3546_v42 = vrot.slane %v3486_v47, 1  ;;  %v3726_v60 = vmul.f32 %v11264_v31, %v13434_v40 }
 0x393   : > { %v5105_v46 = vsel %vm2443_vm3, %v13432_v15, %v5104_v23  ;;  %v3224_v23 = vadd.f32 %v11268_v26, %v3192_v2  ;;  %v3846_v4 = vmul.f32 %v13345_v13, %v13326_v48  ;;  %v11293_v1 = vmul.f32 %v13419_v53, %v13326_v48  ;;  %v13436_v15 = vld [vmem:[#allocation11_spill] sm:$0xff] }
 0x394   : > { %v4543_v49 = vadd.f32 %v4505_v25, %v4423_v8  ;;  %v13437_v55 = vrot.slane %v13436_v15, 4  ;;  %v3308_v47 = vsel %vm580_vm0, %v3306_v12, %v12405_v41  ;;  %v3966_v2 = vmul.f32 %v13418_v34, %v13401_v38  ;;  %v13439_v25 = vld [vmem:[#allocation28_spill] sm:$0xff] }
 0x395   : > { %13435 = vst [vmem:[#allocation56_spill] sm:$0xff] %v11293_v1  ;;  %v3344_v21 = vadd.f32 %v3308_v47, %v3224_v23  ;;  %v3666_v24 = vrot.slane %v3606_v45, 1  ;;  %v11306_v48 = vmul.f32 %v13426_v30, %v13401_v38  ;;  %v5525_v15 = vmul.f32 %v13439_v25, %v11129_v59 }
 0x396   : > { %v5225_v61 = vsel %vm2443_vm3, %v13437_v55, %v5224_v9  ;;  %v4663_v8 = vadd.f32 %v4625_v63, %v4543_v49  ;;  %v13440_v9 = vrot.slane %v11258_v22, 1  ;;  %v13441_v12 = vrot.slane %v11272_v16, 1  ;;  %v13443_v22 = vld [vmem:[#allocation24_spill] sm:$0xff] }
 0x397   : > { %13438 = vst [vmem:[#allocation31_spill] sm:$0xff] %v11306_v48  ;;  %v11316_v45 = vrot.slane %v3726_v60, 1  ;;  %v3906_v47 = vrot.slane %v3846_v4, 2  ;;  %v12412_v40 = vrot.slane %v11293_v1, 2  ;;  %v4026_v10 = vrot.slane %v3966_v2, 2 }
 0x398   : > { %v3428_v55 = vsel %vm580_vm0, %v3426_v35, %v13440_v9  ;;  %v3548_v41 = vsel %vm580_vm0, %v3546_v42, %v13441_v12  ;;  %v4783_v38 = vadd.f32 %v4745_v44, %v4663_v8  ;;  %v12411_v63 = vrot.slane %v11306_v48, 2 }
 0x399   : > { %v3464_v23 = vadd.f32 %v3428_v55, %v3344_v21  ;;  %13442 = vst [vmem:[#allocation39_spill] sm:$0xff] %v11316_v45  ;;  %v4086_v49 = vmul.f32 %v13422_v7, %v12586_v57  ;;  %v13444_v26 = vrot.slane %v13443_v22, 4  ;;  %v13445_v42 = vrot.slane %v11282_v58, 1  ;;  %v13446_v22 = vld [vmem:[#allocation37_spill] sm:$0xff] }
 0x39a   : > { %v11330_v60 = vmul.f32 %v13430_v11, %v12586_v57  ;;  %v4903_v44 = vadd.f32 %v4865_v5, %v4783_v38  ;;  %v4206_v4 = vmul.f32 %v13428_v43, %v12589_v62  ;;  %v11336_v7 = vmul.f32 %v13433_v33, %v12589_v62 }
 0x39b   : > { %v5345_v35 = vsel %vm2443_vm3, %v13444_v26, %v5344_v20  ;;  %v3584_v9 = vadd.f32 %v3548_v41, %v3464_v23  ;;  %v3668_v21 = vsel %vm580_vm0, %v3666_v24, %v13445_v42  ;;  %v13447_v2 = vrot.slane %v13446_v22, 4  ;;  %v11364_v22 = vld [vmem:[#allocation2 + $0x180] sm:$0xff] }
 0x39c   : > { %v5584_v26 = vrot.slane %v5525_v15, 4  ;;  %v3908_v24 = vsel %vm1201_vm1, %v3906_v47, %v12412_v40  ;;  %v5023_v8 = vadd.f32 %v4985_v36, %v4903_v44  ;;  %v4028_v38 = vsel %vm1201_vm1, %v4026_v10, %v12411_v63  ;;  %v13449_v10 = vld [vmem:[#allocation55_spill] sm:$0xff] }
 0x39d   : > { %v5465_v20 = vsel %vm2443_vm3, %v13447_v2, %v5464_v50  ;;  %v3704_v41 = vadd.f32 %v3668_v21, %v3584_v9  ;;  %v4146_v5 = vrot.slane %v4086_v49, 2  ;;  %v4326_v55 = vmul.f32 %v11264_v31, %v6518_v56  ;;  %v13448_v50 = vld [vmem:[#allocation15_spill] sm:$0xff] }
 0x39e   : > { %v12418_v23 = vrot.slane %v11330_v60, 2  ;;  %v4446_v15 = vmul.f32 %v13345_v13, %v13448_v50  ;;  %v11355_v9 = vmul.f32 %v13419_v53, %v13448_v50  ;;  %v5143_v36 = vadd.f32 %v5105_v46, %v5023_v8 }
 0x39f   : > { %v3824_v12 = vadd.f32 %v11316_v45, %v3704_v41  ;;  %v4266_v47 = vrot.slane %v4206_v4, 2  ;;  %v4566_v49 = vmul.f32 %v13418_v34, %v13449_v10  ;;  %v11362_v44 = vmul.f32 %v13426_v30, %v13449_v10 }
 0x3a0   : > { %v4686_v2 = vmul.f32 %v11364_v22, %v12634_v27  ;;  %v11370_v41 = vmul.f32 %v13430_v11, %v12634_v27  ;;  %v5263_v46 = vadd.f32 %v5225_v61, %v5143_v36  ;;  %v11372_v4 = vrot.slane %v4326_v55, 2 }
 0x3a1   : > { %v3944_v21 = vadd.f32 %v3908_v24, %v3824_v12  ;;  %v4806_v8 = vmul.f32 %v13428_v43, %v12857_v52  ;;  %v11378_v24 = vmul.f32 %v13433_v33, %v12857_v52  ;;  %v4148_v63 = vsel %vm1201_vm1, %v4146_v5, %v12418_v23 }
 0x3a2   : > { %v4506_v40 = vrot.slane %v4446_v15, 3  ;;  %v12422_v42 = vrot.slane %v11355_v9, 3  ;;  %v5383_v11 = vadd.f32 %v5345_v35, %v5263_v46  ;;  %v13450_v61 = vrot.slane %v11336_v7, 2  ;;  %v13451_v35 = vld [vmem:[#allocation36_spill] sm:$0xff] }
 0x3a3   : > { %v4064_v12 = vadd.f32 %v4028_v38, %v3944_v21  ;;  %v4626_v36 = vrot.slane %v4566_v49, 3  ;;  %v12421_v1 = vrot.slane %v11362_v44, 3  ;;  %v4746_v45 = vrot.slane %v4686_v2, 3 }
 0x3a4   : > { %v4268_v55 = vsel %vm1201_vm1, %v4266_v47, %v13450_v61  ;;  %v12420_v52 = vrot.slane %v11370_v41, 3  ;;  %v5503_v38 = vadd.f32 %v5465_v20, %v5383_v11  ;;  %v4866_v21 = vrot.slane %v4806_v8, 3  ;;  %v11425_v61 = vld [vmem:[#allocation2 + $0x188] sm:$0xff] }
 0x3a5   : > { %v4184_v48 = vadd.f32 %v4148_v63, %v4064_v12  ;;  %v12419_v5 = vrot.slane %v11378_v24, 3  ;;  %v4926_v15 = vmul.f32 %v11264_v31, %v6573_v6  ;;  %v13452_v46 = vrot.slane %v13451_v35, 4 }
 0x3a6   : > { %v4508_v63 = vsel %vm1822_vm2, %v4506_v40, %v12422_v42  ;;  %v5046_v2 = vmul.f32 %v13345_v13, %v12607_v18  ;;  %v11402_v20 = vmul.f32 %v13419_v53, %v12607_v18  ;;  %v5166_v8 = vmul.f32 %v13418_v34, %v6578_v17 }
 0x3a7   : > { %v5585_v23 = vsel %vm2443_vm3, %v13452_v46, %v5584_v26  ;;  %v4304_v47 = vadd.f32 %v4268_v55, %v4184_v48  ;;  %v4628_v48 = vsel %vm1822_vm2, %v4626_v36, %v12421_v1  ;;  %v11412_v40 = vmul.f32 %v13426_v30, %v6578_v17 }
 0x3a8   : > { %v5623_v49 = vadd.f32 %v5585_v23, %v5503_v38  ;;  %v5286_v13 = vmul.f32 %v11364_v22, %v6593_v28  ;;  %v4748_v26 = vsel %vm1822_vm2, %v4746_v45, %v12420_v52  ;;  %v4868_v23 = vsel %vm1822_vm2, %v4866_v21, %v12419_v5 }
 0x3a9   : > { %v4424_v12 = vadd.f32 %v11372_v4, %v4304_v47  ;;  %13453 = vst [vmem:[#allocation32_spill] sm:$0xff] %v11412_v40  ;;  %v11423_v11 = vrot.slane %v4926_v15, 3  ;;  %v11429_v55 = vmul.f32 %v11425_v61, %v6593_v28  ;;  %v5406_v38 = vmul.f32 %v13428_v43, %v6597_v3  ;;  %v13456_v15 = vld [vmem:[#allocation45_spill] sm:$0xff] }
 0x3aa   : > { %5786 = vst [vmem:[%s6814_s20 + $0xd8] sm:$0xff] %v5623_v49  ;;  %v11435_v35 = vmul.f32 %v13433_v33, %v6597_v3  ;;  %v3081_v45 = vmul.f32 %v13419_v53, %v13118_v19  ;;  %v5106_v21 = vrot.slane %v5046_v2, 4  ;;  %v5226_v46 = vrot.slane %v5166_v8, 4  ;;  %v13457_v3 = vld [vmem:[#allocation30_spill] sm:$0xff] }
 0x3ab   : > { %13454 = vst [vmem:[#allocation53_spill] sm:$0xff] %v11429_v55  ;;  %v4544_v36 = vadd.f32 %v4508_v63, %v4424_v12  ;;  %v3113_v47 = vmul.f32 %v13426_v30, %v13275_v37  ;;  %v5346_v12 = vrot.slane %v5286_v13, 4  ;;  %v3248_v5 = vmul.f32 %v13388_v29, %v13352_v14 }
 0x3ac   : > { %13455 = vst [vmem:[#allocation60_spill] sm:$0xff] %v11435_v35  ;;  %v5526_v52 = vmul.f32 %v11264_v31, %v13439_v25  ;;  %v3145_v53 = vmul.f32 %v11425_v61, %v13421_v32  ;;  %v3368_v2 = vmul.f32 %v11212_v39, %v13423_v54  ;;  %v3177_v63 = vmul.f32 %v13433_v33, %v13389_v51  ;;  %v13462_v33 = vld [vmem:[#allocation21_spill] sm:$0xff] }
 0x3ad   : > { %v4664_v49 = vadd.f32 %v4628_v48, %v4544_v36  ;;  %v3129_v1 = vadd.f32 %v3113_v47, %v3081_v45  ;;  %v5466_v48 = vrot.slane %v5406_v38, 4  ;;  %v3488_v25 = vmul.f32 %v13457_v3, %v13456_v15  ;;  %v11457_v47 = vld [vmem:[#allocation2 + $0x1c0] sm:$0xf] }
 0x3ae   : > { %v3309_v14 = vrot.slane %v3248_v5, 1  ;;  %v3608_v54 = vmul.f32 %v11129_v59, %v13394_v0  ;;  %v13459_v42 = vrot.slane %v11412_v40, 4  ;;  %v13461_v0 = vrot.slane %v11435_v35, 4 }
 0x3af   : > { %v4784_v8 = vadd.f32 %v4748_v26, %v4664_v49  ;;  %v3161_v13 = vadd.f32 %v3145_v53, %v3129_v1  ;;  %v13458_v26 = vrot.slane %v11402_v20, 4  ;;  %v11464_v49 = vrot.slane %v5526_v52, 4 }
 0x3b0   : > { %v3429_v53 = vrot.slane %v3368_v2, 1  ;;  %v5468_v15 = vsel %vm2443_vm3, %v5466_v48, %v13461_v0  ;;  %v3549_v52 = vrot.slane %v3488_v25, 1  ;;  %v13469_v48 = vld [vmem:[#allocation14_spill] sm:$0xff] }
 0x3b1   : > { %v4904_v45 = vadd.f32 %v4868_v23, %v4784_v8  ;;  %v5108_v38 = vsel %vm2443_vm3, %v5106_v21, %v13458_v26  ;;  %v3193_v1 = vadd.f32 %v3177_v63, %v3161_v13  ;;  %v5228_v23 = vsel %vm2443_vm3, %v5226_v46, %v13459_v42  ;;  %v13463_v26 = vld [vmem:[#allocation49_spill] sm:$0xff] }
 0x3b2   : > { %v13460_v8 = vrot.slane %v11429_v55, 4  ;;  %v3728_v63 = vmul.f32 %v11457_v47, %v13463_v26  ;;  %v13464_v13 = vld [vmem:[#allocation41_spill] sm:$0xff]  ;;  %v3669_v42 = vrot.slane %v3608_v54, 1  ;;  %v3968_v25 = vmul.f32 %v11212_v39, %v13469_v48 }
 0x3b3   : > { %v5024_v36 = vadd.f32 %v11423_v11, %v4904_v45  ;;  %v3225_v21 = vadd.f32 %v13462_v33, %v3193_v1  ;;  %v13465_v45 = vrot.slane %v13464_v13, 1  ;;  %v13466_v46 = vld [vmem:[#allocation13_spill] sm:$0xff]  ;;  %v4088_v1 = vmul.f32 %v13457_v3, %v12586_v57 }
 0x3b4   : > { %v5348_v5 = vsel %vm2443_vm3, %v5346_v12, %v13460_v8  ;;  %v3848_v55 = vmul.f32 %v13388_v29, %v13466_v46  ;;  %v13467_v8 = vld [vmem:[#allocation27_spill] sm:$0xff]  ;;  %v4448_v54 = vmul.f32 %v13388_v29, %v13448_v50  ;;  %v4568_v13 = vmul.f32 %v11212_v39, %v13449_v10 }
 0x3b5   : > { %v5144_v2 = vadd.f32 %v5108_v38, %v5024_v36  ;;  %v3310_v40 = vsel %vm580_vm0, %v13465_v45, %v3309_v14  ;;  %v13468_v35 = vrot.slane %v13467_v8, 1  ;;  %v4208_v38 = vmul.f32 %v11129_v59, %v12589_v62 }
 0x3b6   : > { %v3345_v12 = vadd.f32 %v3310_v40, %v3225_v21  ;;  %v4328_v14 = vmul.f32 %v11457_v47, %v6518_v56  ;;  %v13470_v21 = vrot.slane %v11272_v16, 1  ;;  %v3909_v8 = vrot.slane %v3848_v55, 2 }
 0x3b7   : > { %v3430_v0 = vsel %vm580_vm0, %v13468_v35, %v3429_v53  ;;  %v5264_v36 = vadd.f32 %v5228_v23, %v5144_v2  ;;  %v3789_v53 = vrot.slane %v3728_v63, 1  ;;  %v13471_v23 = vrot.slane %v11282_v58, 1 }
 0x3b8   : > { %v3465_v40 = vadd.f32 %v3430_v0, %v3345_v12  ;;  %v3550_v35 = vsel %vm580_vm0, %v13470_v21, %v3549_v52  ;;  %v4688_v56 = vmul.f32 %v13457_v3, %v12634_v27  ;;  %v4029_v50 = vrot.slane %v3968_v25, 2  ;;  %v13472_v0 = vld [vmem:[#allocation57_spill] sm:$0xff]  ;;  %v13474_v25 = vld [vmem:[#allocation56_spill] sm:$0xff] }
 0x3b9   : > { %v5384_v45 = vadd.f32 %v5348_v5, %v5264_v36  ;;  %v3670_v2 = vsel %vm580_vm0, %v13471_v23, %v3669_v42  ;;  %v4149_v12 = vrot.slane %v4088_v1, 2  ;;  %v4808_v16 = vmul.f32 %v11129_v59, %v13472_v0  ;;  %v13473_v36 = vld [vmem:[#allocation39_spill] sm:$0xff] }
 0x3ba   : > { %v3585_v26 = vadd.f32 %v3550_v35, %v3465_v40  ;;  %v4269_v63 = vrot.slane %v4208_v38, 2  ;;  %v4389_v21 = vrot.slane %v4328_v14, 2  ;;  %v4509_v10 = vrot.slane %v4448_v54, 3  ;;  %v13476_v14 = vld [vmem:[#allocation31_spill] sm:$0xff] }
 0x3bb   : > { %v5504_v52 = vadd.f32 %v5468_v15, %v5384_v45  ;;  %v3790_v58 = vsel %vm580_vm0, %v13473_v36, %v3789_v53  ;;  %v4629_v42 = vrot.slane %v4568_v13, 3  ;;  %v4928_v55 = vmul.f32 %v11457_v47, %v6573_v6 }
 0x3bc   : > { %v3705_v5 = vadd.f32 %v3670_v2, %v3585_v26  ;;  %v13475_v1 = vrot.slane %v13474_v25, 2  ;;  %v4749_v23 = vrot.slane %v4688_v56, 3  ;;  %v5048_v15 = vmul.f32 %v13388_v29, %v12607_v18 }
 0x3bd   : > { %v5624_v40 = vadd.f32 %v11464_v49, %v5504_v52  ;;  %v13477_v26 = vrot.slane %v13476_v14, 2  ;;  %v4869_v53 = vrot.slane %v4808_v16, 3  ;;  %v5168_v13 = vmul.f32 %v11212_v39, %v6578_v17 }
 0x3be   : > { %v3910_v35 = vsel %vm1201_vm1, %v13475_v1, %v3909_v8  ;;  %v3825_v38 = vadd.f32 %v3790_v58, %v3705_v5  ;;  %v13478_v45 = vrot.slane %v11330_v60, 2  ;;  %v13479_v8 = vrot.slane %v11336_v7, 2 }
 0x3bf   : > { %v4030_v54 = vsel %vm1201_vm1, %v13477_v26, %v4029_v50  ;;  %5787 = vst [vmem:[%s6814_s20 + $0xe0] sm:$0xff] %v5624_v40  ;;  %v4390_v29 = vsel %vm1201_vm1, %v11372_v4, %v4389_v21  ;;  %v13480_v52 = vrot.slane %v11355_v9, 3  ;;  %v13481_v5 = vrot.slane %v11362_v44, 3 }
 0x3c0   : > { %v4150_v2 = vsel %vm1201_vm1, %v13478_v45, %v4149_v12  ;;  %v4270_v56 = vsel %vm1201_vm1, %v13479_v8, %v4269_v63  ;;  %v3945_v16 = vadd.f32 %v3910_v35, %v3825_v38  ;;  %v4989_v40 = vrot.slane %v4928_v55, 3 }
 0x3c1   : > { %v4510_v50 = vsel %vm1822_vm2, %v13480_v52, %v4509_v10  ;;  %v4630_v58 = vsel %vm1822_vm2, %v13481_v5, %v4629_v42  ;;  %v3082_v60 = vmul.f32 %v13418_v34, %v13118_v19  ;;  %v13482_v7 = vrot.slane %v11370_v41, 3 }
 0x3c2   : > { %v5109_v63 = vrot.slane %v5048_v15, 4  ;;  %v11546_v21 = vmul.f32 %v13457_v3, %v6593_v28  ;;  %v3114_v9 = vmul.f32 %v11364_v22, %v13275_v37  ;;  %v4065_v10 = vadd.f32 %v4030_v54, %v3945_v16  ;;  %v13484_v15 = vld [vmem:[#allocation9_spill] sm:$0xff]  ;;  %v13485_v54 = vld [vmem:[#allocation12_spill] sm:$0xff] }
 0x3c3   : > { %v4750_v12 = vsel %vm1822_vm2, %v13482_v7, %v4749_v23  ;;  %v13483_v44 = vrot.slane %v11378_v24, 3  ;;  %v5229_v55 = vrot.slane %v5168_v13, 4  ;;  %v3146_v25 = vmul.f32 %v13428_v43, %v13421_v32  ;;  %v13487_v16 = vld [vmem:[#allocation17_spill] sm:$0xff] }
 0x3c4   : > { %v3083_v41 = vmul.f32 %v13426_v30, %v13118_v19  ;;  %v3115_v1 = vmul.f32 %v11425_v61, %v13275_v37  ;;  %v3130_v3 = vadd.f32 %v3114_v9, %v3082_v60  ;;  %v3178_v35 = vmul.f32 %v11264_v31, %v13389_v51 }
 0x3c5   : > { %v4870_v42 = vsel %vm1822_vm2, %v13483_v44, %v4869_v53  ;;  %v4185_v23 = vadd.f32 %v4150_v2, %v4065_v10  ;;  %v4990_v24 = vsel %vm1822_vm2, %v11423_v11, %v4989_v40  ;;  %v3249_v38 = vmul.f32 %v13418_v34, %v13484_v15  ;;  %v13490_v44 = vld [vmem:[#allocation61_spill] sm:$0xff] }
 0x3c6   : > { %v11567_v14 = vmul.f32 %v13426_v30, %v13484_v15  ;;  %v5349_v19 = vrot.slane %v11546_v21, 4  ;;  %v3162_v26 = vadd.f32 %v3146_v25, %v3130_v3  ;;  %v3369_v37 = vmul.f32 %v11364_v22, %v13485_v54  ;;  %v13488_v21 = vld [vmem:[#allocation32_spill] sm:$0xff] }
 0x3c7   : > { %v11574_v51 = vmul.f32 %v11425_v61, %v13485_v54  ;;  %v4305_v53 = vadd.f32 %v4270_v56, %v4185_v23  ;;  %v13486_v13 = vrot.slane %v11402_v20, 4  ;;  %v3311_v2 = vrot.slane %v3249_v38, 1  ;;  %v13493_v38 = vld [vmem:[#allocation48_spill] sm:$0xff] }
 0x3c8   : > { %v3312_v8 = vrot.slane %v11567_v14, 1  ;;  %v3131_v52 = vadd.f32 %v3115_v1, %v3083_v41  ;;  %v3147_v5 = vmul.f32 %v13487_v16, %v13421_v32  ;;  %v3194_v40 = vadd.f32 %v3178_v35, %v3162_v26  ;;  %v13492_v1 = vld [vmem:[#allocation45_spill] sm:$0xff] }
 0x3c9   : > { %v5110_v45 = vsel %vm2443_vm3, %v13486_v13, %v5109_v63  ;;  %v3431_v60 = vrot.slane %v3369_v37, 1  ;;  %v4425_v7 = vadd.f32 %v4390_v29, %v4305_v53  ;;  %v13489_v9 = vrot.slane %v13488_v21, 4  ;;  %v13491_v63 = vld [vmem:[#allocation28_spill] sm:$0xff] }
 0x3ca   : > { %v5408_v56 = vmul.f32 %v11129_v59, %v13490_v44  ;;  %v12438_v20 = vrot.slane %v11574_v51, 1  ;;  %v11590_v25 = vmul.f32 %v13491_v63, %v11457_v47  ;;  %v3226_v41 = vadd.f32 %v13462_v33, %v3194_v40 }
 0x3cb   : > { %v5230_v10 = vsel %vm2443_vm3, %v13489_v9, %v5229_v55  ;;  %v3251_v32 = vmul.f32 %v11212_v39, %v13484_v15  ;;  %v3489_v29 = vmul.f32 %v13428_v43, %v13492_v1  ;;  %v4545_v3 = vadd.f32 %v4510_v50, %v4425_v7 }
 0x3cc   : > { %v3313_v55 = vsel %vm580_vm0, %v3311_v2, %v3312_v8  ;;  %v11600_v23 = vmul.f32 %v13487_v16, %v13492_v1  ;;  %v11604_v14 = vmul.f32 %v11264_v31, %v13493_v38  ;;  %v3163_v26 = vadd.f32 %v3147_v5, %v3131_v52 }
 0x3cd   : > { %v3346_v37 = vadd.f32 %v3313_v55, %v3226_v41  ;;  %v3433_v15 = vsel %vm580_vm0, %v3431_v60, %v12438_v20  ;;  %v3551_v53 = vrot.slane %v3489_v29, 1  ;;  %v4665_v13 = vadd.f32 %v4630_v58, %v4545_v3 }
 0x3ce   : > { %v12437_v50 = vrot.slane %v11600_v23, 1  ;;  %v12436_v2 = vrot.slane %v11604_v14, 1  ;;  %v3849_v40 = vmul.f32 %v13418_v34, %v13466_v46  ;;  %v5469_v7 = vrot.slane %v5408_v56, 4 }
 0x3cf   : > { %v3314_v21 = vrot.slane %v3251_v32, 1  ;;  %v3466_v9 = vadd.f32 %v3433_v15, %v3346_v37  ;;  %v11615_v52 = vmul.f32 %v13426_v30, %v13466_v46  ;;  %v4785_v5 = vadd.f32 %v4750_v12, %v4665_v13  ;;  %v13494_v15 = vld [vmem:[#allocation53_spill] sm:$0xff] }
 0x3d0   : > { %v3553_v60 = vsel %vm580_vm0, %v3551_v53, %v12437_v50  ;;  %v3969_v58 = vmul.f32 %v11364_v22, %v13469_v48  ;;  %v3195_v41 = vadd.f32 %v3178_v35, %v3163_v26  ;;  %v3911_v3 = vrot.slane %v3849_v40, 2 }
 0x3d1   : > { %v3586_v29 = vadd.f32 %v3553_v60, %v3466_v9  ;;  %v11624_v56 = vmul.f32 %v11425_v61, %v13469_v48  ;;  %v4905_v32 = vadd.f32 %v4870_v42, %v4785_v5  ;;  %v12440_v55 = vrot.slane %v11615_v52, 2  ;;  %v11643_v9 = vld [vmem:[#allocation2 + $0x190] sm:$0xf] }
 0x3d2   : > { %v4089_v12 = vmul.f32 %v13428_v43, %v12586_v57  ;;  %v11631_v37 = vmul.f32 %v13487_v16, %v12586_v57  ;;  %v13495_v53 = vrot.slane %v13494_v15, 4  ;;  %v5589_v26 = vrot.slane %v11590_v25, 4 }
 0x3d3   : > { %v3706_v13 = vadd.f32 %v12436_v2, %v3586_v29  ;;  %v11641_v42 = vmul.f32 %v11264_v31, %v12589_v62  ;;  %v5025_v40 = vadd.f32 %v4990_v24, %v4905_v32  ;;  %v3371_v43 = vmul.f32 %v11643_v9, %v13485_v54  ;;  %v13496_v2 = vld [vmem:[#allocation60_spill] sm:$0xff] }
 0x3d4   : > { %v5350_v35 = vsel %vm2443_vm3, %v13495_v53, %v5349_v19  ;;  %v4031_v5 = vrot.slane %v3969_v58, 2  ;;  %v12439_v60 = vrot.slane %v11624_v56, 2  ;;  %v3227_v19 = vadd.f32 %v13462_v33, %v3195_v41  ;;  %v13498_v33 = vld [vmem:[#allocation15_spill] sm:$0xff] }
 0x3d5   : > { %v3826_v25 = vadd.f32 %v13473_v36, %v3706_v13  ;;  %v4151_v15 = vrot.slane %v4089_v12, 2  ;;  %v12441_v29 = vrot.slane %v11631_v37, 2  ;;  %v5145_v53 = vadd.f32 %v5110_v45, %v5025_v40 }
 0x3d6   : > { %v13497_v50 = vrot.slane %v13496_v2, 4  ;;  %v3315_v32 = vsel %vm580_vm0, %v3312_v8, %v3314_v21  ;;  %v3913_v54 = vsel %vm1201_vm1, %v3911_v3, %v12440_v55  ;;  %v4271_v20 = vrot.slane %v11641_v42, 2  ;;  %v13499_v8 = vld [vmem:[#allocation55_spill] sm:$0xff] }
 0x3d7   : > { %v3946_v58 = vadd.f32 %v3913_v54, %v3826_v25  ;;  %v4449_v41 = vmul.f32 %v13418_v34, %v13498_v33  ;;  %v11663_v12 = vmul.f32 %v13426_v30, %v13498_v33  ;;  %v5265_v45 = vadd.f32 %v5230_v10, %v5145_v53  ;;  %v5916_v10 = vld [vmem:[#allocation2 + $0x198] sm:$0xff] }
 0x3d8   : > { %v5470_v24 = vsel %vm2443_vm3, %v13497_v50, %v5469_v7  ;;  %v4033_v50 = vsel %vm1201_vm1, %v4031_v5, %v12439_v60  ;;  %v4569_v2 = vmul.f32 %v11364_v22, %v13499_v8  ;;  %v11672_v7 = vmul.f32 %v11425_v61, %v13499_v8 }
 0x3d9   : > { %v3347_v21 = vadd.f32 %v3315_v32, %v3227_v19  ;;  %v3434_v3 = vrot.slane %v3371_v43, 1  ;;  %v4066_v13 = vadd.f32 %v4033_v50, %v3946_v58  ;;  %v4153_v40 = vsel %vm1201_vm1, %v4151_v15, %v12441_v29  ;;  %v11696_v29 = vld [vmem:[#allocation2 + $0x1d8] sm:$0xf] }
 0x3da   : > { %v5385_v25 = vadd.f32 %v5350_v35, %v5265_v45  ;;  %v4689_v53 = vmul.f32 %v5916_v10, %v12634_v27  ;;  %v11680_v5 = vmul.f32 %v13487_v16, %v12634_v27  ;;  %v4511_v60 = vrot.slane %v4449_v41, 3 }
 0x3db   : > { %v4186_v54 = vadd.f32 %v4153_v40, %v4066_v13  ;;  %v4512_v55 = vrot.slane %v11663_v12, 3  ;;  %v11685_v43 = vmul.f32 %v11264_v31, %v13472_v0  ;;  %v4631_v32 = vrot.slane %v4569_v2, 3 }
 0x3dc   : > { %v5505_v19 = vadd.f32 %v5470_v24, %v5385_v25  ;;  %v4632_v35 = vrot.slane %v11672_v7, 3  ;;  %v5590_v15 = vsel %vm2443_vm3, %v11464_v49, %v5589_v26  ;;  %v13500_v58 = vrot.slane %v11574_v51, 1 }
 0x3dd   : > { %v4306_v41 = vadd.f32 %v4271_v20, %v4186_v54  ;;  %v4751_v13 = vrot.slane %v4689_v53, 3  ;;  %v4752_v40 = vrot.slane %v11680_v5, 3  ;;  %v4513_v26 = vsel %vm1822_vm2, %v4511_v60, %v4512_v55 }
 0x3de   : > { %v3435_v16 = vsel %vm580_vm0, %v13500_v58, %v3434_v3  ;;  %v5625_v45 = vadd.f32 %v5590_v15, %v5505_v19  ;;  %v4871_v51 = vrot.slane %v11685_v43, 3  ;;  %v3491_v2 = vmul.f32 %v11129_v59, %v13492_v1  ;;  %v13501_v19 = vld [vmem:[#allocation49_spill] sm:$0xff] }
 0x3df   : > { %v3467_v50 = vadd.f32 %v3435_v16, %v3347_v21  ;;  %v4426_v24 = vadd.f32 %v11372_v4, %v4306_v41  ;;  %v4633_v21 = vsel %vm1822_vm2, %v4631_v32, %v4632_v35  ;;  %v5049_v3 = vmul.f32 %v13418_v34, %v12607_v18 }
 0x3e0   : > { %5788 = vst [vmem:[%s6814_s20 + $0xe8] sm:$0xff] %v5625_v45  ;;  %v11713_v25 = vmul.f32 %v13426_v30, %v12607_v18  ;;  %v3611_v60 = vmul.f32 %v11457_v47, %v13493_v38  ;;  %v5169_v54 = vmul.f32 %v11364_v22, %v6578_v17  ;;  %v3554_v1 = vrot.slane %v3491_v2, 1 }
 0x3e1   : > { %v4546_v53 = vadd.f32 %v4513_v26, %v4426_v24  ;;  %v3731_v15 = vmul.f32 %v11696_v29, %v13501_v19  ;;  %v4753_v32 = vsel %vm1822_vm2, %v4751_v13, %v4752_v40  ;;  %v3851_v30 = vmul.f32 %v11212_v39, %v13466_v46 }
 0x3e2   : > { %v3674_v34 = vrot.slane %v3611_v60, 1  ;;  %v13502_v16 = vrot.slane %v11600_v23, 1  ;;  %v3971_v22 = vmul.f32 %v11643_v9, %v13469_v48  ;;  %v5111_v45 = vrot.slane %v5049_v3, 4 }
 0x3e3   : > { %v4666_v58 = vadd.f32 %v4633_v21, %v4546_v53  ;;  %v3794_v41 = vrot.slane %v3731_v15, 1  ;;  %v11733_v24 = vmul.f32 %v11425_v61, %v6578_v17  ;;  %v13503_v13 = vrot.slane %v11604_v14, 1  ;;  %v5917_v53 = vld [vmem:[#allocation2 + $0x1a0] sm:$0xff] }
 0x3e4   : > { %v3555_v38 = vsel %vm580_vm0, %v13502_v16, %v3554_v1  ;;  %v3914_v21 = vrot.slane %v3851_v30, 2  ;;  %v4091_v60 = vmul.f32 %v11129_v59, %v12586_v57  ;;  %v5112_v48 = vrot.slane %v11713_v25, 4  ;;  %v13505_v16 = vld [vmem:[#allocation54_spill] sm:$0xff] }
 0x3e5   : > { %v3587_v26 = vadd.f32 %v3555_v38, %v3467_v50  ;;  %v3675_v2 = vsel %vm580_vm0, %v13503_v13, %v3674_v34  ;;  %v4786_v46 = vadd.f32 %v4753_v32, %v4666_v58  ;;  %v3795_v23 = vsel %vm580_vm0, %v13473_v36, %v3794_v41 }
 0x3e6   : > { %v5289_v3 = vmul.f32 %v5916_v10, %v6593_v28  ;;  %v11745_v61 = vmul.f32 %v5917_v53, %v6593_v28  ;;  %v4034_v1 = vrot.slane %v3971_v22, 2  ;;  %v4211_v36 = vmul.f32 %v11457_v47, %v12589_v62 }
 0x3e7   : > { %v3707_v50 = vadd.f32 %v3675_v2, %v3587_v26  ;;  %v4906_v14 = vadd.f32 %v4871_v51, %v4786_v46  ;;  %v5231_v19 = vrot.slane %v5169_v54, 4  ;;  %v5232_v15 = vrot.slane %v11733_v24, 4 }
 0x3e8   : > { %v11754_v57 = vmul.f32 %v11264_v31, %v13490_v44  ;;  %v13504_v34 = vrot.slane %v11615_v52, 2  ;;  %v4154_v58 = vrot.slane %v4091_v60, 2  ;;  %v4331_v38 = vmul.f32 %v11696_v29, %v13505_v16 }
 0x3e9   : > { %v3827_v10 = vadd.f32 %v3795_v23, %v3707_v50  ;;  %v5026_v32 = vadd.f32 %v11423_v11, %v4906_v14  ;;  %v5113_v62 = vsel %vm2443_vm3, %v5111_v45, %v5112_v48  ;;  %v5351_v54 = vrot.slane %v5289_v3, 4 }
 0x3ea   : > { %v3915_v30 = vsel %vm1201_vm1, %v13504_v34, %v3914_v21  ;;  %v5352_v41 = vrot.slane %v11745_v61, 4  ;;  %v13506_v24 = vrot.slane %v11624_v56, 2  ;;  %v4274_v52 = vrot.slane %v4211_v36, 2 }
 0x3eb   : > { %v3947_v31 = vadd.f32 %v3915_v30, %v3827_v10  ;;  %v5146_v22 = vadd.f32 %v5113_v62, %v5026_v32  ;;  %v4451_v13 = vmul.f32 %v11212_v39, %v13498_v33  ;;  %v5233_v2 = vsel %vm2443_vm3, %v5231_v19, %v5232_v15 }
 0x3ec   : > { %v4035_v26 = vsel %vm1201_vm1, %v13506_v24, %v4034_v1  ;;  %v5471_v46 = vrot.slane %v11754_v57, 4  ;;  %v13507_v45 = vrot.slane %v11631_v37, 2  ;;  %v4394_v3 = vrot.slane %v4331_v38, 2 }
 0x3ed   : > { %v4067_v23 = vadd.f32 %v4035_v26, %v3947_v31  ;;  %v5266_v21 = vadd.f32 %v5233_v2, %v5146_v22  ;;  %v4571_v56 = vmul.f32 %v11643_v9, %v13499_v8  ;;  %v5353_v53 = vsel %vm2443_vm3, %v5351_v54, %v5352_v41 }
 0x3ee   : > { %v4155_v60 = vsel %vm1201_vm1, %v13507_v45, %v4154_v58  ;;  %v4275_v33 = vsel %vm1201_vm1, %v4271_v20, %v4274_v52  ;;  %v4514_v14 = vrot.slane %v4451_v13, 3  ;;  %v4691_v1 = vmul.f32 %v11129_v59, %v12634_v27 }
 0x3ef   : > { %v4187_v61 = vadd.f32 %v4155_v60, %v4067_v23  ;;  %v5386_v50 = vadd.f32 %v5353_v53, %v5266_v21  ;;  %v4395_v19 = vsel %vm1201_vm1, %v11372_v4, %v4394_v3  ;;  %v4634_v57 = vrot.slane %v4571_v56, 3 }
 0x3f0   : > { %v4811_v8 = vmul.f32 %v11457_v47, %v13472_v0  ;;  %v4515_v20 = vsel %vm1822_vm2, %v4512_v55, %v4514_v14  ;;  %v4754_v42 = vrot.slane %v4691_v1, 3  ;;  %v4931_v27 = vmul.f32 %v11696_v29, %v6573_v6 }
 0x3f1   : > { %v4307_v37 = vadd.f32 %v4275_v33, %v4187_v61  ;;  %v5506_v36 = vadd.f32 %v5471_v46, %v5386_v50  ;;  %v4635_v4 = vsel %vm1822_vm2, %v4632_v35, %v4634_v57  ;;  %v5051_v0 = vmul.f32 %v11212_v39, %v12607_v18 }
 0x3f2   : > { %v4874_v30 = vrot.slane %v4811_v8, 3  ;;  %v4755_v12 = vsel %vm1822_vm2, %v4752_v40, %v4754_v42  ;;  %v4994_v55 = vrot.slane %v4931_v27, 3  ;;  %v5171_v16 = vmul.f32 %v11643_v9, %v6578_v17 }
 0x3f3   : > { %v4427_v10 = vadd.f32 %v4395_v19, %v4307_v37  ;;  %v5626_v32 = vadd.f32 %v11464_v49, %v5506_v36  ;;  %v5114_v38 = vrot.slane %v5051_v0, 4  ;;  %v5291_v35 = vmul.f32 %v11129_v59, %v6593_v28 }
 0x3f4   : > { %v4875_v7 = vsel %vm1822_vm2, %v4871_v51, %v4874_v30  ;;  %v4995_v39 = vsel %vm1822_vm2, %v11423_v11, %v4994_v55  ;;  %v5234_v5 = vrot.slane %v5171_v16, 4  ;;  %v5411_v40 = vmul.f32 %v11457_v47, %v13490_v44 }
 0x3f5   : > { %v4547_v34 = vadd.f32 %v4515_v20, %v4427_v10  ;;  %5789 = vst [vmem:[%s6814_s20 + $0xf0] sm:$0xff] %v5626_v32  ;;  %v5115_v9 = vsel %vm2443_vm3, %v5112_v48, %v5114_v38  ;;  %v5354_v43 = vrot.slane %v5291_v35, 4  ;;  %v5531_v51 = vmul.f32 %v13491_v63, %v11696_v29 }
 0x3f6   : > { %v5235_v59 = vsel %vm2443_vm3, %v5232_v15, %v5234_v5  ;;  %v5474_v62 = vrot.slane %v5411_v40, 4 }
 0x3f7   : > { %v4667_v58 = vadd.f32 %v4635_v4, %v4547_v34  ;;  %v5355_v54 = vsel %vm2443_vm3, %v5352_v41, %v5354_v43  ;;  %v5594_v47 = vrot.slane %v5531_v51, 4 }
 0x3f8   : > { %v5475_v25 = vsel %vm2443_vm3, %v5471_v46, %v5474_v62 }
 0x3f9   : > { %v4787_v6 = vadd.f32 %v4755_v12, %v4667_v58  ;;  %v5595_v63 = vsel %vm2443_vm3, %v11464_v49, %v5594_v47 }
 0x3fb   : > { %v4907_v18 = vadd.f32 %v4875_v7, %v4787_v6 }
 0x3fd   : > { %v5027_v17 = vadd.f32 %v4995_v39, %v4907_v18 }
 0x3ff   : > { %v5147_v28 = vadd.f32 %v5115_v9, %v5027_v17 }
 0x401   : > { %v5267_v11 = vadd.f32 %v5235_v59, %v5147_v28 }
 0x403   : > { %v5387_v44 = vadd.f32 %v5355_v54, %v5267_v11 }
 0x405   : > { %v5507_v48 = vadd.f32 %v5475_v25, %v5387_v44 }
 0x407   : > { %v5627_v29 = vadd.f32 %v5595_v63, %v5507_v48 }
 0x409   : > { %5790 = vst [vmem:[%s6814_s20 + $0xf8] sm:$0xff] %v5627_v29 }
 0x40a   : > { %5961 = shalt.err (!%p5958_p5)
}
 0x40b   : > { %s5962_s20 = scalar_lea.hbm %s11829_s18, 4096  ;;  %s5966_s7 = scalar_lea.hbm %s11883_s2, 8192 }
 0x40c   : > { %p5963_p4 = scmp.ne.s32.totalorder %s11829_s18, %s5962_s20  ;;  %p5967_p12 = scmp.lt.u32.totalorder %s11829_s18, %s11883_s2 }
 0x40d   : > { %p5968_p1 = scmp.lt.u32.totalorder %s5966_s7, %s5962_s20  ;;  %p5970_p8 = scmp.lt.u32.totalorder %s5962_s20, %s11829_s18 }
 0x40e   : > { %p5964_p7 = pnand %p5963_p4, %p13508_p9 }
 0x40f   : > { %p5969_p3 = por %p5968_p1, %p5967_p12 }
 0x410   : > { %p5965_p10 = pneg %p5964_p7 }
 0x411   : > { %p5971_p11 = por %p5970_p8, %p5969_p3 }
 0x413   : > { %p5972_p0 = pnand %p5971_p11, %p5965_p10 }
 0x415   : > { %5975 = shalt.err (!%p5972_p0)
}
 0x416   : > { %s6037_s21 = smov 128   ;;  %s6038_s30 = smov 8  }
 0x417   : > { %5800 = dma.vmem_to_hbm [thread:$0]  (%p13508_p9), %s11831_s5, 4096, %s11829_s18, %s5647_s12, %s6037_s21, %s6037_s21, %s6038_s30  }
 0x418 PF: > { %s5676_s4 = sand.u32 1, %s6010_s9   ;;  %p13509_p6 = scmp.ne.s32.totalorder %s12445_s24, 0 }
 0x419   : > { %p13510_p13 = scmp.ge.s32.totalorder %s6030_s14, 2  ;;  %s5677_s6 = scalar_lea.sflag [#allocation5], %s5676_s4 }
 0x41b   : > { %p5807_p2 = pnand %p13510_p13, %p13509_p6 }
 0x41d   : > { %6005 = dma.done.wait (!%p5807_p2), %s5677_s6, 4096  }
 0x41e   : > { %6007 = vsyncadd (!%p5807_p2), %s5677_s6, 4294963200  ;;  %s18_s14 = sadd.s32 1, %s6030_s14   ;;  %s13511_s9 = smov %s6014_s10 }
 0x41f   : > { %p15_p5 = scmp.ge.s32.totalorder %s18_s14, 4   ;;  %s13512_s10 = smov %s6018_s11 }
 0x420   : > { %s13513_s11 = smov %s6110_s23  ;;  %s13514_s12 = smov %s6026_s13 }
 0x421   : > { %s13515_s13 = smov %s13517_s17  ;;  %17 = sbr.rel (!%p15_p5) target bundleno = 6 (0x6), region = 82 }
 0x428   :  { %5682 = vsyncpa [#allocation4], 1 }
 0x429   :  { %5684 = vsyncpa [#allocation4 + $0x1], 1 }
 0x42a   :  { %5685 = vsyncpa [#allocation5], 1 }
 0x42b   :  { %5687 = vsyncpa [#allocation5 + $0x1], 1 }

</bundles_post_ra>
